<compile_context>
chip_gen: v7x
topology: tpu7x:2x2x1
jax: 0.10.0
libtpu: 0.0.40
codegen_flags: <defaults>
</compile_context>

<pallas_src>
import functools

import jax
import jax.numpy as jnp
from jax.experimental import pallas as pl
from jax.experimental.pallas import tpu as pltpu

# Large finite negative instead of -inf: avoids (-inf) - (-inf) = NaN in the
# online softmax when an entire tile / core-split is padding.
_NEG_INF = -1e30


def _round_up(x, m):
    return (x + m - 1) // m * m


def _vmem_limit_bytes():
    """~3/4 of chip VMEM (96 MiB on v5e/v6e, 48 MiB on v7x), capped at 100 MiB."""
    cap = 64 * 1024 * 1024
    try:
        cap = int(pltpu.get_tpu_info().vmem_capacity_bytes)
    except Exception:
        pass
    return int(min(100 * 1024 * 1024, max(32 * 1024 * 1024, cap * 3 // 4)))


def _abmil_kernel(nv_ref, x_ref, wfc_ref, bfc_ref, wa_ref, ba_ref, wb_ref, bb_ref,
                  wc_ref, bc_ref,
                  a_raw_ref, m_ref, l_ref, acc_ref, *, tile_n, tiles_per_core):
    c = pl.program_id(0)          # core split of the instance axis ("parallel")
    j = pl.program_id(1)          # this core's tile index ("arbitrary" reduction)
    n_valid = nv_ref[0]

    # Per-core online-softmax state lives in the (c, ...)-indexed output blocks
    # (resident across the j axis -> accumulator pattern, no scratch needed).
    @pl.when(j == 0)
    def _():
        m_ref[0] = jnp.full(m_ref.shape[1:], _NEG_INF, jnp.float32)
        l_ref[0] = jnp.zeros(l_ref.shape[1:], jnp.float32)
        acc_ref[0] = jnp.zeros(acc_ref.shape[1:], jnp.float32)

    row0 = (c * tiles_per_core + j) * tile_n   # global row index of this tile's first row

    # --- fc stem: cast the f32 x tile to bf16 here (no wrapper cast/pad pass) ---
    x_b = x_ref[...].astype(jnp.bfloat16)
    h = jnp.dot(x_b, wfc_ref[...], preferred_element_type=jnp.float32) + bfc_ref[...]
    h = jnp.maximum(h, 0.0)                                  # ReLU, f32 (tile_n, H)
    # Zero rows beyond the bag (ragged last tile / fully out-of-range tiles):
    # undefined x rows would otherwise poison the pooled accumulate via 0*inf.
    rows = jax.lax.broadcasted_iota(jnp.int32, (tile_n, 1), 0) + row0
    h = jnp.where(rows < n_valid, h, 0.0)
    h_b = h.astype(jnp.bfloat16)                             # f32 h dies here

    # --- gated attention head (bf16 MXU inputs, f32 accumulation/activations) ---
    a = jnp.tanh(jnp.dot(h_b, wa_ref[...],
                         preferred_element_type=jnp.float32) + ba_ref[...])
    g = jax.nn.sigmoid(jnp.dot(h_b, wb_ref[...],
                               preferred_element_type=jnp.float32) + bb_ref[...])
    ab = (a * g).astype(jnp.bfloat16)                        # (tile_n, D)

    # Attention logits directly in lane-dense (1, tile_n) layout:
    # w_c (1, D) contracted against ab (tile_n, D) over D.
    s = jax.lax.dot_general(wc_ref[...], ab,
                            dimension_numbers=(((1,), (1,)), ((), ())),
                            preferred_element_type=jnp.float32) + bc_ref[...]
    cols = jax.lax.broadcasted_iota(jnp.int32, s.shape, 1) + row0
    s = jnp.where(cols < n_valid, s, _NEG_INF)

    a_raw_ref[...] = s                                       # lane-dense slab store

    # --- flash-style online softmax + attention pooling: M ~ softmax(s) @ h ---
    m_prev = m_ref[0]                                        # (1, 1)
    m_new = jnp.maximum(m_prev, jnp.max(s, axis=-1, keepdims=True))
    alpha = jnp.exp(m_prev - m_new)
    p = jnp.exp(s - m_new)                                   # (1, tile_n); 0 at padding
    l_ref[0] = alpha * l_ref[0] + jnp.sum(p, axis=-1, keepdims=True)
    acc_ref[0] = alpha * acc_ref[0] + jnp.dot(               # bf16 MXU pooling accumulate
        p.astype(jnp.bfloat16), h_b, preferred_element_type=jnp.float32)
    m_ref[0] = m_new


def _attention_pool(x, params, *, tile_n=1024, n_valid=None):
    """x: (N, L_in) f32 bag. Returns (A_raw (1, n_valid), M (1, H), logits (1, C))."""
    N, L_in = x.shape
    H = params["w_fc"].shape[1]
    D = params["w_a"].shape[1]
    if n_valid is None:
        n_valid = N

    # Instance-axis tiling: lane-dense tiles (multiples of 128), <= N when possible.
    tile_n = max(128, min(_round_up(tile_n, 128), max(128, (N // 128) * 128)))
    nt = pl.cdiv(N, tile_n)
    tiles_per_core = pl.cdiv(nt, 2)            # grid = (2, tiles_per_core)
    n_slab = 2 * tiles_per_core * tile_n       # padded A_raw slab (all blocks in range)

    # Weights to bf16 once per call (tiny); x stays f32 (cast happens in-kernel).
    w_fc = params["w_fc"].astype(jnp.bfloat16)
    w_a = params["w_a"].astype(jnp.bfloat16)
    w_b = params["w_b"].astype(jnp.bfloat16)
    w_c = params["w_c"].astype(jnp.bfloat16)                 # (1, D) row layout
    b_fc, b_a, b_b, b_c = params["b_fc"], params["b_a"], params["b_b"], params["b_c"]
    nv = jnp.asarray([n_valid], jnp.int32)                   # runtime scalar

    n_eff = 2 * tiles_per_core * tile_n
    flops = 2 * n_eff * (L_in * H + 2 * H * D + D + H)
    transcendentals = n_eff * (2 * D + 1)
    bytes_accessed = (x.size * 4
                      + (w_fc.size + w_a.size + w_b.size + w_c.size) * 2
                      + (b_fc.size + b_a.size + b_b.size + b_c.size) * 4
                      + n_slab * 4 + 2 * (H + 2) * 4)

    kernel = functools.partial(_abmil_kernel, tile_n=tile_n,
                               tiles_per_core=tiles_per_core)

    def x_map(c, j, nv_ref):
        # Clamp so out-of-range tiles (odd tile counts / tiny bags) re-read a
        # valid, fully-masked block instead of relying on OOB-read semantics.
        return (jnp.minimum(c * tiles_per_core + j, nt - 1), 0)

    def slab_map(c, j, nv_ref):
        return (0, c * tiles_per_core + j)

    def part_map(c, j, nv_ref):
        return (c, 0, 0)

    const2 = lambda c, j, nv_ref: (0, 0)

    a_slab, m_part, l_part, acc_part = pl.pallas_call(
        kernel,
        out_shape=(
            jax.ShapeDtypeStruct((1, n_slab), jnp.float32),   # raw attention logits
            jax.ShapeDtypeStruct((2, 1, 1), jnp.float32),     # per-core running max
            jax.ShapeDtypeStruct((2, 1, 1), jnp.float32),     # per-core softmax denom
            jax.ShapeDtypeStruct((2, 1, H), jnp.float32),     # per-core weighted sum
        ),
        grid_spec=pltpu.PrefetchScalarGridSpec(
            num_scalar_prefetch=1,
            grid=(2, tiles_per_core),
            in_specs=[
                pl.BlockSpec((tile_n, L_in), x_map),          # x tile (f32, pipelined)
                pl.BlockSpec((L_in, H), const2),              # w_fc (resident)
                pl.BlockSpec((1, H), const2),                 # b_fc
                pl.BlockSpec((H, D), const2),                 # w_a
                pl.BlockSpec((1, D), const2),                 # b_a
                pl.BlockSpec((H, D), const2),                 # w_b
                pl.BlockSpec((1, D), const2),                 # b_b
                pl.BlockSpec((1, D), const2),                 # w_c (row layout)
                pl.BlockSpec((1, 1), const2),                 # b_c
            ],
            out_specs=(
                pl.BlockSpec((1, tile_n), slab_map),          # lane-dense A_raw slab
                pl.BlockSpec((1, 1, 1), part_map),
                pl.BlockSpec((1, 1, 1), part_map),
                pl.BlockSpec((1, 1, H), part_map),
            ),
        ),
        compiler_params=pltpu.CompilerParams(
            dimension_semantics=("parallel", "arbitrary"),
            vmem_limit_bytes=_vmem_limit_bytes(),
        ),
        cost_estimate=pl.CostEstimate(
            flops=int(flops),
            transcendentals=int(transcendentals),
            bytes_accessed=int(bytes_accessed),
        ),
    )(nv, x, w_fc, b_fc, w_a, b_a, w_b, b_b, w_c, b_c)

    # Merge the two per-core online-softmax partials (associative flash merge)
    # and run the tiny bag classifier here (epilogue is O(H) work).
    m = jnp.max(m_part)                                       # scalar
    w = jnp.exp(m_part - m)                                   # (2, 1, 1)
    l = jnp.sum(w * l_part)                                   # scalar
    m_feat = jnp.sum(w * acc_part, axis=0) / l                # (1, H)
    logits = jnp.dot(m_feat, params["w_cls"]) + params["b_cls"]   # (1, C)
    return a_slab[:, :n_valid], m_feat, logits


def abmil_forward(h_list, rank_list=None, params=None, *, tile_n=1024,
                  return_features=False, attention_only=False):
    """ABMIL_NAIVE.forward. h_list: list of (n_i, 1792) arrays (or one array).
    Returns (logits, Y_prob, Y_hat, A, results_dict); rank_list is unused
    (as in the PyTorch module)."""
    if isinstance(h_list, (list, tuple)):
        x = jnp.concatenate([jnp.asarray(h, jnp.float32) for h in h_list], axis=0)
    else:
        x = jnp.asarray(h_list, jnp.float32)

    a_raw, m_feat, logits = _attention_pool(x, params, tile_n=tile_n)
    A = jax.nn.softmax(a_raw, axis=1)                        # (1, N)
    if attention_only:
        return A

    Y_prob = jax.nn.softmax(logits, axis=1)
    Y_hat = jnp.argmax(logits, axis=1).reshape(-1, 1)

    results_dict = {}
    if return_features:
        results_dict["features"] = m_feat
    return logits, Y_prob, Y_hat, A, results_dict


def init_abmil_params(key, L_in=1792, H=512, D=256, n_classes=2):
    """PyTorch-style U(-1/sqrt(fan_in), 1/sqrt(fan_in)) init.  Weights are stored
    pre-transposed to (in, out) ONCE here, so the forward path never transposes."""
    ks = jax.random.split(key, 10)

    def lin(kw, kb, fan_in, fan_out):
        lim = 1.0 / jnp.sqrt(jnp.float32(fan_in))
        w = jax.random.uniform(kw, (fan_in, fan_out), jnp.float32, -lim, lim)
        b = jax.random.uniform(kb, (1, fan_out), jnp.float32, -lim, lim)
        return w, b

    w_fc, b_fc = lin(ks[0], ks[1], L_in, H)
    w_a, b_a = lin(ks[2], ks[3], H, D)
    w_b, b_b = lin(ks[4], ks[5], H, D)
    w_c_t, b_c = lin(ks[6], ks[7], D, 1)                     # (D,1), (1,1)
    w_cls, b_cls = lin(ks[8], ks[9], H, n_classes)
    return {
        "w_fc": w_fc, "b_fc": b_fc,
        "w_a": w_a, "b_a": b_a,
        "w_b": w_b, "b_b": b_b,
        "w_c": w_c_t.T, "b_c": b_c,                          # w_c kept as (1, D)
        "w_cls": w_cls, "b_cls": b_cls,
    }


def _reference(x, p):
    """Pure-JAX forward mirroring the kernel's dtype choices (bf16 MXU inputs,
    f32 accumulation / activations)."""
    xb = x.astype(jnp.bfloat16)
    h = jnp.dot(xb, p["w_fc"].astype(jnp.bfloat16),
                preferred_element_type=jnp.float32) + p["b_fc"]
    h = jnp.maximum(h, 0.0)
    hb = h.astype(jnp.bfloat16)
    a = jnp.tanh(jnp.dot(hb, p["w_a"].astype(jnp.bfloat16),
                         preferred_element_type=jnp.float32) + p["b_a"])
    g = jax.nn.sigmoid(jnp.dot(hb, p["w_b"].astype(jnp.bfloat16),
                               preferred_element_type=jnp.float32) + p["b_b"])
    ab = (a * g).astype(jnp.bfloat16)
    s = jnp.dot(ab, p["w_c"].astype(jnp.bfloat16).T,
                preferred_element_type=jnp.float32) + p["b_c"]        # (N, 1)
    A = jax.nn.softmax(s[:, 0])[None, :]                              # (1, N)
    M = jnp.dot(A, h)                                                 # (1, H)
    logits = jnp.dot(M, p["w_cls"]) + p["b_cls"]                      # (1, C)
    return logits, A, M


if __name__ == "__main__":
    # Module-consistent dims: features 1792 -> 512 -> 256, n_classes=2.
    # Two small "slides" concatenated into one bag of N=600 instances.
    L_in, H, D, n_classes = 1792, 512, 256, 2
    N1, N2 = 350, 250

    key = jax.random.PRNGKey(0)
    k1, k2, kp = jax.random.split(key, 3)
    h_list = [jax.random.normal(k1, (N1, L_in), jnp.float32),
              jax.random.normal(k2, (N2, L_in), jnp.float32)]
    params = init_abmil_params(kp, L_in, H, D, n_classes)

    N = N1 + N2
    ref_logits, ref_A, ref_M = _reference(jnp.concatenate(h_list, axis=0), params)

    # Small tile exercises: multi-tile online softmax, a ragged (partial) last
    # x block, and a fully out-of-range (masked) tile on the second core split.
    logits, Y_prob, Y_hat, A, results = abmil_forward(
        h_list, None, params, tile_n=256, return_features=True)
    logits = jax.block_until_ready(logits)
    A = jax.block_until_ready(A)

    assert logits.shape == (1, n_classes)
    assert Y_prob.shape == (1, n_classes)
    assert Y_hat.shape == (1, 1)
    assert A.shape == (1, N)
    assert bool(jnp.all(jnp.isfinite(A))) and bool(jnp.all(jnp.isfinite(logits)))
    assert jnp.allclose(jnp.sum(A), 1.0, atol=1e-3)
    assert jnp.allclose(A, ref_A, rtol=5e-2, atol=1e-5), "attention mismatch"
    assert jnp.allclose(results["features"], ref_M, rtol=5e-2, atol=1e-3), "M mismatch"
    assert jnp.allclose(logits, ref_logits, rtol=5e-2, atol=1e-3), "logits mismatch"

    # Default (large-tile) config: one tile per core -> checks the two-core
    # split / partial-block path gives the same answer.
    logits2, _, _, A2, _ = abmil_forward(h_list, None, params)
    logits2 = jax.block_until_ready(logits2)
    assert jnp.allclose(logits2, logits, rtol=1e-2, atol=1e-3)
    assert jnp.allclose(A2, A, rtol=1e-2, atol=1e-5)

    print("KERNEL_OK")
</pallas_src>

<mosaic_0001>
module attributes {stable_mosaic.version = 11 : i64} {
  func.func @_abmil_kernel(%arg0: i32, %arg1: i32, %arg2: memref<1xi32, #tpu.memory_space<smem>>, %arg3: memref<256x1792xf32, #tpu.memory_space<vmem>>, %arg4: memref<1792x512xbf16, #tpu.memory_space<vmem>>, %arg5: memref<1x512xf32, #tpu.memory_space<vmem>>, %arg6: memref<512x256xbf16, #tpu.memory_space<vmem>>, %arg7: memref<1x256xf32, #tpu.memory_space<vmem>>, %arg8: memref<512x256xbf16, #tpu.memory_space<vmem>>, %arg9: memref<1x256xf32, #tpu.memory_space<vmem>>, %arg10: memref<1x256xbf16, #tpu.memory_space<vmem>>, %arg11: memref<1x1xf32, #tpu.memory_space<vmem>>, %arg12: memref<1x256xf32, #tpu.memory_space<vmem>>, %arg13: memref<1x1x1xf32, #tpu.memory_space<vmem>>, %arg14: memref<1x1x1xf32, #tpu.memory_space<vmem>>, %arg15: memref<1x1x512xf32, #tpu.memory_space<vmem>>) attributes {dimension_semantics = [#tpu.dimension_semantics<parallel>, #tpu.dimension_semantics<arbitrary>], iteration_bounds = array<i64: 2, 2>, scalar_prefetch = 1 : i64, scratch_operands = 0 : i64, tpu.core_type = #tpu.core_type<tc>, window_params = [{transform_indices = @transform_0, window_bounds = array<i64: 256, 1792>}, {pipeline_mode = #tpu.pipeline_mode<synchronous>, transform_indices = @transform_1, window_bounds = array<i64: 1792, 512>}, {pipeline_mode = #tpu.pipeline_mode<synchronous>, transform_indices = @transform_2, window_bounds = array<i64: 1, 512>}, {pipeline_mode = #tpu.pipeline_mode<synchronous>, transform_indices = @transform_3, window_bounds = array<i64: 512, 256>}, {pipeline_mode = #tpu.pipeline_mode<synchronous>, transform_indices = @transform_4, window_bounds = array<i64: 1, 256>}, {pipeline_mode = #tpu.pipeline_mode<synchronous>, transform_indices = @transform_5, window_bounds = array<i64: 512, 256>}, {pipeline_mode = #tpu.pipeline_mode<synchronous>, transform_indices = @transform_6, window_bounds = array<i64: 1, 256>}, {pipeline_mode = #tpu.pipeline_mode<synchronous>, transform_indices = @transform_7, window_bounds = array<i64: 1, 256>}, {pipeline_mode = #tpu.pipeline_mode<synchronous>, transform_indices = @transform_8, window_bounds = array<i64: 1, 1>}, {transform_indices = @transform_9, window_bounds = array<i64: 1, 256>}, {transform_indices = @transform_10, window_bounds = array<i64: 1, 1, 1>}, {transform_indices = @transform_11, window_bounds = array<i64: 1, 1, 1>}, {transform_indices = @transform_12, window_bounds = array<i64: 1, 1, 512>}]} {
    %c0 = arith.constant 0 : index
    %0 = memref.load %arg2[%c0] : memref<1xi32, #tpu.memory_space<smem>>
    %c0_i32 = arith.constant 0 : i32
    %1 = arith.cmpi eq, %arg1, %c0_i32 : i32
    %2 = arith.extui %1 : i1 to i32
    %c0_i32_0 = arith.constant 0 : i32
    %3 = arith.cmpi ne, %2, %c0_i32_0 : i32
    scf.if %3 {
      %cst_49 = arith.constant -1.000000e+30 : f32
      %89 = vector.broadcast %cst_49 : f32 to vector<1x1xf32>
      %c0_50 = arith.constant 0 : index
      %c0_51 = arith.constant 0 : index
      %c0_52 = arith.constant 0 : index
      %90 = vector.load %arg13[%c0_50, %c0_51, %c0_52] : memref<1x1x1xf32, #tpu.memory_space<vmem>>, vector<1x1x1xf32>
      %91 = vector.shape_cast %90 : vector<1x1x1xf32> to vector<1x1xf32>
      %92 = vector.shape_cast %89 : vector<1x1xf32> to vector<1x1x1xf32>
      tpu.vector_store %arg13[%c0_50, %c0_51, %c0_52], %92 {strides = array<i32>} : memref<1x1x1xf32, #tpu.memory_space<vmem>>, vector<1x1x1xf32>,
      %cst_53 = arith.constant 0.000000e+00 : f32
      %93 = vector.broadcast %cst_53 : f32 to vector<1x1xf32>
      %c0_54 = arith.constant 0 : index
      %c0_55 = arith.constant 0 : index
      %c0_56 = arith.constant 0 : index
      %94 = vector.load %arg14[%c0_54, %c0_55, %c0_56] : memref<1x1x1xf32, #tpu.memory_space<vmem>>, vector<1x1x1xf32>
      %95 = vector.shape_cast %94 : vector<1x1x1xf32> to vector<1x1xf32>
      %96 = vector.shape_cast %93 : vector<1x1xf32> to vector<1x1x1xf32>
      tpu.vector_store %arg14[%c0_54, %c0_55, %c0_56], %96 {strides = array<i32>} : memref<1x1x1xf32, #tpu.memory_space<vmem>>, vector<1x1x1xf32>,
      %cst_57 = arith.constant 0.000000e+00 : f32
      %97 = vector.broadcast %cst_57 : f32 to vector<1x512xf32>
      %c0_58 = arith.constant 0 : index
      %c0_59 = arith.constant 0 : index
      %c0_60 = arith.constant 0 : index
      %98 = vector.load %arg15[%c0_58, %c0_59, %c0_60] : memref<1x1x512xf32, #tpu.memory_space<vmem>>, vector<1x1x512xf32>
      %99 = vector.shape_cast %98 : vector<1x1x512xf32> to vector<1x512xf32>
      %100 = vector.shape_cast %97 : vector<1x512xf32> to vector<1x1x512xf32>
      tpu.vector_store %arg15[%c0_58, %c0_59, %c0_60], %100 {strides = array<i32>} : memref<1x1x512xf32, #tpu.memory_space<vmem>>, vector<1x1x512xf32>,
    } else {
    }
    %c2_i32 = arith.constant 2 : i32
    %4 = arith.muli %arg0, %c2_i32 : i32
    %5 = arith.addi %4, %arg1 : i32
    %c256_i32 = arith.constant 256 : i32
    %6 = arith.muli %5, %c256_i32 : i32
    %c0_1 = arith.constant 0 : index
    %c0_2 = arith.constant 0 : index
    %7 = vector.load %arg3[%c0_1, %c0_2] : memref<256x1792xf32, #tpu.memory_space<vmem>>, vector<256x1792xf32>
    %8 = arith.truncf %7 : vector<256x1792xf32> to vector<256x1792xbf16>
    %c0_3 = arith.constant 0 : index
    %c0_4 = arith.constant 0 : index
    %9 = vector.load %arg4[%c0_3, %c0_4] : memref<1792x512xbf16, #tpu.memory_space<vmem>>, vector<1792x512xbf16>
    %cst = arith.constant dense<0.000000e+00> : vector<256x512xf32>
    %10 = tpu.matmul %8, %9, %cst {dimension_numbers = #tpu.dot_dimension_numbers<[1], [0], [0], [1], [0, 0, 1, 1], [], []>} : vector<256x1792xbf16>, vector<1792x512xbf16>, vector<256x512xf32> -> vector<256x512xf32>
    %c0_5 = arith.constant 0 : index
    %c0_6 = arith.constant 0 : index
    %11 = vector.load %arg5[%c0_5, %c0_6] : memref<1x512xf32, #tpu.memory_space<vmem>>, vector<1x512xf32>
    %12 = vector.broadcast %11 : vector<1x512xf32> to vector<256x512xf32>
    %13 = arith.addf %10, %12 : vector<256x512xf32>
    %cst_7 = arith.constant 0.000000e+00 : f32
    %14 = vector.broadcast %cst_7 : f32 to vector<256x512xf32>
    %15 = arith.maximumf %13, %14 : vector<256x512xf32>
    %16 = tpu.iota {dimensions = array<i32: 0>} : vector<256x1xi32>
    %17 = vector.broadcast %6 : i32 to vector<256x1xi32>
    %18 = arith.addi %16, %17 : vector<256x1xi32>
    %19 = vector.broadcast %0 : i32 to vector<256x1xi32>
    %20 = arith.cmpi slt, %18, %19 : vector<256x1xi32>
    %cst_8 = arith.constant 0.000000e+00 : f32
    %21 = vector.shape_cast %20 : vector<256x1xi1> to vector<256x1xi1>
    %22 = vector.broadcast %21 : vector<256x1xi1> to vector<256x512xi1>
    %23 = vector.broadcast %cst_8 : f32 to vector<256x512xf32>
    %24 = arith.select %22, %15, %23 : vector<256x512xi1>, vector<256x512xf32>
    %25 = arith.truncf %24 : vector<256x512xf32> to vector<256x512xbf16>
    %c0_9 = arith.constant 0 : index
    %c0_10 = arith.constant 0 : index
    %26 = vector.load %arg6[%c0_9, %c0_10] : memref<512x256xbf16, #tpu.memory_space<vmem>>, vector<512x256xbf16>
    %cst_11 = arith.constant dense<0.000000e+00> : vector<256x256xf32>
    %27 = tpu.matmul %25, %26, %cst_11 {dimension_numbers = #tpu.dot_dimension_numbers<[1], [0], [0], [1], [0, 0, 1, 1], [], []>} : vector<256x512xbf16>, vector<512x256xbf16>, vector<256x256xf32> -> vector<256x256xf32>
    %c0_12 = arith.constant 0 : index
    %c0_13 = arith.constant 0 : index
    %28 = vector.load %arg7[%c0_12, %c0_13] : memref<1x256xf32, #tpu.memory_space<vmem>>, vector<1x256xf32>
    %29 = vector.broadcast %28 : vector<1x256xf32> to vector<256x256xf32>
    %30 = arith.addf %27, %29 : vector<256x256xf32>
    %31 = math.tanh %30 : vector<256x256xf32>
    %c0_14 = arith.constant 0 : index
    %c0_15 = arith.constant 0 : index
    %32 = vector.load %arg8[%c0_14, %c0_15] : memref<512x256xbf16, #tpu.memory_space<vmem>>, vector<512x256xbf16>
    %cst_16 = arith.constant dense<0.000000e+00> : vector<256x256xf32>
    %33 = tpu.matmul %25, %32, %cst_16 {dimension_numbers = #tpu.dot_dimension_numbers<[1], [0], [0], [1], [0, 0, 1, 1], [], []>} : vector<256x512xbf16>, vector<512x256xbf16>, vector<256x256xf32> -> vector<256x256xf32>
    %c0_17 = arith.constant 0 : index
    %c0_18 = arith.constant 0 : index
    %34 = vector.load %arg9[%c0_17, %c0_18] : memref<1x256xf32, #tpu.memory_space<vmem>>, vector<1x256xf32>
    %35 = vector.broadcast %34 : vector<1x256xf32> to vector<256x256xf32>
    %36 = arith.addf %33, %35 : vector<256x256xf32>
    %37 = arith.negf %36 : vector<256x256xf32>
    %38 = math.exp %37 : vector<256x256xf32>
    %cst_19 = arith.constant 1.000000e+00 : f32
    %39 = vector.broadcast %cst_19 : f32 to vector<256x256xf32>
    %40 = arith.addf %39, %38 : vector<256x256xf32>
    %41 = arith.divf %39, %40 : vector<256x256xf32>
    %42 = arith.mulf %31, %41 : vector<256x256xf32>
    %43 = arith.truncf %42 : vector<256x256xf32> to vector<256x256xbf16>
    %c0_20 = arith.constant 0 : index
    %c0_21 = arith.constant 0 : index
    %44 = vector.load %arg10[%c0_20, %c0_21] : memref<1x256xbf16, #tpu.memory_space<vmem>>, vector<1x256xbf16>
    %cst_22 = arith.constant dense<0.000000e+00> : vector<1x256xf32>
    %45 = tpu.matmul %44, %43, %cst_22 {dimension_numbers = #tpu.dot_dimension_numbers<[1], [1], [0], [0], [0, 0, 1, 0], [], []>} : vector<1x256xbf16>, vector<256x256xbf16>, vector<1x256xf32> -> vector<1x256xf32>
    %c0_23 = arith.constant 0 : index
    %c0_24 = arith.constant 0 : index
    %46 = vector.load %arg11[%c0_23, %c0_24] : memref<1x1xf32, #tpu.memory_space<vmem>>, vector<1x1xf32>
    %47 = vector.broadcast %46 : vector<1x1xf32> to vector<1x256xf32>
    %48 = arith.addf %45, %47 : vector<1x256xf32>
    %49 = tpu.iota {dimensions = array<i32: 1>} : vector<1x256xi32>
    %50 = vector.broadcast %6 : i32 to vector<1x256xi32>
    %51 = arith.addi %49, %50 : vector<1x256xi32>
    %52 = vector.broadcast %0 : i32 to vector<1x256xi32>
    %53 = arith.cmpi slt, %51, %52 : vector<1x256xi32>
    %cst_25 = arith.constant -1.000000e+30 : f32
    %54 = vector.broadcast %cst_25 : f32 to vector<1x256xf32>
    %55 = arith.select %53, %48, %54 : vector<1x256xi1>, vector<1x256xf32>
    %c0_26 = arith.constant 0 : index
    %c0_27 = arith.constant 0 : index
    %56 = vector.load %arg12[%c0_26, %c0_27] : memref<1x256xf32, #tpu.memory_space<vmem>>, vector<1x256xf32>
    tpu.vector_store %arg12[%c0_26, %c0_27], %55 {strides = array<i32>} : memref<1x256xf32, #tpu.memory_space<vmem>>, vector<1x256xf32>,
    %c0_28 = arith.constant 0 : index
    %c0_29 = arith.constant 0 : index
    %c0_30 = arith.constant 0 : index
    %57 = vector.load %arg13[%c0_28, %c0_29, %c0_30] : memref<1x1x1xf32, #tpu.memory_space<vmem>>, vector<1x1x1xf32>
    %58 = vector.shape_cast %57 : vector<1x1x1xf32> to vector<1x1xf32>
    %cst_31 = arith.constant dense<0xFF800000> : vector<1xf32>
    %59 = vector.multi_reduction <maximumf>, %55, %cst_31 [1] : vector<1x256xf32> to vector<1xf32>
    %60 = vector.shape_cast %59 : vector<1xf32> to vector<1x1xf32>
    %61 = arith.maximumf %58, %60 : vector<1x1xf32>
    %62 = arith.subf %58, %61 : vector<1x1xf32>
    %63 = math.exp %62 : vector<1x1xf32>
    %64 = vector.broadcast %61 : vector<1x1xf32> to vector<1x256xf32>
    %65 = arith.subf %55, %64 : vector<1x256xf32>
    %66 = math.exp %65 : vector<1x256xf32>
    %c0_32 = arith.constant 0 : index
    %c0_33 = arith.constant 0 : index
    %c0_34 = arith.constant 0 : index
    %67 = vector.load %arg14[%c0_32, %c0_33, %c0_34] : memref<1x1x1xf32, #tpu.memory_space<vmem>>, vector<1x1x1xf32>
    %68 = vector.shape_cast %67 : vector<1x1x1xf32> to vector<1x1xf32>
    %69 = arith.mulf %63, %68 : vector<1x1xf32>
    %cst_35 = arith.constant dense<0.000000e+00> : vector<1xf32>
    %70 = vector.multi_reduction <add>, %66, %cst_35 [1] : vector<1x256xf32> to vector<1xf32>
    %71 = vector.shape_cast %70 : vector<1xf32> to vector<1x1xf32>
    %72 = arith.addf %69, %71 : vector<1x1xf32>
    %c0_36 = arith.constant 0 : index
    %c0_37 = arith.constant 0 : index
    %c0_38 = arith.constant 0 : index
    %73 = vector.load %arg14[%c0_36, %c0_37, %c0_38] : memref<1x1x1xf32, #tpu.memory_space<vmem>>, vector<1x1x1xf32>
    %74 = vector.shape_cast %73 : vector<1x1x1xf32> to vector<1x1xf32>
    %75 = vector.shape_cast %72 : vector<1x1xf32> to vector<1x1x1xf32>
    tpu.vector_store %arg14[%c0_36, %c0_37, %c0_38], %75 {strides = array<i32>} : memref<1x1x1xf32, #tpu.memory_space<vmem>>, vector<1x1x1xf32>,
    %c0_39 = arith.constant 0 : index
    %c0_40 = arith.constant 0 : index
    %c0_41 = arith.constant 0 : index
    %76 = vector.load %arg15[%c0_39, %c0_40, %c0_41] : memref<1x1x512xf32, #tpu.memory_space<vmem>>, vector<1x1x512xf32>
    %77 = vector.shape_cast %76 : vector<1x1x512xf32> to vector<1x512xf32>
    %78 = vector.broadcast %63 : vector<1x1xf32> to vector<1x512xf32>
    %79 = arith.mulf %78, %77 : vector<1x512xf32>
    %80 = arith.truncf %66 : vector<1x256xf32> to vector<1x256xbf16>
    %cst_42 = arith.constant dense<0.000000e+00> : vector<1x512xf32>
    %81 = tpu.matmul %80, %25, %cst_42 {dimension_numbers = #tpu.dot_dimension_numbers<[1], [0], [0], [1], [0, 0, 1, 1], [], []>} : vector<1x256xbf16>, vector<256x512xbf16>, vector<1x512xf32> -> vector<1x512xf32>
    %82 = arith.addf %79, %81 : vector<1x512xf32>
    %c0_43 = arith.constant 0 : index
    %c0_44 = arith.constant 0 : index
    %c0_45 = arith.constant 0 : index
    %83 = vector.load %arg15[%c0_43, %c0_44, %c0_45] : memref<1x1x512xf32, #tpu.memory_space<vmem>>, vector<1x1x512xf32>
    %84 = vector.shape_cast %83 : vector<1x1x512xf32> to vector<1x512xf32>
    %85 = vector.shape_cast %82 : vector<1x512xf32> to vector<1x1x512xf32>
    tpu.vector_store %arg15[%c0_43, %c0_44, %c0_45], %85 {strides = array<i32>} : memref<1x1x512xf32, #tpu.memory_space<vmem>>, vector<1x1x512xf32>,
    %c0_46 = arith.constant 0 : index
    %c0_47 = arith.constant 0 : index
    %c0_48 = arith.constant 0 : index
    %86 = vector.load %arg13[%c0_46, %c0_47, %c0_48] : memref<1x1x1xf32, #tpu.memory_space<vmem>>, vector<1x1x1xf32>
    %87 = vector.shape_cast %86 : vector<1x1x1xf32> to vector<1x1xf32>
    %88 = vector.shape_cast %61 : vector<1x1xf32> to vector<1x1x1xf32>
    tpu.vector_store %arg13[%c0_46, %c0_47, %c0_48], %88 {strides = array<i32>} : memref<1x1x1xf32, #tpu.memory_space<vmem>>, vector<1x1x1xf32>,
    return
  }
  func.func @transform_0(%arg0: i32, %arg1: i32, %arg2: memref<1xi32, #tpu.memory_space<smem>>) -> (i32, i32) {
    %c2_i32 = arith.constant 2 : i32
    %0 = arith.muli %arg0, %c2_i32 : i32
    %1 = arith.addi %0, %arg1 : i32
    %c2_i32_0 = arith.constant 2 : i32
    %2 = arith.minsi %1, %c2_i32_0 : i32
    %c0_i32 = arith.constant 0 : i32
    %c0_i32_1 = arith.constant 0 : i32
    return %2, %c0_i32 : i32, i32
  }
  func.func @transform_1(%arg0: i32, %arg1: i32, %arg2: memref<1xi32, #tpu.memory_space<smem>>) -> (i32, i32) {
    %c0_i32 = arith.constant 0 : i32
    %c0_i32_0 = arith.constant 0 : i32
    %c0_i32_1 = arith.constant 0 : i32
    return %c0_i32, %c0_i32_0 : i32, i32
  }
  func.func @transform_2(%arg0: i32, %arg1: i32, %arg2: memref<1xi32, #tpu.memory_space<smem>>) -> (i32, i32) {
    %c0_i32 = arith.constant 0 : i32
    %c0_i32_0 = arith.constant 0 : i32
    %c0_i32_1 = arith.constant 0 : i32
    return %c0_i32, %c0_i32_0 : i32, i32
  }
  func.func @transform_3(%arg0: i32, %arg1: i32, %arg2: memref<1xi32, #tpu.memory_space<smem>>) -> (i32, i32) {
    %c0_i32 = arith.constant 0 : i32
    %c0_i32_0 = arith.constant 0 : i32
    %c0_i32_1 = arith.constant 0 : i32
    return %c0_i32, %c0_i32_0 : i32, i32
  }
  func.func @transform_4(%arg0: i32, %arg1: i32, %arg2: memref<1xi32, #tpu.memory_space<smem>>) -> (i32, i32) {
    %c0_i32 = arith.constant 0 : i32
    %c0_i32_0 = arith.constant 0 : i32
    %c0_i32_1 = arith.constant 0 : i32
    return %c0_i32, %c0_i32_0 : i32, i32
  }
  func.func @transform_5(%arg0: i32, %arg1: i32, %arg2: memref<1xi32, #tpu.memory_space<smem>>) -> (i32, i32) {
    %c0_i32 = arith.constant 0 : i32
    %c0_i32_0 = arith.constant 0 : i32
    %c0_i32_1 = arith.constant 0 : i32
    return %c0_i32, %c0_i32_0 : i32, i32
  }
  func.func @transform_6(%arg0: i32, %arg1: i32, %arg2: memref<1xi32, #tpu.memory_space<smem>>) -> (i32, i32) {
    %c0_i32 = arith.constant 0 : i32
    %c0_i32_0 = arith.constant 0 : i32
    %c0_i32_1 = arith.constant 0 : i32
    return %c0_i32, %c0_i32_0 : i32, i32
  }
  func.func @transform_7(%arg0: i32, %arg1: i32, %arg2: memref<1xi32, #tpu.memory_space<smem>>) -> (i32, i32) {
    %c0_i32 = arith.constant 0 : i32
    %c0_i32_0 = arith.constant 0 : i32
    %c0_i32_1 = arith.constant 0 : i32
    return %c0_i32, %c0_i32_0 : i32, i32
  }
  func.func @transform_8(%arg0: i32, %arg1: i32, %arg2: memref<1xi32, #tpu.memory_space<smem>>) -> (i32, i32) {
    %c0_i32 = arith.constant 0 : i32
    %c0_i32_0 = arith.constant 0 : i32
    %c0_i32_1 = arith.constant 0 : i32
    return %c0_i32, %c0_i32_0 : i32, i32
  }
  func.func @transform_9(%arg0: i32, %arg1: i32, %arg2: memref<1xi32, #tpu.memory_space<smem>>) -> (i32, i32) {
    %c2_i32 = arith.constant 2 : i32
    %0 = arith.muli %arg0, %c2_i32 : i32
    %1 = arith.addi %0, %arg1 : i32
    %c0_i32 = arith.constant 0 : i32
    %c0_i32_0 = arith.constant 0 : i32
    return %c0_i32, %1 : i32, i32
  }
  func.func @transform_10(%arg0: i32, %arg1: i32, %arg2: memref<1xi32, #tpu.memory_space<smem>>) -> (i32, i32, i32) {
    %c0_i32 = arith.constant 0 : i32
    %c0_i32_0 = arith.constant 0 : i32
    %c0_i32_1 = arith.constant 0 : i32
    return %arg0, %c0_i32, %c0_i32_0 : i32, i32, i32
  }
  func.func @transform_11(%arg0: i32, %arg1: i32, %arg2: memref<1xi32, #tpu.memory_space<smem>>) -> (i32, i32, i32) {
    %c0_i32 = arith.constant 0 : i32
    %c0_i32_0 = arith.constant 0 : i32
    %c0_i32_1 = arith.constant 0 : i32
    return %arg0, %c0_i32, %c0_i32_0 : i32, i32, i32
  }
  func.func @transform_12(%arg0: i32, %arg1: i32, %arg2: memref<1xi32, #tpu.memory_space<smem>>) -> (i32, i32, i32) {
    %c0_i32 = arith.constant 0 : i32
    %c0_i32_0 = arith.constant 0 : i32
    %c0_i32_1 = arith.constant 0 : i32
    return %arg0, %c0_i32, %c0_i32_0 : i32, i32, i32
  }
}

</mosaic_0001>

<bundles_post_ra>
// kernel: tpu_custom_call.1
= control target key start
LH: loop header
LB: loop body
LE: loop exit
PB: predicated region body
PF: predicated region fallthrough
CT: control target
= control target key end

     0   :  { %s16794_s0 = inlined_call_operand.<no memory space> [shape: s32[1], index: 0, kind: input, shape index: {}]   ;;  %s16795_s1 = inlined_call_operand.hbm [shape: f32[600,1792], index: 1, kind: input, shape index: {}]   ;;  %s16796_s2 = inlined_call_operand.hbm [shape: bf16[1792,512], index: 2, kind: input, shape index: {}]   ;;  %s16797_s3 = inlined_call_operand.hbm [shape: f32[1,512], index: 3, kind: input, shape index: {}]   ;;  %s16798_s4 = inlined_call_operand.hbm [shape: bf16[512,256], index: 4, kind: input, shape index: {}]   ;;  %s16799_s5 = inlined_call_operand.hbm [shape: f32[1,256], index: 5, kind: input, shape index: {}]   ;;  %s16800_s6 = inlined_call_operand.hbm [shape: bf16[512,256], index: 6, kind: input, shape index: {}]   ;;  %s16801_s7 = inlined_call_operand.hbm [shape: f32[1,256], index: 7, kind: input, shape index: {}]   ;;  %s16802_s8 = inlined_call_operand.hbm [shape: bf16[1,256], index: 8, kind: input, shape index: {}]   ;;  %s16803_s9 = inlined_call_operand.<no memory space> [shape: f32[1,1], index: 9, kind: input, shape index: {}]   ;;  %s16804_s10 = inlined_call_operand.hbm [shape: f32[1,1024], index: 10, kind: output, shape index: {0}]   ;;  %s16805_s11 = inlined_call_operand.vmem [shape: f32[2,1,1], index: 11, kind: output, shape index: {1}]   ;;  %s16806_s12 = inlined_call_operand.vmem [shape: f32[2,1,1], index: 12, kind: output, shape index: {2}]   ;;  %s16807_s13 = inlined_call_operand.hbm [shape: f32[2,1,512], index: 13, kind: output, shape index: {3}]  }
   0x1   :  { %16953 = sst [smem:[#allocation109_spill]] %s16795_s1  ;;  %v20_v0 = vstv %s16803_s9 }
   0x2   :  { %16954 = sst [smem:[#allocation110_spill]] %s16796_s2  ;;  %21 = vst [vmem:[#allocation4] sm:$0x1] %v20_v0 }
   0x3   :  { %16955 = sst [smem:[#allocation111_spill]] %s16804_s10 }
   0x4   :  { %16956 = sst [smem:[#allocation112_spill]] %s16805_s11 }
   0x5   :  { %16957 = sst [smem:[#allocation113_spill]] %s16806_s12 }
   0x6   :  { %16958 = sst [smem:[#allocation114_spill]] %s16807_s13 }
   0x7   :  { %19 = sst [smem:[#allocation3]] %s16794_s0 }
   0x8   :  { %22 = vsyncpa [#allocation6], 0 }
   0x9   :  { %24 = vsyncpa [#allocation6 + $0x1], 0 }
   0xa   :  { %25 = vsyncpa [#allocation9], 0 }
   0xb   :  { %26 = vsyncpa [#allocation12], 0 }
   0xc   :  { %27 = vsyncpa [#allocation15], 0 }
   0xd   :  { %28 = vsyncpa [#allocation18], 0 }
   0xe   :  { %29 = vsyncpa [#allocation7], 0 }
   0xf   :  { %31 = vsyncpa [#allocation7 + $0x1], 0 }
  0x10   :  { %32 = vsyncpa [#allocation21], 0 }
  0x11   :  { %34 = vsyncpa [#allocation21 + $0x1], 0  ;;  %s14236_s29 = smov 0   ;;  %s14238_s30 = smov 0  }
  0x12   :  { %s14240_s0 = smov 0   ;;  %s14242_s14 = smov 0  }
  0x13   :  { %s14244_s9 = smov 0   ;;  %s14246_s15 = smov 0  }
  0x14   :  { %s14248_s16 = smov 0   ;;  %s14250_s17 = smov 0  }
  0x15   :  { %s14252_s18 = smov 0   ;;  %s14254_s19 = smov 0  }
  0x16   :  { %s14256_s20 = smov 0   ;;  %s14258_s21 = smov 0  }
  0x17   :  { %s14260_s22 = smov 0   ;;  %s14262_s23 = smov 0  }
  0x18 LB: > { %16959 = sst [smem:[#allocation29_spill]] %s14086_s29  ;;  %s9839_s24 = sadd.s32 4294967295, %s14138_s23   ;;  %s14138_s23 = sphi %s14262_s23, %s40_s23   ;;  %s14134_s22 = sphi %s14260_s22, %s17233_s22   ;;  %s14130_s21 = sphi %s14258_s21, %s17224_s21   ;;  %s14126_s20 = sphi %s14256_s20, %s17223_s20   ;;  %s14122_s19 = sphi %s14254_s19, %s17222_s19   ;;  %s14118_s18 = sphi %s14252_s18, %s17232_s18   ;;  %s14114_s17 = sphi %s14250_s17, %s17231_s17   ;;  %s14110_s16 = sphi %s14248_s16, %s17220_s16   ;;  %s14106_s15 = sphi %s14246_s15, %s17219_s15   ;;  %s14102_s9 = sphi %s14244_s9, %s17230_s9   ;;  %s14098_s14 = sphi %s14242_s14, %s17229_s14   ;;  %s14094_s0 = sphi %s14240_s0, %s17217_s0   ;;  %s14090_s30 = sphi %s14238_s30, %s17228_s30   ;;  %s14086_s29 = sphi %s14236_s29, %s17227_s29  }
  0x19   : > { %16960 = sst [smem:[#allocation30_spill]] %s14094_s0  ;;  %s49_s26 = sadd.s32 1, %s14130_s21 }
  0x1a   : > { %16961 = sst [smem:[#allocation31_spill]] %s14098_s14  ;;  %s52_s27 = sadd.s32 1, %s14134_s22 }
  0x1b   : > { %16962 = sst [smem:[#allocation32_spill]] %s14106_s15  ;;  %p50_p0 = scmp.ge.s32.totalorder %s49_s26, 2 }
  0x1c   : > { %16963 = sst [smem:[#allocation33_spill]] %s14114_s17  ;;  %s9841_s28 = sshll.u32 %s14134_s22, 1 }
  0x1d   : > { %16964 = sst [smem:[#allocation34_spill]] %s14122_s19  ;;  %s57_s13 = sadd.s32 %s14130_s21, %s9841_s28 }
  0x1e   : > { %16965 = sst [smem:[#allocation35_spill]] %s14126_s20  ;;  %s67_s10 = sadd.s32 1, %s14118_s18 }
  0x1f   : > { %16966 = sst [smem:[#allocation36_spill]] %s14130_s21  ;;  %s17235_s26 = smov (%p50_p0, %s49_s26), 0 }
  0x20   : > { %16967 = sst [smem:[#allocation37_spill]] %s14134_s22  ;;  %s17237_s27 = smov (!%p50_p0, %s52_s27), %s14134_s22 }
  0x21   : > { %16968 = sst [smem:[#allocation38_spill]] %s17235_s26  ;;  %p58_p1 = scmp.lt.s32.totalorder %s57_s13, 2 }
  0x22   : > { %p74_p2 = scmp.ne.s32.totalorder %s14118_s18, %s14114_s17  ;;  %p54_p3 = scmp.ge.s32.totalorder %s17237_s27, 2 }
  0x23   : > { %p75_p4 = scmp.eq.s32.totalorder %s14138_s23, 0  ;;  %p80_p6 = scmp.ne.s32.totalorder %s14114_s17, %s14110_s16 }
  0x24   : > { %s14319_s25 = scalar_select %p58_p1, %s57_s13, 2 }
  0x25   : > { %s17239_s27 = smov (%p54_p3, %s17237_s27), 0  ;;  %p14323_p5 = por %p75_p4, %p74_p2 }
  0x26   : > { %16969 = sst [smem:[#allocation39_spill]] %s17239_s27  ;;  %s9842_s21 = sshll.u32 %s17239_s27, 1 }
  0x27   : > { %s16970_s28 = scalar_select %p14323_p5, 1, 0 }
  0x28   : > { %p14330_p7 = scmp.eq.s32.totalorder %s9839_s24, 0  ;;  %s61_s12 = sadd.s32 %s9842_s21, %s17235_s26 }
  0x29   : > { %s265_s11 = sadd.s32 1, %s14106_s15  ;;  %p62_p8 = scmp.lt.s32.totalorder %s61_s12, 2 }
  0x2a   : > { %s16971_s19 = scalar_select %p14330_p7, 1, 0 }
  0x2b   : > { %p14338_p9 = por %p14330_p7, %p80_p6  ;;  %s262_s16 = ssub.s32 %s57_s13, %s61_s12 }
  0x2c   : > { %p275_p10 = scmp.ne.s32.totalorder %s14106_s15, %s14102_s9  ;;  %s17241_s12 = smov (!%p62_p8, %s61_s12), 2 }
  0x2d   : > { %s16972_s20 = scalar_select %p14338_p9, 1, 0 }
  0x2e   : > { %p263_p11 = scmp.eq.s32.totalorder %s262_s16, 0  ;;  %p14344_p12 = scmp.eq.s32.totalorder %s9839_s24, 3 }
  0x2f   : > { %16973 = sst [smem:[#allocation40_spill]] %s16972_s20  ;;  %s64_s26 = ssub.s32 %s14319_s25, %s17241_s12 }
  0x30   : > { %p281_p13 = scmp.ne.s32.totalorder %s14102_s9, %s14098_s14  ;;  %p65_p0 = scmp.eq.s32.totalorder %s64_s26, 0 }
  0x31   : > { %p14353_p1 = por %p14344_p12, %p275_p10  ;;  %s16978_s24 = sadd.s32 4294967294, %s14138_s23  }
  0x32   : > { %s14358_s20 = scalar_select %p263_p11, %s14106_s15, %s265_s11  }
  0x33   : > { %s16975_s13 = scalar_select %p14353_p1, 1, 0 }
  0x34   : > { %16976 = sst [smem:[#allocation41_spill]] %s14358_s20  ;;  %p282_p2 = scmp.eq.s32.totalorder %s16978_s24, 3 }
  0x35   : > { %s14361_s16 = scalar_select %p65_p0, %s14118_s18, %s67_s10  }
  0x36   : > { %s340_s17 = ssub.s32 %s14134_s22, %s17239_s27  ;;  %s343_s1 = sadd.s32 1, %s14094_s0 }
  0x37   : > { %16977 = sst [smem:[#allocation42_spill]] %s14361_s16  ;;  %p341_p3 = scmp.eq.s32.totalorder %s340_s17, 0 }
  0x38   : > { %p14368_p4 = por %p282_p2, %p281_p13  ;;  %p353_p6 = scmp.ne.s32.totalorder %s14094_s0, %s14090_s30 }
  0x39   : > { %s14375_s26 = scalar_select %p341_p3, %s14094_s0, %s343_s1  }
  0x3a   : > { %s16979_s12 = scalar_select %p14368_p4, 1, 0 }
  0x3b   : > { %16981 = sst [smem:[#allocation44_spill]] %s14375_s26  ;;  %p14379_p8 = por %p353_p6, %p14344_p12 }
  0x3c   : > { %16980 = sst [smem:[#allocation43_spill]] %s16979_s12  ;;  %p359_p10 = scmp.ne.s32.totalorder %s14090_s30, %s14086_s29 }
  0x3d   : > { %s16982_s14 = scalar_select %p14379_p8, 1, 0 }
  0x3e   : > { %p9845_p11 = scmp.ge.s32.totalorder %s14138_s23, 1  ;;  %p367_p0 = scmp.lt.s32.totalorder %s14138_s23, 5 }
  0x3f   : > { %16983 = sst [smem:[#allocation45_spill]] %s16982_s14  ;;  %p14387_p1 = por %p359_p10, %p282_p2 }
  0x40   : > { %p14391_p9 = pnand %p9845_p11, %p367_p0  ;;  %s14140_s17 = smov [#allocation8]  }
  0x41   : > { %s16984_s10 = scalar_select %p14387_p1, 1, 0 }
  0x42   : > { %s16986_s11 = scalar_select %p14391_p9, 1, 0 }
  0x43   : > { %16985 = sst [smem:[#allocation46_spill]] %s16984_s10  ;;  %s379_s1 = sshll.u32 %s14140_s17, 4  ;;  %s380_s1 = int_to_ptr.vmem [resolvable:$true] %s379_s1 }
  0x44   : > { %p12291_p13 = pneg %p14391_p9  ;;  %s14141_s24 = smov [#allocation11]  }
  0x45   : > { %s403_s27 = sshll.u32 %s14141_s24, 4  ;;  %s16988_s2 = sld [smem:[#allocation110_spill]]  ;;  %s14403_s27 = int_to_ptr.vmem [resolvable:$true] %s403_s27 }
  0x46   : > { %p14399_p12 = pnand %p12291_p13, %p14330_p7 }
  0x48   : > { %p14413_p3 = pneg %p14399_p12 }
  0x4b   : > { %s13720_s20 = scalar_lea.hbm %s16988_s2, 57344 }
  0x4c   : > { %p13721_p2 = scmp.ne.s32.totalorder %s16988_s2, %s13720_s20  ;;  %p13727_p11 = scmp.lt.u32.totalorder %s13720_s20, %s16988_s2 }
  0x4e   : > { %p13723_p6 = pnand %p14413_p3, %p13721_p2 }
  0x50   : > { %p13724_p10 = pneg %p13723_p6 }
  0x52   : > { %p13729_p0 = pnand %p13727_p11, %p13724_p10 }
  0x54   : > { %13732 = shalt.err (!%p13729_p0)
}
  0x55   : > { %s13733_s22 = scalar_lea.vmem %s380_s1, 57344  ;;  %p13741_p8 = scmp.lt.s32.totalorder %s380_s1, %s380_s1 }
  0x56   : > { %p13734_p13 = scmp.ne.s32.totalorder %s380_s1, %s13733_s22  ;;  %p13742_p7 = scmp.lt.s32.totalorder %s13733_s22, %s13733_s22 }
  0x58   : > { %p13736_p1 = pnand %p13734_p13, %p14413_p3  ;;  %p13743_p9 = por %p13742_p7, %p13741_p8 }
  0x5a   : > { %p13737_p4 = pneg %p13736_p1 }
  0x5c   : > { %p13744_p5 = pnand %p13743_p9, %p13737_p4 }
  0x5e   : > { %13747 = shalt.err (!%p13744_p5)
}
  0x5f   : > { %s14142_s15 = smov 256   ;;  %s14143_s16 = smov 16  }
  0x60   : > { %12294 = dma.hbm_to_vmem [thread:$0]  (!%p14399_p12), %s16988_s2, 57344, %s380_s1, [#allocation9], %s14142_s15, %s14142_s15, %s14143_s16  }
  0x61   : > { %s13748_s10 = scalar_lea.hbm %s16798_s4, 8192 }
  0x62   : > { %p13749_p1 = scmp.ne.s32.totalorder %s16798_s4, %s13748_s10  ;;  %p13755_p9 = scmp.lt.u32.totalorder %s13748_s10, %s16798_s4 }
  0x64   : > { %p13751_p7 = pnand %p13749_p1, %p14413_p3 }
  0x66   : > { %p13752_p5 = pneg %p13751_p7 }
  0x68   : > { %p13757_p4 = pnand %p13755_p9, %p13752_p5 }
  0x6a   : > { %13760 = shalt.err (!%p13757_p4)
}
  0x6b   : > { %s13761_s1 = scalar_lea.vmem %s14403_s27, 8192  ;;  %p13769_p10 = scmp.lt.s32.totalorder %s14403_s27, %s14403_s27 }
  0x6c   : > { %p13762_p8 = scmp.ne.s32.totalorder %s14403_s27, %s13761_s1  ;;  %p13770_p11 = scmp.lt.s32.totalorder %s13761_s1, %s13761_s1 }
  0x6e   : > { %p13764_p2 = pnand %p13762_p8, %p14413_p3  ;;  %p13771_p0 = por %p13770_p11, %p13769_p10 }
  0x70   : > { %p13765_p6 = pneg %p13764_p2 }
  0x72   : > { %p13772_p13 = pnand %p13771_p0, %p13765_p6 }
  0x74   : > { %13775 = shalt.err (!%p13772_p13)
}
  0x75   : > { %s14144_s29 = smov 128   ;;  %s14145_s14 = smov 8  }
  0x76   : > { %12300 = dma.hbm_to_vmem [thread:$0]  (!%p14399_p12), %s16798_s4, 8192, %s14403_s27, [#allocation12], %s14144_s29, %s14144_s29, %s14145_s14  }
  0x77   : > { %s14146_s15 = smov [#allocation14]   ;;  %s14147_s0 = smov [#allocation10]  }
  0x78   : > { %s427_s16 = sshll.u32 %s14146_s15, 4  ;;  %s393_s20 = sshll.u32 %s14147_s0, 4  ;;  %s428_s16 = int_to_ptr.vmem [resolvable:$true] %s427_s16  ;;  %s14452_s20 = int_to_ptr.vmem [resolvable:$true] %s393_s20 }
  0x79   : > { %s13776_s22 = scalar_lea.hbm %s16800_s6, 8192 }
  0x7a   : > { %p13777_p1 = scmp.ne.s32.totalorder %s16800_s6, %s13776_s22  ;;  %p13783_p9 = scmp.lt.u32.totalorder %s13776_s22, %s16800_s6 }
  0x7c   : > { %p13779_p7 = pnand %p13777_p1, %p14413_p3 }
  0x7e   : > { %p13780_p5 = pneg %p13779_p7 }
  0x80   : > { %p13785_p4 = pnand %p13783_p9, %p13780_p5 }
  0x82   : > { %13788 = shalt.err (!%p13785_p4)
}
  0x83   : > { %s13789_s10 = scalar_lea.vmem %s428_s16, 8192  ;;  %p13797_p10 = scmp.lt.s32.totalorder %s428_s16, %s428_s16 }
  0x84   : > { %p13790_p8 = scmp.ne.s32.totalorder %s428_s16, %s13789_s10  ;;  %p13798_p11 = scmp.lt.s32.totalorder %s13789_s10, %s13789_s10 }
  0x86   : > { %p13792_p2 = pnand %p13790_p8, %p14413_p3  ;;  %p13799_p0 = por %p13798_p11, %p13797_p10 }
  0x88   : > { %p13793_p6 = pneg %p13792_p2 }
  0x8a   : > { %p13800_p13 = pnand %p13799_p0, %p13793_p6 }
  0x8c   : > { %13803 = shalt.err (!%p13800_p13)
}
  0x8d   : > { %12306 = dma.hbm_to_vmem [thread:$0]  (!%p14399_p12), %s16800_s6, 8192, %s428_s16, [#allocation15], %s14144_s29, %s14144_s29, %s14145_s14  }
  0x8e   : > { %s13804_s24 = scalar_lea.hbm %s16797_s3, 64 }
  0x8f   : > { %p13805_p1 = scmp.ne.s32.totalorder %s16797_s3, %s13804_s24  ;;  %p13811_p9 = scmp.lt.u32.totalorder %s13804_s24, %s16797_s3 }
  0x91   : > { %p13807_p7 = pnand %p13805_p1, %p14413_p3 }
  0x93   : > { %p13808_p5 = pneg %p13807_p7 }
  0x95   : > { %p13813_p4 = pnand %p13811_p9, %p13808_p5 }
  0x97   : > { %13816 = shalt.err (!%p13813_p4)
}
  0x98   : > { %s13817_s29 = scalar_lea.vmem %s14452_s20, 64  ;;  %p13825_p10 = scmp.lt.s32.totalorder %s14452_s20, %s14452_s20 }
  0x99   : > { %p13818_p8 = scmp.ne.s32.totalorder %s14452_s20, %s13817_s29  ;;  %p13826_p11 = scmp.lt.s32.totalorder %s13817_s29, %s13817_s29 }
  0x9b   : > { %p13820_p2 = pnand %p13818_p8, %p14413_p3  ;;  %p13827_p0 = por %p13826_p11, %p13825_p10 }
  0x9d   : > { %p13821_p6 = pneg %p13820_p2 }
  0x9f   : > { %p13828_p13 = pnand %p13827_p0, %p13821_p6 }
  0xa1   : > { %13831 = shalt.err (!%p13828_p13)
}
  0xa2   : > { %12297 = dma.hbm_to_vmem [thread:$0]  (!%p14399_p12), %s16797_s3, 64, %s14452_s20, [#allocation9]  }
  0xa3   : > { %s14148_s10 = smov [#allocation13]   ;;  %s14149_s15 = smov [#allocation16]  }
  0xa4   : > { %s417_s2 = sshll.u32 %s14148_s10, 4  ;;  %s441_s0 = sshll.u32 %s14149_s15, 4  ;;  %s418_s2 = int_to_ptr.vmem [resolvable:$true] %s417_s2  ;;  %s14495_s0 = int_to_ptr.vmem [resolvable:$true] %s441_s0 }
  0xa5   : > { %s13832_s22 = scalar_lea.hbm %s16799_s5, 32 }
  0xa6   : > { %p13833_p1 = scmp.ne.s32.totalorder %s16799_s5, %s13832_s22  ;;  %p13839_p9 = scmp.lt.u32.totalorder %s13832_s22, %s16799_s5 }
  0xa8   : > { %p13835_p7 = pnand %p13833_p1, %p14413_p3 }
  0xaa   : > { %p13836_p5 = pneg %p13835_p7 }
  0xac   : > { %p13841_p4 = pnand %p13839_p9, %p13836_p5 }
  0xae   : > { %13844 = shalt.err (!%p13841_p4)
}
  0xaf   : > { %s13845_s29 = scalar_lea.vmem %s418_s2, 32  ;;  %p13853_p10 = scmp.lt.s32.totalorder %s418_s2, %s418_s2 }
  0xb0   : > { %p13846_p8 = scmp.ne.s32.totalorder %s418_s2, %s13845_s29  ;;  %p13854_p11 = scmp.lt.s32.totalorder %s13845_s29, %s13845_s29 }
  0xb2   : > { %p13848_p2 = pnand %p13846_p8, %p14413_p3  ;;  %p13855_p0 = por %p13854_p11, %p13853_p10 }
  0xb4   : > { %p13849_p6 = pneg %p13848_p2 }
  0xb6   : > { %p13856_p13 = pnand %p13855_p0, %p13849_p6 }
  0xb8   : > { %13859 = shalt.err (!%p13856_p13)
}
  0xb9   : > { %12303 = dma.hbm_to_vmem [thread:$0]  (!%p14399_p12), %s16799_s5, 32, %s418_s2, [#allocation12]  }
  0xba   : > { %s13860_s26 = scalar_lea.hbm %s16801_s7, 32 }
  0xbb   : > { %p13861_p1 = scmp.ne.s32.totalorder %s16801_s7, %s13860_s26  ;;  %p13867_p9 = scmp.lt.u32.totalorder %s13860_s26, %s16801_s7 }
  0xbd   : > { %p13863_p7 = pnand %p13861_p1, %p14413_p3 }
  0xbf   : > { %p13864_p5 = pneg %p13863_p7 }
  0xc1   : > { %p13869_p4 = pnand %p13867_p9, %p13864_p5 }
  0xc3   : > { %13872 = shalt.err (!%p13869_p4)
}
  0xc4   : > { %s13873_s2 = scalar_lea.vmem %s14495_s0, 32  ;;  %p13881_p10 = scmp.lt.s32.totalorder %s14495_s0, %s14495_s0 }
  0xc5   : > { %p13874_p8 = scmp.ne.s32.totalorder %s14495_s0, %s13873_s2  ;;  %p13882_p11 = scmp.lt.s32.totalorder %s13873_s2, %s13873_s2 }
  0xc7   : > { %p13876_p2 = pnand %p13874_p8, %p14413_p3  ;;  %p13883_p0 = por %p13882_p11, %p13881_p10 }
  0xc9   : > { %p13877_p6 = pneg %p13876_p2 }
  0xcb   : > { %p13884_p13 = pnand %p13883_p0, %p13877_p6 }
  0xcd   : > { %13887 = shalt.err (!%p13884_p13)
}
  0xce   : > { %12309 = dma.hbm_to_vmem [thread:$0]  (!%p14399_p12), %s16801_s7, 32, %s14495_s0, [#allocation15]  }
  0xcf   : > { %s14150_s29 = smov [#allocation17]   ;;  %s13888_s15 = scalar_lea.hbm %s16802_s8, 32 }
  0xd0   : > { %s452_s14 = sshll.u32 %s14150_s29, 4  ;;  %p13889_p1 = scmp.ne.s32.totalorder %s16802_s8, %s13888_s15  ;;  %s453_s14 = int_to_ptr.vmem [resolvable:$true] %s452_s14 }
  0xd1   : > { %p13895_p9 = scmp.lt.u32.totalorder %s13888_s15, %s16802_s8 }
  0xd2   : > { %p13891_p7 = pnand %p13889_p1, %p14413_p3 }
  0xd4   : > { %p13892_p5 = pneg %p13891_p7 }
  0xd6   : > { %p13897_p4 = pnand %p13895_p9, %p13892_p5 }
  0xd8   : > { %13900 = shalt.err (!%p13897_p4)
}
  0xd9   : > { %s13901_s0 = scalar_lea.vmem %s453_s14, 32  ;;  %p13909_p10 = scmp.lt.s32.totalorder %s453_s14, %s453_s14 }
  0xda   : > { %p13902_p8 = scmp.ne.s32.totalorder %s453_s14, %s13901_s0  ;;  %p13910_p11 = scmp.lt.s32.totalorder %s13901_s0, %s13901_s0 }
  0xdc   : > { %p13904_p2 = pnand %p13902_p8, %p14413_p3  ;;  %p13911_p0 = por %p13910_p11, %p13909_p10 }
  0xde   : > { %p13905_p6 = pneg %p13904_p2 }
  0xe0   : > { %p13912_p13 = pnand %p13911_p0, %p13905_p6 }
  0xe2   : > { %13915 = shalt.err (!%p13912_p13)
}
  0xe3   : > { %12312 = dma.hbm_to_vmem [thread:$0]  (!%p14399_p12), %s16802_s8, 32, %s453_s14, [#allocation18]  }
  0xe4   : > { %p9853_p1 = scmp.ge.s32.totalorder %s14138_s23, 4 }
  0xe5   : > { %p16990_p7 = scmp.ne.s32.totalorder (!%p9853_p1), %s16970_s28, 0 }
  0xe6   : > { %462 = sbr.rel (%p9853_p1) target bundleno = 279 (0x117), region = 48 }
  0xed   : > { %465 = sbr.rel (!%p16990_p7) target bundleno = 279 (0x117), region = 52  ;;  %s466_s17 = sand.u32 (%p16990_p7), 1, %s14118_s18  }
  0xee   : > { %s9855_s27 = sshll.u32 (%p16990_p7), %s14319_s25, 5  ;;  %s12255_s20 = smul.u32 (%p16990_p7), 3584, %s466_s17 }
  0xef   : > { %s476_s29 = ssub.s32 (%p16990_p7), 75, %s9855_s27  ;;  %s14564_s10 = scalar_lea.sflag (%p16990_p7), [#allocation6], %s466_s17 }
  0xf0   : > { %p477_p3 = scmp.lt.s32.totalorder (%p16990_p7), %s476_s29, 32  ;;  %s470_s14 = scalar_lea.vmem (%p16990_p7), [#allocation5], %s12255_s20 }
  0xf4   : > { %s17243_s29 = smov (!%p477_p3, %s476_s29), 32 }
  0xf5   : > { %s14561_s16 = smul.u32 1792, %s17243_s29 }
  0xf7   : > { %s482_s21 = ssub.s32 57344, %s14561_s16 }
  0xf8   : > { %483 = vsyncadd %s14564_s10, %s482_s21  ;;  %p9858_p12 = scmp.ne.s32.totalorder %s14561_s16, 0  ;;  %s12256_s28 = smul.u32 57344, %s14319_s25 }
  0xf9   : > { %s489_s15 = sshll.u32 %s470_s14, 4  ;;  %s16991_s22 = sld [smem:[#allocation109_spill]]  ;;  %s14574_s15 = int_to_ptr.vmem [resolvable:$true] %s489_s15 }
  0xff   : > { %s16992_s1 = smov %s16991_s22  ;;  %s14572_s0 = scalar_lea.hbm %s16991_s22, %s12256_s28 }
 0x100   : > { %s13916_s12 = scalar_lea.hbm %s14572_s0, %s14561_s16  ;;  %s13920_s25 = scalar_lea.hbm %s16992_s1, 134400 }
 0x101   : > { %p13917_p5 = scmp.ne.s32.totalorder %s14572_s0, %s13916_s12  ;;  %p13921_p8 = scmp.lt.u32.totalorder %s14572_s0, %s16992_s1 }
 0x102   : > { %p13922_p2 = scmp.lt.u32.totalorder %s13920_s25, %s13916_s12  ;;  %p13924_p10 = scmp.lt.u32.totalorder %s13916_s12, %s14572_s0 }
 0x103   : > { %p13918_p9 = pnand %p13917_p5, %p9858_p12 }
 0x104   : > { %p13923_p6 = por %p13922_p2, %p13921_p8 }
 0x105   : > { %p13919_p4 = pneg %p13918_p9 }
 0x106   : > { %p13925_p11 = por %p13924_p10, %p13923_p6 }
 0x108   : > { %p13926_p0 = pnand %p13925_p11, %p13919_p4 }
 0x10a   : > { %13929 = shalt.err (!%p13926_p0)
}
 0x10b   : > { %s13930_s29 = scalar_lea.vmem %s14574_s15, %s14561_s16  ;;  %s14151_s21 = smov [#allocation5]  }
 0x10c   : > { %p13931_p13 = scmp.ne.s32.totalorder %s14574_s15, %s13930_s29  ;;  %s13934_s14 = sshll.u32 %s14151_s21, 4  ;;  %s13935_s14 = int_to_ptr.vmem [resolvable:$false] %s13934_s14 }
 0x10d   : > { %s13936_s28 = scalar_lea.vmem %s13935_s14, 114688  ;;  %p13937_p3 = scmp.lt.s32.totalorder %s14574_s15, %s13935_s14 }
 0x10e   : > { %p13932_p1 = pnand %p13931_p13, %p9858_p12  ;;  %p13938_p5 = scmp.lt.s32.totalorder %s13936_s28, %s13930_s29 }
 0x110   : > { %p13933_p7 = pneg %p13932_p1  ;;  %p13939_p9 = por %p13938_p5, %p13937_p3 }
 0x112   : > { %p13940_p8 = pnand %p13939_p9, %p13933_p7 }
 0x114   : > { %13943 = shalt.err (!%p13940_p8)
}
 0x115   : > { %s14152_s26 = smov 1792   ;;  %s14153_s24 = smov 112  }
 0x116   : > { %495 = dma.hbm_to_vmem [thread:$0]  (%p9858_p12), %s14572_s0, %s14561_s16, %s14574_s15, %s14564_s10, %s14152_s26, %s14152_s26, %s14153_s24  }
 0x117 PF: > { %p16993_p4 = scmp.ne.s32.totalorder %s16986_s11, 0 }
 0x119   : > { %501 = sbr.rel (%p16993_p4) target bundleno = 2699 (0xa8b), region = 56 }
 0x120   : > { %s16994_s22 = sld [smem:[#allocation33_spill]]  ;;  %s16995_s12 = sld [smem:[#allocation40_spill]] }
 0x126   : > { %s503_s2 = sand.u32 1, %s16994_s22   ;;  %p16996_p2 = scmp.ne.s32.totalorder %s16995_s12, 0 }
 0x127   : > { %s12257_s17 = smul.u32 3584, %s503_s2  ;;  %s504_s25 = scalar_lea.sflag [#allocation6], %s503_s2 }
 0x129   : > { %s14604_s27 = scalar_lea.vmem [#allocation5], %s12257_s17 }
 0x12a   : > { %14057 = dma.done.wait (%p16996_p2), %s504_s25, 57344  }
 0x12b   : > { %14059 = vsyncadd (%p16996_p2), %s504_s25, 4294909952  ;;  %p16997_p6 = scmp.ne.s32.totalorder %s16971_s19, 0 }
 0x12d   : > { %14061 = dma.done.wait (%p16997_p6), [#allocation9], 57408  }
 0x12e   : > { %14063 = vsyncadd (%p16997_p6), [#allocation9], 4294909888 }
 0x12f   : > { %14065 = dma.done.wait (%p16997_p6), [#allocation12], 8224  }
 0x130   : > { %14067 = vsyncadd (%p16997_p6), [#allocation12], 4294959072 }
 0x131   : > { %14069 = dma.done.wait (%p16997_p6), [#allocation15], 8224  }
 0x132   : > { %14071 = vsyncadd (%p16997_p6), [#allocation15], 4294959072 }
 0x133   : > { %14073 = dma.done.wait (%p16997_p6), [#allocation18], 32  }
 0x134   : > { %14075 = vsyncadd (%p16997_p6), [#allocation18], 4294967264  ;;  %s16998_s11 = sld [smem:[#allocation35_spill]]  ;;  %s567_s16 = sand.u32 1, %s14102_s9  }
 0x135   : > { %s16952_s10 = sand.u32 1, %s14090_s30   ;;  %s14628_s15 = sld [smem:[#allocation3]] }
 0x136   : > { %s14632_s0 = sshll.u32 %s567_s16, 1  ;;  %s9871_s20 = sshll.u32 %s16952_s10, 2 }
 0x137   : > { %s16999_s21 = sld [smem:[#allocation112_spill]]  ;;  %s17000_s24 = sld [smem:[#allocation113_spill]] }
 0x138   : > { %s569_s12 = scalar_lea.vmem [#allocation19], %s14632_s0  ;;  %s14649_s2 = scalar_lea.vmem [#allocation20], %s9871_s20 }
 0x139   : > { %s17001_s17 = sld [smem:[#allocation34_spill]] }
 0x13a   : > { %p600_p12 = scmp.lt.s32.totalorder %s16998_s11, 1 }
 0x13c   : > { %s17245_s11 = smov (!%p600_p12, %s16998_s11), 1 }
 0x13d   : > { %s14641_s14 = scalar_lea.vmem %s16999_s21, %s17245_s11  ;;  %s14646_s22 = scalar_lea.vmem %s17000_s24, %s17245_s11 }
 0x13f   : > { %p9872_p10 = scmp.ne.s32.totalorder %s17001_s17, 0 }
 0x140   : > { %vm611_vm0 = vcmask (!%p9872_p10), 0   ;;  %v614_v1 = vlaneseq (!%p9872_p10)  ;;  %v14154_v2 = vmov (!%p9872_p10), -1e+30   ;;  %v14155_v3 = vmov (!%p9872_p10), 0.0  }
 0x141   : > { %610 = sbr.rel (%p9872_p10) target bundleno = 328 (0x148), region = 92  ;;  %612 = vst.msk [vmem:[%s14641_s14] sm:$0x1] (!%p9872_p10), %vm611_vm0, %v14154_v2  ;;  %613 = vst.msk [vmem:[%s14646_s22] sm:$0x1] (!%p9872_p10), %vm611_vm0, %v14155_v3 }
 0x142   : > { %vm616_vm1 = vcmp.lt.s32.totalorder (!%p9872_p10), %v614_v1, 512 }
 0x143   : > { %618 = vst.msk [vmem:[%s14649_s2] sm:$0xf] (!%p9872_p10), %vm616_vm1, %v14155_v3 }
 0x148 PF: > { %v12466_v4 = vld [vmem:[#allocation8 + $0x4] ss:$16 sps:$4 sm:$0xff]   ;;  %v12468_v5 = vld [vmem:[#allocation8 + $0xc] ss:$16 sps:$4 sm:$0xff]   ;;  %v12470_v6 = vld [vmem:[#allocation8] ss:$16 sps:$4 sm:$0xff]  }
 0x149   : > { %4004 = vmatprep.subr.bf16.mxu0 %v12466_v4  ;;  %v12471_v7 = vld [vmem:[#allocation8 + $0x8] ss:$16 sps:$4 sm:$0xff]   ;;  %5355 = vmatprep.subr.bf16.mxu1 %v12468_v5  ;;  %v12472_v8 = vld [vmem:[#allocation8 + $0x24] ss:$16 sps:$4 sm:$0xff]   ;;  %v12474_v9 = vld [vmem:[#allocation8 + $0x2c] ss:$16 sps:$4 sm:$0xff]  }
 0x14a   : > { %4005 = vmatpush1.bf16.msra.mxu0 %v12470_v6  ;;  %5356 = vmatpush1.bf16.msra.mxu1 %v12471_v7  ;;  %v12476_v10 = vld [vmem:[#allocation8 + $0x20] ss:$16 sps:$4 sm:$0xff]   ;;  %v12477_v11 = vld [vmem:[#allocation8 + $0x28] ss:$16 sps:$4 sm:$0xff]   ;;  %v12478_v12 = vld [vmem:[#allocation8 + $0x44] ss:$16 sps:$4 sm:$0xff]  }
 0x14b   : > { %4006 = vmatprep.subr.bf16.mxu0 %v12472_v8  ;;  %5357 = vmatprep.subr.bf16.mxu1 %v12474_v9  ;;  %v12480_v13 = vld [vmem:[#allocation8 + $0x4c] ss:$16 sps:$4 sm:$0xff]   ;;  %v12482_v14 = vld [vmem:[#allocation8 + $0x40] ss:$16 sps:$4 sm:$0xff]   ;;  %v12483_v15 = vld [vmem:[#allocation8 + $0x48] ss:$16 sps:$4 sm:$0xff]  }
 0x14c   : > { %v12484_v16 = vld [vmem:[#allocation8 + $0x64] ss:$16 sps:$4 sm:$0xff]   ;;  %v12486_v17 = vld [vmem:[#allocation8 + $0x6c] ss:$16 sps:$4 sm:$0xff]   ;;  %v12488_v18 = vld [vmem:[#allocation8 + $0x60] ss:$16 sps:$4 sm:$0xff]  }
 0x14d   : > { %v12489_v19 = vld [vmem:[#allocation8 + $0x68] ss:$16 sps:$4 sm:$0xff]   ;;  %v12490_v20 = vld [vmem:[#allocation8 + $0x84] ss:$16 sps:$4 sm:$0xff]   ;;  %v12492_v21 = vld [vmem:[#allocation8 + $0x8c] ss:$16 sps:$4 sm:$0xff]  }
 0x14e   : > { %4007 = vmatpush1.bf16.msra.mxu0 %v12476_v10  ;;  %5358 = vmatpush1.bf16.msra.mxu1 %v12477_v11  ;;  %v12494_v22 = vld [vmem:[#allocation8 + $0x80] ss:$16 sps:$4 sm:$0xff]   ;;  %v12495_v23 = vld [vmem:[#allocation8 + $0x88] ss:$16 sps:$4 sm:$0xff]   ;;  %v12496_v24 = vld [vmem:[#allocation8 + $0xa4] ss:$16 sps:$4 sm:$0xff]  }
 0x14f   : > { %4008 = vmatprep.subr.bf16.mxu0 %v12478_v12  ;;  %5359 = vmatprep.subr.bf16.mxu1 %v12480_v13  ;;  %v12498_v25 = vld [vmem:[#allocation8 + $0xac] ss:$16 sps:$4 sm:$0xff]   ;;  %v12500_v26 = vld [vmem:[#allocation8 + $0xa0] ss:$16 sps:$4 sm:$0xff]   ;;  %v12501_v27 = vld [vmem:[#allocation8 + $0xa8] ss:$16 sps:$4 sm:$0xff]  }
 0x150   : > { %v12502_v28 = vld [vmem:[#allocation8 + $0xc4] ss:$16 sps:$4 sm:$0xff]   ;;  %v12504_v29 = vld [vmem:[#allocation8 + $0xcc] ss:$16 sps:$4 sm:$0xff]   ;;  %v12506_v30 = vld [vmem:[#allocation8 + $0xc0] ss:$16 sps:$4 sm:$0xff]  }
 0x151   : > { %v12507_v31 = vld [vmem:[#allocation8 + $0xc8] ss:$16 sps:$4 sm:$0xff]   ;;  %v12508_v32 = vld [vmem:[#allocation8 + $0xe4] ss:$16 sps:$4 sm:$0xff]   ;;  %v12510_v33 = vld [vmem:[#allocation8 + $0xec] ss:$16 sps:$4 sm:$0xff]  }
 0x152   : > { %4009 = vmatpush1.bf16.msra.mxu0 %v12482_v14  ;;  %5360 = vmatpush1.bf16.msra.mxu1 %v12483_v15  ;;  %v12512_v34 = vld [vmem:[#allocation8 + $0xe0] ss:$16 sps:$4 sm:$0xff]   ;;  %v12513_v35 = vld [vmem:[#allocation8 + $0xe8] ss:$16 sps:$4 sm:$0xff]   ;;  %v12514_v36 = vld [vmem:[#allocation8 + $0x104] ss:$16 sps:$4 sm:$0xff]  }
 0x153   : > { %4010 = vmatprep.subr.bf16.mxu0 %v12484_v16  ;;  %5361 = vmatprep.subr.bf16.mxu1 %v12486_v17  ;;  %v12516_v37 = vld [vmem:[#allocation8 + $0x10c] ss:$16 sps:$4 sm:$0xff]   ;;  %v12518_v38 = vld [vmem:[#allocation8 + $0x100] ss:$16 sps:$4 sm:$0xff]   ;;  %v12519_v39 = vld [vmem:[#allocation8 + $0x108] ss:$16 sps:$4 sm:$0xff]  }
 0x154   : > { %v12520_v40 = vld [vmem:[#allocation8 + $0x124] ss:$16 sps:$4 sm:$0xff]   ;;  %v12522_v41 = vld [vmem:[#allocation8 + $0x12c] ss:$16 sps:$4 sm:$0xff]   ;;  %v12524_v42 = vld [vmem:[#allocation8 + $0x120] ss:$16 sps:$4 sm:$0xff]  }
 0x155   : > { %v12525_v43 = vld [vmem:[#allocation8 + $0x128] ss:$16 sps:$4 sm:$0xff]   ;;  %v12526_v44 = vld [vmem:[#allocation8 + $0x144] ss:$16 sps:$4 sm:$0xff]   ;;  %v12528_v45 = vld [vmem:[#allocation8 + $0x14c] ss:$16 sps:$4 sm:$0xff]  }
 0x156   : > { %4011 = vmatpush1.bf16.msra.mxu0 %v12488_v18  ;;  %5362 = vmatpush1.bf16.msra.mxu1 %v12489_v19  ;;  %v12530_v46 = vld [vmem:[#allocation8 + $0x140] ss:$16 sps:$4 sm:$0xff]   ;;  %v12531_v47 = vld [vmem:[#allocation8 + $0x148] ss:$16 sps:$4 sm:$0xff]   ;;  %v12532_v48 = vld [vmem:[#allocation8 + $0x164] ss:$16 sps:$4 sm:$0xff]  }
 0x157   : > { %4012 = vmatprep.subr.bf16.mxu0 %v12490_v20  ;;  %5363 = vmatprep.subr.bf16.mxu1 %v12492_v21  ;;  %v12534_v49 = vld [vmem:[#allocation8 + $0x16c] ss:$16 sps:$4 sm:$0xff]   ;;  %v12536_v51 = vld [vmem:[#allocation8 + $0x160] ss:$16 sps:$4 sm:$0xff]   ;;  %v12537_v53 = vld [vmem:[#allocation8 + $0x168] ss:$16 sps:$4 sm:$0xff]  }
 0x158   : > { %v623_v50 = vld [vmem:[%s14604_s27 + $0x8] sm:$0xff]  ;;  %v637_v52 = vld [vmem:[%s14604_s27 + $0x78] sm:$0xff]  ;;  %v12538_v55 = vld [vmem:[#allocation8 + $0x184] ss:$16 sps:$4 sm:$0xff]   ;;  %s17002_s25 = sld [smem:[#allocation35_spill]]  ;;  %s17003_s11 = sld [smem:[#allocation34_spill]] }
 0x159   : > { %v1071_v54 = vpack.c.bf16 %v637_v52, %v623_v50  ;;  %v12540_v56 = vld [vmem:[#allocation8 + $0x18c] ss:$16 sps:$4 sm:$0xff]   ;;  %v12542_v57 = vld [vmem:[#allocation8 + $0x180] ss:$16 sps:$4 sm:$0xff]   ;;  %v12543_v58 = vld [vmem:[#allocation8 + $0x188] ss:$16 sps:$4 sm:$0xff]  }
 0x15a   : > { %4013 = vmatpush1.bf16.msra.mxu0 %v12494_v22  ;;  %5364 = vmatpush1.bf16.msra.mxu1 %v12495_v23  ;;  %v12544_v59 = vld [vmem:[#allocation8 + $0x1a4] ss:$16 sps:$4 sm:$0xff]   ;;  %v12546_v60 = vld [vmem:[#allocation8 + $0x1ac] ss:$16 sps:$4 sm:$0xff]   ;;  %v12548_v61 = vld [vmem:[#allocation8 + $0x1a0] ss:$16 sps:$4 sm:$0xff]  }
 0x15b   : > { %4014 = vmatprep.subr.bf16.mxu0 %v12496_v24  ;;  %5365 = vmatprep.subr.bf16.mxu1 %v12498_v25  ;;  %v12549_v62 = vld [vmem:[#allocation8 + $0x1a8] ss:$16 sps:$4 sm:$0xff]   ;;  %v12550_v63 = vld [vmem:[#allocation8 + $0x1c4] ss:$16 sps:$4 sm:$0xff]   ;;  %v12552_v0 = vld [vmem:[#allocation8 + $0x1cc] ss:$16 sps:$4 sm:$0xff]  }
 0x15c   : > { %4036 = vmatprep.mubr.bf16.mxu0 %v1071_v54  ;;  %5387 = vmatprep.mubr.bf16.mxu1 %v1071_v54  ;;  %v12554_v1 = vld [vmem:[#allocation8 + $0x1c0] ss:$16 sps:$4 sm:$0xff]   ;;  %v12555_v2 = vld [vmem:[#allocation8 + $0x1c8] ss:$16 sps:$4 sm:$0xff]   ;;  %v12556_v3 = vld [vmem:[#allocation8 + $0x1e4] ss:$16 sps:$4 sm:$0xff]  }
 0x15d   : > { %v12558_v4 = vld [vmem:[#allocation8 + $0x1ec] ss:$16 sps:$4 sm:$0xff]   ;;  %v12560_v5 = vld [vmem:[#allocation8 + $0x1e0] ss:$16 sps:$4 sm:$0xff]   ;;  %v12561_v6 = vld [vmem:[#allocation8 + $0x1e8] ss:$16 sps:$4 sm:$0xff]  }
 0x15e   : > { %4015 = vmatpush1.bf16.msra.mxu0 %v12500_v26  ;;  %5366 = vmatpush1.bf16.msra.mxu1 %v12501_v27  ;;  %v622_v7 = vld [vmem:[%s14604_s27] sm:$0xff]  ;;  %v636_v8 = vld [vmem:[%s14604_s27 + $0x70] sm:$0xff]  ;;  %v651_v10 = vld [vmem:[%s14604_s27 + $0xe8] sm:$0xff]  ;;  %s9873_s20 = sshll.u32 %s17002_s25, 1  ;;  %s9599_s24 = sshll.u32 %s569_s12, 4  ;;  %s9600_s24 = int_to_ptr.vmem [resolvable:$true] %s9599_s24 }
 0x15f   : > { %4016 = vmatprep.subr.bf16.mxu0 %v12502_v28  ;;  %5367 = vmatprep.subr.bf16.mxu1 %v12504_v29  ;;  %v12564_v9 = vld [vmem:[#allocation8 + $0x204] ss:$16 sps:$4 sm:$0xff]   ;;  %v665_v11 = vld [vmem:[%s14604_s27 + $0x158] sm:$0xff]  ;;  %v1070_v12 = vpack.c.bf16 %v636_v8, %v622_v7  ;;  %v12562_v13 = vld [vmem:[#allocation8 + $0x200] ss:$16 sps:$4 sm:$0xff]   ;;  %s15108_s19 = sadd.s32 %s17003_s11, %s9873_s20  ;;  %s9572_s17 = scalar_lea.sflag [#allocation7], %s567_s16 }
 0x160   : > { %v1085_v14 = vpack.c.bf16 %v665_v11, %v651_v10  ;;  %v12567_v15 = vld [vmem:[#allocation8 + $0x224] ss:$16 sps:$4 sm:$0xff]   ;;  %v12565_v18 = vld [vmem:[#allocation8 + $0x220] ss:$16 sps:$4 sm:$0xff]   ;;  %v12589_v19 = vld [vmem:[#allocation8 + $0x208] ss:$16 sps:$4 sm:$0xff]  }
 0x161   : > { %v650_v16 = vld [vmem:[%s14604_s27 + $0xe0] sm:$0xff]  ;;  %v664_v17 = vld [vmem:[%s14604_s27 + $0x150] sm:$0xff]  ;;  %v12591_v20 = vld [vmem:[#allocation8 + $0x20c] ss:$16 sps:$4 sm:$0xff]   ;;  %s13944_s11 = scalar_lea.vmem %s9600_s24, 32  ;;  %p17204_p0 = scmp.ne.s32.totalorder %s16975_s13, 0 }
 0x162   : > { %4017 = vmatpush1.bf16.msra.mxu0 %v12506_v30  ;;  %5368 = vmatpush1.bf16.msra.mxu1 %v12507_v31  ;;  %v679_v21 = vld [vmem:[%s14604_s27 + $0x1c8] sm:$0xff]  ;;  %v693_v22 = vld [vmem:[%s14604_s27 + $0x238] sm:$0xff]  ;;  %v12570_v23 = vld [vmem:[#allocation8 + $0x244] ss:$16 sps:$4 sm:$0xff]   ;;  %v1084_v25 = vpack.c.bf16 %v664_v17, %v650_v16  ;;  %p13945_p11 = scmp.ne.s32.totalorder %s9600_s24, %s13944_s11  ;;  %s14158_s20 = smov [#allocation19]  }
 0x163   : > { %4018 = vmatprep.subr.bf16.mxu0 %v12508_v32  ;;  %5369 = vmatprep.subr.bf16.mxu1 %v12510_v33  ;;  %v12594_v24 = vld [vmem:[#allocation8 + $0x22c] ss:$16 sps:$4 sm:$0xff]   ;;  %v1099_v26 = vpack.c.bf16 %v693_v22, %v679_v21  ;;  %v12568_v27 = vld [vmem:[#allocation8 + $0x240] ss:$16 sps:$4 sm:$0xff]   ;;  %v12592_v28 = vld [vmem:[#allocation8 + $0x228] ss:$16 sps:$4 sm:$0xff]  }
 0x164   : > { %v678_v29 = vld [vmem:[%s14604_s27 + $0x1c0] sm:$0xff]  ;;  %v12600_v31 = vld [vmem:[#allocation8 + $0x24c] ss:$16 sps:$4 sm:$0xff]   ;;  %v692_v32 = vld [vmem:[%s14604_s27 + $0x230] sm:$0xff]  ;;  %p13946_p13 = pnand %p13945_p11, %p17204_p0 }
 0x165   : > { %v12573_v30 = vld [vmem:[#allocation8 + $0x264] ss:$16 sps:$4 sm:$0xff]   ;;  %v707_v33 = vld [vmem:[%s14604_s27 + $0x2a8] sm:$0xff] }
 0x166   : > { %4019 = vmatpush1.bf16.msra.mxu0 %v12512_v34  ;;  %5370 = vmatpush1.bf16.msra.mxu1 %v12513_v35  ;;  %v721_v34 = vld [vmem:[%s14604_s27 + $0x318] sm:$0xff]  ;;  %v12571_v35 = vld [vmem:[#allocation8 + $0x260] ss:$16 sps:$4 sm:$0xff]   ;;  %v12597_v7 = vld [vmem:[#allocation8 + $0x324] ss:$16 sps:$4 sm:$0xff]   ;;  %p13947_p1 = pneg %p13946_p13 }
 0x167   : > { %4020 = vmatprep.subr.bf16.mxu0 %v12514_v36  ;;  %5371 = vmatprep.subr.bf16.mxu1 %v12516_v37  ;;  %v12598_v36 = vld [vmem:[#allocation8 + $0x248] ss:$16 sps:$4 sm:$0xff]   ;;  %v12576_v37 = vld [vmem:[#allocation8 + $0x284] ss:$16 sps:$4 sm:$0xff]   ;;  %v12612_v52 = vld [vmem:[#allocation8 + $0x2ac] ss:$16 sps:$4 sm:$0xff]  }
 0x168   : > { %v12607_v50 = vld [vmem:[#allocation8 + $0x288] ss:$16 sps:$4 sm:$0xff]   ;;  %v12627_v8 = vld [vmem:[#allocation8 + $0x30c] ss:$16 sps:$4 sm:$0xff]   ;;  %v776_v10 = vld [vmem:[%s14604_s27 + $0x4d0] sm:$0xff] }
 0x169   : > { %v791_v11 = vld [vmem:[%s14604_s27 + $0x548] sm:$0xff]  ;;  %v12615_v21 = vld [vmem:[#allocation8 + $0x364] ss:$16 sps:$4 sm:$0xff]  }
 0x16a   : > { %4021 = vmatpush1.bf16.msra.mxu0 %v12518_v38  ;;  %5372 = vmatpush1.bf16.msra.mxu1 %v12519_v39  ;;  %v12603_v38 = vld [vmem:[#allocation8 + $0x26c] ss:$16 sps:$4 sm:$0xff]   ;;  %v1098_v39 = vpack.c.bf16 %v692_v32, %v678_v29  ;;  %v12624_v29 = vld [vmem:[#allocation8 + $0x384] ss:$16 sps:$4 sm:$0xff]  }
 0x16b   : > { %4022 = vmatprep.subr.bf16.mxu0 %v12520_v40  ;;  %5373 = vmatprep.subr.bf16.mxu1 %v12522_v41  ;;  %v1113_v40 = vpack.c.bf16 %v721_v34, %v707_v33  ;;  %v12574_v41 = vld [vmem:[#allocation8 + $0x280] ss:$16 sps:$4 sm:$0xff]   ;;  %v12630_v16 = vld [vmem:[#allocation8 + $0x32c] ss:$16 sps:$4 sm:$0xff]   ;;  %v12637_v34 = vld [vmem:[#allocation8 + $0x368] ss:$16 sps:$4 sm:$0xff]  }
 0x16c   : > { %v12636_v22 = vld [vmem:[#allocation8 + $0x34c] ss:$16 sps:$4 sm:$0xff]   ;;  %v12622_v33 = vld [vmem:[#allocation8 + $0x380] ss:$16 sps:$4 sm:$0xff]  }
 0x16e   : > { %4023 = vmatpush1.bf16.msra.mxu0 %v12524_v42  ;;  %5374 = vmatpush1.bf16.msra.mxu1 %v12525_v43  ;;  %v12601_v42 = vld [vmem:[#allocation8 + $0x268] ss:$16 sps:$4 sm:$0xff]   ;;  %v12579_v43 = vld [vmem:[#allocation8 + $0x2a4] ss:$16 sps:$4 sm:$0xff]  }
 0x16f   : > { %4024 = vmatprep.subr.bf16.mxu0 %v12526_v44  ;;  %5375 = vmatprep.subr.bf16.mxu1 %v12528_v45  ;;  %v12609_v44 = vld [vmem:[#allocation8 + $0x28c] ss:$16 sps:$4 sm:$0xff]   ;;  %v706_v45 = vld [vmem:[%s14604_s27 + $0x2a0] sm:$0xff] }
 0x172   : > { %4025 = vmatpush1.bf16.msra.mxu0 %v12530_v46  ;;  %5376 = vmatpush1.bf16.msra.mxu1 %v12531_v47  ;;  %v720_v46 = vld [vmem:[%s14604_s27 + $0x310] sm:$0xff]  ;;  %v735_v47 = vld [vmem:[%s14604_s27 + $0x388] sm:$0xff] }
 0x173   : > { %4026 = vmatprep.subr.bf16.mxu0 %v12532_v48  ;;  %5377 = vmatprep.subr.bf16.mxu1 %v12534_v49  ;;  %v749_v48 = vld [vmem:[%s14604_s27 + $0x3f8] sm:$0xff]  ;;  %v12577_v49 = vld [vmem:[#allocation8 + $0x2a0] ss:$16 sps:$4 sm:$0xff]  }
 0x174   : > { %v1127_v54 = vpack.c.bf16 %v749_v48, %v735_v47  ;;  %v12640_v47 = vld [vmem:[#allocation8 + $0x3c0] ss:$16 sps:$4 sm:$0xff]   ;;  %v12646_v48 = vld [vmem:[#allocation8 + $0x3a8] ss:$16 sps:$4 sm:$0xff]  }
 0x176   : > { %4027 = vmatpush1.bf16.msra.mxu0 %v12536_v51  ;;  %5378 = vmatpush1.bf16.msra.mxu1 %v12537_v53  ;;  %v12582_v51 = vld [vmem:[#allocation8 + $0x2c4] ss:$16 sps:$4 sm:$0xff]   ;;  %v1112_v53 = vpack.c.bf16 %v720_v46, %v706_v45 }
 0x177   : > { %4028 = vmatprep.subr.bf16.mxu0 %v12538_v55  ;;  %5379 = vmatprep.subr.bf16.mxu1 %v12540_v56  ;;  %v12580_v55 = vld [vmem:[#allocation8 + $0x2c0] ss:$16 sps:$4 sm:$0xff]   ;;  %v12610_v56 = vld [vmem:[#allocation8 + $0x2a8] ss:$16 sps:$4 sm:$0xff]  }
 0x17a   : > { %4029 = vmatpush1.bf16.msra.mxu0 %v12542_v57  ;;  %5380 = vmatpush1.bf16.msra.mxu1 %v12543_v58  ;;  %v734_v57 = vld [vmem:[%s14604_s27 + $0x380] sm:$0xff] }
 0x17b   : > { %4030 = vmatprep.subr.bf16.mxu0 %v12544_v59  ;;  %5381 = vmatprep.subr.bf16.mxu1 %v12546_v60  ;;  %v12585_v58 = vld [vmem:[#allocation8 + $0x2e4] ss:$16 sps:$4 sm:$0xff]   ;;  %v12618_v59 = vld [vmem:[#allocation8 + $0x2cc] ss:$16 sps:$4 sm:$0xff]  }
 0x17c   : > { %v748_v60 = vld [vmem:[%s14604_s27 + $0x3f0] sm:$0xff] }
 0x17e   : > { %4031 = vmatpush1.bf16.msra.mxu0 %v12548_v61  ;;  %5382 = vmatpush1.bf16.msra.mxu1 %v12549_v62  ;;  %v763_v61 = vld [vmem:[%s14604_s27 + $0x468] sm:$0xff]  ;;  %v777_v62 = vld [vmem:[%s14604_s27 + $0x4d8] sm:$0xff] }
 0x17f   : > { %4032 = vmatprep.subr.bf16.mxu0 %v12550_v63  ;;  %5383 = vmatprep.subr.bf16.mxu1 %v12552_v0  ;;  %v12583_v63 = vld [vmem:[#allocation8 + $0x2e0] ss:$16 sps:$4 sm:$0xff]   ;;  %v12616_v0 = vld [vmem:[#allocation8 + $0x2c8] ss:$16 sps:$4 sm:$0xff]  }
 0x182   : > { %4033 = vmatpush1.bf16.msra.mxu0 %v12554_v1  ;;  %5384 = vmatpush1.bf16.msra.mxu1 %v12555_v2  ;;  %v12588_v1 = vld [vmem:[#allocation8 + $0x304] ss:$16 sps:$4 sm:$0xff]   ;;  %v12621_v2 = vld [vmem:[#allocation8 + $0x2ec] ss:$16 sps:$4 sm:$0xff]  }
 0x183   : > { %4034 = vmatprep.subr.bf16.mxu0 %v12556_v3  ;;  %5385 = vmatprep.subr.bf16.mxu1 %v12558_v4  ;;  %v1126_v3 = vpack.c.bf16 %v748_v60, %v734_v57  ;;  %v1141_v4 = vpack.c.bf16 %v777_v62, %v763_v61  ;;  %v12657_v57 = vld [vmem:[#allocation8 + $0x3ec] ss:$16 sps:$4 sm:$0xff]   ;;  %v12655_v61 = vld [vmem:[#allocation8 + $0x3e8] ss:$16 sps:$4 sm:$0xff]   ;;  %v874_v62 = vld [vmem:[%s14604_s27 + $0x7e0] sm:$0xff] }
 0x186   : > { %4035 = vmatpush1.bf16.msra.mxu0 %v12560_v5  ;;  %5386 = vmatpush1.bf16.msra.mxu1 %v12561_v6  ;;  %v12586_v5 = vld [vmem:[#allocation8 + $0x300] ss:$16 sps:$4 sm:$0xff]   ;;  %v12619_v6 = vld [vmem:[#allocation8 + $0x2e8] ss:$16 sps:$4 sm:$0xff]  }
 0x187   : > { %4197 = vmatprep.subr.bf16.mxu0 %v12564_v9  ;;  %5548 = vmatprep.subr.bf16.mxu1 %v12591_v20  ;;  %v762_v9 = vld [vmem:[%s14604_s27 + $0x460] sm:$0xff]  ;;  %v12628_v20 = vld [vmem:[#allocation8 + $0x328] ss:$16 sps:$4 sm:$0xff]  }
 0x188   : > { %v1140_v17 = vpack.c.bf16 %v776_v10, %v762_v9 }
 0x189   : > { %4037 = vmatmul.mubr.bf16.vlgmr.msra.gmra.mrb[0].mxu0 %v1070_v12  ;;  %5388 = vmatmul.mubr.bf16.vlgmr.msra.gmra.mrb[0].mxu1 %v1070_v12  ;;  %v805_v12 = vld [vmem:[%s14604_s27 + $0x5b8] sm:$0xff] }
 0x18a   : > { %4198 = vmatpush1.bf16.msra.mxu0 %v12562_v13  ;;  %4046 = vmatprep.mubr.bf16.mxu0 %v1085_v14  ;;  %v12595_v13 = vld [vmem:[#allocation8 + $0x320] ss:$16 sps:$4 sm:$0xff]  }
 0x18b   : > { %5397 = vmatprep.mubr.bf16.mxu1 %v1085_v14  ;;  %4199 = vmatprep.subr.bf16.mxu0 %v12567_v15  ;;  %v12625_v14 = vld [vmem:[#allocation8 + $0x308] ss:$16 sps:$4 sm:$0xff]   ;;  %v12606_v15 = vld [vmem:[#allocation8 + $0x344] ss:$16 sps:$4 sm:$0xff]  }
 0x18c   : > { %5549 = vmatpush1.bf16.msra.mxu1 %v12589_v19  ;;  %v12604_v19 = vld [vmem:[#allocation8 + $0x340] ss:$16 sps:$4 sm:$0xff]  }
 0x18d   : > { %5550 = vmatprep.subr.bf16.mxu1 %v12594_v24  ;;  %v804_v24 = vld [vmem:[%s14604_s27 + $0x5b0] sm:$0xff] }
 0x18e   : > { %4200 = vmatpush1.bf16.msra.mxu0 %v12565_v18  ;;  %v1155_v18 = vpack.c.bf16 %v805_v12, %v791_v11  ;;  %v930_v11 = vld [vmem:[%s14604_s27 + $0x9a0] sm:$0xff]  ;;  %v944_v12 = vld [vmem:[%s14604_s27 + $0xa10] sm:$0xff] }
 0x18f   : > { %4201 = vmatprep.subr.bf16.mxu0 %v12570_v23  ;;  %v790_v23 = vld [vmem:[%s14604_s27 + $0x540] sm:$0xff] }
 0x190   : > { %5551 = vmatpush1.bf16.msra.mxu1 %v12592_v28  ;;  %v12634_v28 = vld [vmem:[#allocation8 + $0x348] ss:$16 sps:$4 sm:$0xff]  }
 0x191   : > { %4047 = vmatmul.mubr.bf16.gmra.mrb[4].mxu0 %v1084_v25  ;;  %5398 = vmatmul.mubr.bf16.gmra.mrb[4].mxu1 %v1084_v25  ;;  %v819_v25 = vld [vmem:[%s14604_s27 + $0x628] sm:$0xff] }
 0x192   : > { %4056 = vmatprep.mubr.bf16.mxu0 %v1099_v26  ;;  %5407 = vmatprep.mubr.bf16.mxu1 %v1099_v26  ;;  %v833_v26 = vld [vmem:[%s14604_s27 + $0x698] sm:$0xff] }
 0x193   : > { %4202 = vmatpush1.bf16.msra.mxu0 %v12568_v27  ;;  %5552 = vmatprep.subr.bf16.mxu1 %v12600_v31  ;;  %v12613_v27 = vld [vmem:[#allocation8 + $0x360] ss:$16 sps:$4 sm:$0xff]   ;;  %v1154_v31 = vpack.c.bf16 %v804_v24, %v790_v23  ;;  %v1169_v32 = vpack.c.bf16 %v833_v26, %v819_v25  ;;  %v1015_v25 = vld [vmem:[%s14604_s27 + $0xc48] sm:$0xff]  ;;  %v1029_v26 = vld [vmem:[%s14604_s27 + $0xcb8] sm:$0xff] }
 0x194   : > { %4203 = vmatprep.subr.bf16.mxu0 %v12573_v30  ;;  %5553 = vmatpush1.bf16.msra.mxu1 %v12598_v36  ;;  %v12639_v30 = vld [vmem:[#allocation8 + $0x36c] ss:$16 sps:$4 sm:$0xff]   ;;  %v986_v23 = vld [vmem:[%s14604_s27 + $0xb60] sm:$0xff]  ;;  %v1000_v24 = vld [vmem:[%s14604_s27 + $0xbd0] sm:$0xff] }
 0x195   : > { %5554 = vmatprep.subr.bf16.mxu1 %v12603_v38  ;;  %v12645_v36 = vld [vmem:[#allocation8 + $0x38c] ss:$16 sps:$4 sm:$0xff]   ;;  %v832_v38 = vld [vmem:[%s14604_s27 + $0x690] sm:$0xff] }
 0x197   : > { %4204 = vmatpush1.bf16.msra.mxu0 %v12571_v35  ;;  %v12633_v35 = vld [vmem:[#allocation8 + $0x3a4] ss:$16 sps:$4 sm:$0xff]  }
 0x198   : > { %4205 = vmatprep.subr.bf16.mxu0 %v12576_v37  ;;  %5555 = vmatpush1.bf16.msra.mxu1 %v12601_v42  ;;  %v818_v37 = vld [vmem:[%s14604_s27 + $0x620] sm:$0xff]  ;;  %v12643_v42 = vld [vmem:[#allocation8 + $0x388] ss:$16 sps:$4 sm:$0xff]  }
 0x199   : > { %4057 = vmatmul.mubr.bf16.gmra.mrb[8].mxu0 %v1098_v39  ;;  %5408 = vmatmul.mubr.bf16.gmra.mrb[8].mxu1 %v1098_v39  ;;  %v847_v39 = vld [vmem:[%s14604_s27 + $0x708] sm:$0xff]  ;;  %v1168_v45 = vpack.c.bf16 %v832_v38, %v818_v37  ;;  %v625_v37 = vld [vmem:[%s14604_s27 + $0x18] sm:$0xff] }
 0x19a   : > { %4066 = vmatprep.mubr.bf16.mxu0 %v1113_v40  ;;  %5417 = vmatprep.mubr.bf16.mxu1 %v1113_v40  ;;  %v861_v40 = vld [vmem:[%s14604_s27 + $0x778] sm:$0xff]  ;;  %v639_v38 = vld [vmem:[%s14604_s27 + $0x88] sm:$0xff] }
 0x19b   : > { %4206 = vmatpush1.bf16.msra.mxu0 %v12574_v41  ;;  %5556 = vmatprep.subr.bf16.mxu1 %v12609_v44  ;;  %v12631_v41 = vld [vmem:[#allocation8 + $0x3a0] ss:$16 sps:$4 sm:$0xff]   ;;  %v12648_v44 = vld [vmem:[#allocation8 + $0x3ac] ss:$16 sps:$4 sm:$0xff]   ;;  %v1183_v46 = vpack.c.bf16 %v861_v40, %v847_v39  ;;  %v1073_v40 = vpack.c.bf16 %v639_v38, %v625_v37 }
 0x19c   : > { %4207 = vmatprep.subr.bf16.mxu0 %v12579_v43  ;;  %5557 = vmatpush1.bf16.msra.mxu1 %v12607_v50  ;;  %v12642_v43 = vld [vmem:[#allocation8 + $0x3c4] ss:$16 sps:$4 sm:$0xff]   ;;  %v12654_v50 = vld [vmem:[#allocation8 + $0x3cc] ss:$16 sps:$4 sm:$0xff]   ;;  %v12682_v37 = vld [vmem:[#allocation8 + $0x500] ss:$16 sps:$4 sm:$0xff]  }
 0x19d   : > { %5558 = vmatprep.subr.bf16.mxu1 %v12612_v52  ;;  %v860_v52 = vld [vmem:[%s14604_s27 + $0x770] sm:$0xff]  ;;  %v12723_v38 = vld [vmem:[#allocation8 + $0x50c] ss:$16 sps:$4 sm:$0xff]  }
 0x19f   : > { %4208 = vmatpush1.bf16.msra.mxu0 %v12577_v49  ;;  %v12651_v49 = vld [vmem:[#allocation8 + $0x3e4] ss:$16 sps:$4 sm:$0xff]  }
 0x1a0   : > { %4209 = vmatprep.subr.bf16.mxu0 %v12582_v51  ;;  %5559 = vmatpush1.bf16.msra.mxu1 %v12610_v56  ;;  %v846_v51 = vld [vmem:[%s14604_s27 + $0x700] sm:$0xff]  ;;  %v12652_v56 = vld [vmem:[#allocation8 + $0x3c8] ss:$16 sps:$4 sm:$0xff]  }
 0x1a1   : > { %4067 = vmatmul.mubr.bf16.gmra.mrb[12].mxu0 %v1112_v53  ;;  %5418 = vmatmul.mubr.bf16.gmra.mrb[12].mxu1 %v1112_v53  ;;  %v875_v53 = vld [vmem:[%s14604_s27 + $0x7e8] sm:$0xff] }
 0x1a2   : > { %4076 = vmatprep.mubr.bf16.mxu0 %v1127_v54  ;;  %5427 = vmatprep.mubr.bf16.mxu1 %v1127_v54  ;;  %v889_v54 = vld [vmem:[%s14604_s27 + $0x858] sm:$0xff] }
 0x1a3   : > { %4210 = vmatpush1.bf16.msra.mxu0 %v12580_v55  ;;  %5560 = vmatprep.subr.bf16.mxu1 %v12618_v59  ;;  %v12649_v55 = vld [vmem:[#allocation8 + $0x3e0] ss:$16 sps:$4 sm:$0xff]   ;;  %v1182_v59 = vpack.c.bf16 %v860_v52, %v846_v51  ;;  %v1197_v60 = vpack.c.bf16 %v889_v54, %v875_v53  ;;  %v12690_v53 = vld [vmem:[#allocation8 + $0x42c] ss:$16 sps:$4 sm:$0xff]  }
 0x1a4   : > { %4211 = vmatprep.subr.bf16.mxu0 %v12585_v58  ;;  %5561 = vmatpush1.bf16.msra.mxu1 %v12616_v0  ;;  %v12660_v58 = vld [vmem:[#allocation8 + $0x404] ss:$16 sps:$4 sm:$0xff]   ;;  %v12661_v52 = vld [vmem:[#allocation8 + $0x420] ss:$16 sps:$4 sm:$0xff]   ;;  %v681_v54 = vld [vmem:[%s14604_s27 + $0x1d8] sm:$0xff] }
 0x1a5   : > { %5562 = vmatprep.subr.bf16.mxu1 %v12621_v2  ;;  %v888_v0 = vld [vmem:[%s14604_s27 + $0x850] sm:$0xff]  ;;  %v917_v2 = vld [vmem:[%s14604_s27 + $0x938] sm:$0xff]  ;;  %v666_v51 = vld [vmem:[%s14604_s27 + $0x160] sm:$0xff] }
 0x1a7   : > { %4212 = vmatpush1.bf16.msra.mxu0 %v12583_v63  ;;  %v12687_v63 = vld [vmem:[#allocation8 + $0x40c] ss:$16 sps:$4 sm:$0xff]  }
 0x1a8   : > { %4213 = vmatprep.subr.bf16.mxu0 %v12588_v1  ;;  %5563 = vmatpush1.bf16.msra.mxu1 %v12619_v6  ;;  %v903_v1 = vld [vmem:[%s14604_s27 + $0x8c8] sm:$0xff]  ;;  %v916_v6 = vld [vmem:[%s14604_s27 + $0x930] sm:$0xff] }
 0x1a9   : > { %4077 = vmatmul.mubr.bf16.gmra.mrb[16].mxu0 %v1126_v3  ;;  %5428 = vmatmul.mubr.bf16.gmra.mrb[16].mxu1 %v1126_v3  ;;  %v1196_v3 = vpack.c.bf16 %v888_v0, %v874_v62  ;;  %v12669_v62 = vld [vmem:[#allocation8 + $0x464] ss:$16 sps:$4 sm:$0xff]  }
 0x1aa   : > { %4086 = vmatprep.mubr.bf16.mxu0 %v1141_v4  ;;  %5437 = vmatprep.mubr.bf16.mxu1 %v1141_v4  ;;  %v1211_v4 = vpack.c.bf16 %v917_v2, %v903_v1  ;;  %v680_v0 = vld [vmem:[%s14604_s27 + $0x1d0] sm:$0xff]  ;;  %v694_v1 = vld [vmem:[%s14604_s27 + $0x240] sm:$0xff]  ;;  %v709_v2 = vld [vmem:[%s14604_s27 + $0x2b8] sm:$0xff] }
 0x1ab   : > { %4214 = vmatpush1.bf16.msra.mxu0 %v12586_v5  ;;  %5564 = vmatprep.subr.bf16.mxu1 %v12627_v8  ;;  %v902_v5 = vld [vmem:[%s14604_s27 + $0x8c0] sm:$0xff]  ;;  %v945_v8 = vld [vmem:[%s14604_s27 + $0xa18] sm:$0xff] }
 0x1ac   : > { %4215 = vmatprep.subr.bf16.mxu0 %v12597_v7  ;;  %5565 = vmatpush1.bf16.msra.mxu1 %v12625_v14  ;;  %v931_v7 = vld [vmem:[%s14604_s27 + $0x9a8] sm:$0xff]  ;;  %v1210_v9 = vpack.c.bf16 %v916_v6, %v902_v5  ;;  %v973_v14 = vld [vmem:[%s14604_s27 + $0xaf8] sm:$0xff]  ;;  %v12667_v5 = vld [vmem:[#allocation8 + $0x460] ss:$16 sps:$4 sm:$0xff]  }
 0x1ad   : > { %5566 = vmatprep.subr.bf16.mxu1 %v12630_v16  ;;  %v1225_v10 = vpack.c.bf16 %v945_v8, %v931_v7  ;;  %v12672_v6 = vld [vmem:[#allocation8 + $0x484] ss:$16 sps:$4 sm:$0xff]   ;;  %v12697_v7 = vld [vmem:[#allocation8 + $0x468] ss:$16 sps:$4 sm:$0xff]   ;;  %v1100_v8 = vpack.c.bf16 %v694_v1, %v680_v0  ;;  %v12718_v1 = vld [vmem:[#allocation8 + $0x580] ss:$16 sps:$4 sm:$0xff]  }
 0x1af   : > { %4216 = vmatpush1.bf16.msra.mxu0 %v12595_v13  ;;  %v959_v13 = vld [vmem:[%s14604_s27 + $0xa88] sm:$0xff] }
 0x1b0   : > { %4217 = vmatprep.subr.bf16.mxu0 %v12606_v15  ;;  %5567 = vmatpush1.bf16.msra.mxu1 %v12628_v20  ;;  %v1224_v15 = vpack.c.bf16 %v944_v12, %v930_v11  ;;  %v1239_v16 = vpack.c.bf16 %v973_v14, %v959_v13  ;;  %v1001_v20 = vld [vmem:[%s14604_s27 + $0xbd8] sm:$0xff]  ;;  %v12675_v12 = vld [vmem:[#allocation8 + $0x4a4] ss:$16 sps:$4 sm:$0xff]  }
 0x1b1   : > { %4087 = vmatmul.mubr.bf16.gmra.mrb[20].mxu0 %v1140_v17  ;;  %5438 = vmatmul.mubr.bf16.gmra.mrb[20].mxu1 %v1140_v17  ;;  %v958_v17 = vld [vmem:[%s14604_s27 + $0xa80] sm:$0xff]  ;;  %v12703_v13 = vld [vmem:[#allocation8 + $0x488] ss:$16 sps:$4 sm:$0xff]   ;;  %v708_v14 = vld [vmem:[%s14604_s27 + $0x2b0] sm:$0xff] }
 0x1b2   : > { %4096 = vmatprep.mubr.bf16.mxu0 %v1155_v18  ;;  %5447 = vmatprep.mubr.bf16.mxu1 %v1155_v18  ;;  %v972_v18 = vld [vmem:[%s14604_s27 + $0xaf0] sm:$0xff] }
 0x1b3   : > { %4218 = vmatpush1.bf16.msra.mxu0 %v12604_v19  ;;  %5568 = vmatprep.subr.bf16.mxu1 %v12636_v22  ;;  %v987_v19 = vld [vmem:[%s14604_s27 + $0xb68] sm:$0xff] }
 0x1b4   : > { %4219 = vmatprep.subr.bf16.mxu0 %v12615_v21  ;;  %5569 = vmatpush1.bf16.msra.mxu1 %v12634_v28  ;;  %v1238_v21 = vpack.c.bf16 %v972_v18, %v958_v17  ;;  %v1253_v22 = vpack.c.bf16 %v1001_v20, %v987_v19  ;;  %v1267_v28 = vpack.c.bf16 %v1029_v26, %v1015_v25  ;;  %v751_v17 = vld [vmem:[%s14604_s27 + $0x408] sm:$0xff]  ;;  %v12673_v19 = vld [vmem:[#allocation8 + $0x4a0] ss:$16 sps:$4 sm:$0xff]   ;;  %v12678_v20 = vld [vmem:[#allocation8 + $0x4c4] ss:$16 sps:$4 sm:$0xff]  }
 0x1b5   : > { %5570 = vmatprep.subr.bf16.mxu1 %v12639_v30  ;;  %v1028_v30 = vld [vmem:[%s14604_s27 + $0xcb0] sm:$0xff]  ;;  %v12708_v18 = vld [vmem:[#allocation8 + $0x4ac] ss:$16 sps:$4 sm:$0xff]  }
 0x1b6   : > { %v12681_v26 = vld [vmem:[#allocation8 + $0x4e4] ss:$16 sps:$4 sm:$0xff]  }
 0x1b7   : > { %4220 = vmatpush1.bf16.msra.mxu0 %v12613_v27  ;;  %v1252_v27 = vpack.c.bf16 %v1000_v24, %v986_v23  ;;  %v12676_v23 = vld [vmem:[#allocation8 + $0x4c0] ss:$16 sps:$4 sm:$0xff]   ;;  %v12714_v24 = vld [vmem:[#allocation8 + $0x4cc] ss:$16 sps:$4 sm:$0xff]  }
 0x1b8   : > { %4221 = vmatprep.subr.bf16.mxu0 %v12624_v29  ;;  %5571 = vmatpush1.bf16.msra.mxu1 %v12637_v34  ;;  %v1014_v29 = vld [vmem:[%s14604_s27 + $0xc40] sm:$0xff] }
 0x1b9   : > { %4097 = vmatmul.mubr.bf16.gmra.mrb[24].mxu0 %v1154_v31  ;;  %5448 = vmatmul.mubr.bf16.gmra.mrb[24].mxu1 %v1154_v31  ;;  %v1043_v31 = vld [vmem:[%s14604_s27 + $0xd28] sm:$0xff] }
 0x1ba   : > { %4106 = vmatprep.mubr.bf16.mxu0 %v1169_v32  ;;  %5457 = vmatprep.mubr.bf16.mxu1 %v1169_v32  ;;  %v1057_v32 = vld [vmem:[%s14604_s27 + $0xd98] sm:$0xff] }
 0x1bb   : > { %4222 = vmatpush1.bf16.msra.mxu0 %v12622_v33  ;;  %5572 = vmatprep.subr.bf16.mxu1 %v12645_v36  ;;  %v1266_v33 = vpack.c.bf16 %v1028_v30, %v1014_v29  ;;  %v1281_v34 = vpack.c.bf16 %v1057_v32, %v1043_v31  ;;  %v1056_v36 = vld [vmem:[%s14604_s27 + $0xd90] sm:$0xff]  ;;  %v750_v29 = vld [vmem:[%s14604_s27 + $0x400] sm:$0xff]  ;;  %v765_v30 = vld [vmem:[%s14604_s27 + $0x478] sm:$0xff] }
 0x1bc   : > { %4223 = vmatprep.subr.bf16.mxu0 %v12633_v35  ;;  %5573 = vmatpush1.bf16.msra.mxu1 %v12643_v42  ;;  %v1042_v35 = vld [vmem:[%s14604_s27 + $0xd20] sm:$0xff]  ;;  %v779_v31 = vld [vmem:[%s14604_s27 + $0x4e8] sm:$0xff] }
 0x1bd   : > { %5574 = vmatprep.subr.bf16.mxu1 %v12648_v44  ;;  %v1280_v39 = vpack.c.bf16 %v1056_v36, %v1042_v35  ;;  %v638_v42 = vld [vmem:[%s14604_s27 + $0x80] sm:$0xff]  ;;  %v667_v44 = vld [vmem:[%s14604_s27 + $0x168] sm:$0xff] }
 0x1be   : > { %v12717_v32 = vld [vmem:[#allocation8 + $0x4ec] ss:$16 sps:$4 sm:$0xff]   ;;  %v12715_v35 = vld [vmem:[#allocation8 + $0x4e8] ss:$16 sps:$4 sm:$0xff]  }
 0x1bf   : > { %4224 = vmatpush1.bf16.msra.mxu0 %v12631_v41  ;;  %v624_v41 = vld [vmem:[%s14604_s27 + $0x10] sm:$0xff] }
 0x1c0   : > { %4225 = vmatprep.subr.bf16.mxu0 %v12642_v43  ;;  %5575 = vmatpush1.bf16.msra.mxu1 %v12646_v48  ;;  %v653_v43 = vld [vmem:[%s14604_s27 + $0xf8] sm:$0xff] }
 0x1c1   : > { %4107 = vmatmul.mubr.bf16.gmra.mrb[28].mxu0 %v1168_v45  ;;  %5458 = vmatmul.mubr.bf16.gmra.mrb[28].mxu1 %v1168_v45  ;;  %v12658_v45 = vld [vmem:[#allocation8 + $0x400] ss:$16 sps:$4 sm:$0xff]   ;;  %v1087_v48 = vpack.c.bf16 %v667_v44, %v653_v43  ;;  %v793_v44 = vld [vmem:[%s14604_s27 + $0x558] sm:$0xff] }
 0x1c2   : > { %4116 = vmatprep.mubr.bf16.mxu0 %v1183_v46  ;;  %5467 = vmatprep.mubr.bf16.mxu1 %v1183_v46  ;;  %v1072_v46 = vpack.c.bf16 %v638_v42, %v624_v41  ;;  %v12721_v41 = vld [vmem:[#allocation8 + $0x508] ss:$16 sps:$4 sm:$0xff]   ;;  %v764_v42 = vld [vmem:[%s14604_s27 + $0x470] sm:$0xff]  ;;  %v778_v43 = vld [vmem:[%s14604_s27 + $0x4e0] sm:$0xff] }
 0x1c3   : > { %4226 = vmatpush1.bf16.msra.mxu0 %v12640_v47  ;;  %5576 = vmatprep.subr.bf16.mxu1 %v12654_v50  ;;  %v12663_v47 = vld [vmem:[#allocation8 + $0x424] ss:$16 sps:$4 sm:$0xff]  }
 0x1c4   : > { %4227 = vmatprep.subr.bf16.mxu0 %v12651_v49  ;;  %5577 = vmatpush1.bf16.msra.mxu1 %v12652_v56  ;;  %v12685_v49 = vld [vmem:[#allocation8 + $0x408] ss:$16 sps:$4 sm:$0xff]   ;;  %v652_v50 = vld [vmem:[%s14604_s27 + $0xf0] sm:$0xff] }
 0x1c5   : > { %5578 = vmatprep.subr.bf16.mxu1 %v12657_v57  ;;  %v12666_v56 = vld [vmem:[#allocation8 + $0x444] ss:$16 sps:$4 sm:$0xff]   ;;  %v12688_v57 = vld [vmem:[#allocation8 + $0x428] ss:$16 sps:$4 sm:$0xff]  }
 0x1c7   : > { %4228 = vmatpush1.bf16.msra.mxu0 %v12649_v55  ;;  %v695_v55 = vld [vmem:[%s14604_s27 + $0x248] sm:$0xff] }
 0x1c8   : > { %4390 = vmatprep.subr.bf16.mxu0 %v12660_v58  ;;  %5579 = vmatpush1.bf16.msra.mxu1 %v12655_v61  ;;  %v1086_v58 = vpack.c.bf16 %v666_v51, %v652_v50  ;;  %v1101_v61 = vpack.c.bf16 %v695_v55, %v681_v54  ;;  %v1142_v50 = vpack.c.bf16 %v778_v43, %v764_v42  ;;  %v12700_v51 = vld [vmem:[#allocation8 + $0x540] ss:$16 sps:$4 sm:$0xff]   ;;  %v12711_v54 = vld [vmem:[#allocation8 + $0x564] ss:$16 sps:$4 sm:$0xff]   ;;  %v12730_v55 = vld [vmem:[#allocation8 + $0x548] ss:$16 sps:$4 sm:$0xff]  }
 0x1c9   : > { %4117 = vmatmul.mubr.bf16.gmra.mrb[32].mxu0 %v1182_v59  ;;  %5468 = vmatmul.mubr.bf16.gmra.mrb[32].mxu1 %v1182_v59  ;;  %v12664_v59 = vld [vmem:[#allocation8 + $0x440] ss:$16 sps:$4 sm:$0xff]  }
 0x1ca   : > { %4126 = vmatprep.mubr.bf16.mxu0 %v1197_v60  ;;  %5477 = vmatprep.mubr.bf16.mxu1 %v1197_v60  ;;  %v12696_v60 = vld [vmem:[#allocation8 + $0x44c] ss:$16 sps:$4 sm:$0xff]   ;;  %v932_v43 = vld [vmem:[%s14604_s27 + $0x9b0] sm:$0xff] }
 0x1cb   : > { %5741 = vmatprep.subr.bf16.mxu1 %v12687_v63  ;;  %v12694_v63 = vld [vmem:[#allocation8 + $0x448] ss:$16 sps:$4 sm:$0xff]  }
 0x1d1   : > { %4127 = vmatmul.mubr.bf16.gmra.mrb[36].mxu0 %v1196_v3  ;;  %5478 = vmatmul.mubr.bf16.gmra.mrb[36].mxu1 %v1196_v3  ;;  %v723_v3 = vld [vmem:[%s14604_s27 + $0x328] sm:$0xff] }
 0x1d2   : > { %4136 = vmatprep.mubr.bf16.mxu0 %v1211_v4  ;;  %5487 = vmatprep.mubr.bf16.mxu1 %v1211_v4  ;;  %v12699_v4 = vld [vmem:[#allocation8 + $0x46c] ss:$16 sps:$4 sm:$0xff]   ;;  %v1115_v11 = vpack.c.bf16 %v723_v3, %v709_v2 }
 0x1d3   : > { %v12741_v2 = vld [vmem:[#allocation8 + $0x58c] ss:$16 sps:$4 sm:$0xff]  }
 0x1d9   : > { %4137 = vmatmul.mubr.bf16.gmra.mrb[40].mxu0 %v1210_v9  ;;  %5488 = vmatmul.mubr.bf16.gmra.mrb[40].mxu1 %v1210_v9  ;;  %v12670_v9 = vld [vmem:[#allocation8 + $0x480] ss:$16 sps:$4 sm:$0xff]  }
 0x1da   : > { %4146 = vmatprep.mubr.bf16.mxu0 %v1225_v10  ;;  %5497 = vmatprep.mubr.bf16.mxu1 %v1225_v10  ;;  %v12705_v10 = vld [vmem:[#allocation8 + $0x48c] ss:$16 sps:$4 sm:$0xff]  }
 0x1e1   : > { %4147 = vmatmul.mubr.bf16.gmra.mrb[44].mxu0 %v1224_v15  ;;  %5498 = vmatmul.mubr.bf16.gmra.mrb[44].mxu1 %v1224_v15  ;;  %v722_v15 = vld [vmem:[%s14604_s27 + $0x320] sm:$0xff] }
 0x1e2   : > { %4156 = vmatprep.mubr.bf16.mxu0 %v1239_v16  ;;  %5507 = vmatprep.mubr.bf16.mxu1 %v1239_v16  ;;  %v737_v16 = vld [vmem:[%s14604_s27 + $0x398] sm:$0xff] }
 0x1e3   : > { %v1129_v25 = vpack.c.bf16 %v751_v17, %v737_v16  ;;  %v12750_v16 = vld [vmem:[#allocation8 + $0x5cc] ss:$16 sps:$4 sm:$0xff]  }
 0x1e9   : > { %4157 = vmatmul.mubr.bf16.gmra.mrb[48].mxu0 %v1238_v21  ;;  %5508 = vmatmul.mubr.bf16.gmra.mrb[48].mxu1 %v1238_v21  ;;  %v12706_v21 = vld [vmem:[#allocation8 + $0x4a8] ss:$16 sps:$4 sm:$0xff]  }
 0x1ea   : > { %4166 = vmatprep.mubr.bf16.mxu0 %v1253_v22  ;;  %5517 = vmatprep.mubr.bf16.mxu1 %v1253_v22  ;;  %v1114_v22 = vpack.c.bf16 %v722_v15, %v708_v14  ;;  %v12736_v15 = vld [vmem:[#allocation8 + $0x5c0] ss:$16 sps:$4 sm:$0xff]  }
 0x1f1   : > { %4167 = vmatmul.mubr.bf16.gmra.mrb[52].mxu0 %v1252_v27  ;;  %5518 = vmatmul.mubr.bf16.gmra.mrb[52].mxu1 %v1252_v27  ;;  %v12712_v27 = vld [vmem:[#allocation8 + $0x4c8] ss:$16 sps:$4 sm:$0xff]  }
 0x1f2   : > { %4176 = vmatprep.mubr.bf16.mxu0 %v1267_v28  ;;  %5527 = vmatprep.mubr.bf16.mxu1 %v1267_v28  ;;  %v736_v28 = vld [vmem:[%s14604_s27 + $0x390] sm:$0xff] }
 0x1f3   : > { %v1128_v36 = vpack.c.bf16 %v750_v29, %v736_v28 }
 0x1f9   : > { %4177 = vmatmul.mubr.bf16.gmra.mrb[56].mxu0 %v1266_v33  ;;  %5528 = vmatmul.mubr.bf16.gmra.mrb[56].mxu1 %v1266_v33  ;;  %v12679_v33 = vld [vmem:[#allocation8 + $0x4e0] ss:$16 sps:$4 sm:$0xff]  }
 0x1fa   : > { %4186 = vmatprep.mubr.bf16.mxu0 %v1281_v34  ;;  %5537 = vmatprep.mubr.bf16.mxu1 %v1281_v34  ;;  %v12684_v34 = vld [vmem:[#allocation8 + $0x504] ss:$16 sps:$4 sm:$0xff]  }
 0x201   : > { %4187 = vmatmul.mubr.bf16.gmra.mrb[60].mxu0 %v1280_v39  ;;  %5538 = vmatmul.mubr.bf16.gmra.mrb[60].mxu1 %v1280_v39  ;;  %v1143_v39 = vpack.c.bf16 %v779_v31, %v765_v30  ;;  %v12783_v30 = vld [vmem:[#allocation8 + $0x60c] ss:$16 sps:$4 sm:$0xff]   ;;  %v876_v31 = vld [vmem:[%s14604_s27 + $0x7f0] sm:$0xff] }
 0x202   : > { %4229 = vmatprep.mubr.bf16.mxu0 %v1073_v40  ;;  %5580 = vmatprep.mubr.bf16.mxu1 %v1073_v40  ;;  %v12693_v40 = vld [vmem:[#allocation8 + $0x524] ss:$16 sps:$4 sm:$0xff]  }
 0x209   : > { %4230 = vmatmul.mubr.bf16.vlgmr.msra.gmra.mrb[0].mxu0 %v1072_v46  ;;  %5581 = vmatmul.mubr.bf16.vlgmr.msra.gmra.mrb[0].mxu1 %v1072_v46  ;;  %v12726_v46 = vld [vmem:[#allocation8 + $0x52c] ss:$16 sps:$4 sm:$0xff]  }
 0x20a   : > { %4391 = vmatpush1.bf16.msra.mxu0 %v12658_v45  ;;  %4239 = vmatprep.mubr.bf16.mxu0 %v1087_v48  ;;  %v807_v45 = vld [vmem:[%s14604_s27 + $0x5c8] sm:$0xff] }
 0x20b   : > { %5590 = vmatprep.mubr.bf16.mxu1 %v1087_v48  ;;  %4392 = vmatprep.subr.bf16.mxu0 %v12663_v47  ;;  %v12691_v47 = vld [vmem:[#allocation8 + $0x520] ss:$16 sps:$4 sm:$0xff]   ;;  %v12702_v48 = vld [vmem:[#allocation8 + $0x544] ss:$16 sps:$4 sm:$0xff]  }
 0x20c   : > { %5742 = vmatpush1.bf16.msra.mxu1 %v12685_v49  ;;  %v12724_v49 = vld [vmem:[#allocation8 + $0x528] ss:$16 sps:$4 sm:$0xff]  }
 0x20d   : > { %5743 = vmatprep.subr.bf16.mxu1 %v12690_v53  ;;  %v1157_v53 = vpack.c.bf16 %v807_v45, %v793_v44  ;;  %v946_v44 = vld [vmem:[%s14604_s27 + $0xa20] sm:$0xff]  ;;  %v961_v45 = vld [vmem:[%s14604_s27 + $0xa98] sm:$0xff] }
 0x20e   : > { %4393 = vmatpush1.bf16.msra.mxu0 %v12661_v52  ;;  %v12732_v52 = vld [vmem:[#allocation8 + $0x54c] ss:$16 sps:$4 sm:$0xff]  }
 0x20f   : > { %4394 = vmatprep.subr.bf16.mxu0 %v12666_v56  ;;  %v792_v56 = vld [vmem:[%s14604_s27 + $0x550] sm:$0xff] }
 0x210   : > { %5744 = vmatpush1.bf16.msra.mxu1 %v12688_v57  ;;  %v806_v57 = vld [vmem:[%s14604_s27 + $0x5c0] sm:$0xff] }
 0x211   : > { %4240 = vmatmul.mubr.bf16.gmra.mrb[4].mxu0 %v1086_v58  ;;  %5591 = vmatmul.mubr.bf16.gmra.mrb[4].mxu1 %v1086_v58  ;;  %v821_v58 = vld [vmem:[%s14604_s27 + $0x638] sm:$0xff]  ;;  %v1156_v0 = vpack.c.bf16 %v806_v57, %v792_v56  ;;  %v1002_v56 = vld [vmem:[%s14604_s27 + $0xbe0] sm:$0xff] }
 0x212   : > { %4249 = vmatprep.mubr.bf16.mxu0 %v1101_v61  ;;  %5600 = vmatprep.mubr.bf16.mxu1 %v1101_v61  ;;  %v12709_v61 = vld [vmem:[#allocation8 + $0x560] ss:$16 sps:$4 sm:$0xff]   ;;  %v1017_v57 = vld [vmem:[%s14604_s27 + $0xc58] sm:$0xff] }
 0x213   : > { %4395 = vmatpush1.bf16.msra.mxu0 %v12664_v59  ;;  %5745 = vmatprep.subr.bf16.mxu1 %v12696_v60  ;;  %v835_v59 = vld [vmem:[%s14604_s27 + $0x6a8] sm:$0xff] }
 0x214   : > { %4396 = vmatprep.subr.bf16.mxu0 %v12669_v62  ;;  %5746 = vmatpush1.bf16.msra.mxu1 %v12694_v63  ;;  %v12735_v60 = vld [vmem:[#allocation8 + $0x56c] ss:$16 sps:$4 sm:$0xff]   ;;  %v12720_v62 = vld [vmem:[#allocation8 + $0x584] ss:$16 sps:$4 sm:$0xff]   ;;  %v12733_v63 = vld [vmem:[#allocation8 + $0x568] ss:$16 sps:$4 sm:$0xff]   ;;  %v1171_v3 = vpack.c.bf16 %v835_v59, %v821_v58 }
 0x215   : > { %5747 = vmatprep.subr.bf16.mxu1 %v12699_v4  ;;  %v12729_v4 = vld [vmem:[#allocation8 + $0x5a4] ss:$16 sps:$4 sm:$0xff]   ;;  %v1031_v58 = vld [vmem:[%s14604_s27 + $0xcc8] sm:$0xff] }
 0x217   : > { %4397 = vmatpush1.bf16.msra.mxu0 %v12667_v5  ;;  %v12739_v5 = vld [vmem:[#allocation8 + $0x588] ss:$16 sps:$4 sm:$0xff]  }
 0x218   : > { %4398 = vmatprep.subr.bf16.mxu0 %v12672_v6  ;;  %5748 = vmatpush1.bf16.msra.mxu1 %v12697_v7  ;;  %v820_v6 = vld [vmem:[%s14604_s27 + $0x630] sm:$0xff]  ;;  %v834_v7 = vld [vmem:[%s14604_s27 + $0x6a0] sm:$0xff] }
 0x219   : > { %4250 = vmatmul.mubr.bf16.gmra.mrb[8].mxu0 %v1100_v8  ;;  %5601 = vmatmul.mubr.bf16.gmra.mrb[8].mxu1 %v1100_v8  ;;  %v849_v8 = vld [vmem:[%s14604_s27 + $0x718] sm:$0xff]  ;;  %v1170_v14 = vpack.c.bf16 %v834_v7, %v820_v6 }
 0x21a   : > { %4259 = vmatprep.mubr.bf16.mxu0 %v1115_v11  ;;  %5610 = vmatprep.mubr.bf16.mxu1 %v1115_v11  ;;  %v12727_v11 = vld [vmem:[#allocation8 + $0x5a0] ss:$16 sps:$4 sm:$0xff]   ;;  %v641_v6 = vld [vmem:[%s14604_s27 + $0x98] sm:$0xff] }
 0x21b   : > { %4399 = vmatpush1.bf16.msra.mxu0 %v12670_v9  ;;  %5749 = vmatprep.subr.bf16.mxu1 %v12705_v10  ;;  %v863_v9 = vld [vmem:[%s14604_s27 + $0x788] sm:$0xff] }
 0x21c   : > { %4400 = vmatprep.subr.bf16.mxu0 %v12675_v12  ;;  %5750 = vmatpush1.bf16.msra.mxu1 %v12703_v13  ;;  %v12744_v10 = vld [vmem:[#allocation8 + $0x5ac] ss:$16 sps:$4 sm:$0xff]   ;;  %v12738_v12 = vld [vmem:[#allocation8 + $0x5c4] ss:$16 sps:$4 sm:$0xff]   ;;  %v12742_v13 = vld [vmem:[#allocation8 + $0x5a8] ss:$16 sps:$4 sm:$0xff]   ;;  %v1185_v17 = vpack.c.bf16 %v863_v9, %v849_v8 }
 0x21d   : > { %5751 = vmatprep.subr.bf16.mxu1 %v12708_v18  ;;  %v12747_v18 = vld [vmem:[#allocation8 + $0x5e4] ss:$16 sps:$4 sm:$0xff]  }
 0x21e   : > { %v626_v9 = vld [vmem:[%s14604_s27 + $0x20] sm:$0xff] }
 0x21f   : > { %4401 = vmatpush1.bf16.msra.mxu0 %v12673_v19  ;;  %v12748_v19 = vld [vmem:[#allocation8 + $0x5c8] ss:$16 sps:$4 sm:$0xff]  }
 0x220   : > { %4402 = vmatprep.subr.bf16.mxu0 %v12678_v20  ;;  %5752 = vmatpush1.bf16.msra.mxu1 %v12706_v21  ;;  %v848_v20 = vld [vmem:[%s14604_s27 + $0x710] sm:$0xff]  ;;  %v862_v21 = vld [vmem:[%s14604_s27 + $0x780] sm:$0xff] }
 0x221   : > { %4260 = vmatmul.mubr.bf16.gmra.mrb[12].mxu0 %v1114_v22  ;;  %5611 = vmatmul.mubr.bf16.gmra.mrb[12].mxu1 %v1114_v22  ;;  %v877_v22 = vld [vmem:[%s14604_s27 + $0x7f8] sm:$0xff]  ;;  %v1184_v28 = vpack.c.bf16 %v862_v21, %v848_v20  ;;  %v12757_v20 = vld [vmem:[#allocation8 + $0x620] ss:$16 sps:$4 sm:$0xff]  }
 0x222   : > { %4269 = vmatprep.mubr.bf16.mxu0 %v1129_v25  ;;  %5620 = vmatprep.mubr.bf16.mxu1 %v1129_v25  ;;  %v12745_v25 = vld [vmem:[#allocation8 + $0x5e0] ss:$16 sps:$4 sm:$0xff]   ;;  %v12786_v21 = vld [vmem:[#allocation8 + $0x62c] ss:$16 sps:$4 sm:$0xff]  }
 0x223   : > { %4403 = vmatpush1.bf16.msra.mxu0 %v12676_v23  ;;  %5753 = vmatprep.subr.bf16.mxu1 %v12714_v24  ;;  %v891_v23 = vld [vmem:[%s14604_s27 + $0x868] sm:$0xff] }
 0x224   : > { %4404 = vmatprep.subr.bf16.mxu0 %v12681_v26  ;;  %5754 = vmatpush1.bf16.msra.mxu1 %v12712_v27  ;;  %v12753_v24 = vld [vmem:[#allocation8 + $0x5ec] ss:$16 sps:$4 sm:$0xff]   ;;  %v12751_v26 = vld [vmem:[#allocation8 + $0x5e8] ss:$16 sps:$4 sm:$0xff]   ;;  %v12756_v27 = vld [vmem:[#allocation8 + $0x604] ss:$16 sps:$4 sm:$0xff]   ;;  %v1199_v29 = vpack.c.bf16 %v891_v23, %v877_v22 }
 0x225   : > { %5755 = vmatprep.subr.bf16.mxu1 %v12717_v32  ;;  %v890_v32 = vld [vmem:[%s14604_s27 + $0x860] sm:$0xff]  ;;  %v683_v22 = vld [vmem:[%s14604_s27 + $0x1e8] sm:$0xff]  ;;  %v697_v23 = vld [vmem:[%s14604_s27 + $0x258] sm:$0xff] }
 0x227   : > { %4405 = vmatpush1.bf16.msra.mxu0 %v12679_v33  ;;  %v905_v33 = vld [vmem:[%s14604_s27 + $0x8d8] sm:$0xff] }
 0x228   : > { %4406 = vmatprep.subr.bf16.mxu0 %v12684_v34  ;;  %5756 = vmatpush1.bf16.msra.mxu1 %v12715_v35  ;;  %v919_v34 = vld [vmem:[%s14604_s27 + $0x948] sm:$0xff]  ;;  %v1198_v35 = vpack.c.bf16 %v890_v32, %v876_v31  ;;  %v682_v32 = vld [vmem:[%s14604_s27 + $0x1e0] sm:$0xff] }
 0x229   : > { %4270 = vmatmul.mubr.bf16.gmra.mrb[16].mxu0 %v1128_v36  ;;  %5621 = vmatmul.mubr.bf16.gmra.mrb[16].mxu1 %v1128_v36  ;;  %v1213_v36 = vpack.c.bf16 %v919_v34, %v905_v33  ;;  %v12790_v31 = vld [vmem:[#allocation8 + $0x648] ss:$16 sps:$4 sm:$0xff]   ;;  %v696_v33 = vld [vmem:[%s14604_s27 + $0x250] sm:$0xff] }
 0x22a   : > { %4279 = vmatprep.mubr.bf16.mxu0 %v1143_v39  ;;  %5630 = vmatprep.mubr.bf16.mxu1 %v1143_v39  ;;  %v933_v39 = vld [vmem:[%s14604_s27 + $0x9b8] sm:$0xff]  ;;  %v711_v34 = vld [vmem:[%s14604_s27 + $0x2c8] sm:$0xff] }
 0x22b   : > { %4407 = vmatpush1.bf16.msra.mxu0 %v12682_v37  ;;  %5757 = vmatprep.subr.bf16.mxu1 %v12723_v38  ;;  %v904_v37 = vld [vmem:[%s14604_s27 + $0x8d0] sm:$0xff]  ;;  %v918_v38 = vld [vmem:[%s14604_s27 + $0x940] sm:$0xff] }
 0x22c   : > { %4408 = vmatprep.subr.bf16.mxu0 %v12693_v40  ;;  %5758 = vmatpush1.bf16.msra.mxu1 %v12721_v41  ;;  %v947_v40 = vld [vmem:[%s14604_s27 + $0xa28] sm:$0xff]  ;;  %v1212_v41 = vpack.c.bf16 %v918_v38, %v904_v37  ;;  %v12763_v37 = vld [vmem:[#allocation8 + $0x660] ss:$16 sps:$4 sm:$0xff]   ;;  %v12768_v38 = vld [vmem:[#allocation8 + $0x684] ss:$16 sps:$4 sm:$0xff]  }
 0x22d   : > { %5759 = vmatprep.subr.bf16.mxu1 %v12726_v46  ;;  %v1227_v42 = vpack.c.bf16 %v947_v40, %v933_v39  ;;  %v975_v46 = vld [vmem:[%s14604_s27 + $0xb08] sm:$0xff]  ;;  %v1102_v40 = vpack.c.bf16 %v696_v33, %v682_v32 }
 0x22e   : > { %v12793_v39 = vld [vmem:[#allocation8 + $0x668] ss:$16 sps:$4 sm:$0xff]  }
 0x22f   : > { %4409 = vmatpush1.bf16.msra.mxu0 %v12691_v47  ;;  %v1226_v47 = vpack.c.bf16 %v946_v44, %v932_v43  ;;  %v12771_v44 = vld [vmem:[#allocation8 + $0x6a4] ss:$16 sps:$4 sm:$0xff]  }
 0x230   : > { %4410 = vmatprep.subr.bf16.mxu0 %v12702_v48  ;;  %5760 = vmatpush1.bf16.msra.mxu1 %v12724_v49  ;;  %v1241_v48 = vpack.c.bf16 %v975_v46, %v961_v45  ;;  %v960_v49 = vld [vmem:[%s14604_s27 + $0xa90] sm:$0xff]  ;;  %v12799_v45 = vld [vmem:[#allocation8 + $0x688] ss:$16 sps:$4 sm:$0xff]   ;;  %v710_v46 = vld [vmem:[%s14604_s27 + $0x2c0] sm:$0xff] }
 0x231   : > { %4280 = vmatmul.mubr.bf16.gmra.mrb[20].mxu0 %v1142_v50  ;;  %5631 = vmatmul.mubr.bf16.gmra.mrb[20].mxu1 %v1142_v50  ;;  %v974_v50 = vld [vmem:[%s14604_s27 + $0xb00] sm:$0xff] }
 0x232   : > { %4289 = vmatprep.mubr.bf16.mxu0 %v1157_v53  ;;  %5640 = vmatprep.mubr.bf16.mxu1 %v1157_v53  ;;  %v1240_v53 = vpack.c.bf16 %v974_v50, %v960_v49  ;;  %v753_v49 = vld [vmem:[%s14604_s27 + $0x418] sm:$0xff] }
 0x233   : > { %4411 = vmatpush1.bf16.msra.mxu0 %v12700_v51  ;;  %5761 = vmatprep.subr.bf16.mxu1 %v12732_v52  ;;  %v989_v51 = vld [vmem:[%s14604_s27 + $0xb78] sm:$0xff]  ;;  %v1003_v52 = vld [vmem:[%s14604_s27 + $0xbe8] sm:$0xff] }
 0x234   : > { %4412 = vmatprep.subr.bf16.mxu0 %v12711_v54  ;;  %5762 = vmatpush1.bf16.msra.mxu1 %v12730_v55  ;;  %v1255_v54 = vpack.c.bf16 %v1003_v52, %v989_v51  ;;  %v988_v55 = vld [vmem:[%s14604_s27 + $0xb70] sm:$0xff]  ;;  %v12804_v50 = vld [vmem:[#allocation8 + $0x6ac] ss:$16 sps:$4 sm:$0xff]  }
 0x235   : > { %5763 = vmatprep.subr.bf16.mxu1 %v12735_v60  ;;  %v1254_v59 = vpack.c.bf16 %v1002_v56, %v988_v55  ;;  %v1269_v60 = vpack.c.bf16 %v1031_v58, %v1017_v57  ;;  %v12769_v51 = vld [vmem:[#allocation8 + $0x6a0] ss:$16 sps:$4 sm:$0xff]   ;;  %v12774_v52 = vld [vmem:[#allocation8 + $0x6c4] ss:$16 sps:$4 sm:$0xff]   ;;  %v12810_v56 = vld [vmem:[#allocation8 + $0x6cc] ss:$16 sps:$4 sm:$0xff]  }
 0x236   : > { %v12772_v55 = vld [vmem:[#allocation8 + $0x6c0] ss:$16 sps:$4 sm:$0xff]   ;;  %v12777_v58 = vld [vmem:[#allocation8 + $0x6e4] ss:$16 sps:$4 sm:$0xff]  }
 0x237   : > { %4413 = vmatpush1.bf16.msra.mxu0 %v12709_v61  ;;  %v1016_v61 = vld [vmem:[%s14604_s27 + $0xc50] sm:$0xff] }
 0x238   : > { %4414 = vmatprep.subr.bf16.mxu0 %v12720_v62  ;;  %5764 = vmatpush1.bf16.msra.mxu1 %v12733_v63  ;;  %v1030_v62 = vld [vmem:[%s14604_s27 + $0xcc0] sm:$0xff]  ;;  %v1045_v63 = vld [vmem:[%s14604_s27 + $0xd38] sm:$0xff] }
 0x239   : > { %4290 = vmatmul.mubr.bf16.gmra.mrb[24].mxu0 %v1156_v0  ;;  %5641 = vmatmul.mubr.bf16.gmra.mrb[24].mxu1 %v1156_v0  ;;  %v1059_v0 = vld [vmem:[%s14604_s27 + $0xda8] sm:$0xff] }
 0x23a   : > { %4299 = vmatprep.mubr.bf16.mxu0 %v1171_v3  ;;  %5650 = vmatprep.mubr.bf16.mxu1 %v1171_v3  ;;  %v1044_v3 = vld [vmem:[%s14604_s27 + $0xd30] sm:$0xff] }
 0x23b   : > { %4415 = vmatpush1.bf16.msra.mxu0 %v12718_v1  ;;  %5765 = vmatprep.subr.bf16.mxu1 %v12741_v2  ;;  %v1268_v1 = vpack.c.bf16 %v1030_v62, %v1016_v61  ;;  %v1283_v2 = vpack.c.bf16 %v1059_v0, %v1045_v63  ;;  %v752_v61 = vld [vmem:[%s14604_s27 + $0x410] sm:$0xff]  ;;  %v767_v62 = vld [vmem:[%s14604_s27 + $0x488] sm:$0xff]  ;;  %v781_v0 = vld [vmem:[%s14604_s27 + $0x4f8] sm:$0xff] }
 0x23c   : > { %4416 = vmatprep.subr.bf16.mxu0 %v12729_v4  ;;  %5766 = vmatpush1.bf16.msra.mxu1 %v12739_v5  ;;  %v1058_v4 = vld [vmem:[%s14604_s27 + $0xda0] sm:$0xff]  ;;  %v627_v5 = vld [vmem:[%s14604_s27 + $0x28] sm:$0xff] }
 0x23d   : > { %5767 = vmatprep.subr.bf16.mxu1 %v12744_v10  ;;  %v1282_v7 = vpack.c.bf16 %v1058_v4, %v1044_v3  ;;  %v1075_v8 = vpack.c.bf16 %v641_v6, %v627_v5  ;;  %v640_v10 = vld [vmem:[%s14604_s27 + $0x90] sm:$0xff]  ;;  %v12813_v63 = vld [vmem:[#allocation8 + $0x6ec] ss:$16 sps:$4 sm:$0xff]   ;;  %v12811_v3 = vld [vmem:[#allocation8 + $0x6e8] ss:$16 sps:$4 sm:$0xff]   ;;  %v1145_v5 = vpack.c.bf16 %v781_v0, %v767_v62 }
 0x23e   : > { %v12778_v6 = vld [vmem:[#allocation8 + $0x700] ss:$16 sps:$4 sm:$0xff]   ;;  %v12879_v62 = vld [vmem:[#allocation8 + $0x80c] ss:$16 sps:$4 sm:$0xff]  }
 0x23f   : > { %4417 = vmatpush1.bf16.msra.mxu0 %v12727_v11  ;;  %v655_v11 = vld [vmem:[%s14604_s27 + $0x108] sm:$0xff]  ;;  %v892_v0 = vld [vmem:[%s14604_s27 + $0x870] sm:$0xff] }
 0x240   : > { %4418 = vmatprep.subr.bf16.mxu0 %v12738_v12  ;;  %5768 = vmatpush1.bf16.msra.mxu1 %v12742_v13  ;;  %v669_v12 = vld [vmem:[%s14604_s27 + $0x178] sm:$0xff]  ;;  %v12754_v13 = vld [vmem:[#allocation8 + $0x600] ss:$16 sps:$4 sm:$0xff]  }
 0x241   : > { %4300 = vmatmul.mubr.bf16.gmra.mrb[28].mxu0 %v1170_v14  ;;  %5651 = vmatmul.mubr.bf16.gmra.mrb[28].mxu1 %v1170_v14  ;;  %v1074_v14 = vpack.c.bf16 %v640_v10, %v626_v9  ;;  %v12817_v9 = vld [vmem:[#allocation8 + $0x708] ss:$16 sps:$4 sm:$0xff]   ;;  %v12822_v10 = vld [vmem:[#allocation8 + $0x72c] ss:$16 sps:$4 sm:$0xff]  }
 0x242   : > { %4309 = vmatprep.mubr.bf16.mxu0 %v1185_v17  ;;  %5660 = vmatprep.mubr.bf16.mxu1 %v1185_v17  ;;  %v12781_v17 = vld [vmem:[#allocation8 + $0x608] ss:$16 sps:$4 sm:$0xff]  }
 0x243   : > { %4419 = vmatpush1.bf16.msra.mxu0 %v12736_v15  ;;  %5769 = vmatprep.subr.bf16.mxu1 %v12750_v16  ;;  %v12759_v15 = vld [vmem:[#allocation8 + $0x624] ss:$16 sps:$4 sm:$0xff]   ;;  %v1089_v16 = vpack.c.bf16 %v669_v12, %v655_v11 }
 0x244   : > { %4420 = vmatprep.subr.bf16.mxu0 %v12747_v18  ;;  %5770 = vmatpush1.bf16.msra.mxu1 %v12748_v19  ;;  %v654_v18 = vld [vmem:[%s14604_s27 + $0x100] sm:$0xff]  ;;  %v668_v19 = vld [vmem:[%s14604_s27 + $0x170] sm:$0xff] }
 0x245   : > { %5771 = vmatprep.subr.bf16.mxu1 %v12753_v24  ;;  %v12762_v24 = vld [vmem:[#allocation8 + $0x644] ss:$16 sps:$4 sm:$0xff]  }
 0x246   : > { %v766_v11 = vld [vmem:[%s14604_s27 + $0x480] sm:$0xff]  ;;  %v780_v12 = vld [vmem:[%s14604_s27 + $0x4f0] sm:$0xff] }
 0x247   : > { %4421 = vmatpush1.bf16.msra.mxu0 %v12745_v25  ;;  %v12784_v25 = vld [vmem:[#allocation8 + $0x628] ss:$16 sps:$4 sm:$0xff]  }
 0x248   : > { %5772 = vmatpush1.bf16.msra.mxu1 %v12751_v26  ;;  %4583 = vmatprep.subr.bf16.mxu0 %v12756_v27  ;;  %v1088_v26 = vpack.c.bf16 %v668_v19, %v654_v18  ;;  %v12760_v27 = vld [vmem:[#allocation8 + $0x640] ss:$16 sps:$4 sm:$0xff]   ;;  %v1144_v18 = vpack.c.bf16 %v780_v12, %v766_v11 }
 0x249   : > { %4310 = vmatmul.mubr.bf16.gmra.mrb[32].mxu0 %v1184_v28  ;;  %5661 = vmatmul.mubr.bf16.gmra.mrb[32].mxu1 %v1184_v28  ;;  %v12792_v28 = vld [vmem:[#allocation8 + $0x64c] ss:$16 sps:$4 sm:$0xff]   ;;  %v934_v11 = vld [vmem:[%s14604_s27 + $0x9c0] sm:$0xff]  ;;  %v948_v12 = vld [vmem:[%s14604_s27 + $0xa30] sm:$0xff] }
 0x24a   : > { %4319 = vmatprep.mubr.bf16.mxu0 %v1199_v29  ;;  %5670 = vmatprep.mubr.bf16.mxu1 %v1199_v29  ;;  %v1103_v29 = vpack.c.bf16 %v697_v23, %v683_v22  ;;  %v12807_v22 = vld [vmem:[#allocation8 + $0x764] ss:$16 sps:$4 sm:$0xff]   ;;  %v12826_v23 = vld [vmem:[#allocation8 + $0x748] ss:$16 sps:$4 sm:$0xff]  }
 0x24b   : > { %5934 = vmatprep.subr.bf16.mxu1 %v12783_v30  ;;  %v12765_v30 = vld [vmem:[#allocation8 + $0x664] ss:$16 sps:$4 sm:$0xff]  }
 0x251   : > { %4320 = vmatmul.mubr.bf16.gmra.mrb[36].mxu0 %v1198_v35  ;;  %5671 = vmatmul.mubr.bf16.gmra.mrb[36].mxu1 %v1198_v35  ;;  %v725_v35 = vld [vmem:[%s14604_s27 + $0x338] sm:$0xff] }
 0x252   : > { %4329 = vmatprep.mubr.bf16.mxu0 %v1213_v36  ;;  %5680 = vmatprep.mubr.bf16.mxu1 %v1213_v36  ;;  %v12795_v36 = vld [vmem:[#allocation8 + $0x66c] ss:$16 sps:$4 sm:$0xff]   ;;  %v1117_v43 = vpack.c.bf16 %v725_v35, %v711_v34  ;;  %v12814_v34 = vld [vmem:[#allocation8 + $0x780] ss:$16 sps:$4 sm:$0xff]  }
 0x253   : > { %v12837_v35 = vld [vmem:[#allocation8 + $0x78c] ss:$16 sps:$4 sm:$0xff]  }
 0x259   : > { %4330 = vmatmul.mubr.bf16.gmra.mrb[40].mxu0 %v1212_v41  ;;  %5681 = vmatmul.mubr.bf16.gmra.mrb[40].mxu1 %v1212_v41  ;;  %v12766_v41 = vld [vmem:[#allocation8 + $0x680] ss:$16 sps:$4 sm:$0xff]  }
 0x25a   : > { %4339 = vmatprep.mubr.bf16.mxu0 %v1227_v42  ;;  %5690 = vmatprep.mubr.bf16.mxu1 %v1227_v42  ;;  %v12801_v42 = vld [vmem:[#allocation8 + $0x68c] ss:$16 sps:$4 sm:$0xff]  }
 0x261   : > { %4340 = vmatmul.mubr.bf16.gmra.mrb[44].mxu0 %v1226_v47  ;;  %5691 = vmatmul.mubr.bf16.gmra.mrb[44].mxu1 %v1226_v47  ;;  %v724_v47 = vld [vmem:[%s14604_s27 + $0x330] sm:$0xff] }
 0x262   : > { %4349 = vmatprep.mubr.bf16.mxu0 %v1241_v48  ;;  %5700 = vmatprep.mubr.bf16.mxu1 %v1241_v48  ;;  %v739_v48 = vld [vmem:[%s14604_s27 + $0x3a8] sm:$0xff] }
 0x263   : > { %v1131_v57 = vpack.c.bf16 %v753_v49, %v739_v48  ;;  %v12832_v48 = vld [vmem:[#allocation8 + $0x7c0] ss:$16 sps:$4 sm:$0xff]   ;;  %v12846_v49 = vld [vmem:[#allocation8 + $0x7cc] ss:$16 sps:$4 sm:$0xff]  }
 0x269   : > { %4350 = vmatmul.mubr.bf16.gmra.mrb[48].mxu0 %v1240_v53  ;;  %5701 = vmatmul.mubr.bf16.gmra.mrb[48].mxu1 %v1240_v53  ;;  %v12802_v53 = vld [vmem:[#allocation8 + $0x6a8] ss:$16 sps:$4 sm:$0xff]  }
 0x26a   : > { %4359 = vmatprep.mubr.bf16.mxu0 %v1255_v54  ;;  %5710 = vmatprep.mubr.bf16.mxu1 %v1255_v54  ;;  %v1116_v54 = vpack.c.bf16 %v724_v47, %v710_v46 }
 0x271   : > { %4360 = vmatmul.mubr.bf16.gmra.mrb[52].mxu0 %v1254_v59  ;;  %5711 = vmatmul.mubr.bf16.gmra.mrb[52].mxu1 %v1254_v59  ;;  %v12808_v59 = vld [vmem:[#allocation8 + $0x6c8] ss:$16 sps:$4 sm:$0xff]  }
 0x272   : > { %4369 = vmatprep.mubr.bf16.mxu0 %v1269_v60  ;;  %5720 = vmatprep.mubr.bf16.mxu1 %v1269_v60  ;;  %v738_v60 = vld [vmem:[%s14604_s27 + $0x3a0] sm:$0xff] }
 0x273   : > { %v1130_v4 = vpack.c.bf16 %v752_v61, %v738_v60 }
 0x279   : > { %4370 = vmatmul.mubr.bf16.gmra.mrb[56].mxu0 %v1268_v1  ;;  %5721 = vmatmul.mubr.bf16.gmra.mrb[56].mxu1 %v1268_v1  ;;  %v12775_v1 = vld [vmem:[#allocation8 + $0x6e0] ss:$16 sps:$4 sm:$0xff]  }
 0x27a   : > { %4379 = vmatprep.mubr.bf16.mxu0 %v1283_v2  ;;  %5730 = vmatprep.mubr.bf16.mxu1 %v1283_v2  ;;  %v12780_v2 = vld [vmem:[#allocation8 + $0x704] ss:$16 sps:$4 sm:$0xff]  }
 0x281   : > { %4380 = vmatmul.mubr.bf16.gmra.mrb[60].mxu0 %v1282_v7  ;;  %5731 = vmatmul.mubr.bf16.gmra.mrb[60].mxu1 %v1282_v7  ;;  %v12819_v7 = vld [vmem:[#allocation8 + $0x70c] ss:$16 sps:$4 sm:$0xff]  }
 0x282   : > { %4422 = vmatprep.mubr.bf16.mxu0 %v1075_v8  ;;  %5773 = vmatprep.mubr.bf16.mxu1 %v1075_v8  ;;  %v12789_v8 = vld [vmem:[#allocation8 + $0x724] ss:$16 sps:$4 sm:$0xff]  }
 0x289   : > { %4423 = vmatmul.mubr.bf16.vlgmr.msra.gmra.mrb[0].mxu0 %v1074_v14  ;;  %5774 = vmatmul.mubr.bf16.vlgmr.msra.gmra.mrb[0].mxu1 %v1074_v14  ;;  %v809_v14 = vld [vmem:[%s14604_s27 + $0x5d8] sm:$0xff] }
 0x28a   : > { %4584 = vmatpush1.bf16.msra.mxu0 %v12754_v13  ;;  %4432 = vmatprep.mubr.bf16.mxu0 %v1089_v16  ;;  %v795_v13 = vld [vmem:[%s14604_s27 + $0x568] sm:$0xff] }
 0x28b   : > { %5783 = vmatprep.mubr.bf16.mxu1 %v1089_v16  ;;  %4585 = vmatprep.subr.bf16.mxu0 %v12759_v15  ;;  %v12787_v15 = vld [vmem:[#allocation8 + $0x720] ss:$16 sps:$4 sm:$0xff]   ;;  %v12798_v16 = vld [vmem:[#allocation8 + $0x744] ss:$16 sps:$4 sm:$0xff]   ;;  %v1159_v19 = vpack.c.bf16 %v809_v14, %v795_v13  ;;  %v963_v13 = vld [vmem:[%s14604_s27 + $0xaa8] sm:$0xff] }
 0x28c   : > { %5935 = vmatpush1.bf16.msra.mxu1 %v12781_v17  ;;  %v12820_v17 = vld [vmem:[#allocation8 + $0x728] ss:$16 sps:$4 sm:$0xff]  }
 0x28d   : > { %5936 = vmatprep.subr.bf16.mxu1 %v12786_v21  ;;  %v12828_v21 = vld [vmem:[#allocation8 + $0x74c] ss:$16 sps:$4 sm:$0xff]  }
 0x28e   : > { %4586 = vmatpush1.bf16.msra.mxu0 %v12757_v20  ;;  %v12796_v20 = vld [vmem:[#allocation8 + $0x740] ss:$16 sps:$4 sm:$0xff]   ;;  %v977_v14 = vld [vmem:[%s14604_s27 + $0xb18] sm:$0xff] }
 0x28f   : > { %4587 = vmatprep.subr.bf16.mxu0 %v12762_v24  ;;  %v12831_v24 = vld [vmem:[#allocation8 + $0x76c] ss:$16 sps:$4 sm:$0xff]  }
 0x290   : > { %5937 = vmatpush1.bf16.msra.mxu1 %v12784_v25  ;;  %v794_v25 = vld [vmem:[%s14604_s27 + $0x560] sm:$0xff] }
 0x291   : > { %4433 = vmatmul.mubr.bf16.gmra.mrb[4].mxu0 %v1088_v26  ;;  %5784 = vmatmul.mubr.bf16.gmra.mrb[4].mxu1 %v1088_v26  ;;  %v808_v26 = vld [vmem:[%s14604_s27 + $0x5d0] sm:$0xff] }
 0x292   : > { %4442 = vmatprep.mubr.bf16.mxu0 %v1103_v29  ;;  %5793 = vmatprep.mubr.bf16.mxu1 %v1103_v29  ;;  %v12805_v29 = vld [vmem:[#allocation8 + $0x760] ss:$16 sps:$4 sm:$0xff]   ;;  %v1158_v32 = vpack.c.bf16 %v808_v26, %v794_v25  ;;  %v1019_v25 = vld [vmem:[%s14604_s27 + $0xc68] sm:$0xff]  ;;  %v1033_v26 = vld [vmem:[%s14604_s27 + $0xcd8] sm:$0xff] }
 0x293   : > { %4588 = vmatpush1.bf16.msra.mxu0 %v12760_v27  ;;  %5938 = vmatprep.subr.bf16.mxu1 %v12792_v28  ;;  %v823_v27 = vld [vmem:[%s14604_s27 + $0x648] sm:$0xff]  ;;  %v837_v28 = vld [vmem:[%s14604_s27 + $0x6b8] sm:$0xff] }
 0x294   : > { %4589 = vmatprep.subr.bf16.mxu0 %v12765_v30  ;;  %5939 = vmatpush1.bf16.msra.mxu1 %v12790_v31  ;;  %v12816_v30 = vld [vmem:[#allocation8 + $0x784] ss:$16 sps:$4 sm:$0xff]   ;;  %v12829_v31 = vld [vmem:[#allocation8 + $0x768] ss:$16 sps:$4 sm:$0xff]   ;;  %v1173_v33 = vpack.c.bf16 %v837_v28, %v823_v27  ;;  %v1271_v28 = vpack.c.bf16 %v1033_v26, %v1019_v25  ;;  %v12906_v25 = vld [vmem:[#allocation8 + $0x8cc] ss:$16 sps:$4 sm:$0xff]  }
 0x295   : > { %5940 = vmatprep.subr.bf16.mxu1 %v12795_v36  ;;  %v12825_v36 = vld [vmem:[#allocation8 + $0x7a4] ss:$16 sps:$4 sm:$0xff]  }
 0x296   : > { %v12873_v26 = vld [vmem:[#allocation8 + $0x8e4] ss:$16 sps:$4 sm:$0xff]  }
 0x297   : > { %4590 = vmatpush1.bf16.msra.mxu0 %v12763_v37  ;;  %v12835_v37 = vld [vmem:[#allocation8 + $0x788] ss:$16 sps:$4 sm:$0xff]  }
 0x298   : > { %4591 = vmatprep.subr.bf16.mxu0 %v12768_v38  ;;  %5941 = vmatpush1.bf16.msra.mxu1 %v12793_v39  ;;  %v12840_v38 = vld [vmem:[#allocation8 + $0x7ac] ss:$16 sps:$4 sm:$0xff]   ;;  %v822_v39 = vld [vmem:[%s14604_s27 + $0x640] sm:$0xff] }
 0x299   : > { %4443 = vmatmul.mubr.bf16.gmra.mrb[8].mxu0 %v1102_v40  ;;  %5794 = vmatmul.mubr.bf16.gmra.mrb[8].mxu1 %v1102_v40  ;;  %v836_v40 = vld [vmem:[%s14604_s27 + $0x6b0] sm:$0xff] }
 0x29a   : > { %4452 = vmatprep.mubr.bf16.mxu0 %v1117_v43  ;;  %5803 = vmatprep.mubr.bf16.mxu1 %v1117_v43  ;;  %v12823_v43 = vld [vmem:[#allocation8 + $0x7a0] ss:$16 sps:$4 sm:$0xff]   ;;  %v1172_v46 = vpack.c.bf16 %v836_v40, %v822_v39 }
 0x29b   : > { %4592 = vmatpush1.bf16.msra.mxu0 %v12766_v41  ;;  %5942 = vmatprep.subr.bf16.mxu1 %v12801_v42  ;;  %v851_v41 = vld [vmem:[%s14604_s27 + $0x728] sm:$0xff]  ;;  %v865_v42 = vld [vmem:[%s14604_s27 + $0x798] sm:$0xff] }
 0x29c   : > { %4593 = vmatprep.subr.bf16.mxu0 %v12771_v44  ;;  %5943 = vmatpush1.bf16.msra.mxu1 %v12799_v45  ;;  %v12834_v44 = vld [vmem:[#allocation8 + $0x7c4] ss:$16 sps:$4 sm:$0xff]   ;;  %v12838_v45 = vld [vmem:[#allocation8 + $0x7a8] ss:$16 sps:$4 sm:$0xff]   ;;  %v1187_v47 = vpack.c.bf16 %v865_v42, %v851_v41 }
 0x29d   : > { %5944 = vmatprep.subr.bf16.mxu1 %v12804_v50  ;;  %v12843_v50 = vld [vmem:[#allocation8 + $0x7e4] ss:$16 sps:$4 sm:$0xff]  }
 0x29e   : > { %v628_v41 = vld [vmem:[%s14604_s27 + $0x30] sm:$0xff]  ;;  %v642_v42 = vld [vmem:[%s14604_s27 + $0xa0] sm:$0xff] }
 0x29f   : > { %4594 = vmatpush1.bf16.msra.mxu0 %v12769_v51  ;;  %v12844_v51 = vld [vmem:[#allocation8 + $0x7c8] ss:$16 sps:$4 sm:$0xff]  }
 0x2a0   : > { %4595 = vmatprep.subr.bf16.mxu0 %v12774_v52  ;;  %5945 = vmatpush1.bf16.msra.mxu1 %v12802_v53  ;;  %v12849_v52 = vld [vmem:[#allocation8 + $0x7ec] ss:$16 sps:$4 sm:$0xff]   ;;  %v850_v53 = vld [vmem:[%s14604_s27 + $0x720] sm:$0xff] }
 0x2a1   : > { %4453 = vmatmul.mubr.bf16.gmra.mrb[12].mxu0 %v1116_v54  ;;  %5804 = vmatmul.mubr.bf16.gmra.mrb[12].mxu1 %v1116_v54  ;;  %v864_v54 = vld [vmem:[%s14604_s27 + $0x790] sm:$0xff] }
 0x2a2   : > { %4462 = vmatprep.mubr.bf16.mxu0 %v1131_v57  ;;  %5813 = vmatprep.mubr.bf16.mxu1 %v1131_v57  ;;  %v12841_v57 = vld [vmem:[#allocation8 + $0x7e0] ss:$16 sps:$4 sm:$0xff]   ;;  %v1186_v60 = vpack.c.bf16 %v864_v54, %v850_v53  ;;  %v685_v54 = vld [vmem:[%s14604_s27 + $0x1f8] sm:$0xff] }
 0x2a3   : > { %4596 = vmatpush1.bf16.msra.mxu0 %v12772_v55  ;;  %5946 = vmatprep.subr.bf16.mxu1 %v12810_v56  ;;  %v879_v55 = vld [vmem:[%s14604_s27 + $0x808] sm:$0xff]  ;;  %v893_v56 = vld [vmem:[%s14604_s27 + $0x878] sm:$0xff]  ;;  %v12853_v53 = vld [vmem:[#allocation8 + $0x820] ss:$16 sps:$4 sm:$0xff]  }
 0x2a4   : > { %4597 = vmatprep.subr.bf16.mxu0 %v12777_v58  ;;  %5947 = vmatpush1.bf16.msra.mxu1 %v12808_v59  ;;  %v12847_v58 = vld [vmem:[#allocation8 + $0x7e8] ss:$16 sps:$4 sm:$0xff]   ;;  %v12852_v59 = vld [vmem:[#allocation8 + $0x804] ss:$16 sps:$4 sm:$0xff]   ;;  %v1201_v61 = vpack.c.bf16 %v893_v56, %v879_v55 }
 0x2a5   : > { %5948 = vmatprep.subr.bf16.mxu1 %v12813_v63  ;;  %v878_v63 = vld [vmem:[%s14604_s27 + $0x800] sm:$0xff]  ;;  %v699_v55 = vld [vmem:[%s14604_s27 + $0x268] sm:$0xff] }
 0x2a6   : > { %v12858_v56 = vld [vmem:[#allocation8 + $0x844] ss:$16 sps:$4 sm:$0xff]  }
 0x2a7   : > { %4598 = vmatpush1.bf16.msra.mxu0 %v12775_v1  ;;  %v907_v1 = vld [vmem:[%s14604_s27 + $0x8e8] sm:$0xff] }
 0x2a8   : > { %4599 = vmatprep.subr.bf16.mxu0 %v12780_v2  ;;  %5949 = vmatpush1.bf16.msra.mxu1 %v12811_v3  ;;  %v921_v2 = vld [vmem:[%s14604_s27 + $0x958] sm:$0xff]  ;;  %v1200_v3 = vpack.c.bf16 %v892_v0, %v878_v63 }
 0x2a9   : > { %4463 = vmatmul.mubr.bf16.gmra.mrb[16].mxu0 %v1130_v4  ;;  %5814 = vmatmul.mubr.bf16.gmra.mrb[16].mxu1 %v1130_v4  ;;  %v1215_v4 = vpack.c.bf16 %v921_v2, %v907_v1  ;;  %v12886_v63 = vld [vmem:[#allocation8 + $0x848] ss:$16 sps:$4 sm:$0xff]   ;;  %v12891_v0 = vld [vmem:[#allocation8 + $0x86c] ss:$16 sps:$4 sm:$0xff]   ;;  %v684_v1 = vld [vmem:[%s14604_s27 + $0x1f0] sm:$0xff] }
 0x2aa   : > { %4472 = vmatprep.mubr.bf16.mxu0 %v1145_v5  ;;  %5823 = vmatprep.mubr.bf16.mxu1 %v1145_v5  ;;  %v906_v5 = vld [vmem:[%s14604_s27 + $0x8e0] sm:$0xff] }
 0x2ab   : > { %4600 = vmatpush1.bf16.msra.mxu0 %v12778_v6  ;;  %5950 = vmatprep.subr.bf16.mxu1 %v12819_v7  ;;  %v920_v6 = vld [vmem:[%s14604_s27 + $0x950] sm:$0xff]  ;;  %v935_v7 = vld [vmem:[%s14604_s27 + $0x9c8] sm:$0xff]  ;;  %v698_v2 = vld [vmem:[%s14604_s27 + $0x260] sm:$0xff] }
 0x2ac   : > { %4601 = vmatprep.subr.bf16.mxu0 %v12789_v8  ;;  %5951 = vmatpush1.bf16.msra.mxu1 %v12817_v9  ;;  %v949_v8 = vld [vmem:[%s14604_s27 + $0xa38] sm:$0xff]  ;;  %v1214_v9 = vpack.c.bf16 %v920_v6, %v906_v5  ;;  %v12859_v5 = vld [vmem:[#allocation8 + $0x860] ss:$16 sps:$4 sm:$0xff]   ;;  %v12864_v6 = vld [vmem:[#allocation8 + $0x884] ss:$16 sps:$4 sm:$0xff]  }
 0x2ad   : > { %5952 = vmatprep.subr.bf16.mxu1 %v12822_v10  ;;  %v1229_v10 = vpack.c.bf16 %v949_v8, %v935_v7  ;;  %v12889_v7 = vld [vmem:[#allocation8 + $0x868] ss:$16 sps:$4 sm:$0xff]   ;;  %v1104_v8 = vpack.c.bf16 %v698_v2, %v684_v1  ;;  %v12910_v2 = vld [vmem:[#allocation8 + $0x980] ss:$16 sps:$4 sm:$0xff]  }
 0x2af   : > { %4602 = vmatpush1.bf16.msra.mxu0 %v12787_v15  ;;  %v1228_v15 = vpack.c.bf16 %v948_v12, %v934_v11  ;;  %v12897_v11 = vld [vmem:[#allocation8 + $0x88c] ss:$16 sps:$4 sm:$0xff]   ;;  %v12867_v12 = vld [vmem:[#allocation8 + $0x8a4] ss:$16 sps:$4 sm:$0xff]  }
 0x2b0   : > { %4603 = vmatprep.subr.bf16.mxu0 %v12798_v16  ;;  %5953 = vmatpush1.bf16.msra.mxu1 %v12820_v17  ;;  %v1243_v16 = vpack.c.bf16 %v977_v14, %v963_v13  ;;  %v962_v17 = vld [vmem:[%s14604_s27 + $0xaa0] sm:$0xff]  ;;  %v12895_v13 = vld [vmem:[#allocation8 + $0x888] ss:$16 sps:$4 sm:$0xff]   ;;  %v12900_v14 = vld [vmem:[#allocation8 + $0x8ac] ss:$16 sps:$4 sm:$0xff]  }
 0x2b1   : > { %4473 = vmatmul.mubr.bf16.gmra.mrb[20].mxu0 %v1144_v18  ;;  %5824 = vmatmul.mubr.bf16.gmra.mrb[20].mxu1 %v1144_v18  ;;  %v976_v18 = vld [vmem:[%s14604_s27 + $0xb10] sm:$0xff] }
 0x2b2   : > { %4482 = vmatprep.mubr.bf16.mxu0 %v1159_v19  ;;  %5833 = vmatprep.mubr.bf16.mxu1 %v1159_v19  ;;  %v991_v19 = vld [vmem:[%s14604_s27 + $0xb88] sm:$0xff] }
 0x2b3   : > { %4604 = vmatpush1.bf16.msra.mxu0 %v12796_v20  ;;  %5954 = vmatprep.subr.bf16.mxu1 %v12828_v21  ;;  %v1005_v20 = vld [vmem:[%s14604_s27 + $0xbf8] sm:$0xff]  ;;  %v1242_v21 = vpack.c.bf16 %v976_v18, %v962_v17  ;;  %v755_v18 = vld [vmem:[%s14604_s27 + $0x428] sm:$0xff] }
 0x2b4   : > { %4605 = vmatprep.subr.bf16.mxu0 %v12807_v22  ;;  %5955 = vmatpush1.bf16.msra.mxu1 %v12826_v23  ;;  %v1257_v22 = vpack.c.bf16 %v1005_v20, %v991_v19  ;;  %v990_v23 = vld [vmem:[%s14604_s27 + $0xb80] sm:$0xff]  ;;  %v741_v17 = vld [vmem:[%s14604_s27 + $0x3b8] sm:$0xff] }
 0x2b5   : > { %5956 = vmatprep.subr.bf16.mxu1 %v12831_v24  ;;  %v1004_v24 = vld [vmem:[%s14604_s27 + $0xbf0] sm:$0xff] }
 0x2b6   : > { %v1256_v27 = vpack.c.bf16 %v1004_v24, %v990_v23  ;;  %v12865_v19 = vld [vmem:[#allocation8 + $0x8a0] ss:$16 sps:$4 sm:$0xff]   ;;  %v12870_v20 = vld [vmem:[#allocation8 + $0x8c4] ss:$16 sps:$4 sm:$0xff]   ;;  %v1133_v23 = vpack.c.bf16 %v755_v18, %v741_v17  ;;  %v12942_v17 = vld [vmem:[#allocation8 + $0x9cc] ss:$16 sps:$4 sm:$0xff]  }
 0x2b7   : > { %4606 = vmatpush1.bf16.msra.mxu0 %v12805_v29  ;;  %v1018_v29 = vld [vmem:[%s14604_s27 + $0xc60] sm:$0xff] }
 0x2b8   : > { %4607 = vmatprep.subr.bf16.mxu0 %v12816_v30  ;;  %5957 = vmatpush1.bf16.msra.mxu1 %v12829_v31  ;;  %v1032_v30 = vld [vmem:[%s14604_s27 + $0xcd0] sm:$0xff]  ;;  %v1047_v31 = vld [vmem:[%s14604_s27 + $0xd48] sm:$0xff] }
 0x2b9   : > { %4483 = vmatmul.mubr.bf16.gmra.mrb[24].mxu0 %v1158_v32  ;;  %5834 = vmatmul.mubr.bf16.gmra.mrb[24].mxu1 %v1158_v32  ;;  %v1061_v32 = vld [vmem:[%s14604_s27 + $0xdb8] sm:$0xff]  ;;  %v12868_v24 = vld [vmem:[#allocation8 + $0x8c0] ss:$16 sps:$4 sm:$0xff]   ;;  %v12939_v18 = vld [vmem:[#allocation8 + $0x9e4] ss:$16 sps:$4 sm:$0xff]  }
 0x2ba   : > { %4492 = vmatprep.mubr.bf16.mxu0 %v1173_v33  ;;  %5843 = vmatprep.mubr.bf16.mxu1 %v1173_v33  ;;  %v1270_v33 = vpack.c.bf16 %v1032_v30, %v1018_v29  ;;  %v740_v29 = vld [vmem:[%s14604_s27 + $0x3b0] sm:$0xff]  ;;  %v754_v30 = vld [vmem:[%s14604_s27 + $0x420] sm:$0xff] }
 0x2bb   : > { %4608 = vmatpush1.bf16.msra.mxu0 %v12814_v34  ;;  %5958 = vmatprep.subr.bf16.mxu1 %v12837_v35  ;;  %v1285_v34 = vpack.c.bf16 %v1061_v32, %v1047_v31  ;;  %v1046_v35 = vld [vmem:[%s14604_s27 + $0xd40] sm:$0xff]  ;;  %v769_v31 = vld [vmem:[%s14604_s27 + $0x498] sm:$0xff]  ;;  %v783_v32 = vld [vmem:[%s14604_s27 + $0x508] sm:$0xff] }
 0x2bc   : > { %4609 = vmatprep.subr.bf16.mxu0 %v12825_v36  ;;  %5959 = vmatpush1.bf16.msra.mxu1 %v12835_v37  ;;  %v1060_v36 = vld [vmem:[%s14604_s27 + $0xdb0] sm:$0xff]  ;;  %v629_v37 = vld [vmem:[%s14604_s27 + $0x38] sm:$0xff] }
 0x2bd   : > { %5960 = vmatprep.subr.bf16.mxu1 %v12840_v38  ;;  %v643_v38 = vld [vmem:[%s14604_s27 + $0xa8] sm:$0xff]  ;;  %v1284_v39 = vpack.c.bf16 %v1060_v36, %v1046_v35  ;;  %v1132_v36 = vpack.c.bf16 %v754_v30, %v740_v29 }
 0x2be   : > { %v1077_v40 = vpack.c.bf16 %v643_v38, %v629_v37  ;;  %v12907_v35 = vld [vmem:[#allocation8 + $0x8e8] ss:$16 sps:$4 sm:$0xff]   ;;  %v1147_v37 = vpack.c.bf16 %v783_v32, %v769_v31  ;;  %v12874_v38 = vld [vmem:[#allocation8 + $0x900] ss:$16 sps:$4 sm:$0xff]   ;;  %v12975_v30 = vld [vmem:[#allocation8 + $0xa0c] ss:$16 sps:$4 sm:$0xff]  }
 0x2bf   : > { %4610 = vmatpush1.bf16.msra.mxu0 %v12823_v43  ;;  %v657_v43 = vld [vmem:[%s14604_s27 + $0x118] sm:$0xff]  ;;  %v880_v31 = vld [vmem:[%s14604_s27 + $0x810] sm:$0xff]  ;;  %v894_v32 = vld [vmem:[%s14604_s27 + $0x880] sm:$0xff] }
 0x2c0   : > { %4611 = vmatprep.subr.bf16.mxu0 %v12834_v44  ;;  %5961 = vmatpush1.bf16.msra.mxu1 %v12838_v45  ;;  %v671_v44 = vld [vmem:[%s14604_s27 + $0x188] sm:$0xff]  ;;  %v1076_v45 = vpack.c.bf16 %v642_v42, %v628_v41 }
 0x2c1   : > { %4493 = vmatmul.mubr.bf16.gmra.mrb[28].mxu0 %v1172_v46  ;;  %5844 = vmatmul.mubr.bf16.gmra.mrb[28].mxu1 %v1172_v46  ;;  %v12850_v46 = vld [vmem:[#allocation8 + $0x800] ss:$16 sps:$4 sm:$0xff]   ;;  %v12913_v41 = vld [vmem:[#allocation8 + $0x908] ss:$16 sps:$4 sm:$0xff]   ;;  %v12918_v42 = vld [vmem:[#allocation8 + $0x92c] ss:$16 sps:$4 sm:$0xff]  }
 0x2c2   : > { %4502 = vmatprep.mubr.bf16.mxu0 %v1187_v47  ;;  %5853 = vmatprep.mubr.bf16.mxu1 %v1187_v47  ;;  %v1091_v47 = vpack.c.bf16 %v671_v44, %v657_v43  ;;  %v768_v43 = vld [vmem:[%s14604_s27 + $0x490] sm:$0xff]  ;;  %v782_v44 = vld [vmem:[%s14604_s27 + $0x500] sm:$0xff] }
 0x2c3   : > { %4612 = vmatpush1.bf16.msra.mxu0 %v12832_v48  ;;  %5962 = vmatprep.subr.bf16.mxu1 %v12846_v49  ;;  %v12855_v48 = vld [vmem:[#allocation8 + $0x824] ss:$16 sps:$4 sm:$0xff]   ;;  %v12877_v49 = vld [vmem:[#allocation8 + $0x808] ss:$16 sps:$4 sm:$0xff]  }
 0x2c4   : > { %4613 = vmatprep.subr.bf16.mxu0 %v12843_v50  ;;  %5963 = vmatpush1.bf16.msra.mxu1 %v12844_v51  ;;  %v12882_v50 = vld [vmem:[#allocation8 + $0x82c] ss:$16 sps:$4 sm:$0xff]   ;;  %v656_v51 = vld [vmem:[%s14604_s27 + $0x110] sm:$0xff] }
 0x2c5   : > { %5964 = vmatprep.subr.bf16.mxu1 %v12849_v52  ;;  %v670_v52 = vld [vmem:[%s14604_s27 + $0x180] sm:$0xff] }
 0x2c7   : > { %4614 = vmatpush1.bf16.msra.mxu0 %v12841_v57  ;;  %v12880_v57 = vld [vmem:[#allocation8 + $0x828] ss:$16 sps:$4 sm:$0xff]  }
 0x2c8   : > { %5965 = vmatpush1.bf16.msra.mxu1 %v12847_v58  ;;  %4776 = vmatprep.subr.bf16.mxu0 %v12852_v59  ;;  %v1090_v58 = vpack.c.bf16 %v670_v52, %v656_v51  ;;  %v1105_v59 = vpack.c.bf16 %v699_v55, %v685_v54  ;;  %v12892_v52 = vld [vmem:[#allocation8 + $0x940] ss:$16 sps:$4 sm:$0xff]   ;;  %v12903_v54 = vld [vmem:[#allocation8 + $0x964] ss:$16 sps:$4 sm:$0xff]   ;;  %v12922_v55 = vld [vmem:[#allocation8 + $0x948] ss:$16 sps:$4 sm:$0xff]  }
 0x2c9   : > { %4503 = vmatmul.mubr.bf16.gmra.mrb[32].mxu0 %v1186_v60  ;;  %5854 = vmatmul.mubr.bf16.gmra.mrb[32].mxu1 %v1186_v60  ;;  %v12856_v60 = vld [vmem:[#allocation8 + $0x840] ss:$16 sps:$4 sm:$0xff]  }
 0x2ca   : > { %4512 = vmatprep.mubr.bf16.mxu0 %v1201_v61  ;;  %5863 = vmatprep.mubr.bf16.mxu1 %v1201_v61  ;;  %v12888_v61 = vld [vmem:[#allocation8 + $0x84c] ss:$16 sps:$4 sm:$0xff]  }
 0x2cb   : > { %6127 = vmatprep.subr.bf16.mxu1 %v12879_v62  ;;  %v12861_v62 = vld [vmem:[#allocation8 + $0x864] ss:$16 sps:$4 sm:$0xff]  }
 0x2d1   : > { %4513 = vmatmul.mubr.bf16.gmra.mrb[36].mxu0 %v1200_v3  ;;  %5864 = vmatmul.mubr.bf16.gmra.mrb[36].mxu1 %v1200_v3  ;;  %v713_v3 = vld [vmem:[%s14604_s27 + $0x2d8] sm:$0xff] }
 0x2d2   : > { %4522 = vmatprep.mubr.bf16.mxu0 %v1215_v4  ;;  %5873 = vmatprep.mubr.bf16.mxu1 %v1215_v4  ;;  %v727_v4 = vld [vmem:[%s14604_s27 + $0x348] sm:$0xff] }
 0x2d9   : > { %4523 = vmatmul.mubr.bf16.gmra.mrb[40].mxu0 %v1214_v9  ;;  %5874 = vmatmul.mubr.bf16.gmra.mrb[40].mxu1 %v1214_v9  ;;  %v1119_v9 = vpack.c.bf16 %v727_v4, %v713_v3  ;;  %v12933_v3 = vld [vmem:[#allocation8 + $0x98c] ss:$16 sps:$4 sm:$0xff]   ;;  %v12921_v4 = vld [vmem:[#allocation8 + $0x9a4] ss:$16 sps:$4 sm:$0xff]  }
 0x2da   : > { %4532 = vmatprep.mubr.bf16.mxu0 %v1229_v10  ;;  %5883 = vmatprep.mubr.bf16.mxu1 %v1229_v10  ;;  %v12862_v10 = vld [vmem:[#allocation8 + $0x880] ss:$16 sps:$4 sm:$0xff]  }
 0x2e1   : > { %4533 = vmatmul.mubr.bf16.gmra.mrb[44].mxu0 %v1228_v15  ;;  %5884 = vmatmul.mubr.bf16.gmra.mrb[44].mxu1 %v1228_v15  ;;  %v712_v15 = vld [vmem:[%s14604_s27 + $0x2d0] sm:$0xff] }
 0x2e2   : > { %4542 = vmatprep.mubr.bf16.mxu0 %v1243_v16  ;;  %5893 = vmatprep.mubr.bf16.mxu1 %v1243_v16  ;;  %v726_v16 = vld [vmem:[%s14604_s27 + $0x340] sm:$0xff] }
 0x2e9   : > { %4543 = vmatmul.mubr.bf16.gmra.mrb[48].mxu0 %v1242_v21  ;;  %5894 = vmatmul.mubr.bf16.gmra.mrb[48].mxu1 %v1242_v21  ;;  %v12898_v21 = vld [vmem:[#allocation8 + $0x8a8] ss:$16 sps:$4 sm:$0xff]  }
 0x2ea   : > { %4552 = vmatprep.mubr.bf16.mxu0 %v1257_v22  ;;  %5903 = vmatprep.mubr.bf16.mxu1 %v1257_v22  ;;  %v1118_v22 = vpack.c.bf16 %v726_v16, %v712_v15  ;;  %v12928_v16 = vld [vmem:[#allocation8 + $0x9c0] ss:$16 sps:$4 sm:$0xff]  }
 0x2f1   : > { %4553 = vmatmul.mubr.bf16.gmra.mrb[52].mxu0 %v1256_v27  ;;  %5904 = vmatmul.mubr.bf16.gmra.mrb[52].mxu1 %v1256_v27  ;;  %v12904_v27 = vld [vmem:[#allocation8 + $0x8c8] ss:$16 sps:$4 sm:$0xff]  }
 0x2f2   : > { %4562 = vmatprep.mubr.bf16.mxu0 %v1271_v28  ;;  %5913 = vmatprep.mubr.bf16.mxu1 %v1271_v28  ;;  %v12909_v28 = vld [vmem:[#allocation8 + $0x8ec] ss:$16 sps:$4 sm:$0xff]  }
 0x2f9   : > { %4563 = vmatmul.mubr.bf16.gmra.mrb[56].mxu0 %v1270_v33  ;;  %5914 = vmatmul.mubr.bf16.gmra.mrb[56].mxu1 %v1270_v33  ;;  %v12871_v33 = vld [vmem:[#allocation8 + $0x8e0] ss:$16 sps:$4 sm:$0xff]  }
 0x2fa   : > { %4572 = vmatprep.mubr.bf16.mxu0 %v1285_v34  ;;  %5923 = vmatprep.mubr.bf16.mxu1 %v1285_v34  ;;  %v12876_v34 = vld [vmem:[#allocation8 + $0x904] ss:$16 sps:$4 sm:$0xff]  }
 0x301   : > { %4573 = vmatmul.mubr.bf16.gmra.mrb[60].mxu0 %v1284_v39  ;;  %5924 = vmatmul.mubr.bf16.gmra.mrb[60].mxu1 %v1284_v39  ;;  %v12915_v39 = vld [vmem:[#allocation8 + $0x90c] ss:$16 sps:$4 sm:$0xff]  }
 0x302   : > { %4615 = vmatprep.mubr.bf16.mxu0 %v1077_v40  ;;  %5966 = vmatprep.mubr.bf16.mxu1 %v1077_v40  ;;  %v12885_v40 = vld [vmem:[#allocation8 + $0x924] ss:$16 sps:$4 sm:$0xff]  }
 0x309   : > { %4616 = vmatmul.mubr.bf16.vlgmr.msra.gmra.mrb[0].mxu0 %v1076_v45  ;;  %5967 = vmatmul.mubr.bf16.vlgmr.msra.gmra.mrb[0].mxu1 %v1076_v45  ;;  %v797_v45 = vld [vmem:[%s14604_s27 + $0x578] sm:$0xff] }
 0x30a   : > { %4777 = vmatpush1.bf16.msra.mxu0 %v12850_v46  ;;  %4625 = vmatprep.mubr.bf16.mxu0 %v1091_v47  ;;  %v811_v46 = vld [vmem:[%s14604_s27 + $0x5e8] sm:$0xff] }
 0x30b   : > { %5976 = vmatprep.mubr.bf16.mxu1 %v1091_v47  ;;  %4778 = vmatprep.subr.bf16.mxu0 %v12855_v48  ;;  %v12883_v47 = vld [vmem:[#allocation8 + $0x920] ss:$16 sps:$4 sm:$0xff]   ;;  %v12894_v48 = vld [vmem:[#allocation8 + $0x944] ss:$16 sps:$4 sm:$0xff]   ;;  %v1161_v51 = vpack.c.bf16 %v811_v46, %v797_v45  ;;  %v965_v45 = vld [vmem:[%s14604_s27 + $0xab8] sm:$0xff] }
 0x30c   : > { %6128 = vmatpush1.bf16.msra.mxu1 %v12877_v49  ;;  %v12916_v49 = vld [vmem:[#allocation8 + $0x928] ss:$16 sps:$4 sm:$0xff]  }
 0x30d   : > { %6129 = vmatprep.subr.bf16.mxu1 %v12882_v50  ;;  %v1146_v50 = vpack.c.bf16 %v782_v44, %v768_v43  ;;  %v936_v43 = vld [vmem:[%s14604_s27 + $0x9d0] sm:$0xff]  ;;  %v950_v44 = vld [vmem:[%s14604_s27 + $0xa40] sm:$0xff]  ;;  %v979_v46 = vld [vmem:[%s14604_s27 + $0xb28] sm:$0xff] }
 0x30e   : > { %4779 = vmatpush1.bf16.msra.mxu0 %v12853_v53  ;;  %v12924_v53 = vld [vmem:[#allocation8 + $0x94c] ss:$16 sps:$4 sm:$0xff]  }
 0x30f   : > { %4780 = vmatprep.subr.bf16.mxu0 %v12858_v56  ;;  %v12927_v56 = vld [vmem:[#allocation8 + $0x96c] ss:$16 sps:$4 sm:$0xff]  }
 0x310   : > { %6130 = vmatpush1.bf16.msra.mxu1 %v12880_v57  ;;  %v796_v57 = vld [vmem:[%s14604_s27 + $0x570] sm:$0xff] }
 0x311   : > { %4626 = vmatmul.mubr.bf16.gmra.mrb[4].mxu0 %v1090_v58  ;;  %5977 = vmatmul.mubr.bf16.gmra.mrb[4].mxu1 %v1090_v58  ;;  %v810_v58 = vld [vmem:[%s14604_s27 + $0x5e0] sm:$0xff] }
 0x312   : > { %4635 = vmatprep.mubr.bf16.mxu0 %v1105_v59  ;;  %5986 = vmatprep.mubr.bf16.mxu1 %v1105_v59  ;;  %v825_v59 = vld [vmem:[%s14604_s27 + $0x658] sm:$0xff] }
 0x313   : > { %4781 = vmatpush1.bf16.msra.mxu0 %v12856_v60  ;;  %6131 = vmatprep.subr.bf16.mxu1 %v12888_v61  ;;  %v839_v60 = vld [vmem:[%s14604_s27 + $0x6c8] sm:$0xff]  ;;  %v12901_v61 = vld [vmem:[#allocation8 + $0x960] ss:$16 sps:$4 sm:$0xff]  }
 0x314   : > { %4782 = vmatprep.subr.bf16.mxu0 %v12861_v62  ;;  %6132 = vmatpush1.bf16.msra.mxu1 %v12886_v63  ;;  %v12912_v62 = vld [vmem:[#allocation8 + $0x984] ss:$16 sps:$4 sm:$0xff]   ;;  %v12925_v63 = vld [vmem:[#allocation8 + $0x968] ss:$16 sps:$4 sm:$0xff]   ;;  %v1175_v1 = vpack.c.bf16 %v839_v60, %v825_v59 }
 0x315   : > { %6133 = vmatprep.subr.bf16.mxu1 %v12891_v0  ;;  %v1160_v0 = vpack.c.bf16 %v810_v58, %v796_v57  ;;  %v1021_v57 = vld [vmem:[%s14604_s27 + $0xc78] sm:$0xff]  ;;  %v1035_v58 = vld [vmem:[%s14604_s27 + $0xce8] sm:$0xff] }
 0x316   : > { %v1273_v60 = vpack.c.bf16 %v1035_v58, %v1021_v57  ;;  %v13002_v57 = vld [vmem:[#allocation8 + $0xacc] ss:$16 sps:$4 sm:$0xff]   ;;  %v12969_v58 = vld [vmem:[#allocation8 + $0xae4] ss:$16 sps:$4 sm:$0xff]  }
 0x317   : > { %4783 = vmatpush1.bf16.msra.mxu0 %v12859_v5  ;;  %v12931_v5 = vld [vmem:[#allocation8 + $0x988] ss:$16 sps:$4 sm:$0xff]  }
 0x318   : > { %4784 = vmatprep.subr.bf16.mxu0 %v12864_v6  ;;  %6134 = vmatpush1.bf16.msra.mxu1 %v12889_v7  ;;  %v12936_v6 = vld [vmem:[#allocation8 + $0x9ac] ss:$16 sps:$4 sm:$0xff]   ;;  %v824_v7 = vld [vmem:[%s14604_s27 + $0x650] sm:$0xff] }
 0x319   : > { %4636 = vmatmul.mubr.bf16.gmra.mrb[8].mxu0 %v1104_v8  ;;  %5987 = vmatmul.mubr.bf16.gmra.mrb[8].mxu1 %v1104_v8  ;;  %v838_v8 = vld [vmem:[%s14604_s27 + $0x6c0] sm:$0xff] }
 0x31a   : > { %4645 = vmatprep.mubr.bf16.mxu0 %v1119_v9  ;;  %5996 = vmatprep.mubr.bf16.mxu1 %v1119_v9  ;;  %v853_v9 = vld [vmem:[%s14604_s27 + $0x738] sm:$0xff] }
 0x31b   : > { %4785 = vmatpush1.bf16.msra.mxu0 %v12862_v10  ;;  %6135 = vmatprep.subr.bf16.mxu1 %v12897_v11  ;;  %v867_v10 = vld [vmem:[%s14604_s27 + $0x7a8] sm:$0xff]  ;;  %v12919_v11 = vld [vmem:[#allocation8 + $0x9a0] ss:$16 sps:$4 sm:$0xff]  }
 0x31c   : > { %4786 = vmatprep.subr.bf16.mxu0 %v12867_v12  ;;  %6136 = vmatpush1.bf16.msra.mxu1 %v12895_v13  ;;  %v12930_v12 = vld [vmem:[#allocation8 + $0x9c4] ss:$16 sps:$4 sm:$0xff]   ;;  %v12934_v13 = vld [vmem:[#allocation8 + $0x9a8] ss:$16 sps:$4 sm:$0xff]   ;;  %v1189_v15 = vpack.c.bf16 %v867_v10, %v853_v9 }
 0x31d   : > { %6137 = vmatprep.subr.bf16.mxu1 %v12900_v14  ;;  %v1174_v14 = vpack.c.bf16 %v838_v8, %v824_v7  ;;  %v630_v9 = vld [vmem:[%s14604_s27 + $0x40] sm:$0xff]  ;;  %v644_v10 = vld [vmem:[%s14604_s27 + $0xb0] sm:$0xff] }
 0x31f   : > { %4787 = vmatpush1.bf16.msra.mxu0 %v12865_v19  ;;  %v12940_v19 = vld [vmem:[#allocation8 + $0x9c8] ss:$16 sps:$4 sm:$0xff]  }
 0x320   : > { %4788 = vmatprep.subr.bf16.mxu0 %v12870_v20  ;;  %6138 = vmatpush1.bf16.msra.mxu1 %v12898_v21  ;;  %v12945_v20 = vld [vmem:[#allocation8 + $0x9ec] ss:$16 sps:$4 sm:$0xff]   ;;  %v852_v21 = vld [vmem:[%s14604_s27 + $0x730] sm:$0xff] }
 0x321   : > { %4646 = vmatmul.mubr.bf16.gmra.mrb[12].mxu0 %v1118_v22  ;;  %5997 = vmatmul.mubr.bf16.gmra.mrb[12].mxu1 %v1118_v22  ;;  %v866_v22 = vld [vmem:[%s14604_s27 + $0x7a0] sm:$0xff] }
 0x322   : > { %4655 = vmatprep.mubr.bf16.mxu0 %v1133_v23  ;;  %6006 = vmatprep.mubr.bf16.mxu1 %v1133_v23  ;;  %v881_v23 = vld [vmem:[%s14604_s27 + $0x818] sm:$0xff] }
 0x323   : > { %4789 = vmatpush1.bf16.msra.mxu0 %v12868_v24  ;;  %6139 = vmatprep.subr.bf16.mxu1 %v12906_v25  ;;  %v895_v24 = vld [vmem:[%s14604_s27 + $0x888] sm:$0xff]  ;;  %v12937_v25 = vld [vmem:[#allocation8 + $0x9e0] ss:$16 sps:$4 sm:$0xff]  }
 0x324   : > { %4790 = vmatprep.subr.bf16.mxu0 %v12873_v26  ;;  %6140 = vmatpush1.bf16.msra.mxu1 %v12904_v27  ;;  %v12943_v26 = vld [vmem:[#allocation8 + $0x9e8] ss:$16 sps:$4 sm:$0xff]   ;;  %v12948_v27 = vld [vmem:[#allocation8 + $0xa04] ss:$16 sps:$4 sm:$0xff]   ;;  %v1203_v29 = vpack.c.bf16 %v895_v24, %v881_v23 }
 0x325   : > { %6141 = vmatprep.subr.bf16.mxu1 %v12909_v28  ;;  %v1188_v28 = vpack.c.bf16 %v866_v22, %v852_v21  ;;  %v12949_v21 = vld [vmem:[#allocation8 + $0xa20] ss:$16 sps:$4 sm:$0xff]   ;;  %v687_v22 = vld [vmem:[%s14604_s27 + $0x208] sm:$0xff]  ;;  %v701_v23 = vld [vmem:[%s14604_s27 + $0x278] sm:$0xff] }
 0x326   : > { %v12954_v24 = vld [vmem:[#allocation8 + $0xa44] ss:$16 sps:$4 sm:$0xff]  }
 0x327   : > { %4791 = vmatpush1.bf16.msra.mxu0 %v12871_v33  ;;  %v909_v33 = vld [vmem:[%s14604_s27 + $0x8f8] sm:$0xff] }
 0x328   : > { %4792 = vmatprep.subr.bf16.mxu0 %v12876_v34  ;;  %6142 = vmatpush1.bf16.msra.mxu1 %v12907_v35  ;;  %v923_v34 = vld [vmem:[%s14604_s27 + $0x968] sm:$0xff]  ;;  %v1202_v35 = vpack.c.bf16 %v894_v32, %v880_v31 }
 0x329   : > { %4656 = vmatmul.mubr.bf16.gmra.mrb[16].mxu0 %v1132_v36  ;;  %6007 = vmatmul.mubr.bf16.gmra.mrb[16].mxu1 %v1132_v36  ;;  %v1217_v36 = vpack.c.bf16 %v923_v34, %v909_v33  ;;  %v12982_v31 = vld [vmem:[#allocation8 + $0xa48] ss:$16 sps:$4 sm:$0xff]   ;;  %v12987_v32 = vld [vmem:[#allocation8 + $0xa6c] ss:$16 sps:$4 sm:$0xff]   ;;  %v686_v33 = vld [vmem:[%s14604_s27 + $0x200] sm:$0xff] }
 0x32a   : > { %4665 = vmatprep.mubr.bf16.mxu0 %v1147_v37  ;;  %6016 = vmatprep.mubr.bf16.mxu1 %v1147_v37  ;;  %v908_v37 = vld [vmem:[%s14604_s27 + $0x8f0] sm:$0xff] }
 0x32b   : > { %4793 = vmatpush1.bf16.msra.mxu0 %v12874_v38  ;;  %6143 = vmatprep.subr.bf16.mxu1 %v12915_v39  ;;  %v922_v38 = vld [vmem:[%s14604_s27 + $0x960] sm:$0xff]  ;;  %v937_v39 = vld [vmem:[%s14604_s27 + $0x9d8] sm:$0xff]  ;;  %v700_v34 = vld [vmem:[%s14604_s27 + $0x270] sm:$0xff] }
 0x32c   : > { %4794 = vmatprep.subr.bf16.mxu0 %v12885_v40  ;;  %6144 = vmatpush1.bf16.msra.mxu1 %v12913_v41  ;;  %v951_v40 = vld [vmem:[%s14604_s27 + $0xa48] sm:$0xff]  ;;  %v1216_v41 = vpack.c.bf16 %v922_v38, %v908_v37  ;;  %v12955_v37 = vld [vmem:[#allocation8 + $0xa60] ss:$16 sps:$4 sm:$0xff]   ;;  %v12960_v38 = vld [vmem:[#allocation8 + $0xa84] ss:$16 sps:$4 sm:$0xff]  }
 0x32d   : > { %6145 = vmatprep.subr.bf16.mxu1 %v12918_v42  ;;  %v1231_v42 = vpack.c.bf16 %v951_v40, %v937_v39  ;;  %v12985_v39 = vld [vmem:[#allocation8 + $0xa68] ss:$16 sps:$4 sm:$0xff]   ;;  %v1106_v40 = vpack.c.bf16 %v700_v34, %v686_v33  ;;  %v13006_v34 = vld [vmem:[#allocation8 + $0xb80] ss:$16 sps:$4 sm:$0xff]  }
 0x32f   : > { %4795 = vmatpush1.bf16.msra.mxu0 %v12883_v47  ;;  %v1230_v47 = vpack.c.bf16 %v950_v44, %v936_v43  ;;  %v12993_v43 = vld [vmem:[#allocation8 + $0xa8c] ss:$16 sps:$4 sm:$0xff]   ;;  %v12963_v44 = vld [vmem:[#allocation8 + $0xaa4] ss:$16 sps:$4 sm:$0xff]  }
 0x330   : > { %4796 = vmatprep.subr.bf16.mxu0 %v12894_v48  ;;  %6146 = vmatpush1.bf16.msra.mxu1 %v12916_v49  ;;  %v1245_v48 = vpack.c.bf16 %v979_v46, %v965_v45  ;;  %v964_v49 = vld [vmem:[%s14604_s27 + $0xab0] sm:$0xff]  ;;  %v12991_v45 = vld [vmem:[#allocation8 + $0xa88] ss:$16 sps:$4 sm:$0xff]   ;;  %v12996_v46 = vld [vmem:[#allocation8 + $0xaac] ss:$16 sps:$4 sm:$0xff]  }
 0x331   : > { %4666 = vmatmul.mubr.bf16.gmra.mrb[20].mxu0 %v1146_v50  ;;  %6017 = vmatmul.mubr.bf16.gmra.mrb[20].mxu1 %v1146_v50  ;;  %v978_v50 = vld [vmem:[%s14604_s27 + $0xb20] sm:$0xff] }
 0x332   : > { %4675 = vmatprep.mubr.bf16.mxu0 %v1161_v51  ;;  %6026 = vmatprep.mubr.bf16.mxu1 %v1161_v51  ;;  %v993_v51 = vld [vmem:[%s14604_s27 + $0xb98] sm:$0xff] }
 0x333   : > { %4797 = vmatpush1.bf16.msra.mxu0 %v12892_v52  ;;  %6147 = vmatprep.subr.bf16.mxu1 %v12924_v53  ;;  %v1007_v52 = vld [vmem:[%s14604_s27 + $0xc08] sm:$0xff]  ;;  %v1244_v53 = vpack.c.bf16 %v978_v50, %v964_v49  ;;  %v757_v50 = vld [vmem:[%s14604_s27 + $0x438] sm:$0xff] }
 0x334   : > { %4798 = vmatprep.subr.bf16.mxu0 %v12903_v54  ;;  %6148 = vmatpush1.bf16.msra.mxu1 %v12922_v55  ;;  %v1259_v54 = vpack.c.bf16 %v1007_v52, %v993_v51  ;;  %v992_v55 = vld [vmem:[%s14604_s27 + $0xb90] sm:$0xff]  ;;  %v743_v49 = vld [vmem:[%s14604_s27 + $0x3c8] sm:$0xff] }
 0x335   : > { %6149 = vmatprep.subr.bf16.mxu1 %v12927_v56  ;;  %v1006_v56 = vld [vmem:[%s14604_s27 + $0xc00] sm:$0xff] }
 0x336   : > { %v1258_v59 = vpack.c.bf16 %v1006_v56, %v992_v55  ;;  %v12961_v51 = vld [vmem:[#allocation8 + $0xaa0] ss:$16 sps:$4 sm:$0xff]   ;;  %v12966_v52 = vld [vmem:[#allocation8 + $0xac4] ss:$16 sps:$4 sm:$0xff]   ;;  %v1135_v55 = vpack.c.bf16 %v757_v50, %v743_v49  ;;  %v13038_v49 = vld [vmem:[#allocation8 + $0xbcc] ss:$16 sps:$4 sm:$0xff]  }
 0x337   : > { %4799 = vmatpush1.bf16.msra.mxu0 %v12901_v61  ;;  %v1020_v61 = vld [vmem:[%s14604_s27 + $0xc70] sm:$0xff] }
 0x338   : > { %4800 = vmatprep.subr.bf16.mxu0 %v12912_v62  ;;  %6150 = vmatpush1.bf16.msra.mxu1 %v12925_v63  ;;  %v1034_v62 = vld [vmem:[%s14604_s27 + $0xce0] sm:$0xff]  ;;  %v1049_v63 = vld [vmem:[%s14604_s27 + $0xd58] sm:$0xff] }
 0x339   : > { %4676 = vmatmul.mubr.bf16.gmra.mrb[24].mxu0 %v1160_v0  ;;  %6027 = vmatmul.mubr.bf16.gmra.mrb[24].mxu1 %v1160_v0  ;;  %v1063_v0 = vld [vmem:[%s14604_s27 + $0xdc8] sm:$0xff]  ;;  %v12964_v56 = vld [vmem:[#allocation8 + $0xac0] ss:$16 sps:$4 sm:$0xff]   ;;  %v13035_v50 = vld [vmem:[#allocation8 + $0xbe4] ss:$16 sps:$4 sm:$0xff]  }
 0x33a   : > { %4685 = vmatprep.mubr.bf16.mxu0 %v1175_v1  ;;  %6036 = vmatprep.mubr.bf16.mxu1 %v1175_v1  ;;  %v1272_v1 = vpack.c.bf16 %v1034_v62, %v1020_v61  ;;  %v742_v61 = vld [vmem:[%s14604_s27 + $0x3c0] sm:$0xff]  ;;  %v756_v62 = vld [vmem:[%s14604_s27 + $0x430] sm:$0xff] }
 0x33b   : > { %4801 = vmatpush1.bf16.msra.mxu0 %v12910_v2  ;;  %6151 = vmatprep.subr.bf16.mxu1 %v12933_v3  ;;  %v1287_v2 = vpack.c.bf16 %v1063_v0, %v1049_v63  ;;  %v1048_v3 = vld [vmem:[%s14604_s27 + $0xd50] sm:$0xff]  ;;  %v771_v63 = vld [vmem:[%s14604_s27 + $0x4a8] sm:$0xff]  ;;  %v785_v0 = vld [vmem:[%s14604_s27 + $0x518] sm:$0xff] }
 0x33c   : > { %4802 = vmatprep.subr.bf16.mxu0 %v12921_v4  ;;  %6152 = vmatpush1.bf16.msra.mxu1 %v12931_v5  ;;  %v1062_v4 = vld [vmem:[%s14604_s27 + $0xdc0] sm:$0xff]  ;;  %v631_v5 = vld [vmem:[%s14604_s27 + $0x48] sm:$0xff] }
 0x33d   : > { %6153 = vmatprep.subr.bf16.mxu1 %v12936_v6  ;;  %v645_v6 = vld [vmem:[%s14604_s27 + $0xb8] sm:$0xff]  ;;  %v1286_v7 = vpack.c.bf16 %v1062_v4, %v1048_v3  ;;  %v1134_v4 = vpack.c.bf16 %v756_v62, %v742_v61 }
 0x33e   : > { %v1079_v8 = vpack.c.bf16 %v645_v6, %v631_v5  ;;  %v13003_v3 = vld [vmem:[#allocation8 + $0xae8] ss:$16 sps:$4 sm:$0xff]   ;;  %v1149_v5 = vpack.c.bf16 %v785_v0, %v771_v63  ;;  %v12970_v6 = vld [vmem:[#allocation8 + $0xb00] ss:$16 sps:$4 sm:$0xff]   ;;  %v13071_v62 = vld [vmem:[#allocation8 + $0xc0c] ss:$16 sps:$4 sm:$0xff]  }
 0x33f   : > { %4803 = vmatpush1.bf16.msra.mxu0 %v12919_v11  ;;  %v659_v11 = vld [vmem:[%s14604_s27 + $0x128] sm:$0xff]  ;;  %v882_v63 = vld [vmem:[%s14604_s27 + $0x820] sm:$0xff]  ;;  %v896_v0 = vld [vmem:[%s14604_s27 + $0x890] sm:$0xff] }
 0x340   : > { %4804 = vmatprep.subr.bf16.mxu0 %v12930_v12  ;;  %6154 = vmatpush1.bf16.msra.mxu1 %v12934_v13  ;;  %v673_v12 = vld [vmem:[%s14604_s27 + $0x198] sm:$0xff]  ;;  %v1078_v13 = vpack.c.bf16 %v644_v10, %v630_v9 }
 0x341   : > { %4686 = vmatmul.mubr.bf16.gmra.mrb[28].mxu0 %v1174_v14  ;;  %6037 = vmatmul.mubr.bf16.gmra.mrb[28].mxu1 %v1174_v14  ;;  %v12946_v14 = vld [vmem:[#allocation8 + $0xa00] ss:$16 sps:$4 sm:$0xff]   ;;  %v13009_v9 = vld [vmem:[#allocation8 + $0xb08] ss:$16 sps:$4 sm:$0xff]   ;;  %v13014_v10 = vld [vmem:[#allocation8 + $0xb2c] ss:$16 sps:$4 sm:$0xff]  }
 0x342   : > { %4695 = vmatprep.mubr.bf16.mxu0 %v1189_v15  ;;  %6046 = vmatprep.mubr.bf16.mxu1 %v1189_v15  ;;  %v1093_v15 = vpack.c.bf16 %v673_v12, %v659_v11  ;;  %v770_v11 = vld [vmem:[%s14604_s27 + $0x4a0] sm:$0xff]  ;;  %v784_v12 = vld [vmem:[%s14604_s27 + $0x510] sm:$0xff] }
 0x343   : > { %4805 = vmatpush1.bf16.msra.mxu0 %v12928_v16  ;;  %6155 = vmatprep.subr.bf16.mxu1 %v12942_v17  ;;  %v12951_v16 = vld [vmem:[#allocation8 + $0xa24] ss:$16 sps:$4 sm:$0xff]   ;;  %v12973_v17 = vld [vmem:[#allocation8 + $0xa08] ss:$16 sps:$4 sm:$0xff]  }
 0x344   : > { %4806 = vmatprep.subr.bf16.mxu0 %v12939_v18  ;;  %6156 = vmatpush1.bf16.msra.mxu1 %v12940_v19  ;;  %v12978_v18 = vld [vmem:[#allocation8 + $0xa2c] ss:$16 sps:$4 sm:$0xff]   ;;  %v658_v19 = vld [vmem:[%s14604_s27 + $0x120] sm:$0xff] }
 0x345   : > { %6157 = vmatprep.subr.bf16.mxu1 %v12945_v20  ;;  %v672_v20 = vld [vmem:[%s14604_s27 + $0x190] sm:$0xff] }
 0x347   : > { %4807 = vmatpush1.bf16.msra.mxu0 %v12937_v25  ;;  %v12976_v25 = vld [vmem:[#allocation8 + $0xa28] ss:$16 sps:$4 sm:$0xff]  }
 0x348   : > { %6158 = vmatpush1.bf16.msra.mxu1 %v12943_v26  ;;  %4969 = vmatprep.subr.bf16.mxu0 %v12948_v27  ;;  %v1092_v26 = vpack.c.bf16 %v672_v20, %v658_v19  ;;  %v1107_v27 = vpack.c.bf16 %v701_v23, %v687_v22  ;;  %v12988_v20 = vld [vmem:[#allocation8 + $0xb40] ss:$16 sps:$4 sm:$0xff]   ;;  %v12999_v22 = vld [vmem:[#allocation8 + $0xb64] ss:$16 sps:$4 sm:$0xff]   ;;  %v13018_v23 = vld [vmem:[#allocation8 + $0xb48] ss:$16 sps:$4 sm:$0xff]  }
 0x349   : > { %4696 = vmatmul.mubr.bf16.gmra.mrb[32].mxu0 %v1188_v28  ;;  %6047 = vmatmul.mubr.bf16.gmra.mrb[32].mxu1 %v1188_v28  ;;  %v12952_v28 = vld [vmem:[#allocation8 + $0xa40] ss:$16 sps:$4 sm:$0xff]  }
 0x34a   : > { %4705 = vmatprep.mubr.bf16.mxu0 %v1203_v29  ;;  %6056 = vmatprep.mubr.bf16.mxu1 %v1203_v29  ;;  %v12984_v29 = vld [vmem:[#allocation8 + $0xa4c] ss:$16 sps:$4 sm:$0xff]  }
 0x34b   : > { %6320 = vmatprep.subr.bf16.mxu1 %v12975_v30  ;;  %v12957_v30 = vld [vmem:[#allocation8 + $0xa64] ss:$16 sps:$4 sm:$0xff]  }
 0x351   : > { %4706 = vmatmul.mubr.bf16.gmra.mrb[36].mxu0 %v1202_v35  ;;  %6057 = vmatmul.mubr.bf16.gmra.mrb[36].mxu1 %v1202_v35  ;;  %v715_v35 = vld [vmem:[%s14604_s27 + $0x2e8] sm:$0xff] }
 0x352   : > { %4715 = vmatprep.mubr.bf16.mxu0 %v1217_v36  ;;  %6066 = vmatprep.mubr.bf16.mxu1 %v1217_v36  ;;  %v729_v36 = vld [vmem:[%s14604_s27 + $0x358] sm:$0xff] }
 0x359   : > { %4716 = vmatmul.mubr.bf16.gmra.mrb[40].mxu0 %v1216_v41  ;;  %6067 = vmatmul.mubr.bf16.gmra.mrb[40].mxu1 %v1216_v41  ;;  %v1121_v41 = vpack.c.bf16 %v729_v36, %v715_v35  ;;  %v13029_v35 = vld [vmem:[#allocation8 + $0xb8c] ss:$16 sps:$4 sm:$0xff]   ;;  %v13017_v36 = vld [vmem:[#allocation8 + $0xba4] ss:$16 sps:$4 sm:$0xff]  }
 0x35a   : > { %4725 = vmatprep.mubr.bf16.mxu0 %v1231_v42  ;;  %6076 = vmatprep.mubr.bf16.mxu1 %v1231_v42  ;;  %v12958_v42 = vld [vmem:[#allocation8 + $0xa80] ss:$16 sps:$4 sm:$0xff]  }
 0x361   : > { %4726 = vmatmul.mubr.bf16.gmra.mrb[44].mxu0 %v1230_v47  ;;  %6077 = vmatmul.mubr.bf16.gmra.mrb[44].mxu1 %v1230_v47  ;;  %v714_v47 = vld [vmem:[%s14604_s27 + $0x2e0] sm:$0xff] }
 0x362   : > { %4735 = vmatprep.mubr.bf16.mxu0 %v1245_v48  ;;  %6086 = vmatprep.mubr.bf16.mxu1 %v1245_v48  ;;  %v728_v48 = vld [vmem:[%s14604_s27 + $0x350] sm:$0xff] }
 0x369   : > { %4736 = vmatmul.mubr.bf16.gmra.mrb[48].mxu0 %v1244_v53  ;;  %6087 = vmatmul.mubr.bf16.gmra.mrb[48].mxu1 %v1244_v53  ;;  %v12994_v53 = vld [vmem:[#allocation8 + $0xaa8] ss:$16 sps:$4 sm:$0xff]  }
 0x36a   : > { %4745 = vmatprep.mubr.bf16.mxu0 %v1259_v54  ;;  %6096 = vmatprep.mubr.bf16.mxu1 %v1259_v54  ;;  %v1120_v54 = vpack.c.bf16 %v728_v48, %v714_v47  ;;  %v13024_v48 = vld [vmem:[#allocation8 + $0xbc0] ss:$16 sps:$4 sm:$0xff]  }
 0x371   : > { %4746 = vmatmul.mubr.bf16.gmra.mrb[52].mxu0 %v1258_v59  ;;  %6097 = vmatmul.mubr.bf16.gmra.mrb[52].mxu1 %v1258_v59  ;;  %v13000_v59 = vld [vmem:[#allocation8 + $0xac8] ss:$16 sps:$4 sm:$0xff]  }
 0x372   : > { %4755 = vmatprep.mubr.bf16.mxu0 %v1273_v60  ;;  %6106 = vmatprep.mubr.bf16.mxu1 %v1273_v60  ;;  %v13005_v60 = vld [vmem:[#allocation8 + $0xaec] ss:$16 sps:$4 sm:$0xff]  }
 0x379   : > { %4756 = vmatmul.mubr.bf16.gmra.mrb[56].mxu0 %v1272_v1  ;;  %6107 = vmatmul.mubr.bf16.gmra.mrb[56].mxu1 %v1272_v1  ;;  %v12967_v1 = vld [vmem:[#allocation8 + $0xae0] ss:$16 sps:$4 sm:$0xff]  }
 0x37a   : > { %4765 = vmatprep.mubr.bf16.mxu0 %v1287_v2  ;;  %6116 = vmatprep.mubr.bf16.mxu1 %v1287_v2  ;;  %v12972_v2 = vld [vmem:[#allocation8 + $0xb04] ss:$16 sps:$4 sm:$0xff]  }
 0x381   : > { %4766 = vmatmul.mubr.bf16.gmra.mrb[60].mxu0 %v1286_v7  ;;  %6117 = vmatmul.mubr.bf16.gmra.mrb[60].mxu1 %v1286_v7  ;;  %v13011_v7 = vld [vmem:[#allocation8 + $0xb0c] ss:$16 sps:$4 sm:$0xff]  }
 0x382   : > { %4808 = vmatprep.mubr.bf16.mxu0 %v1079_v8  ;;  %6159 = vmatprep.mubr.bf16.mxu1 %v1079_v8  ;;  %v12981_v8 = vld [vmem:[#allocation8 + $0xb24] ss:$16 sps:$4 sm:$0xff]  }
 0x389   : > { %4809 = vmatmul.mubr.bf16.vlgmr.msra.gmra.mrb[0].mxu0 %v1078_v13  ;;  %6160 = vmatmul.mubr.bf16.vlgmr.msra.gmra.mrb[0].mxu1 %v1078_v13  ;;  %v799_v13 = vld [vmem:[%s14604_s27 + $0x588] sm:$0xff] }
 0x38a   : > { %4970 = vmatpush1.bf16.msra.mxu0 %v12946_v14  ;;  %4818 = vmatprep.mubr.bf16.mxu0 %v1093_v15  ;;  %v813_v14 = vld [vmem:[%s14604_s27 + $0x5f8] sm:$0xff] }
 0x38b   : > { %6169 = vmatprep.mubr.bf16.mxu1 %v1093_v15  ;;  %4971 = vmatprep.subr.bf16.mxu0 %v12951_v16  ;;  %v12979_v15 = vld [vmem:[#allocation8 + $0xb20] ss:$16 sps:$4 sm:$0xff]   ;;  %v12990_v16 = vld [vmem:[#allocation8 + $0xb44] ss:$16 sps:$4 sm:$0xff]   ;;  %v1163_v19 = vpack.c.bf16 %v813_v14, %v799_v13  ;;  %v967_v13 = vld [vmem:[%s14604_s27 + $0xac8] sm:$0xff] }
 0x38c   : > { %6321 = vmatpush1.bf16.msra.mxu1 %v12973_v17  ;;  %v13012_v17 = vld [vmem:[#allocation8 + $0xb28] ss:$16 sps:$4 sm:$0xff]  }
 0x38d   : > { %6322 = vmatprep.subr.bf16.mxu1 %v12978_v18  ;;  %v1148_v18 = vpack.c.bf16 %v784_v12, %v770_v11  ;;  %v938_v11 = vld [vmem:[%s14604_s27 + $0x9e0] sm:$0xff]  ;;  %v952_v12 = vld [vmem:[%s14604_s27 + $0xa50] sm:$0xff]  ;;  %v981_v14 = vld [vmem:[%s14604_s27 + $0xb38] sm:$0xff] }
 0x38e   : > { %4972 = vmatpush1.bf16.msra.mxu0 %v12949_v21  ;;  %v13020_v21 = vld [vmem:[#allocation8 + $0xb4c] ss:$16 sps:$4 sm:$0xff]  }
 0x38f   : > { %4973 = vmatprep.subr.bf16.mxu0 %v12954_v24  ;;  %v13023_v24 = vld [vmem:[#allocation8 + $0xb6c] ss:$16 sps:$4 sm:$0xff]  }
 0x390   : > { %6323 = vmatpush1.bf16.msra.mxu1 %v12976_v25  ;;  %v798_v25 = vld [vmem:[%s14604_s27 + $0x580] sm:$0xff] }
 0x391   : > { %4819 = vmatmul.mubr.bf16.gmra.mrb[4].mxu0 %v1092_v26  ;;  %6170 = vmatmul.mubr.bf16.gmra.mrb[4].mxu1 %v1092_v26  ;;  %v812_v26 = vld [vmem:[%s14604_s27 + $0x5f0] sm:$0xff] }
 0x392   : > { %4828 = vmatprep.mubr.bf16.mxu0 %v1107_v27  ;;  %6179 = vmatprep.mubr.bf16.mxu1 %v1107_v27  ;;  %v827_v27 = vld [vmem:[%s14604_s27 + $0x668] sm:$0xff] }
 0x393   : > { %4974 = vmatpush1.bf16.msra.mxu0 %v12952_v28  ;;  %6324 = vmatprep.subr.bf16.mxu1 %v12984_v29  ;;  %v841_v28 = vld [vmem:[%s14604_s27 + $0x6d8] sm:$0xff]  ;;  %v12997_v29 = vld [vmem:[#allocation8 + $0xb60] ss:$16 sps:$4 sm:$0xff]  }
 0x394   : > { %4975 = vmatprep.subr.bf16.mxu0 %v12957_v30  ;;  %6325 = vmatpush1.bf16.msra.mxu1 %v12982_v31  ;;  %v13008_v30 = vld [vmem:[#allocation8 + $0xb84] ss:$16 sps:$4 sm:$0xff]   ;;  %v13021_v31 = vld [vmem:[#allocation8 + $0xb68] ss:$16 sps:$4 sm:$0xff]   ;;  %v1177_v33 = vpack.c.bf16 %v841_v28, %v827_v27 }
 0x395   : > { %6326 = vmatprep.subr.bf16.mxu1 %v12987_v32  ;;  %v1162_v32 = vpack.c.bf16 %v812_v26, %v798_v25  ;;  %v1023_v25 = vld [vmem:[%s14604_s27 + $0xc88] sm:$0xff]  ;;  %v1037_v26 = vld [vmem:[%s14604_s27 + $0xcf8] sm:$0xff] }
 0x396   : > { %v1275_v28 = vpack.c.bf16 %v1037_v26, %v1023_v25  ;;  %v13098_v25 = vld [vmem:[#allocation8 + $0xccc] ss:$16 sps:$4 sm:$0xff]   ;;  %v13065_v26 = vld [vmem:[#allocation8 + $0xce4] ss:$16 sps:$4 sm:$0xff]  }
 0x397   : > { %4976 = vmatpush1.bf16.msra.mxu0 %v12955_v37  ;;  %v13027_v37 = vld [vmem:[#allocation8 + $0xb88] ss:$16 sps:$4 sm:$0xff]  }
 0x398   : > { %4977 = vmatprep.subr.bf16.mxu0 %v12960_v38  ;;  %6327 = vmatpush1.bf16.msra.mxu1 %v12985_v39  ;;  %v13032_v38 = vld [vmem:[#allocation8 + $0xbac] ss:$16 sps:$4 sm:$0xff]   ;;  %v826_v39 = vld [vmem:[%s14604_s27 + $0x660] sm:$0xff] }
 0x399   : > { %4829 = vmatmul.mubr.bf16.gmra.mrb[8].mxu0 %v1106_v40  ;;  %6180 = vmatmul.mubr.bf16.gmra.mrb[8].mxu1 %v1106_v40  ;;  %v840_v40 = vld [vmem:[%s14604_s27 + $0x6d0] sm:$0xff] }
 0x39a   : > { %4838 = vmatprep.mubr.bf16.mxu0 %v1121_v41  ;;  %6189 = vmatprep.mubr.bf16.mxu1 %v1121_v41  ;;  %v855_v41 = vld [vmem:[%s14604_s27 + $0x748] sm:$0xff] }
 0x39b   : > { %4978 = vmatpush1.bf16.msra.mxu0 %v12958_v42  ;;  %6328 = vmatprep.subr.bf16.mxu1 %v12993_v43  ;;  %v869_v42 = vld [vmem:[%s14604_s27 + $0x7b8] sm:$0xff]  ;;  %v13015_v43 = vld [vmem:[#allocation8 + $0xba0] ss:$16 sps:$4 sm:$0xff]  }
 0x39c   : > { %4979 = vmatprep.subr.bf16.mxu0 %v12963_v44  ;;  %6329 = vmatpush1.bf16.msra.mxu1 %v12991_v45  ;;  %v13026_v44 = vld [vmem:[#allocation8 + $0xbc4] ss:$16 sps:$4 sm:$0xff]   ;;  %v13030_v45 = vld [vmem:[#allocation8 + $0xba8] ss:$16 sps:$4 sm:$0xff]   ;;  %v1191_v47 = vpack.c.bf16 %v869_v42, %v855_v41 }
 0x39d   : > { %6330 = vmatprep.subr.bf16.mxu1 %v12996_v46  ;;  %v1176_v46 = vpack.c.bf16 %v840_v40, %v826_v39  ;;  %v632_v41 = vld [vmem:[%s14604_s27 + $0x50] sm:$0xff]  ;;  %v646_v42 = vld [vmem:[%s14604_s27 + $0xc0] sm:$0xff] }
 0x39f   : > { %4980 = vmatpush1.bf16.msra.mxu0 %v12961_v51  ;;  %v13036_v51 = vld [vmem:[#allocation8 + $0xbc8] ss:$16 sps:$4 sm:$0xff]  }
 0x3a0   : > { %4981 = vmatprep.subr.bf16.mxu0 %v12966_v52  ;;  %6331 = vmatpush1.bf16.msra.mxu1 %v12994_v53  ;;  %v13041_v52 = vld [vmem:[#allocation8 + $0xbec] ss:$16 sps:$4 sm:$0xff]   ;;  %v854_v53 = vld [vmem:[%s14604_s27 + $0x740] sm:$0xff] }
 0x3a1   : > { %4839 = vmatmul.mubr.bf16.gmra.mrb[12].mxu0 %v1120_v54  ;;  %6190 = vmatmul.mubr.bf16.gmra.mrb[12].mxu1 %v1120_v54  ;;  %v868_v54 = vld [vmem:[%s14604_s27 + $0x7b0] sm:$0xff] }
 0x3a2   : > { %4848 = vmatprep.mubr.bf16.mxu0 %v1135_v55  ;;  %6199 = vmatprep.mubr.bf16.mxu1 %v1135_v55  ;;  %v883_v55 = vld [vmem:[%s14604_s27 + $0x828] sm:$0xff] }
 0x3a3   : > { %4982 = vmatpush1.bf16.msra.mxu0 %v12964_v56  ;;  %6332 = vmatprep.subr.bf16.mxu1 %v13002_v57  ;;  %v897_v56 = vld [vmem:[%s14604_s27 + $0x898] sm:$0xff]  ;;  %v13033_v57 = vld [vmem:[#allocation8 + $0xbe0] ss:$16 sps:$4 sm:$0xff]  }
 0x3a4   : > { %4983 = vmatprep.subr.bf16.mxu0 %v12969_v58  ;;  %6333 = vmatpush1.bf16.msra.mxu1 %v13000_v59  ;;  %v13039_v58 = vld [vmem:[#allocation8 + $0xbe8] ss:$16 sps:$4 sm:$0xff]   ;;  %v13044_v59 = vld [vmem:[#allocation8 + $0xc04] ss:$16 sps:$4 sm:$0xff]   ;;  %v1205_v61 = vpack.c.bf16 %v897_v56, %v883_v55 }
 0x3a5   : > { %6334 = vmatprep.subr.bf16.mxu1 %v13005_v60  ;;  %v1190_v60 = vpack.c.bf16 %v868_v54, %v854_v53  ;;  %v13045_v53 = vld [vmem:[#allocation8 + $0xc20] ss:$16 sps:$4 sm:$0xff]   ;;  %v689_v54 = vld [vmem:[%s14604_s27 + $0x218] sm:$0xff]  ;;  %v703_v55 = vld [vmem:[%s14604_s27 + $0x288] sm:$0xff] }
 0x3a6   : > { %v13050_v56 = vld [vmem:[#allocation8 + $0xc44] ss:$16 sps:$4 sm:$0xff]  }
 0x3a7   : > { %4984 = vmatpush1.bf16.msra.mxu0 %v12967_v1  ;;  %v911_v1 = vld [vmem:[%s14604_s27 + $0x908] sm:$0xff] }
 0x3a8   : > { %4985 = vmatprep.subr.bf16.mxu0 %v12972_v2  ;;  %6335 = vmatpush1.bf16.msra.mxu1 %v13003_v3  ;;  %v925_v2 = vld [vmem:[%s14604_s27 + $0x978] sm:$0xff]  ;;  %v1204_v3 = vpack.c.bf16 %v896_v0, %v882_v63 }
 0x3a9   : > { %4849 = vmatmul.mubr.bf16.gmra.mrb[16].mxu0 %v1134_v4  ;;  %6200 = vmatmul.mubr.bf16.gmra.mrb[16].mxu1 %v1134_v4  ;;  %v1219_v4 = vpack.c.bf16 %v925_v2, %v911_v1  ;;  %v13078_v63 = vld [vmem:[#allocation8 + $0xc48] ss:$16 sps:$4 sm:$0xff]   ;;  %v13083_v0 = vld [vmem:[#allocation8 + $0xc6c] ss:$16 sps:$4 sm:$0xff]   ;;  %v688_v1 = vld [vmem:[%s14604_s27 + $0x210] sm:$0xff] }
 0x3aa   : > { %4858 = vmatprep.mubr.bf16.mxu0 %v1149_v5  ;;  %6209 = vmatprep.mubr.bf16.mxu1 %v1149_v5  ;;  %v910_v5 = vld [vmem:[%s14604_s27 + $0x900] sm:$0xff] }
 0x3ab   : > { %4986 = vmatpush1.bf16.msra.mxu0 %v12970_v6  ;;  %6336 = vmatprep.subr.bf16.mxu1 %v13011_v7  ;;  %v924_v6 = vld [vmem:[%s14604_s27 + $0x970] sm:$0xff]  ;;  %v939_v7 = vld [vmem:[%s14604_s27 + $0x9e8] sm:$0xff]  ;;  %v702_v2 = vld [vmem:[%s14604_s27 + $0x280] sm:$0xff] }
 0x3ac   : > { %4987 = vmatprep.subr.bf16.mxu0 %v12981_v8  ;;  %6337 = vmatpush1.bf16.msra.mxu1 %v13009_v9  ;;  %v953_v8 = vld [vmem:[%s14604_s27 + $0xa58] sm:$0xff]  ;;  %v1218_v9 = vpack.c.bf16 %v924_v6, %v910_v5  ;;  %v13051_v5 = vld [vmem:[#allocation8 + $0xc60] ss:$16 sps:$4 sm:$0xff]   ;;  %v13056_v6 = vld [vmem:[#allocation8 + $0xc84] ss:$16 sps:$4 sm:$0xff]  }
 0x3ad   : > { %6338 = vmatprep.subr.bf16.mxu1 %v13014_v10  ;;  %v1233_v10 = vpack.c.bf16 %v953_v8, %v939_v7  ;;  %v13081_v7 = vld [vmem:[#allocation8 + $0xc68] ss:$16 sps:$4 sm:$0xff]   ;;  %v1108_v8 = vpack.c.bf16 %v702_v2, %v688_v1  ;;  %v13102_v2 = vld [vmem:[#allocation8 + $0xd80] ss:$16 sps:$4 sm:$0xff]  }
 0x3af   : > { %4988 = vmatpush1.bf16.msra.mxu0 %v12979_v15  ;;  %v1232_v15 = vpack.c.bf16 %v952_v12, %v938_v11  ;;  %v13089_v11 = vld [vmem:[#allocation8 + $0xc8c] ss:$16 sps:$4 sm:$0xff]   ;;  %v13059_v12 = vld [vmem:[#allocation8 + $0xca4] ss:$16 sps:$4 sm:$0xff]  }
 0x3b0   : > { %4989 = vmatprep.subr.bf16.mxu0 %v12990_v16  ;;  %6339 = vmatpush1.bf16.msra.mxu1 %v13012_v17  ;;  %v1247_v16 = vpack.c.bf16 %v981_v14, %v967_v13  ;;  %v966_v17 = vld [vmem:[%s14604_s27 + $0xac0] sm:$0xff]  ;;  %v13087_v13 = vld [vmem:[#allocation8 + $0xc88] ss:$16 sps:$4 sm:$0xff]   ;;  %v13092_v14 = vld [vmem:[#allocation8 + $0xcac] ss:$16 sps:$4 sm:$0xff]  }
 0x3b1   : > { %4859 = vmatmul.mubr.bf16.gmra.mrb[20].mxu0 %v1148_v18  ;;  %6210 = vmatmul.mubr.bf16.gmra.mrb[20].mxu1 %v1148_v18  ;;  %v980_v18 = vld [vmem:[%s14604_s27 + $0xb30] sm:$0xff] }
 0x3b2   : > { %4868 = vmatprep.mubr.bf16.mxu0 %v1163_v19  ;;  %6219 = vmatprep.mubr.bf16.mxu1 %v1163_v19  ;;  %v995_v19 = vld [vmem:[%s14604_s27 + $0xba8] sm:$0xff] }
 0x3b3   : > { %4990 = vmatpush1.bf16.msra.mxu0 %v12988_v20  ;;  %6340 = vmatprep.subr.bf16.mxu1 %v13020_v21  ;;  %v1009_v20 = vld [vmem:[%s14604_s27 + $0xc18] sm:$0xff]  ;;  %v1246_v21 = vpack.c.bf16 %v980_v18, %v966_v17  ;;  %v759_v18 = vld [vmem:[%s14604_s27 + $0x448] sm:$0xff] }
 0x3b4   : > { %4991 = vmatprep.subr.bf16.mxu0 %v12999_v22  ;;  %6341 = vmatpush1.bf16.msra.mxu1 %v13018_v23  ;;  %v1261_v22 = vpack.c.bf16 %v1009_v20, %v995_v19  ;;  %v994_v23 = vld [vmem:[%s14604_s27 + $0xba0] sm:$0xff]  ;;  %v745_v17 = vld [vmem:[%s14604_s27 + $0x3d8] sm:$0xff] }
 0x3b5   : > { %6342 = vmatprep.subr.bf16.mxu1 %v13023_v24  ;;  %v1008_v24 = vld [vmem:[%s14604_s27 + $0xc10] sm:$0xff] }
 0x3b6   : > { %v1260_v27 = vpack.c.bf16 %v1008_v24, %v994_v23  ;;  %v13057_v19 = vld [vmem:[#allocation8 + $0xca0] ss:$16 sps:$4 sm:$0xff]   ;;  %v13062_v20 = vld [vmem:[#allocation8 + $0xcc4] ss:$16 sps:$4 sm:$0xff]   ;;  %v1137_v23 = vpack.c.bf16 %v759_v18, %v745_v17  ;;  %v13134_v17 = vld [vmem:[#allocation8 + $0xdcc] ss:$16 sps:$4 sm:$0xff]  }
 0x3b7   : > { %4992 = vmatpush1.bf16.msra.mxu0 %v12997_v29  ;;  %v1022_v29 = vld [vmem:[%s14604_s27 + $0xc80] sm:$0xff] }
 0x3b8   : > { %4993 = vmatprep.subr.bf16.mxu0 %v13008_v30  ;;  %6343 = vmatpush1.bf16.msra.mxu1 %v13021_v31  ;;  %v1036_v30 = vld [vmem:[%s14604_s27 + $0xcf0] sm:$0xff]  ;;  %v1051_v31 = vld [vmem:[%s14604_s27 + $0xd68] sm:$0xff] }
 0x3b9   : > { %4869 = vmatmul.mubr.bf16.gmra.mrb[24].mxu0 %v1162_v32  ;;  %6220 = vmatmul.mubr.bf16.gmra.mrb[24].mxu1 %v1162_v32  ;;  %v1065_v32 = vld [vmem:[%s14604_s27 + $0xdd8] sm:$0xff]  ;;  %v13060_v24 = vld [vmem:[#allocation8 + $0xcc0] ss:$16 sps:$4 sm:$0xff]   ;;  %v13131_v18 = vld [vmem:[#allocation8 + $0xde4] ss:$16 sps:$4 sm:$0xff]  }
 0x3ba   : > { %4878 = vmatprep.mubr.bf16.mxu0 %v1177_v33  ;;  %6229 = vmatprep.mubr.bf16.mxu1 %v1177_v33  ;;  %v1274_v33 = vpack.c.bf16 %v1036_v30, %v1022_v29  ;;  %v744_v29 = vld [vmem:[%s14604_s27 + $0x3d0] sm:$0xff]  ;;  %v758_v30 = vld [vmem:[%s14604_s27 + $0x440] sm:$0xff] }
 0x3bb   : > { %4994 = vmatpush1.bf16.msra.mxu0 %v13006_v34  ;;  %6344 = vmatprep.subr.bf16.mxu1 %v13029_v35  ;;  %v1289_v34 = vpack.c.bf16 %v1065_v32, %v1051_v31  ;;  %v1050_v35 = vld [vmem:[%s14604_s27 + $0xd60] sm:$0xff]  ;;  %v773_v31 = vld [vmem:[%s14604_s27 + $0x4b8] sm:$0xff]  ;;  %v787_v32 = vld [vmem:[%s14604_s27 + $0x528] sm:$0xff] }
 0x3bc   : > { %4995 = vmatprep.subr.bf16.mxu0 %v13017_v36  ;;  %6345 = vmatpush1.bf16.msra.mxu1 %v13027_v37  ;;  %v1064_v36 = vld [vmem:[%s14604_s27 + $0xdd0] sm:$0xff]  ;;  %v633_v37 = vld [vmem:[%s14604_s27 + $0x58] sm:$0xff] }
 0x3bd   : > { %6346 = vmatprep.subr.bf16.mxu1 %v13032_v38  ;;  %v647_v38 = vld [vmem:[%s14604_s27 + $0xc8] sm:$0xff]  ;;  %v1288_v39 = vpack.c.bf16 %v1064_v36, %v1050_v35  ;;  %v1136_v36 = vpack.c.bf16 %v758_v30, %v744_v29  ;;  %v884_v29 = vld [vmem:[%s14604_s27 + $0x830] sm:$0xff]  ;;  %v898_v30 = vld [vmem:[%s14604_s27 + $0x8a0] sm:$0xff] }
 0x3be   : > { %v1081_v40 = vpack.c.bf16 %v647_v38, %v633_v37  ;;  %v13099_v35 = vld [vmem:[#allocation8 + $0xce8] ss:$16 sps:$4 sm:$0xff]   ;;  %v1151_v37 = vpack.c.bf16 %v787_v32, %v773_v31  ;;  %v13066_v38 = vld [vmem:[#allocation8 + $0xd00] ss:$16 sps:$4 sm:$0xff]  }
 0x3bf   : > { %4996 = vmatpush1.bf16.msra.mxu0 %v13015_v43  ;;  %v661_v43 = vld [vmem:[%s14604_s27 + $0x138] sm:$0xff]  ;;  %v927_v32 = vld [vmem:[%s14604_s27 + $0x988] sm:$0xff] }
 0x3c0   : > { %4997 = vmatprep.subr.bf16.mxu0 %v13026_v44  ;;  %6347 = vmatpush1.bf16.msra.mxu1 %v13030_v45  ;;  %v675_v44 = vld [vmem:[%s14604_s27 + $0x1a8] sm:$0xff]  ;;  %v1080_v45 = vpack.c.bf16 %v646_v42, %v632_v41  ;;  %v913_v31 = vld [vmem:[%s14604_s27 + $0x918] sm:$0xff] }
 0x3c1   : > { %4879 = vmatmul.mubr.bf16.gmra.mrb[28].mxu0 %v1176_v46  ;;  %6230 = vmatmul.mubr.bf16.gmra.mrb[28].mxu1 %v1176_v46  ;;  %v13042_v46 = vld [vmem:[#allocation8 + $0xc00] ss:$16 sps:$4 sm:$0xff]   ;;  %v13105_v41 = vld [vmem:[#allocation8 + $0xd08] ss:$16 sps:$4 sm:$0xff]   ;;  %v13110_v42 = vld [vmem:[#allocation8 + $0xd2c] ss:$16 sps:$4 sm:$0xff]  }
 0x3c2   : > { %4888 = vmatprep.mubr.bf16.mxu0 %v1191_v47  ;;  %6239 = vmatprep.mubr.bf16.mxu1 %v1191_v47  ;;  %v1095_v47 = vpack.c.bf16 %v675_v44, %v661_v43  ;;  %v772_v43 = vld [vmem:[%s14604_s27 + $0x4b0] sm:$0xff]  ;;  %v786_v44 = vld [vmem:[%s14604_s27 + $0x520] sm:$0xff] }
 0x3c3   : > { %4998 = vmatpush1.bf16.msra.mxu0 %v13024_v48  ;;  %6348 = vmatprep.subr.bf16.mxu1 %v13038_v49  ;;  %v13047_v48 = vld [vmem:[#allocation8 + $0xc24] ss:$16 sps:$4 sm:$0xff]   ;;  %v13069_v49 = vld [vmem:[#allocation8 + $0xc08] ss:$16 sps:$4 sm:$0xff]  }
 0x3c4   : > { %4999 = vmatprep.subr.bf16.mxu0 %v13035_v50  ;;  %6349 = vmatpush1.bf16.msra.mxu1 %v13036_v51  ;;  %v13074_v50 = vld [vmem:[#allocation8 + $0xc2c] ss:$16 sps:$4 sm:$0xff]   ;;  %v660_v51 = vld [vmem:[%s14604_s27 + $0x130] sm:$0xff] }
 0x3c5   : > { %6350 = vmatprep.subr.bf16.mxu1 %v13041_v52  ;;  %v674_v52 = vld [vmem:[%s14604_s27 + $0x1a0] sm:$0xff] }
 0x3c7   : > { %5000 = vmatpush1.bf16.msra.mxu0 %v13033_v57  ;;  %v13072_v57 = vld [vmem:[#allocation8 + $0xc28] ss:$16 sps:$4 sm:$0xff]  }
 0x3c8   : > { %6351 = vmatpush1.bf16.msra.mxu1 %v13039_v58  ;;  %5162 = vmatprep.subr.bf16.mxu0 %v13044_v59  ;;  %v1094_v58 = vpack.c.bf16 %v674_v52, %v660_v51  ;;  %v1109_v59 = vpack.c.bf16 %v703_v55, %v689_v54  ;;  %v13084_v52 = vld [vmem:[#allocation8 + $0xd40] ss:$16 sps:$4 sm:$0xff]   ;;  %v13095_v54 = vld [vmem:[#allocation8 + $0xd64] ss:$16 sps:$4 sm:$0xff]   ;;  %v13114_v55 = vld [vmem:[#allocation8 + $0xd48] ss:$16 sps:$4 sm:$0xff]  }
 0x3c9   : > { %4889 = vmatmul.mubr.bf16.gmra.mrb[32].mxu0 %v1190_v60  ;;  %6240 = vmatmul.mubr.bf16.gmra.mrb[32].mxu1 %v1190_v60  ;;  %v13048_v60 = vld [vmem:[#allocation8 + $0xc40] ss:$16 sps:$4 sm:$0xff]  }
 0x3ca   : > { %4898 = vmatprep.mubr.bf16.mxu0 %v1205_v61  ;;  %6249 = vmatprep.mubr.bf16.mxu1 %v1205_v61  ;;  %v13080_v61 = vld [vmem:[#allocation8 + $0xc4c] ss:$16 sps:$4 sm:$0xff]  }
 0x3cb   : > { %6513 = vmatprep.subr.bf16.mxu1 %v13071_v62  ;;  %v13053_v62 = vld [vmem:[#allocation8 + $0xc64] ss:$16 sps:$4 sm:$0xff]  }
 0x3d1   : > { %4899 = vmatmul.mubr.bf16.gmra.mrb[36].mxu0 %v1204_v3  ;;  %6250 = vmatmul.mubr.bf16.gmra.mrb[36].mxu1 %v1204_v3  ;;  %v717_v3 = vld [vmem:[%s14604_s27 + $0x2f8] sm:$0xff] }
 0x3d2   : > { %4908 = vmatprep.mubr.bf16.mxu0 %v1219_v4  ;;  %6259 = vmatprep.mubr.bf16.mxu1 %v1219_v4  ;;  %v731_v4 = vld [vmem:[%s14604_s27 + $0x368] sm:$0xff] }
 0x3d9   : > { %4909 = vmatmul.mubr.bf16.gmra.mrb[40].mxu0 %v1218_v9  ;;  %6260 = vmatmul.mubr.bf16.gmra.mrb[40].mxu1 %v1218_v9  ;;  %v1123_v9 = vpack.c.bf16 %v731_v4, %v717_v3  ;;  %v13125_v3 = vld [vmem:[#allocation8 + $0xd8c] ss:$16 sps:$4 sm:$0xff]   ;;  %v13113_v4 = vld [vmem:[#allocation8 + $0xda4] ss:$16 sps:$4 sm:$0xff]  }
 0x3da   : > { %4918 = vmatprep.mubr.bf16.mxu0 %v1233_v10  ;;  %6269 = vmatprep.mubr.bf16.mxu1 %v1233_v10  ;;  %v13054_v10 = vld [vmem:[#allocation8 + $0xc80] ss:$16 sps:$4 sm:$0xff]  }
 0x3e1   : > { %4919 = vmatmul.mubr.bf16.gmra.mrb[44].mxu0 %v1232_v15  ;;  %6270 = vmatmul.mubr.bf16.gmra.mrb[44].mxu1 %v1232_v15  ;;  %v716_v15 = vld [vmem:[%s14604_s27 + $0x2f0] sm:$0xff] }
 0x3e2   : > { %4928 = vmatprep.mubr.bf16.mxu0 %v1247_v16  ;;  %6279 = vmatprep.mubr.bf16.mxu1 %v1247_v16  ;;  %v730_v16 = vld [vmem:[%s14604_s27 + $0x360] sm:$0xff] }
 0x3e9   : > { %4929 = vmatmul.mubr.bf16.gmra.mrb[48].mxu0 %v1246_v21  ;;  %6280 = vmatmul.mubr.bf16.gmra.mrb[48].mxu1 %v1246_v21  ;;  %v13090_v21 = vld [vmem:[#allocation8 + $0xca8] ss:$16 sps:$4 sm:$0xff]  }
 0x3ea   : > { %4938 = vmatprep.mubr.bf16.mxu0 %v1261_v22  ;;  %6289 = vmatprep.mubr.bf16.mxu1 %v1261_v22  ;;  %v1122_v22 = vpack.c.bf16 %v730_v16, %v716_v15  ;;  %v13120_v16 = vld [vmem:[#allocation8 + $0xdc0] ss:$16 sps:$4 sm:$0xff]  }
 0x3f1   : > { %4939 = vmatmul.mubr.bf16.gmra.mrb[52].mxu0 %v1260_v27  ;;  %6290 = vmatmul.mubr.bf16.gmra.mrb[52].mxu1 %v1260_v27  ;;  %v13096_v27 = vld [vmem:[#allocation8 + $0xcc8] ss:$16 sps:$4 sm:$0xff]  }
 0x3f2   : > { %4948 = vmatprep.mubr.bf16.mxu0 %v1275_v28  ;;  %6299 = vmatprep.mubr.bf16.mxu1 %v1275_v28  ;;  %v13101_v28 = vld [vmem:[#allocation8 + $0xcec] ss:$16 sps:$4 sm:$0xff]  }
 0x3f9   : > { %4949 = vmatmul.mubr.bf16.gmra.mrb[56].mxu0 %v1274_v33  ;;  %6300 = vmatmul.mubr.bf16.gmra.mrb[56].mxu1 %v1274_v33  ;;  %v13063_v33 = vld [vmem:[#allocation8 + $0xce0] ss:$16 sps:$4 sm:$0xff]  }
 0x3fa   : > { %4958 = vmatprep.mubr.bf16.mxu0 %v1289_v34  ;;  %6309 = vmatprep.mubr.bf16.mxu1 %v1289_v34  ;;  %v13068_v34 = vld [vmem:[#allocation8 + $0xd04] ss:$16 sps:$4 sm:$0xff]  }
 0x401   : > { %4959 = vmatmul.mubr.bf16.gmra.mrb[60].mxu0 %v1288_v39  ;;  %6310 = vmatmul.mubr.bf16.gmra.mrb[60].mxu1 %v1288_v39  ;;  %v13107_v39 = vld [vmem:[#allocation8 + $0xd0c] ss:$16 sps:$4 sm:$0xff]  }
 0x402   : > { %5001 = vmatprep.mubr.bf16.mxu0 %v1081_v40  ;;  %6352 = vmatprep.mubr.bf16.mxu1 %v1081_v40  ;;  %v13077_v40 = vld [vmem:[#allocation8 + $0xd24] ss:$16 sps:$4 sm:$0xff]  }
 0x409   : > { %5002 = vmatmul.mubr.bf16.vlgmr.msra.gmra.mrb[0].mxu0 %v1080_v45  ;;  %6353 = vmatmul.mubr.bf16.vlgmr.msra.gmra.mrb[0].mxu1 %v1080_v45  ;;  %v801_v45 = vld [vmem:[%s14604_s27 + $0x598] sm:$0xff] }
 0x40a   : > { %5163 = vmatpush1.bf16.msra.mxu0 %v13042_v46  ;;  %5011 = vmatprep.mubr.bf16.mxu0 %v1095_v47  ;;  %v815_v46 = vld [vmem:[%s14604_s27 + $0x608] sm:$0xff] }
 0x40b   : > { %6362 = vmatprep.mubr.bf16.mxu1 %v1095_v47  ;;  %5164 = vmatprep.subr.bf16.mxu0 %v13047_v48  ;;  %v13075_v47 = vld [vmem:[#allocation8 + $0xd20] ss:$16 sps:$4 sm:$0xff]   ;;  %v13086_v48 = vld [vmem:[#allocation8 + $0xd44] ss:$16 sps:$4 sm:$0xff]   ;;  %v1165_v51 = vpack.c.bf16 %v815_v46, %v801_v45 }
 0x40c   : > { %6514 = vmatpush1.bf16.msra.mxu1 %v13069_v49  ;;  %v13108_v49 = vld [vmem:[#allocation8 + $0xd28] ss:$16 sps:$4 sm:$0xff]  }
 0x40d   : > { %6515 = vmatprep.subr.bf16.mxu1 %v13074_v50  ;;  %v1150_v50 = vpack.c.bf16 %v786_v44, %v772_v43  ;;  %v969_v43 = vld [vmem:[%s14604_s27 + $0xad8] sm:$0xff]  ;;  %v983_v44 = vld [vmem:[%s14604_s27 + $0xb48] sm:$0xff] }
 0x40e   : > { %5165 = vmatpush1.bf16.msra.mxu0 %v13045_v53  ;;  %v13116_v53 = vld [vmem:[#allocation8 + $0xd4c] ss:$16 sps:$4 sm:$0xff]   ;;  %v1249_v46 = vpack.c.bf16 %v983_v44, %v969_v43 }
 0x40f   : > { %5166 = vmatprep.subr.bf16.mxu0 %v13050_v56  ;;  %v13119_v56 = vld [vmem:[#allocation8 + $0xd6c] ss:$16 sps:$4 sm:$0xff]  }
 0x410   : > { %6516 = vmatpush1.bf16.msra.mxu1 %v13072_v57  ;;  %v800_v57 = vld [vmem:[%s14604_s27 + $0x590] sm:$0xff]  ;;  %v13168_v44 = vld [vmem:[#allocation11 + $0x40] ss:$8 sps:$4 sm:$0xff]  }
 0x411   : > { %5012 = vmatmul.mubr.bf16.gmra.mrb[4].mxu0 %v1094_v58  ;;  %6363 = vmatmul.mubr.bf16.gmra.mrb[4].mxu1 %v1094_v58  ;;  %v814_v58 = vld [vmem:[%s14604_s27 + $0x600] sm:$0xff] }
 0x412   : > { %5021 = vmatprep.mubr.bf16.mxu0 %v1109_v59  ;;  %6372 = vmatprep.mubr.bf16.mxu1 %v1109_v59  ;;  %v829_v59 = vld [vmem:[%s14604_s27 + $0x678] sm:$0xff]  ;;  %v13159_v43 = vld [vmem:[#allocation14 + $0x40] ss:$8 sps:$4 sm:$0xff]  }
 0x413   : > { %5167 = vmatpush1.bf16.msra.mxu0 %v13048_v60  ;;  %6517 = vmatprep.subr.bf16.mxu1 %v13080_v61  ;;  %v843_v60 = vld [vmem:[%s14604_s27 + $0x6e8] sm:$0xff]  ;;  %v13093_v61 = vld [vmem:[#allocation8 + $0xd60] ss:$16 sps:$4 sm:$0xff]  }
 0x414   : > { %5168 = vmatprep.subr.bf16.mxu0 %v13053_v62  ;;  %6518 = vmatpush1.bf16.msra.mxu1 %v13078_v63  ;;  %v13104_v62 = vld [vmem:[#allocation8 + $0xd84] ss:$16 sps:$4 sm:$0xff]   ;;  %v13117_v63 = vld [vmem:[#allocation8 + $0xd68] ss:$16 sps:$4 sm:$0xff]   ;;  %v1179_v1 = vpack.c.bf16 %v843_v60, %v829_v59 }
 0x415   : > { %6519 = vmatprep.subr.bf16.mxu1 %v13083_v0  ;;  %v1164_v0 = vpack.c.bf16 %v814_v58, %v800_v57  ;;  %v1039_v57 = vld [vmem:[%s14604_s27 + $0xd08] sm:$0xff] }
 0x416   : > { %v13146_v60 = vld [vmem:[#allocation11 + $0x4] ss:$8 sps:$4 sm:$0xff]  }
 0x417   : > { %5169 = vmatpush1.bf16.msra.mxu0 %v13051_v5  ;;  %v13123_v5 = vld [vmem:[#allocation8 + $0xd88] ss:$16 sps:$4 sm:$0xff]  }
 0x418   : > { %5170 = vmatprep.subr.bf16.mxu0 %v13056_v6  ;;  %6520 = vmatpush1.bf16.msra.mxu1 %v13081_v7  ;;  %v13128_v6 = vld [vmem:[#allocation8 + $0xdac] ss:$16 sps:$4 sm:$0xff]   ;;  %v828_v7 = vld [vmem:[%s14604_s27 + $0x670] sm:$0xff] }
 0x419   : > { %5022 = vmatmul.mubr.bf16.gmra.mrb[8].mxu0 %v1108_v8  ;;  %6373 = vmatmul.mubr.bf16.gmra.mrb[8].mxu1 %v1108_v8  ;;  %v842_v8 = vld [vmem:[%s14604_s27 + $0x6e0] sm:$0xff] }
 0x41a   : > { %5031 = vmatprep.mubr.bf16.mxu0 %v1123_v9  ;;  %6382 = vmatprep.mubr.bf16.mxu1 %v1123_v9  ;;  %v857_v9 = vld [vmem:[%s14604_s27 + $0x758] sm:$0xff] }
 0x41b   : > { %5171 = vmatpush1.bf16.msra.mxu0 %v13054_v10  ;;  %6521 = vmatprep.subr.bf16.mxu1 %v13089_v11  ;;  %v871_v10 = vld [vmem:[%s14604_s27 + $0x7c8] sm:$0xff]  ;;  %v13111_v11 = vld [vmem:[#allocation8 + $0xda0] ss:$16 sps:$4 sm:$0xff]  }
 0x41c   : > { %5172 = vmatprep.subr.bf16.mxu0 %v13059_v12  ;;  %6522 = vmatpush1.bf16.msra.mxu1 %v13087_v13  ;;  %v13122_v12 = vld [vmem:[#allocation8 + $0xdc4] ss:$16 sps:$4 sm:$0xff]   ;;  %v13126_v13 = vld [vmem:[#allocation8 + $0xda8] ss:$16 sps:$4 sm:$0xff]   ;;  %v1193_v15 = vpack.c.bf16 %v871_v10, %v857_v9 }
 0x41d   : > { %6523 = vmatprep.subr.bf16.mxu1 %v13092_v14  ;;  %v1178_v14 = vpack.c.bf16 %v842_v8, %v828_v7  ;;  %v634_v9 = vld [vmem:[%s14604_s27 + $0x60] sm:$0xff]  ;;  %v648_v10 = vld [vmem:[%s14604_s27 + $0xd0] sm:$0xff] }
 0x41f   : > { %5173 = vmatpush1.bf16.msra.mxu0 %v13057_v19  ;;  %v13132_v19 = vld [vmem:[#allocation8 + $0xdc8] ss:$16 sps:$4 sm:$0xff]  }
 0x420   : > { %5174 = vmatprep.subr.bf16.mxu0 %v13062_v20  ;;  %6524 = vmatpush1.bf16.msra.mxu1 %v13090_v21  ;;  %v13137_v20 = vld [vmem:[#allocation8 + $0xdec] ss:$16 sps:$4 sm:$0xff]   ;;  %v856_v21 = vld [vmem:[%s14604_s27 + $0x750] sm:$0xff] }
 0x421   : > { %5032 = vmatmul.mubr.bf16.gmra.mrb[12].mxu0 %v1122_v22  ;;  %6383 = vmatmul.mubr.bf16.gmra.mrb[12].mxu1 %v1122_v22  ;;  %v870_v22 = vld [vmem:[%s14604_s27 + $0x7c0] sm:$0xff] }
 0x422   : > { %5041 = vmatprep.mubr.bf16.mxu0 %v1137_v23  ;;  %6392 = vmatprep.mubr.bf16.mxu1 %v1137_v23  ;;  %v885_v23 = vld [vmem:[%s14604_s27 + $0x838] sm:$0xff] }
 0x423   : > { %5175 = vmatpush1.bf16.msra.mxu0 %v13060_v24  ;;  %6525 = vmatprep.subr.bf16.mxu1 %v13098_v25  ;;  %v899_v24 = vld [vmem:[%s14604_s27 + $0x8a8] sm:$0xff]  ;;  %v13129_v25 = vld [vmem:[#allocation8 + $0xde0] ss:$16 sps:$4 sm:$0xff]  }
 0x424   : > { %5176 = vmatprep.subr.bf16.mxu0 %v13065_v26  ;;  %6526 = vmatpush1.bf16.msra.mxu1 %v13096_v27  ;;  %v13135_v26 = vld [vmem:[#allocation8 + $0xde8] ss:$16 sps:$4 sm:$0xff]   ;;  %v1192_v27 = vpack.c.bf16 %v870_v22, %v856_v21 }
 0x425   : > { %6527 = vmatprep.subr.bf16.mxu1 %v13101_v28  ;;  %v1207_v28 = vpack.c.bf16 %v899_v24, %v885_v23  ;;  %v691_v21 = vld [vmem:[%s14604_s27 + $0x228] sm:$0xff]  ;;  %v705_v22 = vld [vmem:[%s14604_s27 + $0x298] sm:$0xff] }
 0x426   : > { %v13141_v23 = vld [vmem:[#allocation14 + $0x10] ss:$8 sps:$4 sm:$0xff]  }
 0x427   : > { %5177 = vmatpush1.bf16.msra.mxu0 %v13063_v33  ;;  %v1206_v33 = vpack.c.bf16 %v898_v30, %v884_v29  ;;  %v13150_v24 = vld [vmem:[#allocation11 + $0x10] ss:$8 sps:$4 sm:$0xff]   ;;  %v13147_v29 = vld [vmem:[#allocation14 + $0x20] ss:$8 sps:$4 sm:$0xff]  }
 0x428   : > { %5178 = vmatprep.subr.bf16.mxu0 %v13068_v34  ;;  %6528 = vmatpush1.bf16.msra.mxu1 %v13099_v35  ;;  %v1221_v34 = vpack.c.bf16 %v927_v32, %v913_v31  ;;  %v912_v35 = vld [vmem:[%s14604_s27 + $0x910] sm:$0xff]  ;;  %v13156_v30 = vld [vmem:[#allocation11 + $0x20] ss:$8 sps:$4 sm:$0xff]   ;;  %v13164_v32 = vld [vmem:[#allocation11 + $0x34] ss:$8 sps:$4 sm:$0xff]  }
 0x429   : > { %5042 = vmatmul.mubr.bf16.gmra.mrb[16].mxu0 %v1136_v36  ;;  %6393 = vmatmul.mubr.bf16.gmra.mrb[16].mxu1 %v1136_v36  ;;  %v926_v36 = vld [vmem:[%s14604_s27 + $0x980] sm:$0xff] }
 0x42a   : > { %5051 = vmatprep.mubr.bf16.mxu0 %v1151_v37  ;;  %6402 = vmatprep.mubr.bf16.mxu1 %v1151_v37  ;;  %v941_v37 = vld [vmem:[%s14604_s27 + $0x9f8] sm:$0xff] }
 0x42b   : > { %5179 = vmatpush1.bf16.msra.mxu0 %v13066_v38  ;;  %6529 = vmatprep.subr.bf16.mxu1 %v13107_v39  ;;  %v955_v38 = vld [vmem:[%s14604_s27 + $0xa68] sm:$0xff]  ;;  %v1220_v39 = vpack.c.bf16 %v926_v36, %v912_v35  ;;  %v13155_v31 = vld [vmem:[#allocation14 + $0x34] ss:$8 sps:$4 sm:$0xff]  }
 0x42c   : > { %5180 = vmatprep.subr.bf16.mxu0 %v13077_v40  ;;  %6530 = vmatpush1.bf16.msra.mxu1 %v13105_v41  ;;  %v1235_v40 = vpack.c.bf16 %v955_v38, %v941_v37  ;;  %v940_v41 = vld [vmem:[%s14604_s27 + $0x9f0] sm:$0xff]  ;;  %v719_v35 = vld [vmem:[%s14604_s27 + $0x308] sm:$0xff]  ;;  %v733_v36 = vld [vmem:[%s14604_s27 + $0x378] sm:$0xff] }
 0x42d   : > { %6531 = vmatprep.subr.bf16.mxu1 %v13110_v42  ;;  %v954_v42 = vld [vmem:[%s14604_s27 + $0xa60] sm:$0xff]  ;;  %v13162_v38 = vld [vmem:[#allocation11 + $0x30] ss:$8 sps:$4 sm:$0xff]  }
 0x42e   : > { %v1234_v45 = vpack.c.bf16 %v954_v42, %v940_v41  ;;  %v13153_v37 = vld [vmem:[#allocation14 + $0x30] ss:$8 sps:$4 sm:$0xff]   ;;  %v1125_v42 = vpack.c.bf16 %v733_v36, %v719_v35  ;;  %v13207_v35 = vld [vmem:[#allocation14 + $0xc0] ss:$8 sps:$4 sm:$0xff]  }
 0x42f   : > { %5181 = vmatpush1.bf16.msra.mxu0 %v13075_v47  ;;  %v13140_v47 = vld [vmem:[#allocation14 + $0x4] ss:$8 sps:$4 sm:$0xff]  }
 0x430   : > { %5182 = vmatprep.subr.bf16.mxu0 %v13086_v48  ;;  %6532 = vmatpush1.bf16.msra.mxu1 %v13108_v49  ;;  %v968_v48 = vld [vmem:[%s14604_s27 + $0xad0] sm:$0xff]  ;;  %v982_v49 = vld [vmem:[%s14604_s27 + $0xb40] sm:$0xff] }
 0x431   : > { %5052 = vmatmul.mubr.bf16.gmra.mrb[20].mxu0 %v1150_v50  ;;  %6403 = vmatmul.mubr.bf16.gmra.mrb[20].mxu1 %v1150_v50  ;;  %v997_v50 = vld [vmem:[%s14604_s27 + $0xbb8] sm:$0xff]  ;;  %v13216_v36 = vld [vmem:[#allocation11 + $0xc0] ss:$8 sps:$4 sm:$0xff]  }
 0x432   : > { %5061 = vmatprep.mubr.bf16.mxu0 %v1165_v51  ;;  %6412 = vmatprep.mubr.bf16.mxu1 %v1165_v51  ;;  %v1011_v51 = vld [vmem:[%s14604_s27 + $0xc28] sm:$0xff] }
 0x433   : > { %5183 = vmatpush1.bf16.msra.mxu0 %v13084_v52  ;;  %6533 = vmatprep.subr.bf16.mxu1 %v13116_v53  ;;  %v1248_v52 = vpack.c.bf16 %v982_v49, %v968_v48  ;;  %v1263_v53 = vpack.c.bf16 %v1011_v51, %v997_v50  ;;  %v732_v48 = vld [vmem:[%s14604_s27 + $0x370] sm:$0xff]  ;;  %v747_v49 = vld [vmem:[%s14604_s27 + $0x3e8] sm:$0xff]  ;;  %v761_v50 = vld [vmem:[%s14604_s27 + $0x458] sm:$0xff] }
 0x434   : > { %5184 = vmatprep.subr.bf16.mxu0 %v13095_v54  ;;  %6534 = vmatpush1.bf16.msra.mxu1 %v13114_v55  ;;  %v996_v54 = vld [vmem:[%s14604_s27 + $0xbb0] sm:$0xff]  ;;  %v1010_v55 = vld [vmem:[%s14604_s27 + $0xc20] sm:$0xff] }
 0x435   : > { %6535 = vmatprep.subr.bf16.mxu1 %v13119_v56  ;;  %v1025_v56 = vld [vmem:[%s14604_s27 + $0xc98] sm:$0xff]  ;;  %v1262_v58 = vpack.c.bf16 %v1010_v55, %v996_v54  ;;  %v13182_v54 = vld [vmem:[#allocation11 + $0x64] ss:$8 sps:$4 sm:$0xff]  }
 0x436   : > { %v1277_v59 = vpack.c.bf16 %v1039_v57, %v1025_v56  ;;  %v13165_v51 = vld [vmem:[#allocation14 + $0x50] ss:$8 sps:$4 sm:$0xff]   ;;  %v1139_v56 = vpack.c.bf16 %v761_v50, %v747_v49  ;;  %v13171_v57 = vld [vmem:[#allocation14 + $0x60] ss:$8 sps:$4 sm:$0xff]  }
 0x437   : > { %5185 = vmatpush1.bf16.msra.mxu0 %v13093_v61  ;;  %v1024_v61 = vld [vmem:[%s14604_s27 + $0xc90] sm:$0xff]  ;;  %v858_v49 = vld [vmem:[%s14604_s27 + $0x760] sm:$0xff] }
 0x438   : > { %5186 = vmatprep.subr.bf16.mxu0 %v13104_v62  ;;  %6536 = vmatpush1.bf16.msra.mxu1 %v13117_v63  ;;  %v1038_v62 = vld [vmem:[%s14604_s27 + $0xd00] sm:$0xff]  ;;  %v1053_v63 = vld [vmem:[%s14604_s27 + $0xd78] sm:$0xff]  ;;  %v872_v50 = vld [vmem:[%s14604_s27 + $0x7d0] sm:$0xff] }
 0x439   : > { %5062 = vmatmul.mubr.bf16.gmra.mrb[24].mxu0 %v1164_v0  ;;  %6413 = vmatmul.mubr.bf16.gmra.mrb[24].mxu1 %v1164_v0  ;;  %v1067_v0 = vld [vmem:[%s14604_s27 + $0xde8] sm:$0xff] }
 0x43a   : > { %5071 = vmatprep.mubr.bf16.mxu0 %v1179_v1  ;;  %6422 = vmatprep.mubr.bf16.mxu1 %v1179_v1  ;;  %v1276_v1 = vpack.c.bf16 %v1038_v62, %v1024_v61  ;;  %v746_v61 = vld [vmem:[%s14604_s27 + $0x3e0] sm:$0xff]  ;;  %v760_v62 = vld [vmem:[%s14604_s27 + $0x450] sm:$0xff] }
 0x43b   : > { %5187 = vmatpush1.bf16.msra.mxu0 %v13102_v2  ;;  %6537 = vmatprep.subr.bf16.mxu1 %v13125_v3  ;;  %v1291_v2 = vpack.c.bf16 %v1067_v0, %v1053_v63  ;;  %v1052_v3 = vld [vmem:[%s14604_s27 + $0xd70] sm:$0xff]  ;;  %v775_v63 = vld [vmem:[%s14604_s27 + $0x4c8] sm:$0xff]  ;;  %v789_v0 = vld [vmem:[%s14604_s27 + $0x538] sm:$0xff] }
 0x43c   : > { %5188 = vmatprep.subr.bf16.mxu0 %v13113_v4  ;;  %6538 = vmatpush1.bf16.msra.mxu1 %v13123_v5  ;;  %v1066_v4 = vld [vmem:[%s14604_s27 + $0xde0] sm:$0xff]  ;;  %v635_v5 = vld [vmem:[%s14604_s27 + $0x68] sm:$0xff] }
 0x43d   : > { %6539 = vmatprep.subr.bf16.mxu1 %v13128_v6  ;;  %v649_v6 = vld [vmem:[%s14604_s27 + $0xd8] sm:$0xff]  ;;  %v1290_v7 = vpack.c.bf16 %v1066_v4, %v1052_v3  ;;  %v13185_v3 = vld [vmem:[#allocation14 + $0x84] ss:$8 sps:$4 sm:$0xff]  }
 0x43e   : > { %v1083_v8 = vpack.c.bf16 %v649_v6, %v635_v5  ;;  %v13194_v4 = vld [vmem:[#allocation11 + $0x84] ss:$8 sps:$4 sm:$0xff]   ;;  %v1138_v5 = vpack.c.bf16 %v760_v62, %v746_v61  ;;  %v1153_v6 = vpack.c.bf16 %v789_v0, %v775_v63  ;;  %v914_v61 = vld [vmem:[%s14604_s27 + $0x920] sm:$0xff]  ;;  %v957_v0 = vld [vmem:[%s14604_s27 + $0xa78] sm:$0xff] }
 0x43f   : > { %5189 = vmatpush1.bf16.msra.mxu0 %v13111_v11  ;;  %v663_v11 = vld [vmem:[%s14604_s27 + $0x148] sm:$0xff]  ;;  %v928_v62 = vld [vmem:[%s14604_s27 + $0x990] sm:$0xff] }
 0x440   : > { %5190 = vmatprep.subr.bf16.mxu0 %v13122_v12  ;;  %6540 = vmatpush1.bf16.msra.mxu1 %v13126_v13  ;;  %v677_v12 = vld [vmem:[%s14604_s27 + $0x1b8] sm:$0xff]  ;;  %v1082_v13 = vpack.c.bf16 %v648_v10, %v634_v9  ;;  %v943_v63 = vld [vmem:[%s14604_s27 + $0xa08] sm:$0xff] }
 0x441   : > { %5072 = vmatmul.mubr.bf16.gmra.mrb[28].mxu0 %v1178_v14  ;;  %6423 = vmatmul.mubr.bf16.gmra.mrb[28].mxu1 %v1178_v14  ;;  %v1097_v14 = vpack.c.bf16 %v677_v12, %v663_v11  ;;  %v13191_v9 = vld [vmem:[#allocation14 + $0x94] ss:$8 sps:$4 sm:$0xff]   ;;  %v788_v12 = vld [vmem:[%s14604_s27 + $0x530] sm:$0xff] }
 0x442   : > { %5081 = vmatprep.mubr.bf16.mxu0 %v1193_v15  ;;  %6432 = vmatprep.mubr.bf16.mxu1 %v1193_v15  ;;  %v13138_v15 = vld [vmem:[#allocation14] ss:$8 sps:$4 sm:$0xff]   ;;  %v13200_v10 = vld [vmem:[#allocation11 + $0x94] ss:$8 sps:$4 sm:$0xff]  }
 0x443   : > { %5191 = vmatpush1.bf16.msra.mxu0 %v13120_v16  ;;  %6541 = vmatprep.subr.bf16.mxu1 %v13134_v17  ;;  %v13144_v16 = vld [vmem:[#allocation11] ss:$8 sps:$4 sm:$0xff]  }
 0x444   : > { %5192 = vmatprep.subr.bf16.mxu0 %v13131_v18  ;;  %6542 = vmatpush1.bf16.msra.mxu1 %v13132_v19  ;;  %v13143_v17 = vld [vmem:[#allocation14 + $0x14] ss:$8 sps:$4 sm:$0xff]  }
 0x445   : > { %6543 = vmatprep.subr.bf16.mxu1 %v13137_v20  ;;  %v13152_v18 = vld [vmem:[#allocation11 + $0x14] ss:$8 sps:$4 sm:$0xff]   ;;  %v676_v20 = vld [vmem:[%s14604_s27 + $0x1b0] sm:$0xff] }
 0x446   : > { %v662_v19 = vld [vmem:[%s14604_s27 + $0x140] sm:$0xff] }
 0x447   : > { %5193 = vmatpush1.bf16.msra.mxu0 %v13129_v25  ;;  %v13149_v25 = vld [vmem:[#allocation14 + $0x24] ss:$8 sps:$4 sm:$0xff]   ;;  %v774_v11 = vld [vmem:[%s14604_s27 + $0x4c0] sm:$0xff] }
 0x448   : > { %6544 = vmatpush1.bf16.msra.mxu1 %v13135_v26  ;;  %7585 = vmatprep.subr.bf16.mxu0 %v13146_v60  ;;  %v13158_v26 = vld [vmem:[#allocation11 + $0x24] ss:$8 sps:$4 sm:$0xff]   ;;  %v13188_v60 = vld [vmem:[#allocation11 + $0x74] ss:$8 sps:$4 sm:$0xff]  }
 0x449   : > { %5082 = vmatmul.mubr.bf16.gmra.mrb[32].mxu0 %v1192_v27  ;;  %6433 = vmatmul.mubr.bf16.gmra.mrb[32].mxu1 %v1192_v27  ;;  %v1096_v27 = vpack.c.bf16 %v676_v20, %v662_v19  ;;  %v1152_v19 = vpack.c.bf16 %v788_v12, %v774_v11  ;;  %v13230_v11 = vld [vmem:[#allocation14 + $0xf4] ss:$8 sps:$4 sm:$0xff]   ;;  %v13228_v12 = vld [vmem:[#allocation14 + $0xf0] ss:$8 sps:$4 sm:$0xff]  }
 0x44a   : > { %5091 = vmatprep.mubr.bf16.mxu0 %v1207_v28  ;;  %6442 = vmatprep.mubr.bf16.mxu1 %v1207_v28  ;;  %v1111_v28 = vpack.c.bf16 %v705_v22, %v691_v21  ;;  %v13195_v21 = vld [vmem:[#allocation14 + $0xa0] ss:$8 sps:$4 sm:$0xff]  }
 0x44b   : > { %8431 = vmatprep.subr.bf16.mxu1 %v13140_v47  ;;  %v718_v47 = vld [vmem:[%s14604_s27 + $0x300] sm:$0xff] }
 0x44c   : > { %v1124_v55 = vpack.c.bf16 %v732_v48, %v718_v47  ;;  %v13204_v22 = vld [vmem:[#allocation11 + $0xa0] ss:$8 sps:$4 sm:$0xff]  }
 0x44d   : > { %v13219_v48 = vld [vmem:[#allocation14 + $0xe0] ss:$8 sps:$4 sm:$0xff]  }
 0x451   : > { %5092 = vmatmul.mubr.bf16.gmra.mrb[36].mxu0 %v1206_v33  ;;  %6443 = vmatmul.mubr.bf16.gmra.mrb[36].mxu1 %v1206_v33  ;;  %v690_v33 = vld [vmem:[%s14604_s27 + $0x220] sm:$0xff] }
 0x452   : > { %5101 = vmatprep.mubr.bf16.mxu0 %v1221_v34  ;;  %6452 = vmatprep.mubr.bf16.mxu1 %v1221_v34  ;;  %v704_v34 = vld [vmem:[%s14604_s27 + $0x290] sm:$0xff] }
 0x453   : > { %v1110_v41 = vpack.c.bf16 %v704_v34, %v690_v33 }
 0x459   : > { %5102 = vmatmul.mubr.bf16.gmra.mrb[40].mxu0 %v1220_v39  ;;  %6453 = vmatmul.mubr.bf16.gmra.mrb[40].mxu1 %v1220_v39  ;;  %v13161_v39 = vld [vmem:[#allocation14 + $0x44] ss:$8 sps:$4 sm:$0xff]  }
 0x45a   : > { %5111 = vmatprep.mubr.bf16.mxu0 %v1235_v40  ;;  %6462 = vmatprep.mubr.bf16.mxu1 %v1235_v40  ;;  %v13170_v40 = vld [vmem:[#allocation11 + $0x44] ss:$8 sps:$4 sm:$0xff]  }
 0x461   : > { %5112 = vmatmul.mubr.bf16.gmra.mrb[44].mxu0 %v1234_v45  ;;  %6463 = vmatmul.mubr.bf16.gmra.mrb[44].mxu1 %v1234_v45  ;;  %v13167_v45 = vld [vmem:[#allocation14 + $0x54] ss:$8 sps:$4 sm:$0xff]  }
 0x462   : > { %5121 = vmatprep.mubr.bf16.mxu0 %v1249_v46  ;;  %6472 = vmatprep.mubr.bf16.mxu1 %v1249_v46  ;;  %v13176_v46 = vld [vmem:[#allocation11 + $0x54] ss:$8 sps:$4 sm:$0xff]  }
 0x469   : > { %5122 = vmatmul.mubr.bf16.gmra.mrb[48].mxu0 %v1248_v52  ;;  %6473 = vmatmul.mubr.bf16.gmra.mrb[48].mxu1 %v1248_v52  ;;  %v13174_v52 = vld [vmem:[#allocation11 + $0x50] ss:$8 sps:$4 sm:$0xff]  }
 0x46a   : > { %5131 = vmatprep.mubr.bf16.mxu0 %v1263_v53  ;;  %6482 = vmatprep.mubr.bf16.mxu1 %v1263_v53  ;;  %v13173_v53 = vld [vmem:[#allocation14 + $0x64] ss:$8 sps:$4 sm:$0xff]  }
 0x471   : > { %5132 = vmatmul.mubr.bf16.gmra.mrb[52].mxu0 %v1262_v58  ;;  %6483 = vmatmul.mubr.bf16.gmra.mrb[52].mxu1 %v1262_v58  ;;  %v13180_v58 = vld [vmem:[#allocation11 + $0x60] ss:$8 sps:$4 sm:$0xff]  }
 0x472   : > { %5141 = vmatprep.mubr.bf16.mxu0 %v1277_v59  ;;  %6492 = vmatprep.mubr.bf16.mxu1 %v1277_v59  ;;  %v13179_v59 = vld [vmem:[#allocation14 + $0x74] ss:$8 sps:$4 sm:$0xff]  }
 0x479   : > { %5142 = vmatmul.mubr.bf16.gmra.mrb[56].mxu0 %v1276_v1  ;;  %6493 = vmatmul.mubr.bf16.gmra.mrb[56].mxu1 %v1276_v1  ;;  %v13177_v1 = vld [vmem:[#allocation14 + $0x70] ss:$8 sps:$4 sm:$0xff]  }
 0x47a   : > { %5151 = vmatprep.mubr.bf16.mxu0 %v1291_v2  ;;  %6502 = vmatprep.mubr.bf16.mxu1 %v1291_v2  ;;  %v13186_v2 = vld [vmem:[#allocation11 + $0x70] ss:$8 sps:$4 sm:$0xff]  }
 0x481   : > { %5152 = vmatmul.mubr.bf16.gmra.mrb[60].mxu0 %v1290_v7  ;;  %6503 = vmatmul.mubr.bf16.gmra.mrb[60].mxu1 %v1290_v7  ;;  %v13183_v7 = vld [vmem:[#allocation14 + $0x80] ss:$8 sps:$4 sm:$0xff]  }
 0x482   : > { %5194 = vmatprep.mubr.bf16.mxu0 %v1083_v8  ;;  %6545 = vmatprep.mubr.bf16.mxu1 %v1083_v8  ;;  %v13192_v8 = vld [vmem:[#allocation11 + $0x80] ss:$8 sps:$4 sm:$0xff]  }
 0x489   : > { %5195 = vmatmul.mubr.bf16.vlgmr.msra.gmra.mrb[0].mxu0 %v1082_v13  ;;  %6546 = vmatmul.mubr.bf16.vlgmr.msra.gmra.mrb[0].mxu1 %v1082_v13  ;;  %v803_v13 = vld [vmem:[%s14604_s27 + $0x5a8] sm:$0xff] }
 0x48a   : > { %5204 = vmatprep.mubr.bf16.mxu0 %v1097_v14  ;;  %6555 = vmatprep.mubr.bf16.mxu1 %v1097_v14  ;;  %v817_v14 = vld [vmem:[%s14604_s27 + $0x618] sm:$0xff] }
 0x48b   : > { %8432 = vmatpush1.bf16.msra.mxu1 %v13138_v15  ;;  %7586 = vmatpush1.bf16.msra.mxu0 %v13144_v16  ;;  %v13189_v15 = vld [vmem:[#allocation14 + $0x90] ss:$8 sps:$4 sm:$0xff]   ;;  %v1167_v20 = vpack.c.bf16 %v817_v14, %v803_v13 }
 0x48c   : > { %8433 = vmatprep.subr.bf16.mxu1 %v13143_v17  ;;  %7587 = vmatprep.subr.bf16.mxu0 %v13152_v18  ;;  %v13198_v16 = vld [vmem:[#allocation11 + $0x90] ss:$8 sps:$4 sm:$0xff]   ;;  %v13206_v18 = vld [vmem:[#allocation11 + $0xa4] ss:$8 sps:$4 sm:$0xff]   ;;  %v13233_v13 = vld [vmem:[#allocation11 + $0xf4] ss:$8 sps:$4 sm:$0xff]  }
 0x48d   : > { %v13197_v17 = vld [vmem:[#allocation14 + $0xa4] ss:$8 sps:$4 sm:$0xff]   ;;  %v970_v14 = vld [vmem:[%s14604_s27 + $0xae0] sm:$0xff] }
 0x48f   : > { %8434 = vmatpush1.bf16.msra.mxu1 %v13141_v23  ;;  %7588 = vmatpush1.bf16.msra.mxu0 %v13150_v24  ;;  %v13203_v23 = vld [vmem:[#allocation14 + $0xb4] ss:$8 sps:$4 sm:$0xff]  }
 0x490   : > { %8435 = vmatprep.subr.bf16.mxu1 %v13149_v25  ;;  %7589 = vmatprep.subr.bf16.mxu0 %v13158_v26  ;;  %v13212_v24 = vld [vmem:[#allocation11 + $0xb4] ss:$8 sps:$4 sm:$0xff]   ;;  %v816_v26 = vld [vmem:[%s14604_s27 + $0x610] sm:$0xff] }
 0x491   : > { %5205 = vmatmul.mubr.bf16.gmra.mrb[4].mxu0 %v1096_v27  ;;  %6556 = vmatmul.mubr.bf16.gmra.mrb[4].mxu1 %v1096_v27  ;;  %v802_v25 = vld [vmem:[%s14604_s27 + $0x5a0] sm:$0xff]  ;;  %v831_v27 = vld [vmem:[%s14604_s27 + $0x688] sm:$0xff] }
 0x492   : > { %5214 = vmatprep.mubr.bf16.mxu0 %v1111_v28  ;;  %6565 = vmatprep.mubr.bf16.mxu1 %v1111_v28  ;;  %v845_v28 = vld [vmem:[%s14604_s27 + $0x6f8] sm:$0xff]  ;;  %v1166_v33 = vpack.c.bf16 %v816_v26, %v802_v25 }
 0x493   : > { %8436 = vmatpush1.bf16.msra.mxu1 %v13147_v29  ;;  %7590 = vmatpush1.bf16.msra.mxu0 %v13156_v30  ;;  %v13201_v29 = vld [vmem:[#allocation14 + $0xb0] ss:$8 sps:$4 sm:$0xff]   ;;  %v1181_v34 = vpack.c.bf16 %v845_v28, %v831_v27 }
 0x494   : > { %8437 = vmatprep.subr.bf16.mxu1 %v13155_v31  ;;  %7591 = vmatprep.subr.bf16.mxu0 %v13164_v32  ;;  %v13210_v30 = vld [vmem:[#allocation11 + $0xb0] ss:$8 sps:$4 sm:$0xff]   ;;  %v13218_v32 = vld [vmem:[#allocation11 + $0xc4] ss:$8 sps:$4 sm:$0xff]   ;;  %v1026_v28 = vld [vmem:[%s14604_s27 + $0xca0] sm:$0xff] }
 0x495   : > { %v13209_v31 = vld [vmem:[#allocation14 + $0xc4] ss:$8 sps:$4 sm:$0xff]   ;;  %v1041_v25 = vld [vmem:[%s14604_s27 + $0xd18] sm:$0xff] }
 0x497   : > { %8438 = vmatpush1.bf16.msra.mxu1 %v13153_v37  ;;  %7592 = vmatpush1.bf16.msra.mxu0 %v13162_v38  ;;  %v13215_v37 = vld [vmem:[#allocation14 + $0xd4] ss:$8 sps:$4 sm:$0xff]  }
 0x498   : > { %8439 = vmatprep.subr.bf16.mxu1 %v13161_v39  ;;  %7593 = vmatprep.subr.bf16.mxu0 %v13170_v40  ;;  %v13224_v38 = vld [vmem:[#allocation11 + $0xd4] ss:$8 sps:$4 sm:$0xff]   ;;  %v844_v40 = vld [vmem:[%s14604_s27 + $0x6f0] sm:$0xff] }
 0x499   : > { %5215 = vmatmul.mubr.bf16.gmra.mrb[8].mxu0 %v1110_v41  ;;  %6566 = vmatmul.mubr.bf16.gmra.mrb[8].mxu1 %v1110_v41  ;;  %v830_v39 = vld [vmem:[%s14604_s27 + $0x680] sm:$0xff]  ;;  %v859_v41 = vld [vmem:[%s14604_s27 + $0x768] sm:$0xff] }
 0x49a   : > { %5224 = vmatprep.mubr.bf16.mxu0 %v1125_v42  ;;  %6575 = vmatprep.mubr.bf16.mxu1 %v1125_v42  ;;  %v873_v42 = vld [vmem:[%s14604_s27 + $0x7d8] sm:$0xff] }
 0x49b   : > { %8440 = vmatpush1.bf16.msra.mxu1 %v13159_v43  ;;  %7594 = vmatpush1.bf16.msra.mxu0 %v13168_v44  ;;  %v13213_v43 = vld [vmem:[#allocation14 + $0xd0] ss:$8 sps:$4 sm:$0xff]   ;;  %v1195_v47 = vpack.c.bf16 %v873_v42, %v859_v41 }
 0x49c   : > { %8441 = vmatprep.subr.bf16.mxu1 %v13167_v45  ;;  %7595 = vmatprep.subr.bf16.mxu0 %v13176_v46  ;;  %v13222_v44 = vld [vmem:[#allocation11 + $0xd0] ss:$8 sps:$4 sm:$0xff]   ;;  %v1180_v46 = vpack.c.bf16 %v844_v40, %v830_v39  ;;  %v1742_v42 = vld [vmem:[#allocation10] sm:$0xf] }
 0x49d   : > { %v13221_v45 = vld [vmem:[#allocation14 + $0xe4] ss:$8 sps:$4 sm:$0xff]  }
 0x49f   : > { %8442 = vmatpush1.bf16.msra.mxu1 %v13165_v51  ;;  %7596 = vmatpush1.bf16.msra.mxu0 %v13174_v52  ;;  %v887_v51 = vld [vmem:[%s14604_s27 + $0x848] sm:$0xff]  ;;  %v901_v52 = vld [vmem:[%s14604_s27 + $0x8b8] sm:$0xff] }
 0x4a0   : > { %8443 = vmatprep.subr.bf16.mxu1 %v13173_v53  ;;  %7597 = vmatprep.subr.bf16.mxu0 %v13182_v54  ;;  %v1194_v53 = vpack.c.bf16 %v872_v50, %v858_v49  ;;  %v1209_v54 = vpack.c.bf16 %v901_v52, %v887_v51 }
 0x4a1   : > { %5225 = vmatmul.mubr.bf16.gmra.mrb[12].mxu0 %v1124_v55  ;;  %6576 = vmatmul.mubr.bf16.gmra.mrb[12].mxu1 %v1124_v55  ;;  %v886_v55 = vld [vmem:[%s14604_s27 + $0x840] sm:$0xff] }
 0x4a2   : > { %5234 = vmatprep.mubr.bf16.mxu0 %v1139_v56  ;;  %6585 = vmatprep.mubr.bf16.mxu1 %v1139_v56  ;;  %v900_v56 = vld [vmem:[%s14604_s27 + $0x8b0] sm:$0xff] }
 0x4a3   : > { %8444 = vmatpush1.bf16.msra.mxu1 %v13171_v57  ;;  %7598 = vmatpush1.bf16.msra.mxu0 %v13180_v58  ;;  %v915_v57 = vld [vmem:[%s14604_s27 + $0x928] sm:$0xff]  ;;  %v929_v58 = vld [vmem:[%s14604_s27 + $0x998] sm:$0xff] }
 0x4a4   : > { %8445 = vmatprep.subr.bf16.mxu1 %v13179_v59  ;;  %7599 = vmatprep.subr.bf16.mxu0 %v13188_v60  ;;  %v1208_v59 = vpack.c.bf16 %v900_v56, %v886_v55  ;;  %v1223_v60 = vpack.c.bf16 %v929_v58, %v915_v57  ;;  %v15136_v55 = vstv %s14628_s15  ;;  %s11101_s15 = sshll.u32 %s15108_s19, 5 }
 0x4a5   : > { %17007 = vst [vmem:[#allocation50_spill] sm:$0xff] %v15136_v55 }
 0x4a7   : > { %8446 = vmatpush1.bf16.msra.mxu1 %v13177_v1  ;;  %7600 = vmatpush1.bf16.msra.mxu0 %v13186_v2  ;;  %v1222_v1 = vpack.c.bf16 %v928_v62, %v914_v61  ;;  %v1237_v2 = vpack.c.bf16 %v957_v0, %v943_v63 }
 0x4a8   : > { %8447 = vmatprep.subr.bf16.mxu1 %v13185_v3  ;;  %7601 = vmatprep.subr.bf16.mxu0 %v13194_v4  ;;  %v942_v3 = vld [vmem:[%s14604_s27 + $0xa00] sm:$0xff]  ;;  %v956_v4 = vld [vmem:[%s14604_s27 + $0xa70] sm:$0xff] }
 0x4a9   : > { %5235 = vmatmul.mubr.bf16.gmra.mrb[16].mxu0 %v1138_v5  ;;  %6586 = vmatmul.mubr.bf16.gmra.mrb[16].mxu1 %v1138_v5  ;;  %v971_v5 = vld [vmem:[%s14604_s27 + $0xae8] sm:$0xff] }
 0x4aa   : > { %5244 = vmatprep.mubr.bf16.mxu0 %v1153_v6  ;;  %6595 = vmatprep.mubr.bf16.mxu1 %v1153_v6  ;;  %v985_v6 = vld [vmem:[%s14604_s27 + $0xb58] sm:$0xff] }
 0x4ab   : > { %8448 = vmatpush1.bf16.msra.mxu1 %v13183_v7  ;;  %7602 = vmatpush1.bf16.msra.mxu0 %v13192_v8  ;;  %v1236_v7 = vpack.c.bf16 %v956_v4, %v942_v3  ;;  %v13227_v8 = vld [vmem:[#allocation11 + $0xe4] ss:$8 sps:$4 sm:$0xff]  }
 0x4ac   : > { %8449 = vmatprep.subr.bf16.mxu1 %v13191_v9  ;;  %7603 = vmatprep.subr.bf16.mxu0 %v13200_v10  ;;  %v1251_v9 = vpack.c.bf16 %v985_v6, %v971_v5  ;;  %v13225_v10 = vld [vmem:[#allocation11 + $0xe0] ss:$8 sps:$4 sm:$0xff]  }
 0x4af   : > { %8450 = vmatpush1.bf16.msra.mxu1 %v13189_v15  ;;  %7604 = vmatpush1.bf16.msra.mxu0 %v13198_v16  ;;  %v984_v15 = vld [vmem:[%s14604_s27 + $0xb50] sm:$0xff] }
 0x4b0   : > { %8451 = vmatprep.subr.bf16.mxu1 %v13197_v17  ;;  %7605 = vmatprep.subr.bf16.mxu0 %v13206_v18  ;;  %v13231_v16 = vld [vmem:[#allocation11 + $0xf0] ss:$8 sps:$4 sm:$0xff]   ;;  %v999_v17 = vld [vmem:[%s14604_s27 + $0xbc8] sm:$0xff] }
 0x4b1   : > { %5245 = vmatmul.mubr.bf16.gmra.mrb[20].mxu0 %v1152_v19  ;;  %6596 = vmatmul.mubr.bf16.gmra.mrb[20].mxu1 %v1152_v19  ;;  %v1013_v18 = vld [vmem:[%s14604_s27 + $0xc38] sm:$0xff]  ;;  %v13236_v19 = vld [vmem:[#allocation14 + $0x104] ss:$8 sps:$4 sm:$0xff]  }
 0x4b2   : > { %5254 = vmatprep.mubr.bf16.mxu0 %v1167_v20  ;;  %6605 = vmatprep.mubr.bf16.mxu1 %v1167_v20  ;;  %v1250_v20 = vpack.c.bf16 %v984_v15, %v970_v14 }
 0x4b3   : > { %8452 = vmatpush1.bf16.msra.mxu1 %v13195_v21  ;;  %7606 = vmatpush1.bf16.msra.mxu0 %v13204_v22  ;;  %v1265_v21 = vpack.c.bf16 %v1013_v18, %v999_v17  ;;  %v998_v22 = vld [vmem:[%s14604_s27 + $0xbc0] sm:$0xff]  ;;  %v17009_v18 = vmov 0 }
 0x4b4   : > { %8453 = vmatprep.subr.bf16.mxu1 %v13203_v23  ;;  %7607 = vmatprep.subr.bf16.mxu0 %v13212_v24  ;;  %v1012_v23 = vld [vmem:[%s14604_s27 + $0xc30] sm:$0xff]  ;;  %v1027_v24 = vld [vmem:[%s14604_s27 + $0xca8] sm:$0xff] }
 0x4b5   : > { %v1264_v26 = vpack.c.bf16 %v1012_v23, %v998_v22  ;;  %v1279_v27 = vpack.c.bf16 %v1041_v25, %v1027_v24  ;;  %v13234_v24 = vld [vmem:[#allocation14 + $0x100] ss:$8 sps:$4 sm:$0xff]  }
 0x4b7   : > { %8454 = vmatpush1.bf16.msra.mxu1 %v13201_v29  ;;  %7608 = vmatpush1.bf16.msra.mxu0 %v13210_v30  ;;  %v1040_v29 = vld [vmem:[%s14604_s27 + $0xd10] sm:$0xff]  ;;  %v1055_v30 = vld [vmem:[%s14604_s27 + $0xd88] sm:$0xff] }
 0x4b8   : > { %8455 = vmatprep.subr.bf16.mxu1 %v13209_v31  ;;  %7609 = vmatprep.subr.bf16.mxu0 %v13218_v32  ;;  %v1069_v31 = vld [vmem:[%s14604_s27 + $0xdf8] sm:$0xff]  ;;  %v1278_v32 = vpack.c.bf16 %v1040_v29, %v1026_v28 }
 0x4b9   : > { %5255 = vmatmul.mubr.bf16.gmra.mrb[24].mxu0 %v1166_v33  ;;  %6606 = vmatmul.mubr.bf16.gmra.mrb[24].mxu1 %v1166_v33  ;;  %v1293_v33 = vpack.c.bf16 %v1069_v31, %v1055_v30  ;;  %v13239_v31 = vld [vmem:[#allocation14 + $0x114] ss:$8 sps:$4 sm:$0xff]  }
 0x4ba   : > { %5264 = vmatprep.mubr.bf16.mxu0 %v1181_v34  ;;  %6615 = vmatprep.mubr.bf16.mxu1 %v1181_v34  ;;  %v1054_v34 = vld [vmem:[%s14604_s27 + $0xd80] sm:$0xff] }
 0x4bb   : > { %8456 = vmatpush1.bf16.msra.mxu1 %v13207_v35  ;;  %7610 = vmatpush1.bf16.msra.mxu0 %v13216_v36  ;;  %v1068_v35 = vld [vmem:[%s14604_s27 + $0xdf0] sm:$0xff]  ;;  %s9874_s27 = sshll.u32 %s15108_s19, 8 }
 0x4bc   : > { %8457 = vmatprep.subr.bf16.mxu1 %v13215_v37  ;;  %7611 = vmatprep.subr.bf16.mxu0 %v13224_v38  ;;  %v13248_v36 = vld [vmem:[#allocation11 + $0x104] ss:$8 sps:$4 sm:$0xff]   ;;  %v1292_v37 = vpack.c.bf16 %v1068_v35, %v1054_v34  ;;  %v16834_v38 = vlaneseq }
 0x4be   : > { %v15105_v39 = vshrl.u32 %v16834_v38, 7 }
 0x4bf   : > { %8458 = vmatpush1.bf16.msra.mxu1 %v13213_v43  ;;  %7612 = vmatpush1.bf16.msra.mxu0 %v13222_v44 }
 0x4c0   : > { %8459 = vmatprep.subr.bf16.mxu1 %v13221_v45  ;;  %7613 = vmatprep.subr.bf16.mxu0 %v13227_v8  ;;  %v15111_v40 = vsub.s32 0, %v15105_v39  ;;  %v1754_v41 = vsub.s32 2, %v15105_v39  ;;  %v15116_v43 = vsub.s32 1, %v15105_v39  ;;  %v1758_v44 = vsub.s32 3, %v15105_v39 }
 0x4c1   : > { %5265 = vmatmul.mubr.bf16.gmra.mrb[28].mxu0 %v1180_v46  ;;  %6616 = vmatmul.mubr.bf16.gmra.mrb[28].mxu1 %v1180_v46  ;;  %v6836_v45 = vadd.s32 8, %v15105_v39  ;;  %v15120_v46 = vstv %s9874_s27  ;;  %v6837_v4 = vadd.s32 16, %v15105_v39  ;;  %s13948_s27 = sshll.u32 %s14158_s20, 4  ;;  %s13949_s27 = int_to_ptr.vmem [resolvable:$false] %s13948_s27 }
 0x4c2   : > { %5274 = vmatprep.mubr.bf16.mxu0 %v1195_v47  ;;  %6625 = vmatprep.mubr.bf16.mxu1 %v1195_v47  ;;  %17004 = vst [vmem:[#allocation47_spill] sm:$0xff] %v15111_v40  ;;  %17005 = vst [vmem:[#allocation48_spill] sm:$0xff] %v15116_v43  ;;  %v15123_v47 = vrot.slane %v1742_v42, %v15111_v40  ;;  %v15128_v49 = vrot.slane %v1742_v42, %v15116_v43  ;;  %v13320_v43 = vld [vmem:[#allocation11 + $0x1c4] ss:$8 sps:$4 sm:$0xff]   ;;  %s13950_s10 = scalar_lea.vmem %s13949_s27, 64  ;;  %p13951_p7 = scmp.lt.s32.totalorder %s9600_s24, %s13949_s27 }
 0x4c3   : > { %8460 = vmatpush1.bf16.msra.mxu1 %v13219_v48  ;;  %7614 = vmatpush1.bf16.msra.mxu0 %v13225_v10  ;;  %17006 = vst [vmem:[#allocation49_spill] sm:$0xff] %v15120_v46  ;;  %v15125_v48 = vrot.slane %v1742_v42, %v1754_v41  ;;  %v15130_v50 = vrot.slane %v1742_v42, %v1758_v44  ;;  %p13952_p3 = scmp.lt.s32.totalorder %s13950_s10, %s13944_s11 }
 0x4c4   : > { %8461 = vmatprep.subr.bf16.mxu1 %v13230_v11  ;;  %7615 = vmatprep.subr.bf16.mxu0 %v13233_v13  ;;  %v6868_v51 = vadd.s32 %v15120_v46, %v15105_v39 }
 0x4c5   : > { %p13953_p5 = por %p13952_p3, %p13951_p7 }
 0x4c6   : > { %vm6901_vm2 = vcmp.lt.s32.totalorder %v6868_v51, %v15136_v55  ;;  %v6839_v51 = vadd.s32 32, %v15105_v39 }
 0x4c7   : > { %8462 = vmatpush1.bf16.msra.mxu1 %v13228_v12  ;;  %7616 = vmatpush1.bf16.msra.mxu0 %v13231_v16  ;;  %p13954_p9 = pnand %p13953_p5, %p13947_p1 }
 0x4c8   : > { %8624 = vmatprep.subr.bf16.mxu1 %v13236_v19  ;;  %7778 = vmatprep.subr.bf16.mxu0 %v13248_v36  ;;  %v6870_v19 = vadd.s32 %v15120_v46, %v6837_v4 }
 0x4c9   : > { %5275 = vmatmul.mubr.bf16.gmra.mrb[32].mxu0 %v1194_v53  ;;  %6626 = vmatmul.mubr.bf16.gmra.mrb[32].mxu1 %v1194_v53 }
 0x4ca   : > { %5284 = vmatprep.mubr.bf16.mxu0 %v1209_v54  ;;  %6635 = vmatprep.mubr.bf16.mxu1 %v1209_v54  ;;  %v6869_v54 = vadd.s32 %v15120_v46, %v6836_v45  ;;  %v13237_v45 = vld [vmem:[#allocation14 + $0x110] ss:$8 sps:$4 sm:$0xff]   ;;  %vm6903_vm5 = vcmp.lt.s32.totalorder %v6870_v19, %v15136_v55 }
 0x4cc   : > { %vm6902_vm3 = vcmp.lt.s32.totalorder %v6869_v54, %v15136_v55  ;;  %v13242_v54 = vld [vmem:[#allocation14 + $0x124] ss:$8 sps:$4 sm:$0xff]  }
 0x4cd   : > { %vm15156_vm4 = vmpackc.low %vm6902_vm3, %vm6901_vm2 }
 0x4ce   : > { %v17010_v18 = vsel %vm15156_vm4, 4294967295, %v17009_v18 }
 0x4cf   : > { %17011 = vst [vmem:[#allocation52_spill] sm:$0xff] %v17010_v18 }
 0x4d1   : > { %5285 = vmatmul.mubr.bf16.gmra.mrb[36].mxu0 %v1208_v59  ;;  %6636 = vmatmul.mubr.bf16.gmra.mrb[36].mxu1 %v1208_v59 }
 0x4d2   : > { %5294 = vmatprep.mubr.bf16.mxu0 %v1223_v60  ;;  %6645 = vmatprep.mubr.bf16.mxu1 %v1223_v60 }
 0x4d9   : > { %5295 = vmatmul.mubr.bf16.gmra.mrb[40].mxu0 %v1222_v1  ;;  %6646 = vmatmul.mubr.bf16.gmra.mrb[40].mxu1 %v1222_v1 }
 0x4da   : > { %5304 = vmatprep.mubr.bf16.mxu0 %v1237_v2  ;;  %6655 = vmatprep.mubr.bf16.mxu1 %v1237_v2 }
 0x4e1   : > { %5305 = vmatmul.mubr.bf16.gmra.mrb[44].mxu0 %v1236_v7  ;;  %6656 = vmatmul.mubr.bf16.gmra.mrb[44].mxu1 %v1236_v7  ;;  %v6838_v7 = vadd.s32 24, %v15105_v39 }
 0x4e2   : > { %5314 = vmatprep.mubr.bf16.mxu0 %v1251_v9  ;;  %6665 = vmatprep.mubr.bf16.mxu1 %v1251_v9 }
 0x4e3   : > { %v6871_v25 = vadd.s32 %v15120_v46, %v6838_v7 }
 0x4e5   : > { %vm6904_vm6 = vcmp.lt.s32.totalorder %v6871_v25, %v15136_v55 }
 0x4e6   : > { %vm15198_vm7 = vmpackc.low %vm6904_vm6, %vm6903_vm5 }
 0x4e9   : > { %5315 = vmatmul.mubr.bf16.gmra.mrb[48].mxu0 %v1250_v20  ;;  %6666 = vmatmul.mubr.bf16.gmra.mrb[48].mxu1 %v1250_v20 }
 0x4ea   : > { %5324 = vmatprep.mubr.bf16.mxu0 %v1265_v21  ;;  %6675 = vmatprep.mubr.bf16.mxu1 %v1265_v21 }
 0x4f1   : > { %5325 = vmatmul.mubr.bf16.gmra.mrb[52].mxu0 %v1264_v26  ;;  %6676 = vmatmul.mubr.bf16.gmra.mrb[52].mxu1 %v1264_v26  ;;  %v13246_v26 = vld [vmem:[#allocation11 + $0x100] ss:$8 sps:$4 sm:$0xff]  }
 0x4f2   : > { %5334 = vmatprep.mubr.bf16.mxu0 %v1279_v27  ;;  %6685 = vmatprep.mubr.bf16.mxu1 %v1279_v27 }
 0x4f9   : > { %5335 = vmatmul.mubr.bf16.gmra.mrb[56].mxu0 %v1278_v32  ;;  %6686 = vmatmul.mubr.bf16.gmra.mrb[56].mxu1 %v1278_v32  ;;  %v13257_v32 = vld [vmem:[#allocation11 + $0x114] ss:$8 sps:$4 sm:$0xff]  }
 0x4fa   : > { %5344 = vmatprep.mubr.bf16.mxu0 %v1293_v33  ;;  %6695 = vmatprep.mubr.bf16.mxu1 %v1293_v33 }
 0x501   : > { %5345 = vmatmul.mubr.bf16.gmra.mrb[60].mxu0 %v1292_v37  ;;  %6696 = vmatmul.mubr.bf16.gmra.mrb[60].mxu1 %v1292_v37 }
 0x55c   : > { %v5196_v52 = vpop.f32.mrb[0].mxu0  ;;  %v6547_v53 = vpop.f32.mrb[0].mxu1 }
 0x55d   : > { %v11103_v56 = vadd.f32 %v5196_v52, %v15123_v47  ;;  %v11167_v57 = vadd.f32 %v6547_v53, %v15125_v48  ;;  %v5198_v58 = vpop.f32.mrb[1].mxu0  ;;  %v6549_v59 = vpop.f32.mrb[1].mxu1 }
 0x55e   : > { %v11104_v60 = vadd.f32 %v5198_v58, %v15128_v49  ;;  %v11168_v61 = vadd.f32 %v6549_v59, %v15130_v50  ;;  %v5200_v62 = vpop.f32.mrb[2].mxu0  ;;  %v6551_v63 = vpop.f32.mrb[2].mxu1 }
 0x55f   : > { %v11105_v0 = vadd.f32 %v5200_v62, %v15123_v47  ;;  %v11169_v1 = vadd.f32 %v6551_v63, %v15125_v48  ;;  %v5202_v2 = vpop.f32.mrb[3].mxu0  ;;  %v6553_v3 = vpop.f32.mrb[3].mxu1  ;;  %v6706_v8 = vmax.f32 %v11103_v56, 0.0  ;;  %v6708_v9 = vmax.f32 %v11167_v57, 0.0  ;;  %v13255_v57 = vld [vmem:[#allocation11 + $0x110] ss:$8 sps:$4 sm:$0xff]  }
 0x560   : > { %v11106_v5 = vadd.f32 %v5202_v2, %v15128_v49  ;;  %v11170_v6 = vadd.f32 %v6553_v3, %v15130_v50  ;;  %v6707_v12 = vmax.f32 %v11104_v60, 0.0  ;;  %v6709_v13 = vmax.f32 %v11168_v61, 0.0  ;;  %v13266_v62 = vld [vmem:[#allocation11 + $0x124] ss:$8 sps:$4 sm:$0xff]  }
 0x561   : > { %v6710_v10 = vmax.f32 %v11105_v0, 0.0  ;;  %v6712_v11 = vmax.f32 %v11169_v1, 0.0  ;;  %v6840_v56 = vadd.s32 40, %v15105_v39 }
 0x562   : > { %v6711_v14 = vmax.f32 %v11106_v5, 0.0  ;;  %v6713_v15 = vmax.f32 %v11170_v6, 0.0  ;;  %v17014_v5 = vmov 0  ;;  %v6872_v6 = vadd.s32 %v15120_v46, %v6839_v51 }
 0x563   : > { %v15150_v16 = vpack.c.bf16 %v6710_v10, %v6706_v8  ;;  %v15152_v17 = vpack.c.bf16 %v6712_v11, %v6708_v9  ;;  %v17015_v5 = vsel %vm15198_vm7, 4294967295, %v17014_v5  ;;  %v13240_v11 = vld [vmem:[#allocation14 + $0x120] ss:$8 sps:$4 sm:$0xff]  }
 0x564   : > { %v15161_v20 = vpack.c.bf16 %v6711_v14, %v6707_v12  ;;  %v15163_v21 = vpack.c.bf16 %v6713_v15, %v6709_v13  ;;  %v5206_v22 = vpop.f32.mrb[4].mxu0  ;;  %v6557_v23 = vpop.f32.mrb[4].mxu1  ;;  %17016 = vst [vmem:[#allocation55_spill] sm:$0xff] %v17015_v5  ;;  %v6873_v12 = vadd.s32 %v15120_v46, %v6840_v56  ;;  %v13264_v13 = vld [vmem:[#allocation11 + $0x120] ss:$8 sps:$4 sm:$0xff]   ;;  %vm6905_vm8 = vcmp.lt.s32.totalorder %v6872_v6, %v15136_v55 }
 0x565   : > { %17008 = vst [vmem:[#allocation51_spill] sm:$0xff] %v15152_v17  ;;  %v11107_v27 = vadd.f32 %v5206_v22, %v15123_v47  ;;  %v11171_v28 = vadd.f32 %v6557_v23, %v15125_v48  ;;  %v5208_v29 = vpop.f32.mrb[5].mxu0  ;;  %v6559_v30 = vpop.f32.mrb[5].mxu1  ;;  %v13245_v23 = vld [vmem:[#allocation14 + $0x134] ss:$8 sps:$4 sm:$0xff]  }
 0x566   : > { %17012 = vst [vmem:[#allocation53_spill] sm:$0xff] %v15163_v21  ;;  %v11108_v33 = vadd.f32 %v5208_v29, %v15128_v49  ;;  %v11172_v34 = vadd.f32 %v6559_v30, %v15130_v50  ;;  %v5210_v35 = vpop.f32.mrb[6].mxu0  ;;  %v6561_v36 = vpop.f32.mrb[6].mxu1  ;;  %10389 = vmatprep.mubr.msk.bf16.mxu0 %vm15156_vm4, %v15161_v20  ;;  %10645 = vmatprep.mubr.msk.bf16.mxu1 %vm15156_vm4, %v15161_v20  ;;  %v13282_v6 = vld [vmem:[#allocation11 + $0x140] ss:$8 sps:$4 sm:$0xff]  }
 0x567   : > { %v11109_v37 = vadd.f32 %v5210_v35, %v15123_v47  ;;  %v11173_v41 = vadd.f32 %v6561_v36, %v15125_v48  ;;  %v5212_v42 = vpop.f32.mrb[7].mxu0  ;;  %v6563_v44 = vpop.f32.mrb[7].mxu1  ;;  %10392 = vmatmul.mubr.msk.bf16.vlgmr.msra.gmra.mrb[64].mxu0 %vm15156_vm4, %v15150_v16  ;;  %10648 = vmatmul.mubr.msk.bf16.vlgmr.msra.gmra.mrb[64].mxu1 %vm15156_vm4, %v15150_v16  ;;  %v6714_v58 = vmax.f32 %v11107_v27, 0.0  ;;  %v6716_v59 = vmax.f32 %v11171_v28, 0.0 }
 0x568   : > { %v11110_v52 = vadd.f32 %v5212_v42, %v15128_v49  ;;  %v11174_v53 = vadd.f32 %v6563_v44, %v15130_v50  ;;  %8625 = vmatpush1.bf16.msra.mxu1 %v13234_v24  ;;  %7779 = vmatpush1.bf16.msra.mxu0 %v13246_v26  ;;  %v6715_v63 = vmax.f32 %v11108_v33, 0.0  ;;  %v6717_v0 = vmax.f32 %v11172_v34, 0.0  ;;  %v13275_v24 = vld [vmem:[#allocation11 + $0x134] ss:$8 sps:$4 sm:$0xff]   ;;  %v13273_v42 = vld [vmem:[#allocation11 + $0x130] ss:$8 sps:$4 sm:$0xff]  }
 0x569   : > { %v6718_v60 = vmax.f32 %v11109_v37, 0.0  ;;  %v6720_v61 = vmax.f32 %v11173_v41, 0.0  ;;  %8626 = vmatprep.subr.bf16.mxu1 %v13239_v31  ;;  %7780 = vmatprep.subr.bf16.mxu0 %v13257_v32  ;;  %v13243_v33 = vld [vmem:[#allocation14 + $0x130] ss:$8 sps:$4 sm:$0xff]   ;;  %v6841_v34 = vadd.s32 48, %v15105_v39  ;;  %vm6906_vm9 = vcmp.lt.s32.totalorder %v6873_v12, %v15136_v55 }
 0x56a   : > { %v6719_v1 = vmax.f32 %v11110_v52, 0.0  ;;  %v6721_v2 = vmax.f32 %v11174_v53, 0.0  ;;  %v13251_v37 = vld [vmem:[#allocation14 + $0x144] ss:$8 sps:$4 sm:$0xff]   ;;  %v6842_v41 = vadd.s32 56, %v15105_v39  ;;  %vm15240_vm10 = vmpackc.low %vm6906_vm9, %vm6905_vm8 }
 0x56b   : > { %v15190_v3 = vpack.c.bf16 %v6718_v60, %v6714_v58  ;;  %v15192_v4 = vpack.c.bf16 %v6720_v61, %v6716_v59  ;;  %v13284_v53 = vld [vmem:[#allocation11 + $0x144] ss:$8 sps:$4 sm:$0xff]   ;;  %v17019_v61 = vmov 0 }
 0x56c   : > { %v15203_v7 = vpack.c.bf16 %v6719_v1, %v6715_v63  ;;  %v15205_v8 = vpack.c.bf16 %v6721_v2, %v6717_v0  ;;  %8627 = vmatpush1.bf16.msra.mxu1 %v13237_v45  ;;  %v5216_v9 = vpop.f32.mrb[8].mxu0  ;;  %v6567_v10 = vpop.f32.mrb[8].mxu1  ;;  %7781 = vmatpush1.bf16.msra.mxu0 %v13255_v57  ;;  %v17020_v61 = vsel %vm15240_vm10, 4294967295, %v17019_v61 }
 0x56d   : > { %17013 = vst [vmem:[#allocation54_spill] sm:$0xff] %v15192_v4  ;;  %v11111_v14 = vadd.f32 %v5216_v9, %v15123_v47  ;;  %v11175_v15 = vadd.f32 %v6567_v10, %v15125_v48  ;;  %v5218_v19 = vpop.f32.mrb[9].mxu0  ;;  %v6569_v22 = vpop.f32.mrb[9].mxu1  ;;  %8628 = vmatprep.subr.bf16.mxu1 %v13242_v54  ;;  %7782 = vmatprep.subr.bf16.mxu0 %v13266_v62  ;;  %17021 = vst [vmem:[#allocation58_spill] sm:$0xff] %v17020_v61  ;;  %v13249_v9 = vld [vmem:[#allocation14 + $0x140] ss:$8 sps:$4 sm:$0xff]  }
 0x56e   : > { %17017 = vst [vmem:[#allocation56_spill] sm:$0xff] %v15205_v8  ;;  %v11112_v25 = vadd.f32 %v5218_v19, %v15128_v49  ;;  %v11176_v26 = vadd.f32 %v6569_v22, %v15130_v50  ;;  %v5220_v27 = vpop.f32.mrb[10].mxu0  ;;  %v6571_v28 = vpop.f32.mrb[10].mxu1  ;;  %10395 = vmatprep.mubr.msk.bf16.mxu0 %vm15198_vm7, %v15203_v7  ;;  %10651 = vmatprep.mubr.msk.bf16.mxu1 %vm15198_vm7, %v15203_v7  ;;  %v13293_v19 = vld [vmem:[#allocation11 + $0x154] ss:$8 sps:$4 sm:$0xff]  }
 0x56f   : > { %v11113_v29 = vadd.f32 %v5220_v27, %v15123_v47  ;;  %v11177_v30 = vadd.f32 %v6571_v28, %v15125_v48  ;;  %v5222_v31 = vpop.f32.mrb[11].mxu0  ;;  %v6573_v32 = vpop.f32.mrb[11].mxu1  ;;  %10398 = vmatmul.mubr.msk.bf16.gmra.mrb[68].mxu0 %vm15198_vm7, %v15190_v3  ;;  %10654 = vmatmul.mubr.msk.bf16.gmra.mrb[68].mxu1 %vm15198_vm7, %v15190_v3  ;;  %v6722_v44 = vmax.f32 %v11111_v14, 0.0  ;;  %v6724_v45 = vmax.f32 %v11175_v15, 0.0  ;;  %v13254_v15 = vld [vmem:[#allocation14 + $0x154] ss:$8 sps:$4 sm:$0xff]  }
 0x570   : > { %v11114_v35 = vadd.f32 %v5222_v31, %v15128_v49  ;;  %v11178_v36 = vadd.f32 %v6573_v32, %v15130_v50  ;;  %8629 = vmatpush1.bf16.msra.mxu1 %v13240_v11  ;;  %7783 = vmatpush1.bf16.msra.mxu0 %v13264_v13  ;;  %v6723_v54 = vmax.f32 %v11112_v25, 0.0  ;;  %v6725_v56 = vmax.f32 %v11176_v26, 0.0 }
 0x571   : > { %v6726_v51 = vmax.f32 %v11113_v29, 0.0  ;;  %v6728_v52 = vmax.f32 %v11177_v30, 0.0  ;;  %8630 = vmatprep.subr.bf16.mxu1 %v13245_v23  ;;  %7784 = vmatprep.subr.bf16.mxu0 %v13275_v24  ;;  %v6874_v62 = vadd.s32 %v15120_v46, %v6841_v34  ;;  %v6875_v10 = vadd.s32 %v15120_v46, %v6842_v41  ;;  %v13252_v30 = vld [vmem:[#allocation14 + $0x150] ss:$8 sps:$4 sm:$0xff]   ;;  %v13260_v34 = vld [vmem:[#allocation14 + $0x164] ss:$8 sps:$4 sm:$0xff]  }
 0x572   : > { %v6727_v57 = vmax.f32 %v11114_v35, 0.0  ;;  %v6729_v58 = vmax.f32 %v11178_v36, 0.0  ;;  %v6843_v31 = vadd.s32 64, %v15105_v39  ;;  %v6844_v35 = vadd.s32 72, %v15105_v39  ;;  %v13291_v36 = vld [vmem:[#allocation11 + $0x150] ss:$8 sps:$4 sm:$0xff]  }
 0x573   : > { %v15232_v59 = vpack.c.bf16 %v6726_v51, %v6722_v44  ;;  %v15234_v60 = vpack.c.bf16 %v6728_v52, %v6724_v45  ;;  %vm6907_vm11 = vcmp.lt.s32.totalorder %v6874_v62, %v15136_v55  ;;  %vm6908_vm12 = vcmp.lt.s32.totalorder %v6875_v10, %v15136_v55  ;;  %v13302_v45 = vld [vmem:[#allocation11 + $0x164] ss:$8 sps:$4 sm:$0xff]   ;;  %v13300_v62 = vld [vmem:[#allocation11 + $0x160] ss:$8 sps:$4 sm:$0xff]  }
 0x574   : > { %v15245_v63 = vpack.c.bf16 %v6727_v57, %v6723_v54  ;;  %v15247_v0 = vpack.c.bf16 %v6729_v58, %v6725_v56  ;;  %8631 = vmatpush1.bf16.msra.mxu1 %v13243_v33  ;;  %v5226_v1 = vpop.f32.mrb[12].mxu0  ;;  %v6577_v2 = vpop.f32.mrb[12].mxu1  ;;  %7785 = vmatpush1.bf16.msra.mxu0 %v13273_v42  ;;  %vm15282_vm13 = vmpackc.low %vm6908_vm12, %vm6907_vm11  ;;  %v17024_v58 = vmov 0 }
 0x575   : > { %17018 = vst [vmem:[#allocation57_spill] sm:$0xff] %v15234_v60  ;;  %v11115_v11 = vadd.f32 %v5226_v1, %v15123_v47  ;;  %v11179_v12 = vadd.f32 %v6577_v2, %v15125_v48  ;;  %v5228_v13 = vpop.f32.mrb[13].mxu0  ;;  %v6579_v14 = vpop.f32.mrb[13].mxu1  ;;  %8632 = vmatprep.subr.bf16.mxu1 %v13251_v37  ;;  %7786 = vmatprep.subr.bf16.mxu0 %v13284_v53  ;;  %v17025_v58 = vsel %vm15282_vm13, 4294967295, %v17024_v58 }
 0x576   : > { %17022 = vst [vmem:[#allocation59_spill] sm:$0xff] %v15247_v0  ;;  %v11116_v22 = vadd.f32 %v5228_v13, %v15128_v49  ;;  %v11180_v23 = vadd.f32 %v6579_v14, %v15130_v50  ;;  %v5230_v24 = vpop.f32.mrb[14].mxu0  ;;  %v6581_v25 = vpop.f32.mrb[14].mxu1  ;;  %10401 = vmatprep.mubr.msk.bf16.mxu0 %vm15240_vm10, %v15245_v63  ;;  %10657 = vmatprep.mubr.msk.bf16.mxu1 %vm15240_vm10, %v15245_v63  ;;  %17026 = vst [vmem:[#allocation61_spill] sm:$0xff] %v17025_v58 }
 0x577   : > { %v11117_v26 = vadd.f32 %v5230_v24, %v15123_v47  ;;  %v11181_v27 = vadd.f32 %v6581_v25, %v15125_v48  ;;  %v5232_v28 = vpop.f32.mrb[15].mxu0  ;;  %v6583_v29 = vpop.f32.mrb[15].mxu1  ;;  %10404 = vmatmul.mubr.msk.bf16.gmra.mrb[72].mxu0 %vm15240_vm10, %v15232_v59  ;;  %10660 = vmatmul.mubr.msk.bf16.gmra.mrb[72].mxu1 %vm15240_vm10, %v15232_v59  ;;  %v6730_v37 = vmax.f32 %v11115_v11, 0.0  ;;  %v6732_v41 = vmax.f32 %v11179_v12, 0.0  ;;  %v13258_v12 = vld [vmem:[#allocation14 + $0x160] ss:$8 sps:$4 sm:$0xff]  }
 0x578   : > { %v11118_v32 = vadd.f32 %v5232_v28, %v15128_v49  ;;  %v11182_v33 = vadd.f32 %v6583_v29, %v15130_v50  ;;  %8633 = vmatpush1.bf16.msra.mxu1 %v13249_v9  ;;  %7787 = vmatpush1.bf16.msra.mxu0 %v13282_v6  ;;  %v6731_v51 = vmax.f32 %v11116_v22, 0.0  ;;  %v6733_v52 = vmax.f32 %v11180_v23, 0.0  ;;  %v13263_v22 = vld [vmem:[#allocation14 + $0x174] ss:$8 sps:$4 sm:$0xff]  }
 0x579   : > { %v6734_v42 = vmax.f32 %v11117_v26, 0.0  ;;  %v6736_v44 = vmax.f32 %v11181_v27, 0.0  ;;  %8634 = vmatprep.subr.bf16.mxu1 %v13254_v15  ;;  %7788 = vmatprep.subr.bf16.mxu0 %v13293_v19  ;;  %v6876_v1 = vadd.s32 %v15120_v46, %v6843_v31  ;;  %v6877_v13 = vadd.s32 %v15120_v46, %v6844_v35  ;;  %v13305_v23 = vld [vmem:[#allocation11 + $0x174] ss:$8 sps:$4 sm:$0xff]  }
 0x57a   : > { %v6735_v53 = vmax.f32 %v11118_v32, 0.0  ;;  %v6737_v54 = vmax.f32 %v11182_v33, 0.0  ;;  %v13261_v32 = vld [vmem:[#allocation14 + $0x170] ss:$8 sps:$4 sm:$0xff]   ;;  %v6845_v33 = vadd.s32 80, %v15105_v39 }
 0x57b   : > { %v15274_v56 = vpack.c.bf16 %v6734_v42, %v6730_v37  ;;  %v15276_v57 = vpack.c.bf16 %v6736_v44, %v6732_v41  ;;  %vm6909_vm14 = vcmp.lt.s32.totalorder %v6876_v1, %v15136_v55  ;;  %vm6910_vm15 = vcmp.lt.s32.totalorder %v6877_v13, %v15136_v55  ;;  %v13303_v41 = vld [vmem:[#allocation11 + $0x170] ss:$8 sps:$4 sm:$0xff]   ;;  %v13306_v1 = vld [vmem:[#allocation11 + $0x180] ss:$8 sps:$4 sm:$0xff]  }
 0x57c   : > { %v15287_v2 = vpack.c.bf16 %v6735_v53, %v6731_v51  ;;  %v15289_v9 = vpack.c.bf16 %v6737_v54, %v6733_v52  ;;  %8635 = vmatpush1.bf16.msra.mxu1 %v13252_v30  ;;  %v5236_v6 = vpop.f32.mrb[16].mxu0  ;;  %v6587_v11 = vpop.f32.mrb[16].mxu1  ;;  %7789 = vmatpush1.bf16.msra.mxu0 %v13291_v36  ;;  %v13269_v36 = vld [vmem:[#allocation14 + $0x184] ss:$8 sps:$4 sm:$0xff]   ;;  %v6846_v37 = vadd.s32 88, %v15105_v39  ;;  %vm15324_vm0 = vmpackc.low %vm6910_vm15, %vm6909_vm14 }
 0x57d   : > { %17023 = vst [vmem:[#allocation60_spill] sm:$0xff] %v15276_v57  ;;  %v11119_v10 = vadd.f32 %v5236_v6, %v15123_v47  ;;  %v11183_v14 = vadd.f32 %v6587_v11, %v15125_v48  ;;  %v5238_v15 = vpop.f32.mrb[17].mxu0  ;;  %v6589_v19 = vpop.f32.mrb[17].mxu1  ;;  %8636 = vmatprep.subr.bf16.mxu1 %v13260_v34  ;;  %7790 = vmatprep.subr.bf16.mxu0 %v13302_v45  ;;  %v13308_v52 = vld [vmem:[#allocation11 + $0x184] ss:$8 sps:$4 sm:$0xff]  }
 0x57e   : > { %17027 = vst [vmem:[#allocation62_spill] sm:$0xff] %v15289_v9  ;;  %v11120_v24 = vadd.f32 %v5238_v15, %v15128_v49  ;;  %v11184_v25 = vadd.f32 %v6589_v19, %v15130_v50  ;;  %v5240_v26 = vpop.f32.mrb[18].mxu0  ;;  %v6591_v27 = vpop.f32.mrb[18].mxu1  ;;  %10407 = vmatprep.mubr.msk.bf16.mxu0 %vm15282_vm13, %v15287_v2  ;;  %10663 = vmatprep.mubr.msk.bf16.mxu1 %vm15282_vm13, %v15287_v2 }
 0x57f   : > { %v11121_v28 = vadd.f32 %v5240_v26, %v15123_v47  ;;  %v11185_v29 = vadd.f32 %v6591_v27, %v15125_v48  ;;  %v5242_v30 = vpop.f32.mrb[19].mxu0  ;;  %v6593_v31 = vpop.f32.mrb[19].mxu1  ;;  %10410 = vmatmul.mubr.msk.bf16.gmra.mrb[76].mxu0 %vm15282_vm13, %v15274_v56  ;;  %10666 = vmatmul.mubr.msk.bf16.gmra.mrb[76].mxu1 %vm15282_vm13, %v15274_v56  ;;  %v6738_v42 = vmax.f32 %v11119_v10, 0.0  ;;  %v6740_v44 = vmax.f32 %v11183_v14, 0.0 }
 0x580   : > { %v11122_v34 = vadd.f32 %v5242_v30, %v15128_v49  ;;  %v11186_v35 = vadd.f32 %v6593_v31, %v15130_v50  ;;  %8637 = vmatpush1.bf16.msra.mxu1 %v13258_v12  ;;  %7791 = vmatpush1.bf16.msra.mxu0 %v13300_v62  ;;  %v6739_v53 = vmax.f32 %v11120_v24, 0.0  ;;  %v6741_v54 = vmax.f32 %v11184_v25, 0.0  ;;  %v13267_v24 = vld [vmem:[#allocation14 + $0x180] ss:$8 sps:$4 sm:$0xff]   ;;  %v13311_v30 = vld [vmem:[#allocation11 + $0x194] ss:$8 sps:$4 sm:$0xff]  }
 0x581   : > { %v6742_v45 = vmax.f32 %v11121_v28, 0.0  ;;  %v6744_v51 = vmax.f32 %v11185_v29, 0.0  ;;  %8638 = vmatprep.subr.bf16.mxu1 %v13263_v22  ;;  %7792 = vmatprep.subr.bf16.mxu0 %v13305_v23  ;;  %v17029_v62 = vmov 0  ;;  %v6878_v10 = vadd.s32 %v15120_v46, %v6845_v33  ;;  %v13272_v29 = vld [vmem:[#allocation14 + $0x194] ss:$8 sps:$4 sm:$0xff]  }
 0x582   : > { %v6743_v6 = vmax.f32 %v11122_v34, 0.0  ;;  %v6745_v11 = vmax.f32 %v11186_v35, 0.0  ;;  %v17030_v62 = vsel %vm15324_vm0, 4294967295, %v17029_v62  ;;  %v6879_v25 = vadd.s32 %v15120_v46, %v6846_v37 }
 0x583   : > { %v15316_v15 = vpack.c.bf16 %v6742_v45, %v6738_v42  ;;  %v15318_v12 = vpack.c.bf16 %v6744_v51, %v6740_v44  ;;  %17031 = vst [vmem:[#allocation64_spill] sm:$0xff] %v17030_v62  ;;  %v13270_v42 = vld [vmem:[#allocation14 + $0x190] ss:$8 sps:$4 sm:$0xff]   ;;  %vm6911_vm1 = vcmp.lt.s32.totalorder %v6878_v10, %v15136_v55  ;;  %v6847_v44 = vadd.s32 96, %v15105_v39  ;;  %v13312_v10 = vld [vmem:[#allocation11 + $0x1a0] ss:$8 sps:$4 sm:$0xff]  }
 0x584   : > { %v15329_v14 = vpack.c.bf16 %v6743_v6, %v6739_v53  ;;  %v15331_v19 = vpack.c.bf16 %v6745_v11, %v6741_v54  ;;  %8639 = vmatpush1.bf16.msra.mxu1 %v13261_v32  ;;  %v5246_v22 = vpop.f32.mrb[20].mxu0  ;;  %v6597_v23 = vpop.f32.mrb[20].mxu1  ;;  %7793 = vmatpush1.bf16.msra.mxu0 %v13303_v41  ;;  %vm6912_vm2 = vcmp.lt.s32.totalorder %v6879_v25, %v15136_v55  ;;  %v6848_v53 = vadd.s32 104, %v15105_v39  ;;  %v13309_v54 = vld [vmem:[#allocation11 + $0x190] ss:$8 sps:$4 sm:$0xff]  }
 0x585   : > { %17028 = vst [vmem:[#allocation63_spill] sm:$0xff] %v15318_v12  ;;  %v11123_v13 = vadd.f32 %v5246_v22, %v15123_v47  ;;  %v11187_v26 = vadd.f32 %v6597_v23, %v15125_v48  ;;  %v5248_v27 = vpop.f32.mrb[21].mxu0  ;;  %v6599_v28 = vpop.f32.mrb[21].mxu1  ;;  %8640 = vmatprep.subr.bf16.mxu1 %v13269_v36  ;;  %7794 = vmatprep.subr.bf16.mxu0 %v13308_v52  ;;  %v13278_v52 = vld [vmem:[#allocation14 + $0x1a4] ss:$8 sps:$4 sm:$0xff]   ;;  %vm15366_vm3 = vmpackc.low %vm6912_vm2, %vm6911_vm1 }
 0x586   : > { %17032 = vst [vmem:[#allocation65_spill] sm:$0xff] %v15331_v19  ;;  %v11124_v31 = vadd.f32 %v5248_v27, %v15128_v49  ;;  %v11188_v32 = vadd.f32 %v6599_v28, %v15130_v50  ;;  %v5250_v33 = vpop.f32.mrb[22].mxu0  ;;  %v6601_v34 = vpop.f32.mrb[22].mxu1  ;;  %10413 = vmatprep.mubr.msk.bf16.mxu0 %vm15324_vm0, %v15329_v14  ;;  %10669 = vmatprep.mubr.msk.bf16.mxu1 %vm15324_vm0, %v15329_v14  ;;  %v13314_v27 = vld [vmem:[#allocation11 + $0x1a4] ss:$8 sps:$4 sm:$0xff]  }
 0x587   : > { %v11125_v35 = vadd.f32 %v5250_v33, %v15123_v47  ;;  %v11189_v36 = vadd.f32 %v6601_v34, %v15125_v48  ;;  %v5252_v37 = vpop.f32.mrb[23].mxu0  ;;  %v6603_v41 = vpop.f32.mrb[23].mxu1  ;;  %10416 = vmatmul.mubr.msk.bf16.gmra.mrb[80].mxu0 %vm15324_vm0, %v15316_v15  ;;  %10672 = vmatmul.mubr.msk.bf16.gmra.mrb[80].mxu1 %vm15324_vm0, %v15316_v15  ;;  %v6746_v6 = vmax.f32 %v11123_v13, 0.0  ;;  %v6748_v11 = vmax.f32 %v11187_v26, 0.0 }
 0x588   : > { %v11126_v45 = vadd.f32 %v5252_v37, %v15128_v49  ;;  %v11190_v51 = vadd.f32 %v6603_v41, %v15130_v50  ;;  %8641 = vmatpush1.bf16.msra.mxu1 %v13267_v24  ;;  %7795 = vmatpush1.bf16.msra.mxu0 %v13306_v1  ;;  %v6747_v28 = vmax.f32 %v11124_v31, 0.0  ;;  %v6749_v33 = vmax.f32 %v11188_v32, 0.0  ;;  %v13276_v32 = vld [vmem:[#allocation14 + $0x1a0] ss:$8 sps:$4 sm:$0xff]  }
 0x589   : > { %v6750_v22 = vmax.f32 %v11125_v35, 0.0  ;;  %v6752_v23 = vmax.f32 %v11189_v36, 0.0  ;;  %8642 = vmatprep.subr.bf16.mxu1 %v13272_v29  ;;  %7796 = vmatprep.subr.bf16.mxu0 %v13311_v30  ;;  %v17034_v1 = vmov 0  ;;  %v6880_v13 = vadd.s32 %v15120_v46, %v6847_v44  ;;  %v13281_v44 = vld [vmem:[#allocation14 + $0x1b4] ss:$8 sps:$4 sm:$0xff]  }
 0x58a   : > { %v6751_v34 = vmax.f32 %v11126_v45, 0.0  ;;  %v6753_v37 = vmax.f32 %v11190_v51, 0.0  ;;  %v17035_v1 = vsel %vm15366_vm3, 4294967295, %v17034_v1  ;;  %v6881_v35 = vadd.s32 %v15120_v46, %v6848_v53 }
 0x58b   : > { %v15358_v41 = vpack.c.bf16 %v6750_v22, %v6746_v6  ;;  %v15360_v24 = vpack.c.bf16 %v6752_v23, %v6748_v11  ;;  %17036 = vst [vmem:[#allocation67_spill] sm:$0xff] %v17035_v1  ;;  %v13317_v6 = vld [vmem:[#allocation11 + $0x1b4] ss:$8 sps:$4 sm:$0xff]   ;;  %vm6913_vm5 = vcmp.lt.s32.totalorder %v6880_v13, %v15136_v55  ;;  %v13318_v13 = vld [vmem:[#allocation11 + $0x1c0] ss:$8 sps:$4 sm:$0xff]  }
 0x58c   : > { %v15371_v26 = vpack.c.bf16 %v6751_v34, %v6747_v28  ;;  %v15373_v29 = vpack.c.bf16 %v6753_v37, %v6749_v33  ;;  %8643 = vmatpush1.bf16.msra.mxu1 %v13270_v42  ;;  %v5256_v30 = vpop.f32.mrb[24].mxu0  ;;  %v6607_v31 = vpop.f32.mrb[24].mxu1  ;;  %7797 = vmatpush1.bf16.msra.mxu0 %v13309_v54  ;;  %v13279_v28 = vld [vmem:[#allocation14 + $0x1b0] ss:$8 sps:$4 sm:$0xff]   ;;  %v6849_v33 = vadd.s32 112, %v15105_v39  ;;  %vm6914_vm6 = vcmp.lt.s32.totalorder %v6881_v35, %v15136_v55 }
 0x58d   : > { %17033 = vst [vmem:[#allocation66_spill] sm:$0xff] %v15360_v24  ;;  %v11127_v25 = vadd.f32 %v5256_v30, %v15123_v47  ;;  %v11191_v36 = vadd.f32 %v6607_v31, %v15125_v48  ;;  %v5258_v45 = vpop.f32.mrb[25].mxu0  ;;  %v6609_v51 = vpop.f32.mrb[25].mxu1  ;;  %8644 = vmatprep.subr.bf16.mxu1 %v13278_v52  ;;  %7798 = vmatprep.subr.bf16.mxu0 %v13314_v27  ;;  %v13287_v30 = vld [vmem:[#allocation14 + $0x1c4] ss:$8 sps:$4 sm:$0xff]   ;;  %v6850_v31 = vadd.s32 120, %v15105_v39  ;;  %vm15408_vm8 = vmpackc.low %vm6914_vm6, %vm6913_vm5 }
 0x58e   : > { %17037 = vst [vmem:[#allocation68_spill] sm:$0xff] %v15373_v29  ;;  %v11128_v11 = vadd.f32 %v5258_v45, %v15128_v49  ;;  %v11192_v42 = vadd.f32 %v6609_v51, %v15130_v50  ;;  %v5260_v22 = vpop.f32.mrb[26].mxu0  ;;  %v6611_v23 = vpop.f32.mrb[26].mxu1  ;;  %10419 = vmatprep.mubr.msk.bf16.mxu0 %vm15366_vm3, %v15371_v26  ;;  %10675 = vmatprep.mubr.msk.bf16.mxu1 %vm15366_vm3, %v15371_v26  ;;  %v13315_v45 = vld [vmem:[#allocation11 + $0x1b0] ss:$8 sps:$4 sm:$0xff]  }
 0x58f   : > { %v11129_v53 = vadd.f32 %v5260_v22, %v15123_v47  ;;  %v11193_v52 = vadd.f32 %v6611_v23, %v15125_v48  ;;  %v5262_v54 = vpop.f32.mrb[27].mxu0  ;;  %v6613_v27 = vpop.f32.mrb[27].mxu1  ;;  %10422 = vmatmul.mubr.msk.bf16.gmra.mrb[84].mxu0 %vm15366_vm3, %v15358_v41  ;;  %10678 = vmatmul.mubr.msk.bf16.gmra.mrb[84].mxu1 %vm15366_vm3, %v15358_v41  ;;  %v6754_v51 = vmax.f32 %v11127_v25, 0.0  ;;  %v6756_v22 = vmax.f32 %v11191_v36, 0.0 }
 0x590   : > { %v11130_v34 = vadd.f32 %v5262_v54, %v15128_v49  ;;  %v11194_v37 = vadd.f32 %v6613_v27, %v15130_v50  ;;  %8645 = vmatpush1.bf16.msra.mxu1 %v13276_v32  ;;  %7799 = vmatpush1.bf16.msra.mxu0 %v13312_v10  ;;  %v6755_v40 = vmax.f32 %v11128_v11, 0.0  ;;  %v6757_v24 = vmax.f32 %v11192_v42, 0.0  ;;  %v13285_v42 = vld [vmem:[#allocation14 + $0x1c0] ss:$8 sps:$4 sm:$0xff]  }
 0x591   : > { %v6758_v23 = vmax.f32 %v11129_v53, 0.0  ;;  %v6760_v38 = vmax.f32 %v11193_v52, 0.0  ;;  %8646 = vmatprep.subr.bf16.mxu1 %v13281_v44  ;;  %7800 = vmatprep.subr.bf16.mxu0 %v13317_v6  ;;  %v17040_v10 = vmov 0  ;;  %v6882_v25 = vadd.s32 %v15120_v46, %v6849_v33  ;;  %v13290_v33 = vld [vmem:[#allocation14 + $0x1d4] ss:$8 sps:$4 sm:$0xff]  }
 0x592   : > { %v6759_v54 = vmax.f32 %v11130_v34, 0.0  ;;  %v6761_v29 = vmax.f32 %v11194_v37, 0.0  ;;  %v17041_v10 = vsel %vm15408_vm8, 4294967295, %v17040_v10 }
 0x593   : > { %v15400_v27 = vpack.c.bf16 %v6758_v23, %v6754_v51  ;;  %v15402_v32 = vpack.c.bf16 %v6760_v38, %v6756_v22  ;;  %17042 = vst [vmem:[#allocation71_spill] sm:$0xff] %v17041_v10  ;;  %v6883_v38 = vadd.s32 %v15120_v46, %v6850_v31  ;;  %v13288_v51 = vld [vmem:[#allocation14 + $0x1d0] ss:$8 sps:$4 sm:$0xff]   ;;  %vm6915_vm9 = vcmp.lt.s32.totalorder %v6882_v25, %v15136_v55  ;;  %v13324_v25 = vld [vmem:[#allocation11 + $0x1e0] ss:$8 sps:$4 sm:$0xff]  }
 0x594   : > { %v15413_v36 = vpack.c.bf16 %v6759_v54, %v6755_v40  ;;  %v15415_v44 = vpack.c.bf16 %v6761_v29, %v6757_v24  ;;  %8647 = vmatpush1.bf16.msra.mxu1 %v13279_v28  ;;  %v5266_v6 = vpop.f32.mrb[28].mxu0  ;;  %v6617_v11 = vpop.f32.mrb[28].mxu1  ;;  %7801 = vmatpush1.bf16.msra.mxu0 %v13315_v45  ;;  %v13323_v40 = vld [vmem:[#allocation11 + $0x1d4] ss:$8 sps:$4 sm:$0xff]   ;;  %v6851_v22 = vadd.s32 128, %v15105_v39 }
 0x595   : > { %17038 = vst [vmem:[#allocation69_spill] sm:$0xff] %v15400_v27  ;;  %17039 = vst [vmem:[#allocation70_spill] sm:$0xff] %v15402_v32  ;;  %v11131_v35 = vadd.f32 %v5266_v6, %v15123_v47  ;;  %v11195_v53 = vadd.f32 %v6617_v11, %v15125_v48  ;;  %v5268_v52 = vpop.f32.mrb[29].mxu0  ;;  %v6619_v34 = vpop.f32.mrb[29].mxu1  ;;  %8648 = vmatprep.subr.bf16.mxu1 %v13287_v30  ;;  %7802 = vmatprep.subr.bf16.mxu0 %v13320_v43  ;;  %v13296_v6 = vld [vmem:[#allocation14 + $0x1e4] ss:$8 sps:$4 sm:$0xff]  }
 0x596   : > { %17043 = vst [vmem:[#allocation72_spill] sm:$0xff] %v15415_v44  ;;  %v11132_v24 = vadd.f32 %v5268_v52, %v15128_v49  ;;  %v11196_v29 = vadd.f32 %v6619_v34, %v15130_v50  ;;  %v5270_v28 = vpop.f32.mrb[30].mxu0  ;;  %v6621_v37 = vpop.f32.mrb[30].mxu1  ;;  %10425 = vmatprep.mubr.msk.bf16.mxu0 %vm15408_vm8, %v15413_v36  ;;  %10681 = vmatprep.mubr.msk.bf16.mxu1 %vm15408_vm8, %v15413_v36  ;;  %v6852_v11 = vadd.s32 136, %v15105_v39  ;;  %v13321_v52 = vld [vmem:[#allocation11 + $0x1d0] ss:$8 sps:$4 sm:$0xff]  }
 0x597   : > { %v11133_v31 = vadd.f32 %v5270_v28, %v15123_v47  ;;  %v11197_v30 = vadd.f32 %v6621_v37, %v15125_v48  ;;  %v5272_v43 = vpop.f32.mrb[31].mxu0  ;;  %v6623_v45 = vpop.f32.mrb[31].mxu1  ;;  %10428 = vmatmul.mubr.msk.bf16.gmra.mrb[88].mxu0 %vm15408_vm8, %v15400_v27  ;;  %10684 = vmatmul.mubr.msk.bf16.gmra.mrb[88].mxu1 %vm15408_vm8, %v15400_v27  ;;  %vm6916_vm11 = vcmp.lt.s32.totalorder %v6883_v38, %v15136_v55  ;;  %v6762_v34 = vmax.f32 %v11131_v35, 0.0  ;;  %v13326_v44 = vld [vmem:[#allocation11 + $0x1e4] ss:$8 sps:$4 sm:$0xff]  }
 0x598   : > { %v11134_v23 = vadd.f32 %v5272_v43, %v15128_v49  ;;  %v11198_v54 = vadd.f32 %v6623_v45, %v15130_v50  ;;  %8649 = vmatpush1.bf16.msra.mxu1 %v13285_v42  ;;  %7803 = vmatpush1.bf16.msra.mxu0 %v13318_v13  ;;  %v6764_v28 = vmax.f32 %v11195_v53, 0.0  ;;  %v6763_v12 = vmax.f32 %v11132_v24, 0.0  ;;  %vm15450_vm12 = vmpackc.low %vm6916_vm11, %vm6915_vm9 }
 0x599   : > { %v6766_v37 = vmax.f32 %v11133_v31, 0.0  ;;  %v6768_v32 = vmax.f32 %v11197_v30, 0.0  ;;  %8650 = vmatprep.subr.bf16.mxu1 %v13290_v33  ;;  %7804 = vmatprep.subr.bf16.mxu0 %v13323_v40  ;;  %v6765_v19 = vmax.f32 %v11196_v29, 0.0  ;;  %v17046_v13 = vmov 0  ;;  %v13294_v29 = vld [vmem:[#allocation14 + $0x1e0] ss:$8 sps:$4 sm:$0xff]  }
 0x59a   : > { %v6767_v43 = vmax.f32 %v11134_v23, 0.0  ;;  %v6769_v27 = vmax.f32 %v11198_v54, 0.0  ;;  %v17047_v13 = vsel %vm15450_vm12, 4294967295, %v17046_v13  ;;  %v6884_v35 = vadd.s32 %v15120_v46, %v6851_v22  ;;  %v13299_v22 = vld [vmem:[#allocation14 + $0x1f4] ss:$8 sps:$4 sm:$0xff]  }
 0x59b   : > { %v15442_v45 = vpack.c.bf16 %v6766_v37, %v6762_v34  ;;  %v15444_v42 = vpack.c.bf16 %v6768_v32, %v6764_v28  ;;  %17048 = vst [vmem:[#allocation75_spill] sm:$0xff] %v17047_v13  ;;  %v6885_v32 = vadd.s32 %v15120_v46, %v6852_v11  ;;  %v6853_v34 = vadd.s32 144, %v15105_v39 }
 0x59c   : > { %v15455_v53 = vpack.c.bf16 %v6767_v43, %v6763_v12  ;;  %v15457_v33 = vpack.c.bf16 %v6769_v27, %v6765_v19  ;;  %8651 = vmatpush1.bf16.msra.mxu1 %v13288_v51  ;;  %v5276_v40 = vpop.f32.mrb[32].mxu0  ;;  %v6627_v24 = vpop.f32.mrb[32].mxu1  ;;  %7805 = vmatpush1.bf16.msra.mxu0 %v13321_v52  ;;  %v13329_v12 = vld [vmem:[#allocation11 + $0x1f4] ss:$8 sps:$4 sm:$0xff]   ;;  %vm6917_vm14 = vcmp.lt.s32.totalorder %v6884_v35, %v15136_v55 }
 0x59d   : > { %17044 = vst [vmem:[#allocation73_spill] sm:$0xff] %v15442_v45  ;;  %17045 = vst [vmem:[#allocation74_spill] sm:$0xff] %v15444_v42  ;;  %v11135_v38 = vadd.f32 %v5276_v40, %v15123_v47  ;;  %v11199_v31 = vadd.f32 %v6627_v24, %v15125_v48  ;;  %v5278_v30 = vpop.f32.mrb[33].mxu0  ;;  %v6629_v23 = vpop.f32.mrb[33].mxu1  ;;  %8652 = vmatprep.subr.bf16.mxu1 %v13296_v6  ;;  %7806 = vmatprep.subr.bf16.mxu0 %v13326_v44  ;;  %v13297_v43 = vld [vmem:[#allocation14 + $0x1f0] ss:$8 sps:$4 sm:$0xff]  }
 0x59e   : > { %17049 = vst [vmem:[#allocation76_spill] sm:$0xff] %v15457_v33  ;;  %v11136_v19 = vadd.f32 %v5278_v30, %v15128_v49  ;;  %v11200_v27 = vadd.f32 %v6629_v23, %v15130_v50  ;;  %v5280_v51 = vpop.f32.mrb[34].mxu0  ;;  %v6631_v54 = vpop.f32.mrb[34].mxu1  ;;  %10431 = vmatprep.mubr.msk.bf16.mxu0 %vm15450_vm12, %v15455_v53  ;;  %10687 = vmatprep.mubr.msk.bf16.mxu1 %vm15450_vm12, %v15455_v53  ;;  %v6854_v40 = vadd.s32 152, %v15105_v39  ;;  %v13327_v24 = vld [vmem:[#allocation11 + $0x1f0] ss:$8 sps:$4 sm:$0xff]  }
 0x59f   : > { %v11137_v11 = vadd.f32 %v5280_v51, %v15123_v47  ;;  %v11201_v6 = vadd.f32 %v6631_v54, %v15125_v48  ;;  %v5282_v44 = vpop.f32.mrb[35].mxu0  ;;  %v6633_v52 = vpop.f32.mrb[35].mxu1  ;;  %10434 = vmatmul.mubr.msk.bf16.gmra.mrb[92].mxu0 %vm15450_vm12, %v15442_v45  ;;  %10690 = vmatmul.mubr.msk.bf16.gmra.mrb[92].mxu1 %vm15450_vm12, %v15442_v45  ;;  %vm6918_vm15 = vcmp.lt.s32.totalorder %v6885_v32, %v15136_v55  ;;  %v6770_v30 = vmax.f32 %v11135_v38, 0.0 }
 0x5a0   : > { %v11138_v28 = vadd.f32 %v5282_v44, %v15128_v49  ;;  %v11202_v37 = vadd.f32 %v6633_v52, %v15130_v50  ;;  %8653 = vmatpush1.bf16.msra.mxu1 %v13294_v29  ;;  %7807 = vmatpush1.bf16.msra.mxu0 %v13324_v25  ;;  %v6772_v23 = vmax.f32 %v11199_v31, 0.0  ;;  %v6771_v42 = vmax.f32 %v11136_v19, 0.0  ;;  %vm15492_vm1 = vmpackc.low %vm6918_vm15, %vm6917_vm14 }
 0x5a1   : > { %v6774_v51 = vmax.f32 %v11137_v11, 0.0  ;;  %v6776_v54 = vmax.f32 %v11201_v6, 0.0  ;;  %8654 = vmatprep.subr.bf16.mxu1 %v13299_v22  ;;  %7808 = vmatprep.subr.bf16.mxu0 %v13329_v12  ;;  %v6773_v33 = vmax.f32 %v11200_v27, 0.0  ;;  %v17051_v25 = vmov 0 }
 0x5a2   : > { %v6775_v45 = vmax.f32 %v11138_v28, 0.0  ;;  %v6777_v44 = vmax.f32 %v11202_v37, 0.0  ;;  %v17052_v25 = vsel %vm15492_vm1, 4294967295, %v17051_v25  ;;  %v6886_v38 = vadd.s32 %v15120_v46, %v6853_v34 }
 0x5a3   : > { %v15484_v13 = vpack.c.bf16 %v6774_v51, %v6770_v30  ;;  %v15486_v29 = vpack.c.bf16 %v6776_v54, %v6772_v23  ;;  %17053 = vst [vmem:[#allocation78_spill] sm:$0xff] %v17052_v25  ;;  %v6887_v27 = vadd.s32 %v15120_v46, %v6854_v40  ;;  %v6856_v30 = vadd.s32 168, %v15105_v39 }
 0x5a4   : > { %v15497_v31 = vpack.c.bf16 %v6775_v45, %v6771_v42  ;;  %v15499_v22 = vpack.c.bf16 %v6777_v44, %v6773_v33  ;;  %8655 = vmatpush1.bf16.msra.mxu1 %v13297_v43  ;;  %v5286_v12 = vpop.f32.mrb[36].mxu0  ;;  %v6637_v19 = vpop.f32.mrb[36].mxu1  ;;  %7809 = vmatpush1.bf16.msra.mxu0 %v13327_v24  ;;  %vm6919_vm2 = vcmp.lt.s32.totalorder %v6886_v38, %v15136_v55  ;;  %v6855_v43 = vadd.s32 160, %v15105_v39 }
 0x5a5   : > { %17050 = vst [vmem:[#allocation77_spill] sm:$0xff] %v15486_v29  ;;  %v11139_v35 = vadd.f32 %v5286_v12, %v15123_v47  ;;  %v11203_v32 = vadd.f32 %v6637_v19, %v15125_v48  ;;  %10902 = vmatprep.subr.msk.bf16.mxu1 %vm15156_vm4, %v15161_v20  ;;  %v5288_v11 = vpop.f32.mrb[37].mxu0  ;;  %v6639_v6 = vpop.f32.mrb[37].mxu1  ;;  %vm6920_vm5 = vcmp.lt.s32.totalorder %v6887_v27, %v15136_v55 }
 0x5a6   : > { %17054 = vst [vmem:[#allocation79_spill] sm:$0xff] %v15499_v22  ;;  %v11140_v45 = vadd.f32 %v5288_v11, %v15128_v49  ;;  %v11204_v42 = vadd.f32 %v6639_v6, %v15130_v50  ;;  %v5290_v33 = vpop.f32.mrb[38].mxu0  ;;  %v6641_v52 = vpop.f32.mrb[38].mxu1  ;;  %10437 = vmatprep.mubr.msk.bf16.mxu0 %vm15492_vm1, %v15497_v31  ;;  %10693 = vmatprep.mubr.msk.bf16.mxu1 %vm15492_vm1, %v15497_v31  ;;  %vm15535_vm6 = vmpackc.low %vm6920_vm5, %vm6919_vm2 }
 0x5a7   : > { %v11141_v34 = vadd.f32 %v5290_v33, %v15123_v47  ;;  %v11205_v20 = vadd.f32 %v6641_v52, %v15125_v48  ;;  %v5292_v28 = vpop.f32.mrb[39].mxu0  ;;  %v6643_v37 = vpop.f32.mrb[39].mxu1  ;;  %10440 = vmatmul.mubr.msk.bf16.gmra.mrb[96].mxu0 %vm15492_vm1, %v15484_v13  ;;  %10696 = vmatmul.mubr.msk.bf16.gmra.mrb[96].mxu1 %vm15492_vm1, %v15484_v13  ;;  %v6778_v23 = vmax.f32 %v11139_v35, 0.0  ;;  %v6780_v51 = vmax.f32 %v11203_v32, 0.0 }
 0x5a8   : > { %v11142_v40 = vadd.f32 %v5292_v28, %v15128_v49  ;;  %v11206_v24 = vadd.f32 %v6643_v37, %v15130_v50  ;;  %v6779_v12 = vmax.f32 %v11140_v45, 0.0  ;;  %v6781_v19 = vmax.f32 %v11204_v42, 0.0 }
 0x5a9   : > { %v6782_v54 = vmax.f32 %v11141_v34, 0.0  ;;  %v6784_v44 = vmax.f32 %v11205_v20, 0.0  ;;  %v17057_v28 = vmov 0  ;;  %v6888_v27 = vadd.s32 %v15120_v46, %v6855_v43 }
 0x5aa   : > { %v6783_v11 = vmax.f32 %v11142_v40, 0.0  ;;  %v6785_v6 = vmax.f32 %v11206_v24, 0.0  ;;  %v17058_v28 = vsel %vm15535_vm6, 4294967295, %v17057_v28  ;;  %v6889_v34 = vadd.s32 %v15120_v46, %v6856_v30 }
 0x5ab   : > { %v15529_v33 = vpack.c.bf16 %v6782_v54, %v6778_v23  ;;  %v15531_v52 = vpack.c.bf16 %v6784_v44, %v6780_v51  ;;  %17059 = vst [vmem:[#allocation82_spill] sm:$0xff] %v17058_v28  ;;  %vm6921_vm9 = vcmp.lt.s32.totalorder %v6888_v27, %v15136_v55 }
 0x5ac   : > { %v15540_v35 = vpack.c.bf16 %v6783_v11, %v6779_v12  ;;  %v15542_v32 = vpack.c.bf16 %v6785_v6, %v6781_v19  ;;  %v5296_v45 = vpop.f32.mrb[40].mxu0  ;;  %v6647_v42 = vpop.f32.mrb[40].mxu1  ;;  %v6857_v19 = vadd.s32 176, %v15105_v39  ;;  %vm6922_vm11 = vcmp.lt.s32.totalorder %v6889_v34, %v15136_v55 }
 0x5ad   : > { %17055 = vst [vmem:[#allocation80_spill] sm:$0xff] %v15529_v33  ;;  %17056 = vst [vmem:[#allocation81_spill] sm:$0xff] %v15531_v52  ;;  %v11143_v20 = vadd.f32 %v5296_v45, %v15123_v47  ;;  %v11207_v37 = vadd.f32 %v6647_v42, %v15125_v48  ;;  %v5298_v40 = vpop.f32.mrb[41].mxu0  ;;  %v6649_v38 = vpop.f32.mrb[41].mxu1  ;;  %v6858_v45 = vadd.s32 184, %v15105_v39 }
 0x5ae   : > { %17060 = vst [vmem:[#allocation83_spill] sm:$0xff] %v15542_v32  ;;  %v11144_v24 = vadd.f32 %v5298_v40, %v15128_v49  ;;  %v11208_v23 = vadd.f32 %v6649_v38, %v15130_v50  ;;  %v5300_v51 = vpop.f32.mrb[42].mxu0  ;;  %v6651_v43 = vpop.f32.mrb[42].mxu1  ;;  %10443 = vmatprep.mubr.msk.bf16.mxu0 %vm15535_vm6, %v15540_v35  ;;  %10699 = vmatprep.mubr.msk.bf16.mxu1 %vm15535_vm6, %v15540_v35  ;;  %vm15575_vm14 = vmpackc.low %vm6922_vm11, %vm6921_vm9 }
 0x5af   : > { %v11145_v30 = vadd.f32 %v5300_v51, %v15123_v47  ;;  %v11209_v54 = vadd.f32 %v6651_v43, %v15125_v48  ;;  %v5302_v44 = vpop.f32.mrb[43].mxu0  ;;  %v6653_v12 = vpop.f32.mrb[43].mxu1  ;;  %10446 = vmatmul.mubr.msk.bf16.gmra.mrb[100].mxu0 %vm15535_vm6, %v15529_v33  ;;  %10702 = vmatmul.mubr.msk.bf16.gmra.mrb[100].mxu1 %vm15535_vm6, %v15529_v33  ;;  %v6786_v42 = vmax.f32 %v11143_v20, 0.0  ;;  %v6788_v40 = vmax.f32 %v11207_v37, 0.0 }
 0x5b0   : > { %v11146_v11 = vadd.f32 %v5302_v44, %v15128_v49  ;;  %v11210_v6 = vadd.f32 %v6653_v12, %v15130_v50  ;;  %v6787_v43 = vmax.f32 %v11144_v24, 0.0  ;;  %v6789_v52 = vmax.f32 %v11208_v23, 0.0 }
 0x5b1   : > { %v6790_v38 = vmax.f32 %v11145_v30, 0.0  ;;  %v6792_v51 = vmax.f32 %v11209_v54, 0.0  ;;  %v17063_v44 = vmov 0  ;;  %v6890_v34 = vadd.s32 %v15120_v46, %v6857_v19 }
 0x5b2   : > { %v6791_v32 = vmax.f32 %v11146_v11, 0.0  ;;  %v6793_v29 = vmax.f32 %v11210_v6, 0.0  ;;  %v17064_v44 = vsel %vm15575_vm14, 4294967295, %v17063_v44  ;;  %v6891_v30 = vadd.s32 %v15120_v46, %v6858_v45 }
 0x5b3   : > { %v15569_v22 = vpack.c.bf16 %v6790_v38, %v6786_v42  ;;  %v15571_v33 = vpack.c.bf16 %v6792_v51, %v6788_v40  ;;  %17065 = vst [vmem:[#allocation86_spill] sm:$0xff] %v17064_v44  ;;  %vm6923_vm15 = vcmp.lt.s32.totalorder %v6890_v34, %v15136_v55  ;;  %v6859_v38 = vadd.s32 192, %v15105_v39 }
 0x5b4   : > { %v15580_v20 = vpack.c.bf16 %v6791_v32, %v6787_v43  ;;  %v15582_v37 = vpack.c.bf16 %v6793_v29, %v6789_v52  ;;  %v5306_v24 = vpop.f32.mrb[44].mxu0  ;;  %v6657_v23 = vpop.f32.mrb[44].mxu1  ;;  %vm6924_vm2 = vcmp.lt.s32.totalorder %v6891_v30, %v15136_v55 }
 0x5b5   : > { %17061 = vst [vmem:[#allocation84_spill] sm:$0xff] %v15569_v22  ;;  %17062 = vst [vmem:[#allocation85_spill] sm:$0xff] %v15571_v33  ;;  %v11147_v54 = vadd.f32 %v5306_v24, %v15123_v47  ;;  %v11211_v12 = vadd.f32 %v6657_v23, %v15125_v48  ;;  %v5308_v11 = vpop.f32.mrb[45].mxu0  ;;  %v6659_v27 = vpop.f32.mrb[45].mxu1  ;;  %v6860_v24 = vadd.s32 200, %v15105_v39  ;;  %v6892_v30 = vadd.s32 %v15120_v46, %v6859_v38 }
 0x5b6   : > { %17066 = vst [vmem:[#allocation87_spill] sm:$0xff] %v15580_v20  ;;  %17067 = vst [vmem:[#allocation88_spill] sm:$0xff] %v15582_v37  ;;  %v11148_v6 = vadd.f32 %v5308_v11, %v15128_v49  ;;  %v11212_v42 = vadd.f32 %v6659_v27, %v15130_v50  ;;  %v5310_v40 = vpop.f32.mrb[46].mxu0  ;;  %v6661_v19 = vpop.f32.mrb[46].mxu1  ;;  %10449 = vmatprep.mubr.msk.bf16.mxu0 %vm15575_vm14, %v15580_v20  ;;  %10705 = vmatprep.mubr.msk.bf16.mxu1 %vm15575_vm14, %v15580_v20 }
 0x5b7   : > { %v11149_v29 = vadd.f32 %v5310_v40, %v15123_v47  ;;  %v11213_v52 = vadd.f32 %v6661_v19, %v15125_v48  ;;  %v5312_v32 = vpop.f32.mrb[47].mxu0  ;;  %v6663_v45 = vpop.f32.mrb[47].mxu1  ;;  %10452 = vmatmul.mubr.msk.bf16.gmra.mrb[104].mxu0 %vm15575_vm14, %v15569_v22  ;;  %10708 = vmatmul.mubr.msk.bf16.gmra.mrb[104].mxu1 %vm15575_vm14, %v15569_v22  ;;  %v6794_v23 = vmax.f32 %v11147_v54, 0.0  ;;  %v6796_v11 = vmax.f32 %v11211_v12, 0.0  ;;  %vm15615_vm5 = vmpackc.low %vm6924_vm2, %vm6923_vm15 }
 0x5b8   : > { %v11150_v51 = vadd.f32 %v5312_v32, %v15128_v49  ;;  %v11214_v43 = vadd.f32 %v6663_v45, %v15130_v50  ;;  %v6795_v19 = vmax.f32 %v11148_v6, 0.0  ;;  %v6797_v33 = vmax.f32 %v11212_v42, 0.0 }
 0x5b9   : > { %v6798_v27 = vmax.f32 %v11149_v29, 0.0  ;;  %v6800_v40 = vmax.f32 %v11213_v52, 0.0  ;;  %v17070_v32 = vmov 0  ;;  %v6893_v29 = vadd.s32 %v15120_v46, %v6860_v24 }
 0x5ba   : > { %v6799_v37 = vmax.f32 %v11150_v51, 0.0  ;;  %v6801_v22 = vmax.f32 %v11214_v43, 0.0  ;;  %v17071_v32 = vsel %vm15615_vm5, 4294967295, %v17070_v32  ;;  %vm6925_vm9 = vcmp.lt.s32.totalorder %v6892_v30, %v15136_v55 }
 0x5bb   : > { %v15609_v44 = vpack.c.bf16 %v6798_v27, %v6794_v23  ;;  %v15611_v20 = vpack.c.bf16 %v6800_v40, %v6796_v11  ;;  %17072 = vst [vmem:[#allocation91_spill] sm:$0xff] %v17071_v32  ;;  %v6861_v27 = vadd.s32 208, %v15105_v39  ;;  %vm6926_vm11 = vcmp.lt.s32.totalorder %v6893_v29, %v15136_v55 }
 0x5bc   : > { %v15620_v54 = vpack.c.bf16 %v6799_v37, %v6795_v19  ;;  %v15622_v12 = vpack.c.bf16 %v6801_v22, %v6797_v33  ;;  %v5316_v6 = vpop.f32.mrb[48].mxu0  ;;  %v6667_v42 = vpop.f32.mrb[48].mxu1  ;;  %vm15655_vm15 = vmpackc.low %vm6926_vm11, %vm6925_vm9 }
 0x5bd   : > { %17068 = vst [vmem:[#allocation89_spill] sm:$0xff] %v15609_v44  ;;  %17069 = vst [vmem:[#allocation90_spill] sm:$0xff] %v15611_v20  ;;  %v11151_v52 = vadd.f32 %v5316_v6, %v15123_v47  ;;  %v11215_v45 = vadd.f32 %v6667_v42, %v15125_v48  ;;  %v5318_v51 = vpop.f32.mrb[49].mxu0  ;;  %v6669_v34 = vpop.f32.mrb[49].mxu1  ;;  %v6862_v6 = vadd.s32 216, %v15105_v39  ;;  %v6894_v29 = vadd.s32 %v15120_v46, %v6861_v27 }
 0x5be   : > { %17073 = vst [vmem:[#allocation92_spill] sm:$0xff] %v15620_v54  ;;  %17074 = vst [vmem:[#allocation93_spill] sm:$0xff] %v15622_v12  ;;  %v11152_v43 = vadd.f32 %v5318_v51, %v15128_v49  ;;  %v11216_v23 = vadd.f32 %v6669_v34, %v15130_v50  ;;  %v5320_v11 = vpop.f32.mrb[50].mxu0  ;;  %v6671_v38 = vpop.f32.mrb[50].mxu1  ;;  %10455 = vmatprep.mubr.msk.bf16.mxu0 %vm15615_vm5, %v15620_v54  ;;  %10711 = vmatprep.mubr.msk.bf16.mxu1 %vm15615_vm5, %v15620_v54 }
 0x5bf   : > { %v11153_v22 = vadd.f32 %v5320_v11, %v15123_v47  ;;  %v11217_v33 = vadd.f32 %v6671_v38, %v15125_v48  ;;  %v5322_v37 = vpop.f32.mrb[51].mxu0  ;;  %v6673_v24 = vpop.f32.mrb[51].mxu1  ;;  %10458 = vmatmul.mubr.msk.bf16.gmra.mrb[108].mxu0 %vm15615_vm5, %v15609_v44  ;;  %10714 = vmatmul.mubr.msk.bf16.gmra.mrb[108].mxu1 %vm15615_vm5, %v15609_v44  ;;  %v6802_v42 = vmax.f32 %v11151_v52, 0.0  ;;  %v6804_v51 = vmax.f32 %v11215_v45, 0.0 }
 0x5c0   : > { %v11154_v40 = vadd.f32 %v5322_v37, %v15128_v49  ;;  %v11218_v19 = vadd.f32 %v6673_v24, %v15130_v50  ;;  %v6803_v38 = vmax.f32 %v11152_v43, 0.0  ;;  %v6805_v20 = vmax.f32 %v11216_v23, 0.0 }
 0x5c1   : > { %v6806_v34 = vmax.f32 %v11153_v22, 0.0  ;;  %v6808_v11 = vmax.f32 %v11217_v33, 0.0  ;;  %v17077_v37 = vmov 0  ;;  %v6895_v22 = vadd.s32 %v15120_v46, %v6862_v6 }
 0x5c2   : > { %v6807_v12 = vmax.f32 %v11154_v40, 0.0  ;;  %v6809_v44 = vmax.f32 %v11218_v19, 0.0  ;;  %v17078_v37 = vsel %vm15655_vm15, 4294967295, %v17077_v37  ;;  %v6863_v33 = vadd.s32 224, %v15105_v39 }
 0x5c3   : > { %v15649_v32 = vpack.c.bf16 %v6806_v34, %v6802_v42  ;;  %v15651_v54 = vpack.c.bf16 %v6808_v11, %v6804_v51  ;;  %17079 = vst [vmem:[#allocation96_spill] sm:$0xff] %v17078_v37  ;;  %vm6927_vm2 = vcmp.lt.s32.totalorder %v6894_v29, %v15136_v55  ;;  %v6864_v11 = vadd.s32 232, %v15105_v39 }
 0x5c4   : > { %v15660_v52 = vpack.c.bf16 %v6807_v12, %v6803_v38  ;;  %v15662_v45 = vpack.c.bf16 %v6809_v44, %v6805_v20  ;;  %v5326_v43 = vpop.f32.mrb[52].mxu0  ;;  %v6677_v23 = vpop.f32.mrb[52].mxu1  ;;  %vm6928_vm9 = vcmp.lt.s32.totalorder %v6895_v22, %v15136_v55 }
 0x5c5   : > { %17075 = vst [vmem:[#allocation94_spill] sm:$0xff] %v15649_v32  ;;  %17076 = vst [vmem:[#allocation95_spill] sm:$0xff] %v15651_v54  ;;  %v11155_v24 = vadd.f32 %v5326_v43, %v15123_v47  ;;  %v11219_v30 = vadd.f32 %v6677_v23, %v15125_v48  ;;  %v5328_v40 = vpop.f32.mrb[53].mxu0  ;;  %v6679_v19 = vpop.f32.mrb[53].mxu1  ;;  %v6896_v23 = vadd.s32 %v15120_v46, %v6863_v33 }
 0x5c6   : > { %17080 = vst [vmem:[#allocation97_spill] sm:$0xff] %v15660_v52  ;;  %17081 = vst [vmem:[#allocation98_spill] sm:$0xff] %v15662_v45  ;;  %v11156_v42 = vadd.f32 %v5328_v40, %v15128_v49  ;;  %v11220_v27 = vadd.f32 %v6679_v19, %v15130_v50  ;;  %v5330_v12 = vpop.f32.mrb[54].mxu0  ;;  %v6681_v51 = vpop.f32.mrb[54].mxu1  ;;  %10461 = vmatprep.mubr.msk.bf16.mxu0 %vm15655_vm15, %v15660_v52  ;;  %10717 = vmatprep.mubr.msk.bf16.mxu1 %vm15655_vm15, %v15660_v52 }
 0x5c7   : > { %v11157_v44 = vadd.f32 %v5330_v12, %v15123_v47  ;;  %v11221_v20 = vadd.f32 %v6681_v51, %v15125_v48  ;;  %v5332_v6 = vpop.f32.mrb[55].mxu0  ;;  %v6683_v34 = vpop.f32.mrb[55].mxu1  ;;  %10464 = vmatmul.mubr.msk.bf16.gmra.mrb[112].mxu0 %vm15655_vm15, %v15649_v32  ;;  %10720 = vmatmul.mubr.msk.bf16.gmra.mrb[112].mxu1 %vm15655_vm15, %v15649_v32  ;;  %v6810_v40 = vmax.f32 %v11155_v24, 0.0  ;;  %v6812_v19 = vmax.f32 %v11219_v30, 0.0  ;;  %vm15696_vm11 = vmpackc.low %vm6928_vm9, %vm6927_vm2 }
 0x5c8   : > { %v11158_v38 = vadd.f32 %v5332_v6, %v15128_v49  ;;  %v11222_v43 = vadd.f32 %v6683_v34, %v15130_v50  ;;  %v6811_v54 = vmax.f32 %v11156_v42, 0.0  ;;  %v6813_v45 = vmax.f32 %v11220_v27, 0.0 }
 0x5c9   : > { %v6814_v12 = vmax.f32 %v11157_v44, 0.0  ;;  %v6816_v51 = vmax.f32 %v11221_v20, 0.0  ;;  %v17084_v6 = vmov 0  ;;  %v6897_v22 = vadd.s32 %v15120_v46, %v6864_v11 }
 0x5ca   : > { %v6815_v37 = vmax.f32 %v11158_v38, 0.0  ;;  %v6817_v32 = vmax.f32 %v11222_v43, 0.0  ;;  %v17085_v6 = vsel %vm15696_vm11, 4294967295, %v17084_v6  ;;  %vm6929_vm2 = vcmp.lt.s32.totalorder %v6896_v23, %v15136_v55 }
 0x5cb   : > { %v15690_v52 = vpack.c.bf16 %v6814_v12, %v6810_v40  ;;  %v15692_v28 = vpack.c.bf16 %v6816_v51, %v6812_v19  ;;  %17086 = vst [vmem:[#allocation101_spill] sm:$0xff] %v17085_v6  ;;  %vm6930_vm9 = vcmp.lt.s32.totalorder %v6897_v22, %v15136_v55  ;;  %v6865_v12 = vadd.s32 240, %v15105_v39 }
 0x5cc   : > { %v15701_v33 = vpack.c.bf16 %v6815_v37, %v6811_v54  ;;  %v15703_v24 = vpack.c.bf16 %v6817_v32, %v6813_v45  ;;  %v5336_v30 = vpop.f32.mrb[56].mxu0  ;;  %v6687_v42 = vpop.f32.mrb[56].mxu1  ;;  %v6866_v51 = vadd.s32 248, %v15105_v39 }
 0x5cd   : > { %17082 = vst [vmem:[#allocation99_spill] sm:$0xff] %v15690_v52  ;;  %17083 = vst [vmem:[#allocation100_spill] sm:$0xff] %v15692_v28  ;;  %v11159_v27 = vadd.f32 %v5336_v30, %v15123_v47  ;;  %v11223_v44 = vadd.f32 %v6687_v42, %v15125_v48  ;;  %v5338_v20 = vpop.f32.mrb[57].mxu0  ;;  %v6689_v34 = vpop.f32.mrb[57].mxu1 }
 0x5ce   : > { %17087 = vst [vmem:[#allocation102_spill] sm:$0xff] %v15703_v24  ;;  %v11160_v29 = vadd.f32 %v5338_v20, %v15128_v49  ;;  %v11224_v38 = vadd.f32 %v6689_v34, %v15130_v50  ;;  %v5340_v43 = vpop.f32.mrb[58].mxu0  ;;  %v6691_v40 = vpop.f32.mrb[58].mxu1  ;;  %10467 = vmatprep.mubr.msk.bf16.mxu0 %vm15696_vm11, %v15701_v33  ;;  %10723 = vmatprep.mubr.msk.bf16.mxu1 %vm15696_vm11, %v15701_v33 }
 0x5cf   : > { %v11161_v32 = vadd.f32 %v5340_v43, %v15123_v47  ;;  %v11225_v54 = vadd.f32 %v6691_v40, %v15125_v48  ;;  %v5342_v37 = vpop.f32.mrb[59].mxu0  ;;  %v6693_v45 = vpop.f32.mrb[59].mxu1  ;;  %10470 = vmatmul.mubr.msk.bf16.gmra.mrb[116].mxu0 %vm15696_vm11, %v15690_v52  ;;  %10726 = vmatmul.mubr.msk.bf16.gmra.mrb[116].mxu1 %vm15696_vm11, %v15690_v52  ;;  %v6818_v30 = vmax.f32 %v11159_v27, 0.0  ;;  %v6820_v42 = vmax.f32 %v11223_v44, 0.0  ;;  %vm15737_vm11 = vmpackc.low %vm6930_vm9, %vm6929_vm2 }
 0x5d0   : > { %v11162_v11 = vadd.f32 %v5342_v37, %v15128_v49  ;;  %v11226_v19 = vadd.f32 %v6693_v45, %v15130_v50  ;;  %v6819_v43 = vmax.f32 %v11160_v29, 0.0  ;;  %v6821_v40 = vmax.f32 %v11224_v38, 0.0 }
 0x5d1   : > { %v6822_v20 = vmax.f32 %v11161_v32, 0.0  ;;  %v6824_v34 = vmax.f32 %v11225_v54, 0.0  ;;  %v17089_v37 = vmov 0  ;;  %v6898_v32 = vadd.s32 %v15120_v46, %v6865_v12 }
 0x5d2   : > { %v6823_v28 = vmax.f32 %v11162_v11, 0.0  ;;  %v6825_v24 = vmax.f32 %v11226_v19, 0.0  ;;  %v17090_v37 = vsel %vm15737_vm11, 4294967295, %v17089_v37  ;;  %v6899_v54 = vadd.s32 %v15120_v46, %v6866_v51 }
 0x5d3   : > { %v15729_v6 = vpack.c.bf16 %v6822_v20, %v6818_v30  ;;  %v15731_v52 = vpack.c.bf16 %v6824_v34, %v6820_v42  ;;  %17091 = vst [vmem:[#allocation104_spill] sm:$0xff] %v17090_v37  ;;  %vm6931_vm2 = vcmp.lt.s32.totalorder %v6898_v32, %v15136_v55 }
 0x5d4   : > { %v15741_v27 = vpack.c.bf16 %v6823_v28, %v6819_v43  ;;  %v15743_v44 = vpack.c.bf16 %v6825_v24, %v6821_v40  ;;  %v5346_v29 = vpop.f32.mrb[60].mxu0  ;;  %v6697_v38 = vpop.f32.mrb[60].mxu1  ;;  %vm6932_vm9 = vcmp.lt.s32.totalorder %v6899_v54, %v15136_v55  ;;  %v17114_v54 = vld [vmem:[#allocation97_spill] sm:$0xff] }
 0x5d5   : > { %17088 = vst [vmem:[#allocation103_spill] sm:$0xff] %v15731_v52  ;;  %v11163_v45 = vadd.f32 %v5346_v29, %v15123_v47  ;;  %v11227_v23 = vadd.f32 %v6697_v38, %v15125_v48  ;;  %v5348_v11 = vpop.f32.mrb[61].mxu0  ;;  %v6699_v22 = vpop.f32.mrb[61].mxu1 }
 0x5d6   : > { %17092 = vst [vmem:[#allocation105_spill] sm:$0xff] %v15743_v44  ;;  %v11164_v19 = vadd.f32 %v5348_v11, %v15128_v49  ;;  %v11228_v30 = vadd.f32 %v6699_v22, %v15130_v50  ;;  %v5350_v28 = vpop.f32.mrb[62].mxu0  ;;  %v6701_v42 = vpop.f32.mrb[62].mxu1  ;;  %10473 = vmatprep.mubr.msk.bf16.mxu0 %vm15737_vm11, %v15741_v27  ;;  %10729 = vmatprep.mubr.msk.bf16.mxu1 %vm15737_vm11, %v15741_v27 }
 0x5d7   : > { %v11165_v24 = vadd.f32 %v5350_v28, %v15123_v47  ;;  %v11229_v12 = vadd.f32 %v6701_v42, %v15125_v48  ;;  %v5352_v51 = vpop.f32.mrb[63].mxu0  ;;  %v6703_v20 = vpop.f32.mrb[63].mxu1  ;;  %10476 = vmatmul.mubr.msk.bf16.gmra.mrb[120].mxu0 %vm15737_vm11, %v15729_v6  ;;  %10732 = vmatmul.mubr.msk.bf16.gmra.mrb[120].mxu1 %vm15737_vm11, %v15729_v6  ;;  %v6826_v47 = vmax.f32 %v11163_v45, 0.0  ;;  %v6828_v48 = vmax.f32 %v11227_v23, 0.0  ;;  %vm15773_vm11 = vmpackc.low %vm6932_vm9, %vm6931_vm2  ;;  %v17116_v23 = vld [vmem:[#allocation70_spill] sm:$0xff] }
 0x5d8   : > { %v11166_v34 = vadd.f32 %v5352_v51, %v15128_v49  ;;  %v11230_v43 = vadd.f32 %v6703_v20, %v15130_v50  ;;  %v6827_v38 = vmax.f32 %v11164_v19, 0.0  ;;  %v6829_v11 = vmax.f32 %v11228_v30, 0.0  ;;  %v17117_v19 = vld [vmem:[#allocation94_spill] sm:$0xff]  ;;  %v17118_v30 = vld [vmem:[#allocation76_spill] sm:$0xff]  ;;  %v17127_v20 = vld [vmem:[#allocation81_spill] sm:$0xff] }
 0x5d9   : > { %v6830_v40 = vmax.f32 %v11165_v24, 0.0  ;;  %v6832_v29 = vmax.f32 %v11229_v12, 0.0  ;;  %v17094_v49 = vmov 0  ;;  %v17119_v24 = vld [vmem:[#allocation101_spill] sm:$0xff]  ;;  %v17121_v12 = vld [vmem:[#allocation99_spill] sm:$0xff]  ;;  %vm17122_vm9 = vnez %v17090_v37  ;;  %v17123_v51 = vld [vmem:[#allocation74_spill] sm:$0xff] }
 0x5da   : > { %v6831_v22 = vmax.f32 %v11166_v34, 0.0  ;;  %v6833_v28 = vmax.f32 %v11230_v43, 0.0  ;;  %v17095_v49 = vsel %vm15773_vm11, 4294967295, %v17094_v49  ;;  %vm17120_vm2 = vnez %v17119_v24  ;;  %v17128_v34 = vld [vmem:[#allocation88_spill] sm:$0xff]  ;;  %v17129_v43 = vld [vmem:[#allocation85_spill] sm:$0xff] }
 0x5db   : > { %v15769_v42 = vpack.c.bf16 %v6830_v40, %v6826_v47  ;;  %v15771_v46 = vpack.c.bf16 %v6832_v29, %v6828_v48  ;;  %17096 = vst [vmem:[#allocation107_spill] sm:$0xff] %v17095_v49  ;;  %v17130_v47 = vld [vmem:[#allocation93_spill] sm:$0xff]  ;;  %v17131_v48 = vld [vmem:[#allocation90_spill] sm:$0xff]  ;;  %v17133_v29 = vld [vmem:[#allocation95_spill] sm:$0xff] }
 0x5dc   : > { %v15777_v50 = vpack.c.bf16 %v6831_v22, %v6827_v38  ;;  %v15779_v32 = vpack.c.bf16 %v6833_v28, %v6829_v11  ;;  %v17132_v40 = vld [vmem:[#allocation98_spill] sm:$0xff]  ;;  %v17135_v11 = vld [vmem:[#allocation100_spill] sm:$0xff]  ;;  %v8099_v22 = vld [vmem:[#allocation16] sm:$0x3] }
 0x5dd   : > { %17093 = vst [vmem:[#allocation106_spill] sm:$0xff] %v15771_v46  ;;  %v17134_v38 = vld [vmem:[#allocation102_spill] sm:$0xff]  ;;  %v17136_v28 = vld [vmem:[#allocation47_spill] sm:$0xff] }
 0x5de   : > { %17097 = vst [vmem:[#allocation108_spill] sm:$0xff] %v15779_v32  ;;  %10479 = vmatprep.mubr.msk.bf16.mxu0 %vm15773_vm11, %v15777_v50  ;;  %10735 = vmatprep.mubr.msk.bf16.mxu1 %vm15773_vm11, %v15777_v50 }
 0x5df   : > { %10482 = vmatmul.mubr.msk.bf16.gmra.mrb[124].mxu0 %vm15773_vm11, %v15769_v42  ;;  %10738 = vmatmul.mubr.msk.bf16.gmra.mrb[124].mxu1 %vm15773_vm11, %v15769_v42 }
 0x5e0   : > { %10485 = vmatprep.mubr.msk.bf16.mxu0 %vm15156_vm4, %v15163_v21  ;;  %10741 = vmatprep.mubr.msk.bf16.mxu1 %vm15156_vm4, %v15163_v21 }
 0x5e7   : > { %10488 = vmatmul.mubr.msk.bf16.vlgmr.msra.gmra.mrb[64].mxu0 %vm15156_vm4, %v15152_v17  ;;  %10744 = vmatmul.mubr.msk.bf16.vlgmr.msra.gmra.mrb[64].mxu1 %vm15156_vm4, %v15152_v17 }
 0x5e8   : > { %10905 = vmatpush1.bf16.msk.msra.mxu1 %vm15156_vm4, %v15150_v16  ;;  %10491 = vmatprep.mubr.msk.bf16.mxu0 %vm15198_vm7, %v15205_v8  ;;  %v17098_v16 = vld [vmem:[#allocation69_spill] sm:$0xff] }
 0x5e9   : > { %10747 = vmatprep.mubr.msk.bf16.mxu1 %vm15198_vm7, %v15205_v8  ;;  %10908 = vmatprep.subr.msk.bf16.mxu1 %vm15198_vm7, %v15203_v7 }
 0x5ec   : > { %10911 = vmatpush1.bf16.msk.msra.mxu1 %vm15198_vm7, %v15190_v3  ;;  %v17099_v3 = vld [vmem:[#allocation65_spill] sm:$0xff] }
 0x5ed   : > { %10914 = vmatprep.subr.msk.bf16.mxu1 %vm15240_vm10, %v15245_v63  ;;  %v17102_v63 = vld [vmem:[#allocation63_spill] sm:$0xff] }
 0x5ef   : > { %10494 = vmatmul.mubr.msk.bf16.gmra.mrb[68].mxu0 %vm15198_vm7, %v15192_v4  ;;  %10750 = vmatmul.mubr.msk.bf16.gmra.mrb[68].mxu1 %vm15198_vm7, %v15192_v4 }
 0x5f0   : > { %10917 = vmatpush1.bf16.msk.msra.mxu1 %vm15240_vm10, %v15232_v59  ;;  %10497 = vmatprep.mubr.msk.bf16.mxu0 %vm15240_vm10, %v15247_v0  ;;  %v17101_v59 = vld [vmem:[#allocation73_spill] sm:$0xff] }
 0x5f1   : > { %10753 = vmatprep.mubr.msk.bf16.mxu1 %vm15240_vm10, %v15247_v0  ;;  %10920 = vmatprep.subr.msk.bf16.mxu1 %vm15282_vm13, %v15287_v2  ;;  %v14156_v0 = vmov 1966171168  }
 0x5f2   : > { %v9318_v4 = vunpack.c.l.s4 %v14156_v0 }
 0x5f4   : > { %10923 = vmatpush1.bf16.msk.msra.mxu1 %vm15282_vm13, %v15274_v56  ;;  %v17103_v56 = vld [vmem:[#allocation68_spill] sm:$0xff] }
 0x5f5   : > { %10926 = vmatprep.subr.msk.bf16.mxu1 %vm15324_vm0, %v15329_v14  ;;  %v17106_v14 = vld [vmem:[#allocation87_spill] sm:$0xff] }
 0x5f7   : > { %10500 = vmatmul.mubr.msk.bf16.gmra.mrb[72].mxu0 %vm15240_vm10, %v15234_v60  ;;  %10756 = vmatmul.mubr.msk.bf16.gmra.mrb[72].mxu1 %vm15240_vm10, %v15234_v60 }
 0x5f8   : > { %10929 = vmatpush1.bf16.msk.msra.mxu1 %vm15324_vm0, %v15316_v15  ;;  %10503 = vmatprep.mubr.msk.bf16.mxu0 %vm15282_vm13, %v15289_v9  ;;  %v17105_v15 = vld [vmem:[#allocation80_spill] sm:$0xff] }
 0x5f9   : > { %10759 = vmatprep.mubr.msk.bf16.mxu1 %vm15282_vm13, %v15289_v9  ;;  %10932 = vmatprep.subr.msk.bf16.mxu1 %vm15366_vm3, %v15371_v26  ;;  %v17108_v26 = vld [vmem:[#allocation66_spill] sm:$0xff] }
 0x5fc   : > { %10935 = vmatpush1.bf16.msk.msra.mxu1 %vm15366_vm3, %v15358_v41 }
 0x5fd   : > { %10938 = vmatprep.subr.msk.bf16.mxu1 %vm15408_vm8, %v15413_v36  ;;  %v17109_v36 = vld [vmem:[#allocation84_spill] sm:$0xff] }
 0x5ff   : > { %10506 = vmatmul.mubr.msk.bf16.gmra.mrb[76].mxu0 %vm15282_vm13, %v15276_v57  ;;  %10762 = vmatmul.mubr.msk.bf16.gmra.mrb[76].mxu1 %vm15282_vm13, %v15276_v57 }
 0x600   : > { %10941 = vmatpush1.bf16.msk.msra.mxu1 %vm15408_vm8, %v17098_v16  ;;  %10509 = vmatprep.mubr.msk.bf16.mxu0 %vm15324_vm0, %v17099_v3  ;;  %v17137_v16 = vld [vmem:[#allocation48_spill] sm:$0xff] }
 0x601   : > { %10765 = vmatprep.mubr.msk.bf16.mxu1 %vm15324_vm0, %v17099_v3  ;;  %10944 = vmatprep.subr.msk.bf16.mxu1 %vm15450_vm12, %v15455_v53  ;;  %v17111_v53 = vld [vmem:[#allocation92_spill] sm:$0xff] }
 0x604   : > { %10947 = vmatpush1.bf16.msk.msra.mxu1 %vm15450_vm12, %v17101_v59  ;;  %v16082_v59 = vrot.slane %v8099_v22, %v17137_v16 }
 0x605   : > { %10950 = vmatprep.subr.msk.bf16.mxu1 %vm15492_vm1, %v15497_v31 }
 0x607   : > { %10512 = vmatmul.mubr.msk.bf16.gmra.mrb[80].mxu0 %vm15324_vm0, %v17102_v63  ;;  %10768 = vmatmul.mubr.msk.bf16.gmra.mrb[80].mxu1 %vm15324_vm0, %v17102_v63 }
 0x608   : > { %10953 = vmatpush1.bf16.msk.msra.mxu1 %vm15492_vm1, %v15484_v13  ;;  %10515 = vmatprep.mubr.msk.bf16.mxu0 %vm15366_vm3, %v17103_v56  ;;  %v17110_v13 = vld [vmem:[#allocation72_spill] sm:$0xff] }
 0x609   : > { %10771 = vmatprep.mubr.msk.bf16.mxu1 %vm15366_vm3, %v17103_v56  ;;  %10956 = vmatprep.subr.msk.bf16.mxu1 %vm15535_vm6, %v15540_v35  ;;  %v17113_v35 = vld [vmem:[#allocation89_spill] sm:$0xff] }
 0x60c   : > { %10959 = vmatpush1.bf16.msk.msra.mxu1 %vm15535_vm6, %v17105_v15 }
 0x60d   : > { %10962 = vmatprep.subr.msk.bf16.mxu1 %vm15575_vm14, %v17106_v14 }
 0x60f   : > { %10518 = vmatmul.mubr.msk.bf16.gmra.mrb[84].mxu0 %vm15366_vm3, %v17108_v26  ;;  %10774 = vmatmul.mubr.msk.bf16.gmra.mrb[84].mxu1 %vm15366_vm3, %v17108_v26 }
 0x610   : > { %10965 = vmatpush1.bf16.msk.msra.mxu1 %vm15575_vm14, %v17109_v36  ;;  %10521 = vmatprep.mubr.msk.bf16.mxu0 %vm15408_vm8, %v17110_v13 }
 0x611   : > { %10777 = vmatprep.mubr.msk.bf16.mxu1 %vm15408_vm8, %v17110_v13  ;;  %10968 = vmatprep.subr.msk.bf16.mxu1 %vm15615_vm5, %v17111_v53 }
 0x614   : > { %10971 = vmatpush1.bf16.msk.msra.mxu1 %vm15615_vm5, %v17113_v35 }
 0x615   : > { %10974 = vmatprep.subr.msk.bf16.mxu1 %vm15655_vm15, %v17114_v54 }
 0x617   : > { %10524 = vmatmul.mubr.msk.bf16.gmra.mrb[88].mxu0 %vm15408_vm8, %v17116_v23  ;;  %10780 = vmatmul.mubr.msk.bf16.gmra.mrb[88].mxu1 %vm15408_vm8, %v17116_v23 }
 0x618   : > { %10977 = vmatpush1.bf16.msk.msra.mxu1 %vm15655_vm15, %v17117_v19  ;;  %10527 = vmatprep.mubr.msk.bf16.mxu0 %vm15450_vm12, %v17118_v30 }
 0x619   : > { %10783 = vmatprep.mubr.msk.bf16.mxu1 %vm15450_vm12, %v17118_v30  ;;  %10980 = vmatprep.subr.msk.bf16.mxu1 %vm17120_vm2, %v15701_v33  ;;  %v17124_v33 = vld [vmem:[#allocation79_spill] sm:$0xff] }
 0x61c   : > { %10983 = vmatpush1.bf16.msk.msra.mxu1 %vm17120_vm2, %v17121_v12 }
 0x61d   : > { %10986 = vmatprep.subr.msk.bf16.mxu1 %vm17122_vm9, %v15741_v27  ;;  %v17125_v27 = vld [vmem:[#allocation77_spill] sm:$0xff] }
 0x61f   : > { %10530 = vmatmul.mubr.msk.bf16.gmra.mrb[92].mxu0 %vm15450_vm12, %v17123_v51  ;;  %10786 = vmatmul.mubr.msk.bf16.gmra.mrb[92].mxu1 %vm15450_vm12, %v17123_v51 }
 0x620   : > { %10989 = vmatpush1.bf16.msk.msra.mxu1 %vm17122_vm9, %v15729_v6  ;;  %10533 = vmatprep.mubr.msk.bf16.mxu0 %vm15492_vm1, %v17124_v33  ;;  %v17126_v6 = vld [vmem:[#allocation83_spill] sm:$0xff] }
 0x621   : > { %10789 = vmatprep.mubr.msk.bf16.mxu1 %vm15492_vm1, %v17124_v33  ;;  %10992 = vmatprep.subr.msk.bf16.mxu1 %vm15773_vm11, %v15777_v50  ;;  %v7253_v50 = vld [vmem:[#allocation13] sm:$0x3] }
 0x622   : > { %v16085_v36 = vrot.slane %v7253_v50, %v17136_v28  ;;  %v16090_v49 = vrot.slane %v7253_v50, %v17137_v16 }
 0x624   : > { %10995 = vmatpush1.bf16.msk.msra.mxu1 %vm15773_vm11, %v15769_v42  ;;  %v16079_v42 = vrot.slane %v8099_v22, %v17136_v28 }
 0x627   : > { %10536 = vmatmul.mubr.msk.bf16.gmra.mrb[96].mxu0 %vm15492_vm1, %v17125_v27  ;;  %10792 = vmatmul.mubr.msk.bf16.gmra.mrb[96].mxu1 %vm15492_vm1, %v17125_v27 }
 0x628   : > { %10539 = vmatprep.mubr.msk.bf16.mxu0 %vm15535_vm6, %v17126_v6  ;;  %10795 = vmatprep.mubr.msk.bf16.mxu1 %vm15535_vm6, %v17126_v6 }
 0x62f   : > { %10542 = vmatmul.mubr.msk.bf16.gmra.mrb[100].mxu0 %vm15535_vm6, %v17127_v20  ;;  %10798 = vmatmul.mubr.msk.bf16.gmra.mrb[100].mxu1 %vm15535_vm6, %v17127_v20 }
 0x630   : > { %10545 = vmatprep.mubr.msk.bf16.mxu0 %vm15575_vm14, %v17128_v34  ;;  %10801 = vmatprep.mubr.msk.bf16.mxu1 %vm15575_vm14, %v17128_v34 }
 0x637   : > { %10548 = vmatmul.mubr.msk.bf16.gmra.mrb[104].mxu0 %vm15575_vm14, %v17129_v43  ;;  %10804 = vmatmul.mubr.msk.bf16.gmra.mrb[104].mxu1 %vm15575_vm14, %v17129_v43 }
 0x638   : > { %10551 = vmatprep.mubr.msk.bf16.mxu0 %vm15615_vm5, %v17130_v47  ;;  %10807 = vmatprep.mubr.msk.bf16.mxu1 %vm15615_vm5, %v17130_v47 }
 0x63f   : > { %10554 = vmatmul.mubr.msk.bf16.gmra.mrb[108].mxu0 %vm15615_vm5, %v17131_v48  ;;  %10810 = vmatmul.mubr.msk.bf16.gmra.mrb[108].mxu1 %vm15615_vm5, %v17131_v48 }
 0x640   : > { %10557 = vmatprep.mubr.msk.bf16.mxu0 %vm15655_vm15, %v17132_v40  ;;  %10813 = vmatprep.mubr.msk.bf16.mxu1 %vm15655_vm15, %v17132_v40 }
 0x647   : > { %10560 = vmatmul.mubr.msk.bf16.gmra.mrb[112].mxu0 %vm15655_vm15, %v17133_v29  ;;  %10816 = vmatmul.mubr.msk.bf16.gmra.mrb[112].mxu1 %vm15655_vm15, %v17133_v29 }
 0x648   : > { %10563 = vmatprep.mubr.msk.bf16.mxu0 %vm17120_vm2, %v17134_v38  ;;  %10819 = vmatprep.mubr.msk.bf16.mxu1 %vm17120_vm2, %v17134_v38 }
 0x64f   : > { %10566 = vmatmul.mubr.msk.bf16.gmra.mrb[116].mxu0 %vm17120_vm2, %v17135_v11  ;;  %10822 = vmatmul.mubr.msk.bf16.gmra.mrb[116].mxu1 %vm17120_vm2, %v17135_v11 }
 0x650   : > { %10569 = vmatprep.mubr.msk.bf16.mxu0 %vm17122_vm9, %v15743_v44  ;;  %10825 = vmatprep.mubr.msk.bf16.mxu1 %vm17122_vm9, %v15743_v44 }
 0x657   : > { %10572 = vmatmul.mubr.msk.bf16.gmra.mrb[120].mxu0 %vm17122_vm9, %v15731_v52  ;;  %10828 = vmatmul.mubr.msk.bf16.gmra.mrb[120].mxu1 %vm17122_vm9, %v15731_v52 }
 0x658   : > { %10575 = vmatprep.mubr.msk.bf16.mxu0 %vm15773_vm11, %v15779_v32  ;;  %10831 = vmatprep.mubr.msk.bf16.mxu1 %vm15773_vm11, %v15779_v32 }
 0x65f   : > { %10578 = vmatmul.mubr.msk.bf16.gmra.mrb[124].mxu0 %vm15773_vm11, %v15771_v46  ;;  %10834 = vmatmul.mubr.msk.bf16.gmra.mrb[124].mxu1 %vm15773_vm11, %v15771_v46 }
 0x6ba   : > { %v7812_v15 = vpop.f32.mrb[64].mxu0  ;;  %v8658_v14 = vpop.f32.mrb[64].mxu1 }
 0x6bb   : > { %v11295_v53 = vadd.f32 %v8658_v14, %v16079_v42  ;;  %v7814_v35 = vpop.f32.mrb[65].mxu0  ;;  %v8660_v54 = vpop.f32.mrb[65].mxu1  ;;  %v11231_v44 = vadd.f32 %v7812_v15, %v16085_v36 }
 0x6bc   : > { %v11296_v19 = vadd.f32 %v8660_v54, %v16082_v59  ;;  %v7816_v12 = vpop.f32.mrb[66].mxu0  ;;  %v8662_v55 = vpop.f32.mrb[66].mxu1  ;;  %v11232_v54 = vadd.f32 %v7814_v35, %v16090_v49 }
 0x6bd   : > { %v10835_v46 = vmul.f32 -1.442695, %v11295_v53  ;;  %v11297_v22 = vadd.f32 %v8662_v55, %v16079_v42  ;;  %v7818_v32 = vpop.f32.mrb[67].mxu0  ;;  %v8664_v52 = vpop.f32.mrb[67].mxu1  ;;  %v11233_v53 = vadd.f32 %v7816_v12, %v16085_v36 }
 0x6be   : > { %v10836_v37 = vmul.f32 -1.442695, %v11296_v19  ;;  %v11298_v28 = vadd.f32 %v8664_v52, %v16082_v59 }
 0x6bf   : > { %13330 = vpow2.f32 %v10835_v46  ;;  %v10837_v14 = vmul.f32 -1.442695, %v11297_v22 }
 0x6c0   : > { %13332 = vpow2.f32 %v10836_v37  ;;  %v10838_v11 = vmul.f32 -1.442695, %v11298_v28  ;;  %v11234_v37 = vadd.f32 %v7818_v32, %v16090_v49 }
 0x6c1   : > { %13334 = vpow2.f32 %v10837_v14 }
 0x6c2   : > { %v7822_v50 = vpop.f32.mrb[68].mxu0  ;;  %v8668_v16 = vpop.f32.mrb[68].mxu1  ;;  %13336 = vtanh.f32 %v11231_v44 }
 0x6c3   : > { %v11299_v55 = vadd.f32 %v8668_v16, %v16079_v42  ;;  %v7824_v24 = vpop.f32.mrb[69].mxu0  ;;  %v8670_v19 = vpop.f32.mrb[69].mxu1  ;;  %13338 = vpow2.f32 %v10838_v11  ;;  %v11235_v16 = vadd.f32 %v7822_v50, %v16085_v36 }
 0x6c4   : > { %v11300_v52 = vadd.f32 %v8670_v19, %v16082_v59  ;;  %v7826_v15 = vpop.f32.mrb[70].mxu0  ;;  %v8672_v46 = vpop.f32.mrb[70].mxu1  ;;  %13340 = vtanh.f32 %v11232_v54 }
 0x6c5   : > { %v10839_v28 = vmul.f32 -1.442695, %v11299_v55  ;;  %v11301_v35 = vadd.f32 %v8672_v46, %v16079_v42  ;;  %v16101_v12 = vpop.f32.mrb[71].mxu0  ;;  %v8674_v22 = vpop.f32.mrb[71].mxu1  ;;  %13342 = vtanh.f32 %v11233_v53 }
 0x6c6   : > { %v10840_v44 = vmul.f32 -1.442695, %v11300_v52  ;;  %v11302_v14 = vadd.f32 %v8674_v22, %v16082_v59 }
 0x6c7   : > { %13344 = vpow2.f32 %v10839_v28  ;;  %v10841_v11 = vmul.f32 -1.442695, %v11301_v35  ;;  %v11236_v28 = vadd.f32 %v7824_v24, %v16090_v49 }
 0x6c8   : > { %13346 = vpow2.f32 %v10840_v44  ;;  %v10842_v32 = vmul.f32 -1.442695, %v11302_v14 }
 0x6c9   : > { %v13331_v19 = vpop.eup %13330  ;;  %13348 = vtanh.f32 %v11234_v37 }
 0x6ca   : > { %v13333_v54 = vpop.eup %13332  ;;  %v9009_v38 = vadd.f32 1.0, %v13331_v19  ;;  %13350 = vpow2.f32 %v10841_v11  ;;  %v16105_v55 = vpop.f32.mrb[72].mxu0 }
 0x6cb   : > { %v8678_v46 = vpop.f32.mrb[72].mxu1  ;;  %v9010_v29 = vadd.f32 1.0, %v13333_v54  ;;  %13352 = vtanh.f32 %v11235_v16  ;;  %v16108_v52 = vpop.f32.mrb[73].mxu0 }
 0x6cc   : > { %v11303_v53 = vadd.f32 %v8678_v46, %v16079_v42  ;;  %v8680_v22 = vpop.f32.mrb[73].mxu1  ;;  %v13335_v50 = vpop.eup %13334  ;;  %13354 = vrcp.f32 %v9009_v38  ;;  %v11237_v38 = vadd.f32 %v7826_v15, %v16085_v36 }
 0x6cd   : > { %v16111_v35 = vpop.f32.mrb[74].mxu0  ;;  %v8682_v37 = vpop.f32.mrb[74].mxu1  ;;  %13356 = vrcp.f32 %v9010_v29  ;;  %v9011_v14 = vadd.f32 1.0, %v13335_v50  ;;  %v11304_v46 = vadd.f32 %v8680_v22, %v16082_v59 }
 0x6ce   : > { %v13337_v44 = vpop.eup %13336  ;;  %v16113_v11 = vpop.f32.mrb[75].mxu0  ;;  %13358 = vpow2.f32 %v10842_v32  ;;  %v10843_v16 = vmul.f32 -1.442695, %v11303_v53  ;;  %v11305_v29 = vadd.f32 %v8682_v37, %v16079_v42  ;;  %v11241_v7 = vadd.f32 %v16111_v35, %v16085_v36 }
 0x6cf   : > { %v8684_v19 = vpop.f32.mrb[75].mxu1  ;;  %v13339_v54 = vpop.eup %13338  ;;  %13360 = vrcp.f32 %v9011_v14  ;;  %v10844_v47 = vmul.f32 -1.442695, %v11304_v46  ;;  %v11242_v10 = vadd.f32 %v16113_v11, %v16090_v49 }
 0x6d0   : > { %v13341_v45 = vpop.eup %13340  ;;  %v9012_v40 = vadd.f32 1.0, %v13339_v54  ;;  %13362 = vtanh.f32 %v11236_v28  ;;  %v11306_v28 = vadd.f32 %v8684_v19, %v16082_v59 }
 0x6d1   : > { %v13343_v24 = vpop.eup %13342 }
 0x6d2   : > { %v13345_v48 = vpop.eup %13344  ;;  %13364 = vrcp.f32 %v9012_v40  ;;  %v16118_v43 = vpop.f32.mrb[76].mxu0  ;;  %v10846_v6 = vmul.f32 -1.442695, %v11306_v28 }
 0x6d3   : > { %v13347_v50 = vpop.eup %13346  ;;  %v9013_v31 = vadd.f32 1.0, %v13345_v48  ;;  %13366 = vpow2.f32 %v10843_v16  ;;  %v8688_v32 = vpop.f32.mrb[76].mxu1  ;;  %v10845_v16 = vmul.f32 -1.442695, %v11305_v29  ;;  %v11239_v29 = vadd.f32 %v16105_v55, %v16085_v36 }
 0x6d4   : > { %v13349_v53 = vpop.eup %13348  ;;  %v9014_v22 = vadd.f32 1.0, %v13347_v50  ;;  %13368 = vtanh.f32 %v11237_v38  ;;  %v16120_v14 = vpop.f32.mrb[77].mxu0  ;;  %v11238_v38 = vadd.f32 %v16101_v12, %v16090_v49  ;;  %v11307_v50 = vadd.f32 %v8688_v32, %v16079_v42 }
 0x6d5   : > { %v8690_v54 = vpop.f32.mrb[77].mxu1  ;;  %v13351_v15 = vpop.eup %13350  ;;  %13370 = vrcp.f32 %v9013_v31  ;;  %v11243_v11 = vadd.f32 %v16118_v43, %v16085_v36 }
 0x6d6   : > { %v16123_v40 = vpop.f32.mrb[78].mxu0  ;;  %v8692_v37 = vpop.f32.mrb[78].mxu1  ;;  %13372 = vrcp.f32 %v9014_v22  ;;  %v9015_v48 = vadd.f32 1.0, %v13351_v15  ;;  %v11308_v15 = vadd.f32 %v8690_v54, %v16082_v59  ;;  %v10847_v12 = vmul.f32 -1.442695, %v11307_v50 }
 0x6d7   : > { %v13353_v41 = vpop.eup %13352  ;;  %v16125_v46 = vpop.f32.mrb[79].mxu0  ;;  %13374 = vpow2.f32 %v10844_v47  ;;  %v11309_v55 = vadd.f32 %v8692_v37, %v16079_v42 }
 0x6d8   : > { %v8694_v34 = vpop.f32.mrb[79].mxu1  ;;  %v13355_v20 = vpop.eup %13354  ;;  %13376 = vrcp.f32 %v9015_v48 }
 0x6d9   : > { %v13357_v31 = vpop.eup %13356  ;;  %v9201_v19 = vmul.f32 %v13355_v20, %v13337_v44  ;;  %13378 = vpow2.f32 %v10845_v16 }
 0x6da   : > { %v13359_v2 = vpop.eup %13358  ;;  %v9202_v27 = vmul.f32 %v13357_v31, %v13341_v45  ;;  %13380 = vtanh.f32 %v11238_v38  ;;  %v16133_v47 = vpop.f32.mrb[80].mxu0 }
 0x6db   : > { %v13361_v25 = vpop.eup %13360  ;;  %v9016_v22 = vadd.f32 1.0, %v13359_v2  ;;  %v8698_v32 = vpop.f32.mrb[80].mxu1  ;;  %v11240_v2 = vadd.f32 %v16108_v52, %v16090_v49  ;;  %v11310_v52 = vadd.f32 %v8694_v34, %v16082_v59 }
 0x6dc   : > { %v13363_v33 = vpop.eup %13362  ;;  %v9203_v51 = vmul.f32 %v13361_v25, %v13343_v24  ;;  %v16135_v20 = vpop.f32.mrb[81].mxu0  ;;  %v10848_v25 = vmul.f32 -1.442695, %v11308_v15  ;;  %v11311_v35 = vadd.f32 %v8698_v32, %v16079_v42 }
 0x6dd   : > { %v13365_v48 = vpop.eup %13364  ;;  %13382 = vrcp.f32 %v9016_v22  ;;  %v8700_v45 = vpop.f32.mrb[81].mxu1 }
 0x6de   : > { %v13367_v44 = vpop.eup %13366  ;;  %13384 = vpow2.f32 %v10846_v6  ;;  %v16140_v54 = vpop.f32.mrb[82].mxu0  ;;  %v9204_v16 = vmul.f32 %v13365_v48, %v13349_v53  ;;  %v9265_v30 = vpack.c.bf16 %v9203_v51, %v9201_v19  ;;  %v10850_v19 = vmul.f32 -1.442695, %v11310_v52 }
 0x6df   : > { %v8702_v28 = vpop.f32.mrb[82].mxu1  ;;  %v13369_v38 = vpop.eup %13368  ;;  %13386 = vtanh.f32 %v11239_v29  ;;  %v9017_v50 = vadd.f32 1.0, %v13367_v44  ;;  %v10849_v29 = vmul.f32 -1.442695, %v11309_v55 }
 0x6e0   : > { %v16142_v24 = vpop.f32.mrb[83].mxu0  ;;  %v16144_v31 = vpop.f32.mrb[83].mxu1  ;;  %13388 = vpow2.f32 %v10847_v12  ;;  %v9266_v37 = vpack.c.bf16 %v9204_v16, %v9202_v27  ;;  %v11312_v16 = vadd.f32 %v8700_v45, %v16082_v59 }
 0x6e1   : > { %v13371_v22 = vpop.eup %13370  ;;  %13390 = vrcp.f32 %v9017_v50 }
 0x6e2   : > { %v13373_v6 = vpop.eup %13372  ;;  %13392 = vtanh.f32 %v11240_v2  ;;  %v9205_v15 = vmul.f32 %v13371_v22, %v13353_v41  ;;  %9333 = vmatprep.subr.bf16.mxu0 %v9266_v37  ;;  %v16152_v12 = vpop.f32.mrb[84].mxu0  ;;  %v11244_v37 = vadd.f32 %v16120_v14, %v16090_v49  ;;  %v11245_v14 = vadd.f32 %v16123_v40, %v16085_v36 }
 0x6e3   : > { %v13375_v53 = vpop.eup %13374  ;;  %v9206_v48 = vmul.f32 %v13373_v6, %v13363_v33  ;;  %13394 = vpow2.f32 %v10848_v25  ;;  %9334 = vmatpush1.bf16.xpose.msra.mxu0 %v9265_v30  ;;  %v8708_v27 = vpop.f32.mrb[84].mxu1  ;;  %v10851_v25 = vmul.f32 -1.442695, %v11311_v35 }
 0x6e4   : > { %v13377_v44 = vpop.eup %13376  ;;  %v9018_v23 = vadd.f32 1.0, %v13375_v53  ;;  %13396 = vtanh.f32 %v11241_v7  ;;  %v16154_v33 = vpop.f32.mrb[85].mxu0 }
 0x6e5   : > { %v9207_v51 = vmul.f32 %v13377_v44, %v13369_v38  ;;  %v13379_v34 = vpop.eup %13378  ;;  %v16156_v41 = vpop.f32.mrb[85].mxu1  ;;  %v10852_v44 = vmul.f32 -1.442695, %v11312_v16 }
 0x6e6   : > { %13398 = vrcp.f32 %v9018_v23  ;;  %v13381_v2 = vpop.eup %13380  ;;  %v9019_v55 = vadd.f32 1.0, %v13379_v34  ;;  %v16160_v7 = vpop.f32.mrb[86].mxu0 }
 0x6e7   : > { %13400 = vpow2.f32 %v10849_v29  ;;  %v16162_v30 = vpop.f32.mrb[86].mxu1  ;;  %v13383_v32 = vpop.eup %13382  ;;  %v9267_v53 = vpack.c.bf16 %v9207_v51, %v9205_v15 }
 0x6e8   : > { %13402 = vtanh.f32 %v11242_v10  ;;  %v16165_v23 = vpop.f32.mrb[87].mxu0  ;;  %v16167_v38 = vpop.f32.mrb[87].mxu1  ;;  %v9208_v43 = vmul.f32 %v13383_v32, %v13381_v2  ;;  %v11313_v10 = vadd.f32 %v8702_v28, %v16079_v42  ;;  %v11314_v28 = vadd.f32 %v16144_v31, %v16082_v59 }
 0x6e9   : > { %v13385_v50 = vpop.eup %13384  ;;  %13404 = vrcp.f32 %v9019_v55 }
 0x6ea   : > { %v13387_v22 = vpop.eup %13386  ;;  %v9020_v6 = vadd.f32 1.0, %v13385_v50  ;;  %13406 = vpow2.f32 %v10850_v19  ;;  %v9268_v34 = vpack.c.bf16 %v9208_v43, %v9206_v48  ;;  %v16172_v35 = vpop.f32.mrb[88].mxu0  ;;  %v10853_v32 = vmul.f32 -1.442695, %v11313_v10 }
 0x6eb   : > { %v13389_v52 = vpop.eup %13388  ;;  %13408 = vtanh.f32 %v11243_v11  ;;  %v16174_v55 = vpop.f32.mrb[88].mxu1  ;;  %v11315_v43 = vadd.f32 %v8708_v27, %v16079_v42  ;;  %v10854_v10 = vmul.f32 -1.442695, %v11314_v28 }
 0x6ec   : > { %v13391_v45 = vpop.eup %13390  ;;  %13410 = vrcp.f32 %v9020_v6  ;;  %v9021_v29 = vadd.f32 1.0, %v13389_v52  ;;  %9335 = vmatprep.subr.bf16.mxu0 %v9268_v34  ;;  %v16182_v15 = vpop.f32.mrb[89].mxu0  ;;  %v11246_v6 = vadd.f32 %v16125_v46, %v16090_v49  ;;  %v11316_v34 = vadd.f32 %v16156_v41, %v16082_v59 }
 0x6ed   : > { %v13393_v13 = vpop.eup %13392  ;;  %13412 = vpow2.f32 %v10851_v25  ;;  %v16176_v19 = vmul.f32 %v13391_v45, %v13387_v22  ;;  %v16184_v48 = vpop.f32.mrb[89].mxu1  ;;  %9336 = vmatpush1.bf16.xpose.msra.mxu0 %v9267_v53  ;;  %v10855_v27 = vmul.f32 -1.442695, %v11315_v43  ;;  %v11248_v41 = vadd.f32 %v16135_v20, %v16090_v49 }
 0x6ee   : > { %v13395_v2 = vpop.eup %13394  ;;  %13414 = vrcp.f32 %v9021_v29  ;;  %v16186_v16 = vpop.f32.mrb[90].mxu0 }
 0x6ef   : > { %v13397_v51 = vpop.eup %13396  ;;  %13416 = vtanh.f32 %v11244_v37  ;;  %v9022_v11 = vadd.f32 1.0, %v13395_v2  ;;  %v16188_v50 = vpop.f32.mrb[90].mxu1 }
 0x6f0   : > { %v13399_v25 = vpop.eup %13398  ;;  %13418 = vpow2.f32 %v10852_v44  ;;  %v16190_v40 = vpop.f32.mrb[91].mxu0  ;;  %v11247_v44 = vadd.f32 %v16133_v47, %v16085_v36 }
 0x6f1   : > { %v16192_v22 = vpop.f32.mrb[91].mxu1  ;;  %v13401_v31 = vpop.eup %13400  ;;  %13420 = vrcp.f32 %v9022_v11  ;;  %v9210_v53 = vmul.f32 %v13399_v25, %v13393_v13 }
 0x6f2   : > { %v13403_v52 = vpop.eup %13402  ;;  %13422 = vtanh.f32 %v11245_v14  ;;  %v9023_v37 = vadd.f32 1.0, %v13401_v31  ;;  %v16201_v26 = vpop.f32.mrb[92].mxu0 }
 0x6f3   : > { %v13405_v45 = vpop.eup %13404  ;;  %13424 = vpow2.f32 %v10853_v32  ;;  %v16203_v14 = vpop.f32.mrb[92].mxu1 }
 0x6f4   : > { %v13407_v29 = vpop.eup %13406  ;;  %13426 = vrcp.f32 %v9023_v37  ;;  %v9211_v2 = vmul.f32 %v13405_v45, %v13397_v51  ;;  %v16206_v32 = vpop.f32.mrb[93].mxu0  ;;  %v11317_v51 = vadd.f32 %v16162_v30, %v16079_v42  ;;  %v11249_v30 = vadd.f32 %v16140_v54, %v16085_v36 }
 0x6f5   : > { %v13409_v11 = vpop.eup %13408  ;;  %13428 = vtanh.f32 %v11246_v6  ;;  %v9024_v46 = vadd.f32 1.0, %v13407_v29  ;;  %v16208_v25 = vpop.f32.mrb[93].mxu1  ;;  %v11319_v54 = vadd.f32 %v16174_v55, %v16079_v42 }
 0x6f6   : > { %v13411_v13 = vpop.eup %13410  ;;  %13430 = vpow2.f32 %v10854_v10  ;;  %v9269_v28 = vpack.c.bf16 %v9211_v2, %v16176_v19  ;;  %v16214_v6 = vpop.f32.mrb[94].mxu0  ;;  %v10856_v10 = vmul.f32 -1.442695, %v11316_v34 }
 0x6f7   : > { %v13413_v47 = vpop.eup %13412  ;;  %13432 = vrcp.f32 %v9024_v46  ;;  %v9212_v31 = vmul.f32 %v13411_v13, %v13403_v52  ;;  %v16216_v43 = vpop.f32.mrb[94].mxu1  ;;  %v11318_v52 = vadd.f32 %v16167_v38, %v16082_v59  ;;  %v11261_v0 = vadd.f32 %v16214_v6, %v16085_v36 }
 0x6f8   : > { %v13415_v37 = vpop.eup %13414  ;;  %13434 = vtanh.f32 %v11247_v44  ;;  %v9025_v19 = vadd.f32 1.0, %v13413_v47  ;;  %v16218_v45 = vpop.f32.mrb[95].mxu0  ;;  %v10857_v47 = vmul.f32 -1.442695, %v11317_v51 }
 0x6f9   : > { %v16220_v29 = vpop.f32.mrb[95].mxu1  ;;  %v13417_v2 = vpop.eup %13416  ;;  %13436 = vpow2.f32 %v10855_v27  ;;  %v9270_v46 = vpack.c.bf16 %v9212_v31, %v9210_v53  ;;  %v16226_v13 = vmul.f32 %v13415_v37, %v13409_v11  ;;  %v11250_v31 = vadd.f32 %v16142_v24, %v16090_v49 }
 0x6fa   : > { %v13419_v20 = vpop.eup %13418  ;;  %13438 = vrcp.f32 %v9025_v19  ;;  %v16232_v38 = vpop.f32.mrb[96].mxu0  ;;  %v10858_v37 = vmul.f32 -1.442695, %v11318_v52  ;;  %v11326_v9 = vadd.f32 %v16220_v29, %v16082_v59 }
 0x6fb   : > { %v13421_v44 = vpop.eup %13420  ;;  %13440 = vtanh.f32 %v11248_v41  ;;  %v9026_v34 = vadd.f32 1.0, %v13419_v20  ;;  %9337 = vmatprep.subr.bf16.mxu0 %v9270_v46  ;;  %v16234_v11 = vpop.f32.mrb[96].mxu1  ;;  %v11251_v20 = vadd.f32 %v16152_v12, %v16085_v36  ;;  %v11252_v12 = vadd.f32 %v16154_v33, %v16090_v49 }
 0x6fc   : > { %v13423_v1 = vpop.eup %13422  ;;  %13442 = vpow2.f32 %v10856_v10  ;;  %9338 = vmatpush1.bf16.xpose.msra.mxu0 %v9269_v28  ;;  %v9214_v27 = vmul.f32 %v13421_v44, %v13417_v2  ;;  %v16236_v19 = vpop.f32.mrb[97].mxu0  ;;  %v11253_v33 = vadd.f32 %v16160_v7, %v16085_v36 }
 0x6fd   : > { %v13425_v53 = vpop.eup %13424  ;;  %13444 = vrcp.f32 %v9026_v34  ;;  %v16238_v28 = vpop.f32.mrb[97].mxu1 }
 0x6fe   : > { %v13427_v41 = vpop.eup %13426  ;;  %13446 = vtanh.f32 %v11249_v30  ;;  %v9027_v51 = vadd.f32 1.0, %v13425_v53  ;;  %v16240_v46 = vpop.f32.mrb[98].mxu0  ;;  %v11320_v30 = vadd.f32 %v16184_v48, %v16082_v59  ;;  %v11321_v48 = vadd.f32 %v16188_v50, %v16079_v42 }
 0x6ff   : > { %v13429_v10 = vpop.eup %13428  ;;  %13448 = vpow2.f32 %v10857_v47  ;;  %v9215_v2 = vmul.f32 %v13427_v41, %v13423_v1  ;;  %v16242_v24 = vpop.f32.mrb[98].mxu1  ;;  %v10859_v1 = vmul.f32 -1.442695, %v11319_v54  ;;  %v11322_v50 = vadd.f32 %v16192_v22, %v16082_v59 }
 0x700   : > { %v13431_v55 = vpop.eup %13430  ;;  %13450 = vrcp.f32 %v9027_v51  ;;  %v16248_v52 = vpop.f32.mrb[99].mxu0  ;;  %v10860_v3 = vmul.f32 -1.442695, %v11320_v30 }
 0x701   : > { %v16250_v44 = vpop.f32.mrb[99].mxu1  ;;  %v13433_v34 = vpop.eup %13432  ;;  %13452 = vtanh.f32 %v11250_v31  ;;  %v9028_v47 = vadd.f32 1.0, %v13431_v55  ;;  %v9271_v53 = vpack.c.bf16 %v9215_v2, %v16226_v13 }
 0x702   : > { %v13435_v41 = vpop.eup %13434  ;;  %13454 = vpow2.f32 %v10858_v37  ;;  %v9216_v56 = vmul.f32 %v13433_v34, %v13429_v10  ;;  %v16259_v13 = vpop.f32.mrb[100].mxu0 }
 0x703   : > { %v13437_v51 = vpop.eup %13436  ;;  %13456 = vrcp.f32 %v9028_v47  ;;  %v16261_v37 = vpop.f32.mrb[100].mxu1 }
 0x704   : > { %v13439_v63 = vpop.eup %13438  ;;  %13458 = vtanh.f32 %v11251_v20  ;;  %v9029_v62 = vadd.f32 1.0, %v13437_v51  ;;  %v9272_v31 = vpack.c.bf16 %v9216_v56, %v9214_v27  ;;  %v16267_v2 = vpop.f32.mrb[101].mxu0  ;;  %v10861_v20 = vmul.f32 -1.442695, %v11321_v48 }
 0x705   : > { %v13441_v55 = vpop.eup %13440  ;;  %13460 = vpow2.f32 %v10859_v1  ;;  %v16257_v54 = vmul.f32 %v13439_v63, %v13435_v41  ;;  %v16269_v56 = vpop.f32.mrb[101].mxu1  ;;  %v11254_v41 = vadd.f32 %v16165_v23, %v16090_v49  ;;  %v11323_v51 = vadd.f32 %v16203_v14, %v16079_v42 }
 0x706   : > { %v13443_v10 = vpop.eup %13442  ;;  %13462 = vrcp.f32 %v9029_v62  ;;  %9339 = vmatprep.subr.bf16.mxu0 %v9272_v31  ;;  %v16271_v30 = vpop.f32.mrb[102].mxu0  ;;  %v10862_v48 = vmul.f32 -1.442695, %v11322_v50 }
 0x707   : > { %v13445_v27 = vpop.eup %13444  ;;  %13464 = vtanh.f32 %v11252_v12  ;;  %v9030_v63 = vadd.f32 1.0, %v13443_v10  ;;  %9340 = vmatpush1.bf16.xpose.msra.mxu0 %v9271_v53  ;;  %v16273_v34 = vpop.f32.mrb[102].mxu1  ;;  %v11255_v10 = vadd.f32 %v16172_v35, %v16085_v36  ;;  %v10863_v57 = vmul.f32 -1.442695, %v11323_v51 }
 0x708   : > { %v13447_v62 = vpop.eup %13446  ;;  %13466 = vpow2.f32 %v10860_v3  ;;  %v9218_v7 = vmul.f32 %v13445_v27, %v13441_v55  ;;  %v16275_v47 = vpop.f32.mrb[103].mxu0  ;;  %v11324_v27 = vadd.f32 %v16208_v25, %v16082_v59  ;;  %v11256_v25 = vadd.f32 %v16182_v15, %v16090_v49 }
 0x709   : > { %v16277_v22 = vpop.f32.mrb[103].mxu1  ;;  %v13449_v1 = vpop.eup %13448  ;;  %13468 = vrcp.f32 %v9030_v63 }
 0x70a   : > { %v13451_v53 = vpop.eup %13450  ;;  %13470 = vtanh.f32 %v11253_v33  ;;  %v9031_v12 = vadd.f32 1.0, %v13449_v1  ;;  %v16288_v33 = vpop.f32.mrb[104].mxu0 }
 0x70b   : > { %v13453_v31 = vpop.eup %13452  ;;  %13472 = vpow2.f32 %v10861_v20  ;;  %v9219_v3 = vmul.f32 %v13451_v53, %v13447_v62  ;;  %v16290_v50 = vpop.f32.mrb[104].mxu1 }
 0x70c   : > { %v13455_v55 = vpop.eup %13454  ;;  %13474 = vrcp.f32 %v9031_v12  ;;  %v16292_v1 = vpop.f32.mrb[105].mxu0 }
 0x70d   : > { %v13457_v63 = vpop.eup %13456  ;;  %13476 = vtanh.f32 %v11254_v41  ;;  %v9032_v23 = vadd.f32 1.0, %v13455_v55  ;;  %v9273_v14 = vpack.c.bf16 %v9219_v3, %v16257_v54  ;;  %v16294_v53 = vpop.f32.mrb[105].mxu1  ;;  %v11325_v41 = vadd.f32 %v16216_v43, %v16079_v42 }
 0x70e   : > { %v13459_v20 = vpop.eup %13458  ;;  %13478 = vpow2.f32 %v10862_v48  ;;  %v9220_v62 = vmul.f32 %v13457_v63, %v13453_v31  ;;  %v16300_v54 = vpop.f32.mrb[106].mxu0  ;;  %v10864_v31 = vmul.f32 -1.442695, %v11324_v27  ;;  %v11257_v43 = vadd.f32 %v16186_v16, %v16085_v36 }
 0x70f   : > { %v13461_v35 = vpop.eup %13460  ;;  %13480 = vrcp.f32 %v9032_v23  ;;  %v16302_v51 = vpop.f32.mrb[106].mxu1  ;;  %v10865_v27 = vmul.f32 -1.442695, %v11325_v41  ;;  %v11327_v16 = vadd.f32 %v16234_v11, %v16079_v42  ;;  %v10866_v41 = vmul.f32 -1.442695, %v11326_v9 }
 0x710   : > { %v13463_v12 = vpop.eup %13462  ;;  %13482 = vtanh.f32 %v11255_v10  ;;  %v9033_v48 = vadd.f32 1.0, %v13461_v35  ;;  %v9274_v3 = vpack.c.bf16 %v9220_v62, %v9218_v7  ;;  %v16304_v55 = vpop.f32.mrb[107].mxu0 }
 0x711   : > { %v16306_v63 = vpop.f32.mrb[107].mxu1  ;;  %v13465_v23 = vpop.eup %13464  ;;  %13484 = vpow2.f32 %v10863_v57  ;;  %v16308_v58 = vmul.f32 %v13463_v12, %v13459_v20  ;;  %v11258_v20 = vadd.f32 %v16190_v40, %v16090_v49 }
 0x712   : > { %v13467_v15 = vpop.eup %13466  ;;  %13486 = vrcp.f32 %v9033_v48  ;;  %9341 = vmatprep.subr.bf16.mxu0 %v9274_v3  ;;  %v16318_v12 = vpop.f32.mrb[108].mxu0 }
 0x713   : > { %v13469_v10 = vpop.eup %13468  ;;  %13488 = vtanh.f32 %v11256_v25  ;;  %v9034_v7 = vadd.f32 1.0, %v13467_v15  ;;  %9342 = vmatpush1.bf16.xpose.msra.mxu0 %v9273_v14  ;;  %v16320_v29 = vpop.f32.mrb[108].mxu1 }
 0x714   : > { %v13471_v62 = vpop.eup %13470  ;;  %13490 = vpow2.f32 %v10864_v31  ;;  %v9222_v35 = vmul.f32 %v13469_v10, %v13465_v23  ;;  %v16322_v14 = vpop.f32.mrb[109].mxu0  ;;  %v11259_v10 = vadd.f32 %v16201_v26, %v16085_v36  ;;  %v11260_v26 = vadd.f32 %v16206_v32, %v16090_v49 }
 0x715   : > { %v13473_v57 = vpop.eup %13472  ;;  %13492 = vrcp.f32 %v9034_v7  ;;  %v16324_v31 = vpop.f32.mrb[109].mxu1 }
 0x716   : > { %v13475_v48 = vpop.eup %13474  ;;  %13494 = vtanh.f32 %v11257_v43  ;;  %v9035_v25 = vadd.f32 1.0, %v13473_v57  ;;  %v16326_v15 = vpop.f32.mrb[110].mxu0  ;;  %v11328_v43 = vadd.f32 %v16238_v28, %v16082_v59  ;;  %v11329_v28 = vadd.f32 %v16242_v24, %v16079_v42 }
 0x717   : > { %v13477_v3 = vpop.eup %13476  ;;  %13496 = vpow2.f32 %v10865_v27  ;;  %v9223_v23 = vmul.f32 %v13475_v48, %v13471_v62  ;;  %v16328_v40 = vpop.f32.mrb[110].mxu1  ;;  %v10867_v62 = vmul.f32 -1.442695, %v11327_v16  ;;  %v11330_v24 = vadd.f32 %v16250_v44, %v16082_v59 }
 0x718   : > { %v13479_v11 = vpop.eup %13478  ;;  %13498 = vrcp.f32 %v9035_v25  ;;  %v16334_v9 = vpop.f32.mrb[111].mxu0 }
 0x719   : > { %v16336_v7 = vpop.f32.mrb[111].mxu1  ;;  %v13481_v57 = vpop.eup %13480  ;;  %13500 = vtanh.f32 %v11258_v20  ;;  %v9036_v27 = vadd.f32 1.0, %v13479_v11  ;;  %v9275_v48 = vpack.c.bf16 %v9223_v23, %v16308_v58  ;;  %v10868_v11 = vmul.f32 -1.442695, %v11328_v43 }
 0x71a   : > { %v13483_v60 = vpop.eup %13482  ;;  %13502 = vpow2.f32 %v10866_v41  ;;  %v9224_v61 = vmul.f32 %v13481_v57, %v13477_v3  ;;  %v16345_v41 = vpop.f32.mrb[112].mxu0  ;;  %v16349_v23 = vld.sshfl [vmem:[#allocation17] sm:$0x11 pattern:$0x75316420] }
 0x71b   : > { %v13485_v25 = vpop.eup %13484  ;;  %13504 = vrcp.f32 %v9036_v27  ;;  %v16347_v3 = vpop.f32.mrb[112].mxu1  ;;  %17138 = vst [vmem:[#allocation69_spill] sm:$0xff] %v16349_v23  ;;  %v10869_v43 = vmul.f32 -1.442695, %v11329_v28 }
 0x71c   : > { %v13487_v5 = vpop.eup %13486  ;;  %13506 = vtanh.f32 %v11259_v10  ;;  %v9037_v20 = vadd.f32 1.0, %v13485_v25  ;;  %v9276_v16 = vpack.c.bf16 %v9224_v61, %v9222_v35  ;;  %v16355_v61 = vpop.f32.mrb[113].mxu0 }
 0x71d   : > { %v13489_v8 = vpop.eup %13488  ;;  %13508 = vpow2.f32 %v10867_v62  ;;  %v16343_v58 = vmul.f32 %v13487_v5, %v13483_v60  ;;  %v16357_v35 = vpop.f32.mrb[113].mxu1  ;;  %v9319_v5 = vunpack.c.0.s8 %v9318_v4 }
 0x71e   : > { %v13491_v32 = vpop.eup %13490  ;;  %13510 = vrcp.f32 %v9037_v20  ;;  %9343 = vmatprep.subr.bf16.mxu0 %v9276_v16  ;;  %v16359_v57 = vpop.f32.mrb[114].mxu0  ;;  %v9316_v20 = vcombine.high %v16349_v23, %v16349_v23 }
 0x71f   : > { %v13493_v60 = vpop.eup %13492  ;;  %13512 = vtanh.f32 %v11260_v26  ;;  %v9038_v10 = vadd.f32 1.0, %v13491_v32  ;;  %9344 = vmatpush1.bf16.xpose.msra.mxu0 %v9275_v48  ;;  %v16361_v27 = vpop.f32.mrb[114].mxu1  ;;  %v11262_v26 = vadd.f32 %v16218_v45, %v16090_v49  ;;  %v11331_v48 = vadd.f32 %v16261_v37, %v16079_v42 }
 0x720   : > { %v13495_v62 = vpop.eup %13494  ;;  %13514 = vpow2.f32 %v10868_v11  ;;  %v9226_v6 = vmul.f32 %v13493_v60, %v13489_v8  ;;  %v16363_v25 = vpop.f32.mrb[115].mxu0  ;;  %v10870_v11 = vmul.f32 -1.442695, %v11330_v24  ;;  %v16374_v8 = vsub.s32 %v9319_v5, %v15105_v39 }
 0x721   : > { %v16365_v44 = vpop.f32.mrb[115].mxu1  ;;  %v13497_v4 = vpop.eup %13496  ;;  %13516 = vrcp.f32 %v9038_v10  ;;  %v11263_v10 = vadd.f32 %v16232_v38, %v16085_v36  ;;  %v11332_v45 = vadd.f32 %v16269_v56, %v16082_v59  ;;  %v10871_v24 = vmul.f32 -1.442695, %v11331_v48 }
 0x722   : > { %v13499_v28 = vpop.eup %13498  ;;  %13518 = vtanh.f32 %v11261_v0  ;;  %v9039_v16 = vadd.f32 1.0, %v13497_v4  ;;  %17139 = vst [vmem:[#allocation73_spill] sm:$0xff] %v16374_v8  ;;  %v9330_v37 = vrot.slane %v9316_v20, %v16374_v8  ;;  %v16382_v5 = vpop.f32.mrb[116].mxu0  ;;  %v11334_v8 = vadd.f32 %v16277_v22, %v16082_v59 }
 0x723   : > { %v13501_v32 = vpop.eup %13500  ;;  %13520 = vpow2.f32 %v10869_v43  ;;  %v9227_v60 = vmul.f32 %v13499_v28, %v13495_v62  ;;  %v16384_v43 = vpop.f32.mrb[116].mxu1 }
 0x724   : > { %v13503_v17 = vpop.eup %13502  ;;  %13522 = vrcp.f32 %v9039_v16  ;;  %v16386_v28 = vpop.f32.mrb[117].mxu0  ;;  %9365 = vmatprep.mubr.bf16.mxu0 %v9330_v37  ;;  %v10872_v16 = vmul.f32 -1.442695, %v11332_v45 }
 0x725   : > { %v13505_v23 = vpop.eup %13504  ;;  %13524 = vtanh.f32 %v11262_v26  ;;  %v9040_v0 = vadd.f32 1.0, %v13503_v17  ;;  %v9277_v39 = vpack.c.bf16 %v9227_v60, %v16343_v58  ;;  %v16388_v38 = vpop.f32.mrb[117].mxu1  ;;  %v11264_v17 = vadd.f32 %v16236_v19, %v16090_v49 }
 0x726   : > { %v13507_v62 = vpop.eup %13506  ;;  %13526 = vpow2.f32 %v10870_v11  ;;  %v9228_v4 = vmul.f32 %v13505_v23, %v13501_v32  ;;  %v11333_v58 = vadd.f32 %v16273_v34, %v16079_v42  ;;  %v16394_v20 = vpop.f32.mrb[118].mxu0  ;;  %v11265_v34 = vadd.f32 %v16240_v46, %v16085_v36 }
 0x727   : > { %v13509_v56 = vpop.eup %13508  ;;  %13528 = vrcp.f32 %v9040_v0  ;;  %v16396_v26 = vpop.f32.mrb[118].mxu1  ;;  %v11335_v46 = vadd.f32 %v16290_v50, %v16079_v42 }
 0x728   : > { %v13511_v48 = vpop.eup %13510  ;;  %13530 = vtanh.f32 %v11263_v10  ;;  %v9041_v23 = vadd.f32 1.0, %v13509_v56  ;;  %v9278_v11 = vpack.c.bf16 %v9228_v4, %v9226_v6  ;;  %v16398_v32 = vpop.f32.mrb[119].mxu0  ;;  %v10873_v45 = vmul.f32 -1.442695, %v11333_v58 }
 0x729   : > { %v16400_v60 = vpop.f32.mrb[119].mxu1  ;;  %v13513_v37 = vpop.eup %13512  ;;  %13532 = vpow2.f32 %v10871_v24  ;;  %v16402_v0 = vmul.f32 %v13511_v48, %v13507_v62  ;;  %v11266_v62 = vadd.f32 %v16248_v52, %v16090_v49  ;;  %v10874_v58 = vmul.f32 -1.442695, %v11334_v8 }
 0x72a   : > { %v13515_v19 = vpop.eup %13514  ;;  %13534 = vrcp.f32 %v9041_v23  ;;  %9345 = vmatprep.subr.bf16.mxu0 %v9278_v11  ;;  %v16412_v48 = vpop.f32.mrb[120].mxu0 }
 0x72b   : > { %v13517_v10 = vpop.eup %13516  ;;  %13536 = vtanh.f32 %v11264_v17  ;;  %v9042_v6 = vadd.f32 1.0, %v13515_v19  ;;  %9346 = vmatpush1.bf16.xpose.msra.mxu0 %v9277_v39  ;;  %v16414_v22 = vpop.f32.mrb[120].mxu1 }
 0x72c   : > { %v13519_v4 = vpop.eup %13518  ;;  %13538 = vpow2.f32 %v10872_v16  ;;  %v9230_v56 = vmul.f32 %v13517_v10, %v13513_v37  ;;  %v16416_v39 = vpop.f32.mrb[121].mxu0  ;;  %v11267_v10 = vadd.f32 %v16259_v13, %v16085_v36  ;;  %v11268_v13 = vadd.f32 %v16267_v2, %v16090_v49 }
 0x72d   : > { %v13521_v24 = vpop.eup %13520  ;;  %13540 = vrcp.f32 %v9042_v6  ;;  %17140 = vst [vmem:[#allocation80_spill] sm:$0xff] %v16416_v39  ;;  %v16418_v16 = vpop.f32.mrb[121].mxu1  ;;  %v11269_v2 = vadd.f32 %v16271_v30, %v16085_v36 }
 0x72e   : > { %v13523_v23 = vpop.eup %13522  ;;  %13542 = vtanh.f32 %v11265_v34  ;;  %v9043_v17 = vadd.f32 1.0, %v13521_v24  ;;  %v16420_v19 = vpop.f32.mrb[122].mxu0  ;;  %v11336_v34 = vadd.f32 %v16294_v53, %v16082_v59  ;;  %v11337_v53 = vadd.f32 %v16302_v51, %v16079_v42 }
 0x72f   : > { %v13525_v11 = vpop.eup %13524  ;;  %13544 = vpow2.f32 %v10873_v45  ;;  %v9231_v37 = vmul.f32 %v13523_v23, %v13519_v4  ;;  %17141 = vst [vmem:[#allocation87_spill] sm:$0xff] %v16420_v19  ;;  %v16422_v52 = vpop.f32.mrb[122].mxu1  ;;  %v10875_v4 = vmul.f32 -1.442695, %v11335_v46  ;;  %v11338_v51 = vadd.f32 %v16306_v63, %v16082_v59 }
 0x730   : > { %v13527_v50 = vpop.eup %13526  ;;  %13546 = vrcp.f32 %v9043_v17  ;;  %v16428_v8 = vpop.f32.mrb[123].mxu0  ;;  %v10876_v39 = vmul.f32 -1.442695, %v11336_v34 }
 0x731   : > { %17142 = vst [vmem:[#allocation84_spill] sm:$0xff] %v16428_v8  ;;  %v16430_v6 = vpop.f32.mrb[123].mxu1  ;;  %v13529_v24 = vpop.eup %13528  ;;  %13548 = vtanh.f32 %v11266_v62  ;;  %v9044_v45 = vadd.f32 1.0, %v13527_v50  ;;  %v9279_v23 = vpack.c.bf16 %v9231_v37, %v16402_v0 }
 0x732   : > { %v13531_v18 = vpop.eup %13530  ;;  %13550 = vpow2.f32 %v10874_v58  ;;  %v9232_v21 = vmul.f32 %v13529_v24, %v13525_v11  ;;  %v16439_v0 = vpop.f32.mrb[124].mxu0 }
 0x733   : > { %v13533_v17 = vpop.eup %13532  ;;  %13552 = vrcp.f32 %v9044_v45  ;;  %v16441_v58 = vpop.f32.mrb[124].mxu1 }
 0x734   : > { %v13535_v8 = vpop.eup %13534  ;;  %13554 = vtanh.f32 %v11267_v10  ;;  %v9045_v19 = vadd.f32 1.0, %v13533_v17  ;;  %v9280_v62 = vpack.c.bf16 %v9232_v21, %v9230_v56  ;;  %v16447_v37 = vpop.f32.mrb[125].mxu0  ;;  %v10877_v10 = vmul.f32 -1.442695, %v11337_v53 }
 0x735   : > { %v13537_v50 = vpop.eup %13536  ;;  %13556 = vpow2.f32 %v10875_v4  ;;  %v16437_v46 = vmul.f32 %v13535_v8, %v13531_v18  ;;  %v16449_v21 = vpop.f32.mrb[125].mxu1  ;;  %v11270_v4 = vadd.f32 %v16275_v47, %v16090_v49  ;;  %v11339_v17 = vadd.f32 %v16320_v29, %v16079_v42 }
 0x736   : > { %v13539_v11 = vpop.eup %13538  ;;  %13558 = vrcp.f32 %v9045_v19  ;;  %9347 = vmatprep.subr.bf16.mxu0 %v9280_v62  ;;  %v16451_v34 = vpop.f32.mrb[126].mxu0  ;;  %v10878_v53 = vmul.f32 -1.442695, %v11338_v51 }
 0x737   : > { %v13541_v56 = vpop.eup %13540  ;;  %13560 = vtanh.f32 %v11268_v13  ;;  %v9046_v18 = vadd.f32 1.0, %v13539_v11  ;;  %9348 = vmatpush1.bf16.xpose.msra.mxu0 %v9279_v23  ;;  %v16453_v8 = vpop.f32.mrb[126].mxu1  ;;  %v11271_v11 = vadd.f32 %v16288_v33, %v16085_v36  ;;  %v11341_v33 = vadd.f32 %v16328_v40, %v16079_v42 }
 0x738   : > { %v13543_v19 = vpop.eup %13542  ;;  %13562 = vpow2.f32 %v10876_v39  ;;  %v9234_v30 = vmul.f32 %v13541_v56, %v13537_v50  ;;  %v16455_v24 = vpop.f32.mrb[127].mxu0  ;;  %v11340_v56 = vadd.f32 %v16324_v31, %v16082_v59 }
 0x739   : > { %17143 = vst [vmem:[#allocation92_spill] sm:$0xff] %v16455_v24  ;;  %v16457_v63 = vpop.f32.mrb[127].mxu1  ;;  %v13545_v45 = vpop.eup %13544  ;;  %13564 = vrcp.f32 %v9046_v18  ;;  %v10879_v24 = vmul.f32 -1.442695, %v11339_v17 }
 0x73a   : > { %v13547_v23 = vpop.eup %13546  ;;  %13566 = vtanh.f32 %v11269_v2  ;;  %v9047_v13 = vadd.f32 1.0, %v13545_v45 }
 0x73b   : > { %v13549_v62 = vpop.eup %13548  ;;  %13568 = vpow2.f32 %v10877_v10  ;;  %v9235_v39 = vmul.f32 %v13547_v23, %v13543_v19  ;;  %v11272_v10 = vadd.f32 %v16292_v1, %v16090_v49  ;;  %v10880_v23 = vmul.f32 -1.442695, %v11340_v56 }
 0x73c   : > { %v13551_v50 = vpop.eup %13550  ;;  %13570 = vrcp.f32 %v9047_v13 }
 0x73d   : > { %v13553_v18 = vpop.eup %13552  ;;  %13572 = vtanh.f32 %v11270_v4  ;;  %v9048_v47 = vadd.f32 1.0, %v13551_v50  ;;  %v9281_v29 = vpack.c.bf16 %v9235_v39, %v16437_v46  ;;  %v10881_v39 = vmul.f32 -1.442695, %v11341_v33 }
 0x73e   : > { %v13555_v2 = vpop.eup %13554  ;;  %13574 = vpow2.f32 %v10878_v53  ;;  %v9236_v51 = vmul.f32 %v13553_v18, %v13549_v62  ;;  %v11273_v53 = vadd.f32 %v16300_v54, %v16085_v36  ;;  %v11342_v62 = vadd.f32 %v16336_v7, %v16082_v59 }
 0x73f   : > { %v13557_v45 = vpop.eup %13556  ;;  %13576 = vrcp.f32 %v9048_v47  ;;  %v11343_v54 = vadd.f32 %v16347_v3, %v16079_v42 }
 0x740   : > { %v13559_v19 = vpop.eup %13558  ;;  %13578 = vtanh.f32 %v11271_v11  ;;  %v9049_v31 = vadd.f32 1.0, %v13557_v45  ;;  %v9282_v4 = vpack.c.bf16 %v9236_v51, %v9234_v30  ;;  %v10882_v18 = vmul.f32 -1.442695, %v11342_v62 }
 0x741   : > { %v13561_v13 = vpop.eup %13560  ;;  %13580 = vpow2.f32 %v10879_v24  ;;  %v9237_v17 = vmul.f32 %v13559_v19, %v13555_v2  ;;  %v11274_v24 = vadd.f32 %v16304_v55, %v16090_v49  ;;  %v11344_v45 = vadd.f32 %v16357_v35, %v16082_v59 }
 0x742   : > { %v13563_v46 = vpop.eup %13562  ;;  %13582 = vrcp.f32 %v9049_v31  ;;  %9349 = vmatprep.subr.bf16.mxu0 %v9282_v4  ;;  %v10883_v33 = vmul.f32 -1.442695, %v11343_v54  ;;  %v11276_v4 = vadd.f32 %v16322_v14, %v16090_v49  ;;  %v11278_v54 = vadd.f32 %v16334_v9, %v16090_v49 }
 0x743   : > { %v13565_v1 = vpop.eup %13564  ;;  %13584 = vtanh.f32 %v11272_v10  ;;  %v9050_v40 = vadd.f32 1.0, %v13563_v46  ;;  %9350 = vmatpush1.bf16.xpose.msra.mxu0 %v9281_v29  ;;  %v11275_v29 = vadd.f32 %v16318_v12, %v16085_v36  ;;  %v10884_v35 = vmul.f32 -1.442695, %v11344_v45 }
 0x744   : > { %v13567_v50 = vpop.eup %13566  ;;  %13586 = vpow2.f32 %v10880_v23  ;;  %v9238_v30 = vmul.f32 %v13565_v1, %v13561_v13  ;;  %v11345_v13 = vadd.f32 %v16361_v27, %v16079_v42 }
 0x745   : > { %v13569_v11 = vpop.eup %13568  ;;  %13588 = vrcp.f32 %v9050_v40  ;;  %v11277_v40 = vadd.f32 %v16326_v15, %v16085_v36  ;;  %v11347_v15 = vadd.f32 %v16384_v43, %v16079_v42 }
 0x746   : > { %v13571_v56 = vpop.eup %13570  ;;  %13590 = vtanh.f32 %v11273_v53  ;;  %v9051_v7 = vadd.f32 1.0, %v13569_v11 }
 0x747   : > { %v13573_v47 = vpop.eup %13572  ;;  %13592 = vpow2.f32 %v10881_v39  ;;  %v9239_v2 = vmul.f32 %v13571_v56, %v13567_v50  ;;  %v11346_v39 = vadd.f32 %v16365_v44, %v16082_v59  ;;  %v10885_v50 = vmul.f32 -1.442695, %v11345_v13 }
 0x748   : > { %v13575_v51 = vpop.eup %13574  ;;  %13594 = vrcp.f32 %v9051_v7 }
 0x749   : > { %v13577_v10 = vpop.eup %13576  ;;  %13596 = vtanh.f32 %v11274_v24  ;;  %v9052_v55 = vadd.f32 1.0, %v13575_v51  ;;  %v9283_v3 = vpack.c.bf16 %v9239_v2, %v9237_v17  ;;  %v10886_v7 = vmul.f32 -1.442695, %v11346_v39 }
 0x74a   : > { %v13579_v19 = vpop.eup %13578  ;;  %13598 = vpow2.f32 %v10882_v18  ;;  %v9240_v31 = vmul.f32 %v13577_v10, %v13573_v47  ;;  %v11279_v51 = vadd.f32 %v16345_v41, %v16085_v36  ;;  %v10887_v10 = vmul.f32 -1.442695, %v11347_v15 }
 0x74b   : > { %v13581_v23 = vpop.eup %13580  ;;  %13600 = vrcp.f32 %v9052_v55  ;;  %v14157_v39 = vmov 0   ;;  %v11283_v15 = vadd.f32 %v16382_v5, %v16085_v36  ;;  %v11353_v5 = vadd.f32 %v16422_v52, %v16079_v42 }
 0x74c   : > { %v13583_v12 = vpop.eup %13582  ;;  %13602 = vtanh.f32 %v11275_v29  ;;  %v9053_v46 = vadd.f32 1.0, %v13581_v23  ;;  %v9284_v53 = vpack.c.bf16 %v9240_v31, %v9238_v30  ;;  %v11348_v29 = vadd.f32 %v16388_v38, %v16082_v59  ;;  %12464 = vset.pattern.permute.xlu0 %v14157_v39  ;;  %12465 = vset.pattern.permute.xlu1 %v14157_v39  ;;  %v17144_v39 = vld [vmem:[#allocation80_spill] sm:$0xff] }
 0x74d   : > { %v13585_v62 = vpop.eup %13584  ;;  %13604 = vpow2.f32 %v10883_v33  ;;  %v9241_v1 = vmul.f32 %v13583_v12, %v13579_v19  ;;  %v11280_v19 = vadd.f32 %v16355_v61, %v16090_v49  ;;  %v11349_v31 = vadd.f32 %v16396_v26, %v16079_v42 }
 0x74e   : > { %v13587_v17 = vpop.eup %13586  ;;  %13606 = vrcp.f32 %v9053_v46  ;;  %9351 = vmatprep.subr.bf16.mxu0 %v9284_v53  ;;  %v10888_v38 = vmul.f32 -1.442695, %v11348_v29  ;;  %v11350_v61 = vadd.f32 %v16400_v60, %v16082_v59  ;;  %v11351_v60 = vadd.f32 %v16414_v22, %v16079_v42 }
 0x74f   : > { %v13589_v14 = vpop.eup %13588  ;;  %13608 = vtanh.f32 %v11276_v4  ;;  %v9054_v27 = vadd.f32 1.0, %v13587_v17  ;;  %9352 = vmatpush1.bf16.xpose.msra.mxu0 %v9283_v3 }
 0x750   : > { %v13591_v11 = vpop.eup %13590  ;;  %13610 = vpow2.f32 %v10884_v35  ;;  %v9242_v30 = vmul.f32 %v13589_v14, %v13585_v62  ;;  %v11281_v35 = vadd.f32 %v16359_v57, %v16085_v36  ;;  %v10889_v62 = vmul.f32 -1.442695, %v11349_v31 }
 0x751   : > { %v13593_v24 = vpop.eup %13592  ;;  %13612 = vrcp.f32 %v9054_v27  ;;  %v11282_v57 = vadd.f32 %v16363_v25, %v16090_v49  ;;  %v10891_v22 = vmul.f32 -1.442695, %v11351_v60 }
 0x752   : > { %v13595_v56 = vpop.eup %13594  ;;  %13614 = vtanh.f32 %v11277_v40  ;;  %v9055_v44 = vadd.f32 1.0, %v13593_v24 }
 0x753   : > { %v13597_v18 = vpop.eup %13596  ;;  %13616 = vpow2.f32 %v10885_v50  ;;  %v9243_v47 = vmul.f32 %v13595_v56, %v13591_v11  ;;  %v10890_v11 = vmul.f32 -1.442695, %v11350_v61  ;;  %v11352_v56 = vadd.f32 %v16418_v16, %v16082_v59 }
 0x754   : > { %v13599_v2 = vpop.eup %13598  ;;  %13618 = vrcp.f32 %v9055_v44  ;;  %v11287_v61 = vadd.f32 %v16412_v48, %v16085_v36 }
 0x755   : > { %v13601_v45 = vpop.eup %13600  ;;  %13620 = vtanh.f32 %v11278_v54  ;;  %v9056_v9 = vadd.f32 1.0, %v13599_v2  ;;  %v9285_v43 = vpack.c.bf16 %v9243_v47, %v9241_v1  ;;  %v9298_v1 = vld [vmem:[#allocation4] sm:$0x1] }
 0x756   : > { %v13603_v55 = vpop.eup %13602  ;;  %13622 = vpow2.f32 %v10886_v7  ;;  %v9244_v33 = vmul.f32 %v13601_v45, %v13597_v18  ;;  %9301 = vperm.xlu0 %12464, %v9298_v1   ;;  %v10892_v45 = vmul.f32 -1.442695, %v11352_v56 }
 0x757   : > { %v13605_v3 = vpop.eup %13604  ;;  %13624 = vrcp.f32 %v9056_v9 }
 0x758   : > { %v13607_v41 = vpop.eup %13606  ;;  %13626 = vtanh.f32 %v11279_v51  ;;  %v9057_v23 = vadd.f32 1.0, %v13605_v3  ;;  %v9286_v4 = vpack.c.bf16 %v9244_v33, %v9242_v30  ;;  %v11284_v51 = vadd.f32 %v16386_v28, %v16090_v49 }
 0x759   : > { %v13609_v13 = vpop.eup %13608  ;;  %13628 = vpow2.f32 %v10887_v10  ;;  %v16504_v12 = vmul.f32 %v13607_v41, %v13603_v55  ;;  %v11285_v33 = vadd.f32 %v16394_v20, %v16085_v36  ;;  %v11354_v3 = vadd.f32 %v16430_v6, %v16082_v59 }
 0x75a   : > { %v13611_v46 = vpop.eup %13610  ;;  %13630 = vrcp.f32 %v9057_v23  ;;  %9353 = vmatprep.subr.bf16.mxu0 %v9286_v4  ;;  %v11355_v20 = vadd.f32 %v16441_v58, %v16079_v42 }
 0x75b   : > { %v13613_v53 = vpop.eup %13612  ;;  %13632 = vtanh.f32 %v11280_v19  ;;  %v9058_v26 = vadd.f32 1.0, %v13611_v46  ;;  %9354 = vmatpush1.bf16.xpose.msra.mxu0 %v9285_v43  ;;  %v10893_v19 = vmul.f32 -1.442695, %v11353_v5 }
 0x75c   : > { %v13615_v17 = vpop.eup %13614  ;;  %13634 = vpow2.f32 %v10888_v38  ;;  %v9246_v40 = vmul.f32 %v13613_v53, %v13609_v13  ;;  %v11286_v38 = vadd.f32 %v16398_v32, %v16090_v49  ;;  %v10894_v13 = vmul.f32 -1.442695, %v11354_v3 }
 0x75d   : > { %v13617_v14 = vpop.eup %13616  ;;  %13636 = vrcp.f32 %v9058_v26  ;;  %v11356_v53 = vadd.f32 %v16449_v21, %v16082_v59 }
 0x75e   : > { %v13619_v27 = vpop.eup %13618  ;;  %13638 = vtanh.f32 %v11281_v35  ;;  %v9059_v50 = vadd.f32 1.0, %v13617_v14  ;;  %v11288_v14 = vadd.f32 %v17144_v39, %v16090_v49 }
 0x75f   : > { %v13621_v30 = vpop.eup %13620  ;;  %13640 = vpow2.f32 %v10889_v62  ;;  %v9247_v24 = vmul.f32 %v13619_v27, %v13615_v17  ;;  %v10895_v62 = vmul.f32 -1.442695, %v11355_v20  ;;  %v10896_v21 = vmul.f32 -1.442695, %v11356_v53 }
 0x760   : > { %v13623_v54 = vpop.eup %13622  ;;  %13642 = vrcp.f32 %v9059_v50 }
 0x761   : > { %v13625_v25 = vpop.eup %13624  ;;  %13644 = vtanh.f32 %v11282_v57  ;;  %v9060_v44 = vadd.f32 1.0, %v13623_v54  ;;  %v9287_v7 = vpack.c.bf16 %v9247_v24, %v16504_v12  ;;  %v11357_v57 = vadd.f32 %v16453_v8, %v16079_v42  ;;  %v17145_v24 = vld [vmem:[#allocation87_spill] sm:$0xff] }
 0x762   : > { %v13627_v18 = vpop.eup %13626  ;;  %13646 = vpow2.f32 %v10890_v11  ;;  %v9248_v47 = vmul.f32 %v13625_v25, %v13621_v30  ;;  %v11289_v54 = vadd.f32 %v17145_v24, %v16085_v36 }
 0x763   : > { %v13629_v2 = vpop.eup %13628  ;;  %13648 = vrcp.f32 %v9060_v44  ;;  %v10897_v8 = vmul.f32 -1.442695, %v11357_v57 }
 0x764   : > { %v13631_v29 = vpop.eup %13630  ;;  %13650 = vtanh.f32 %v11283_v15  ;;  %v9061_v16 = vadd.f32 1.0, %v13629_v2  ;;  %v9288_v9 = vpack.c.bf16 %v9248_v47, %v9246_v40  ;;  %v11358_v15 = vadd.f32 %v16457_v63, %v16082_v59 }
 0x765   : > { %v13633_v10 = vpop.eup %13632  ;;  %13652 = vpow2.f32 %v10891_v22  ;;  %v9249_v43 = vmul.f32 %v13631_v29, %v13627_v18 }
 0x766   : > { %v13635_v55 = vpop.eup %13634  ;;  %13654 = vrcp.f32 %v9061_v16  ;;  %9355 = vmatprep.subr.bf16.mxu0 %v9288_v9 }
 0x767   : > { %v13637_v28 = vpop.eup %13636  ;;  %13656 = vtanh.f32 %v11284_v51  ;;  %v9062_v52 = vadd.f32 1.0, %v13635_v55  ;;  %9356 = vmatpush1.bf16.xpose.msra.mxu0 %v9287_v7  ;;  %v17146_v7 = vld [vmem:[#allocation84_spill] sm:$0xff]  ;;  %v10898_v51 = vmul.f32 -1.442695, %v11358_v15  ;;  %v17151_v15 = vld [vmem:[#allocation69_spill] sm:$0xff] }
 0x768   : > { %v13639_v31 = vpop.eup %13638  ;;  %13658 = vpow2.f32 %v10892_v45  ;;  %v9250_v41 = vmul.f32 %v13637_v28, %v13633_v10  ;;  %v11290_v18 = vadd.f32 %v17146_v7, %v16090_v49  ;;  %v11291_v45 = vadd.f32 %v16439_v0, %v16085_v36 }
 0x769   : > { %v13641_v23 = vpop.eup %13640  ;;  %13660 = vrcp.f32 %v9062_v52  ;;  %v11292_v28 = vadd.f32 %v16447_v37, %v16090_v49 }
 0x76a   : > { %v13643_v4 = vpop.eup %13642  ;;  %13662 = vtanh.f32 %v11285_v33  ;;  %v9063_v6 = vadd.f32 1.0, %v13641_v23 }
 0x76b   : > { %v13645_v12 = vpop.eup %13644  ;;  %13664 = vpow2.f32 %v10893_v19  ;;  %v9251_v46 = vmul.f32 %v13643_v4, %v13639_v31 }
 0x76c   : > { %v13647_v35 = vpop.eup %13646  ;;  %13666 = vrcp.f32 %v9063_v6 }
 0x76d   : > { %v13649_v26 = vpop.eup %13648  ;;  %13668 = vtanh.f32 %v11286_v38  ;;  %v9064_v32 = vadd.f32 1.0, %v13647_v35  ;;  %v9289_v58 = vpack.c.bf16 %v9251_v46, %v9249_v43  ;;  %v11293_v38 = vadd.f32 %v16451_v34, %v16085_v36 }
 0x76e   : > { %v13651_v1 = vpop.eup %13650  ;;  %13670 = vpow2.f32 %v10894_v13  ;;  %v9252_v17 = vmul.f32 %v13649_v26, %v13645_v12  ;;  %v17147_v12 = vld [vmem:[#allocation92_spill] sm:$0xff] }
 0x76f   : > { %v13653_v40 = vpop.eup %13652  ;;  %13672 = vrcp.f32 %v9064_v32  ;;  %v11294_v46 = vadd.f32 %v17147_v12, %v16090_v49 }
 0x770   : > { %v13655_v48 = vpop.eup %13654  ;;  %13674 = vtanh.f32 %v11287_v61  ;;  %v9065_v60 = vadd.f32 1.0, %v13653_v40  ;;  %v9290_v27 = vpack.c.bf16 %v9252_v17, %v9250_v41 }
 0x771   : > { %v13657_v50 = vpop.eup %13656  ;;  %13676 = vpow2.f32 %v10895_v62  ;;  %v9253_v11 = vmul.f32 %v13655_v48, %v13651_v1 }
 0x772   : > { %v13659_v30 = vpop.eup %13658  ;;  %13678 = vrcp.f32 %v9065_v60  ;;  %9357 = vmatprep.subr.bf16.mxu0 %v9290_v27 }
 0x773   : > { %v13661_v56 = vpop.eup %13660  ;;  %13680 = vtanh.f32 %v11288_v14  ;;  %v9066_v42 = vadd.f32 1.0, %v13659_v30  ;;  %9358 = vmatpush1.bf16.xpose.msra.mxu0 %v9289_v58  ;;  %v17148_v30 = vld [vmem:[#allocation53_spill] sm:$0xff] }
 0x774   : > { %v13663_v25 = vpop.eup %13662  ;;  %13682 = vpow2.f32 %v10896_v21  ;;  %v9254_v44 = vmul.f32 %v13661_v56, %v13657_v50 }
 0x775   : > { %v13665_v22 = vpop.eup %13664  ;;  %13684 = vrcp.f32 %v9066_v42  ;;  %v17152_v42 = vld [vmem:[#allocation51_spill] sm:$0xff] }
 0x776   : > { %v13667_v47 = vpop.eup %13666  ;;  %13686 = vtanh.f32 %v11289_v54  ;;  %v9067_v2 = vadd.f32 1.0, %v13665_v22  ;;  %v17150_v54 = vld [vmem:[#allocation73_spill] sm:$0xff]  ;;  %v17156_v22 = vld [vmem:[#allocation59_spill] sm:$0xff] }
 0x777   : > { %v13669_v5 = vpop.eup %13668  ;;  %13688 = vpow2.f32 %v10897_v8  ;;  %v9255_v59 = vmul.f32 %v13667_v47, %v13663_v25  ;;  %v9323_v56 = vrot.slane %v17151_v15, %v17150_v54  ;;  %v17153_v8 = vld [vmem:[#allocation56_spill] sm:$0xff]  ;;  %v17159_v47 = vld [vmem:[#allocation62_spill] sm:$0xff] }
 0x778   : > { %v13671_v63 = vpop.eup %13670  ;;  %13690 = vrcp.f32 %v9067_v2 }
 0x779   : > { %v13673_v29 = vpop.eup %13672  ;;  %13692 = vtanh.f32 %v11290_v18  ;;  %v9068_v16 = vadd.f32 1.0, %v13671_v63  ;;  %v9291_v9 = vpack.c.bf16 %v9255_v59, %v9253_v11  ;;  %v17158_v18 = vld [vmem:[#allocation57_spill] sm:$0xff]  ;;  %v17164_v63 = vld [vmem:[#allocation63_spill] sm:$0xff] }
 0x77a   : > { %v13675_v10 = vpop.eup %13674  ;;  %13694 = vpow2.f32 %v10898_v51  ;;  %v9256_v43 = vmul.f32 %v13673_v29, %v13669_v5  ;;  %v17161_v51 = vld [vmem:[#allocation60_spill] sm:$0xff]  ;;  %v17162_v5 = vld [vmem:[#allocation65_spill] sm:$0xff] }
 0x77b   : > { %v13677_v55 = vpop.eup %13676  ;;  %13696 = vrcp.f32 %v9068_v16  ;;  %v17165_v29 = vld [vmem:[#allocation68_spill] sm:$0xff] }
 0x77c   : > { %v13679_v33 = vpop.eup %13678  ;;  %v9069_v3 = vadd.f32 1.0, %v13677_v55  ;;  %v9292_v52 = vpack.c.bf16 %v9256_v43, %v9254_v44  ;;  %13698 = vtanh.f32 %v11291_v45  ;;  %v17155_v44 = vld [vmem:[#allocation54_spill] sm:$0xff]  ;;  %v17171_v55 = vld [vmem:[#allocation76_spill] sm:$0xff] }
 0x77d   : > { %v13681_v19 = vpop.eup %13680  ;;  %v9257_v31 = vmul.f32 %v13679_v33, %v13675_v10  ;;  %v17167_v45 = vld [vmem:[#allocation66_spill] sm:$0xff] }
 0x77e   : > { %v13683_v41 = vpop.eup %13682  ;;  %13700 = vrcp.f32 %v9069_v3  ;;  %9359 = vmatprep.subr.bf16.mxu0 %v9292_v52  ;;  %v17170_v43 = vld [vmem:[#allocation70_spill] sm:$0xff] }
 0x77f   : > { %v13685_v23 = vpop.eup %13684  ;;  %v9070_v0 = vadd.f32 1.0, %v13683_v41  ;;  %9360 = vmatpush1.bf16.xpose.msra.mxu0 %v9291_v9  ;;  %13702 = vtanh.f32 %v11292_v28  ;;  %v17168_v9 = vld [vmem:[#allocation72_spill] sm:$0xff]  ;;  %v17173_v3 = vld [vmem:[#allocation74_spill] sm:$0xff]  ;;  %v17174_v28 = vld [vmem:[#allocation79_spill] sm:$0xff] }
 0x780   : > { %v13687_v20 = vpop.eup %13686  ;;  %v9258_v4 = vmul.f32 %v13685_v23, %v13681_v19  ;;  %v17176_v19 = vld [vmem:[#allocation77_spill] sm:$0xff] }
 0x781   : > { %v13689_v6 = vpop.eup %13688  ;;  %13704 = vrcp.f32 %v9070_v0  ;;  %v17179_v23 = vld [vmem:[#allocation81_spill] sm:$0xff]  ;;  %v17180_v0 = vld [vmem:[#allocation88_spill] sm:$0xff] }
 0x782   : > { %v13691_v13 = vpop.eup %13690  ;;  %v9071_v37 = vadd.f32 1.0, %v13689_v6  ;;  %13706 = vtanh.f32 %v11293_v38 }
 0x783   : > { %v13693_v35 = vpop.eup %13692  ;;  %v9259_v61 = vmul.f32 %v13691_v13, %v13687_v20  ;;  %v17182_v20 = vld [vmem:[#allocation85_spill] sm:$0xff]  ;;  %v17185_v13 = vld [vmem:[#allocation90_spill] sm:$0xff] }
 0x784   : > { %v13695_v53 = vpop.eup %13694  ;;  %13708 = vrcp.f32 %v9071_v37  ;;  %v17186_v37 = vld [vmem:[#allocation98_spill] sm:$0xff] }
 0x785   : > { %v13697_v26 = vpop.eup %13696  ;;  %v9072_v32 = vadd.f32 1.0, %v13695_v53  ;;  %v9293_v62 = vpack.c.bf16 %v9259_v61, %v9257_v31  ;;  %13710 = vtanh.f32 %v11294_v46  ;;  %v17177_v31 = vld [vmem:[#allocation83_spill] sm:$0xff]  ;;  %v17191_v53 = vld [vmem:[#allocation100_spill] sm:$0xff] }
 0x786   : > { %v9260_v36 = vmul.f32 %v13697_v26, %v13693_v35  ;;  %v13699_v34 = vpop.eup %13698  ;;  %v17188_v46 = vld [vmem:[#allocation95_spill] sm:$0xff]  ;;  %v17189_v35 = vld [vmem:[#allocation102_spill] sm:$0xff]  ;;  %v17192_v26 = vld [vmem:[#allocation105_spill] sm:$0xff] }
 0x787   : > { %13712 = vrcp.f32 %v9072_v32 }
 0x788   : > { %v13701_v58 = vpop.eup %13700  ;;  %v9294_v1 = vpack.c.bf16 %v9260_v36, %v9258_v4  ;;  %v17183_v4 = vld [vmem:[#allocation93_spill] sm:$0xff]  ;;  %v17195_v36 = vld [vmem:[#allocation108_spill] sm:$0xff] }
 0x789   : > { %v9261_v17 = vmul.f32 %v13701_v58, %v13699_v34  ;;  %v13703_v40 = vpop.eup %13702  ;;  %v17197_v58 = vld [vmem:[#allocation106_spill] sm:$0xff] }
 0x78a   : > { %9361 = vmatprep.subr.bf16.mxu0 %v9294_v1  ;;  %v17198_v1 = vlaneseq }
 0x78b   : > { %v13705_v39 = vpop.eup %13704  ;;  %9362 = vmatpush1.bf16.xpose.msra.mxu0 %v9293_v62  ;;  %v17194_v62 = vld [vmem:[#allocation103_spill] sm:$0xff] }
 0x78c   : > { %v9262_v49 = vmul.f32 %v13705_v39, %v13703_v40  ;;  %v13707_v14 = vpop.eup %13706 }
 0x78e   : > { %v13709_v57 = vpop.eup %13708 }
 0x78f   : > { %v9263_v48 = vmul.f32 %v13709_v57, %v13707_v14  ;;  %v13711_v60 = vpop.eup %13710  ;;  %v17200_v57 = vld [vmem:[#allocation47_spill] sm:$0xff] }
 0x791   : > { %v13713_v21 = vpop.eup %13712  ;;  %v9295_v27 = vpack.c.bf16 %v9263_v48, %v9261_v17  ;;  %v9375_v17 = vand.u32 127, %v17198_v1 }
 0x792   : > { %v9264_v50 = vmul.f32 %v13713_v21, %v13711_v60 }
 0x793   : > { %v9376_v40 = vadd.s32 128, %v9375_v17 }
 0x794   : > { %v9296_v11 = vpack.c.bf16 %v9264_v50, %v9262_v49  ;;  %v17199_v49 = vld [vmem:[#allocation49_spill] sm:$0xff] }
 0x795   : > { %v9377_v14 = vadd.s32 %v9375_v17, %v17199_v49  ;;  %v9378_v60 = vadd.s32 %v9376_v40, %v17199_v49 }
 0x796   : > { %9363 = vmatprep.subr.bf16.mxu0 %v9296_v11 }
 0x797   : > { %9364 = vmatpush1.bf16.xpose.msra.mxu0 %v9295_v27  ;;  %v17201_v27 = vld [vmem:[#allocation50_spill] sm:$0xff] }
 0x798   : > { %10998 = vmatprep.subr.msk.bf16.mxu0 %vm15156_vm4, %v17148_v30 }
 0x79e   : > { %9366 = vmatmul.mubr.bf16.vlgmr.msra.gmra.mrb[128].mxu0 %v9323_v56 }
 0x79f   : > { %11001 = vmatpush1.bf16.msk.msra.mxu0 %vm15156_vm4, %v17152_v42  ;;  %vm9379_vm4 = vcmp.lt.s32.totalorder %v9377_v14, %v17201_v27 }
 0x7a0   : > { %11004 = vmatprep.subr.msk.bf16.mxu0 %vm15198_vm7, %v17153_v8 }
 0x7a3   : > { %11007 = vmatpush1.bf16.msk.msra.mxu0 %vm15198_vm7, %v17155_v44  ;;  %vm9380_vm7 = vcmp.lt.s32.totalorder %v9378_v60, %v17201_v27 }
 0x7a4   : > { %11010 = vmatprep.subr.msk.bf16.mxu0 %vm15240_vm10, %v17156_v22 }
 0x7a7   : > { %11013 = vmatpush1.bf16.msk.msra.mxu0 %vm15240_vm10, %v17158_v18  ;;  %vm9407_vm10 = vcmask 1040384  }
 0x7a8   : > { %11016 = vmatprep.subr.msk.bf16.mxu0 %vm15282_vm13, %v17159_v47  ;;  %v9406_v47 = vld [vmem:[%s14641_s14] sm:$0x1] }
 0x7ab   : > { %11019 = vmatpush1.bf16.msk.msra.mxu0 %vm15282_vm13, %v17161_v51  ;;  %vm9403_vm13 = vcmp.lt.s32.totalorder %v17198_v1, 256 }
 0x7ac   : > { %11022 = vmatprep.subr.msk.bf16.mxu0 %vm15324_vm0, %v17162_v5 }
 0x7af   : > { %11025 = vmatpush1.bf16.msk.msra.mxu0 %vm15324_vm0, %v17164_v63  ;;  %vm9440_vm0 = vcmask 0  }
 0x7b0   : > { %11028 = vmatprep.subr.msk.bf16.mxu0 %vm15366_vm3, %v17165_v29 }
 0x7b3   : > { %11031 = vmatpush1.bf16.msk.msra.mxu0 %vm15366_vm3, %v17167_v45 }
 0x7b4   : > { %11034 = vmatprep.subr.msk.bf16.mxu0 %vm15408_vm8, %v17168_v9 }
 0x7b7   : > { %11037 = vmatpush1.bf16.msk.msra.mxu0 %vm15408_vm8, %v17170_v43 }
 0x7b8   : > { %11040 = vmatprep.subr.msk.bf16.mxu0 %vm15450_vm12, %v17171_v55 }
 0x7bb   : > { %11043 = vmatpush1.bf16.msk.msra.mxu0 %vm15450_vm12, %v17173_v3 }
 0x7bc   : > { %11046 = vmatprep.subr.msk.bf16.mxu0 %vm15492_vm1, %v17174_v28 }
 0x7bf   : > { %11049 = vmatpush1.bf16.msk.msra.mxu0 %vm15492_vm1, %v17176_v19 }
 0x7c0   : > { %11052 = vmatprep.subr.msk.bf16.mxu0 %vm15535_vm6, %v17177_v31 }
 0x7c3   : > { %11055 = vmatpush1.bf16.msk.msra.mxu0 %vm15535_vm6, %v17179_v23 }
 0x7c4   : > { %11058 = vmatprep.subr.msk.bf16.mxu0 %vm15575_vm14, %v17180_v0 }
 0x7c7   : > { %11061 = vmatpush1.bf16.msk.msra.mxu0 %vm15575_vm14, %v17182_v20 }
 0x7c8   : > { %11064 = vmatprep.subr.msk.bf16.mxu0 %vm15615_vm5, %v17183_v4 }
 0x7cb   : > { %11067 = vmatpush1.bf16.msk.msra.mxu0 %vm15615_vm5, %v17185_v13 }
 0x7cc   : > { %11070 = vmatprep.subr.msk.bf16.mxu0 %vm15655_vm15, %v17186_v37 }
 0x7cf   : > { %11073 = vmatpush1.bf16.msk.msra.mxu0 %vm15655_vm15, %v17188_v46 }
 0x7d0   : > { %11076 = vmatprep.subr.msk.bf16.mxu0 %vm17120_vm2, %v17189_v35 }
 0x7d3   : > { %11079 = vmatpush1.bf16.msk.msra.mxu0 %vm17120_vm2, %v17191_v53 }
 0x7d4   : > { %11082 = vmatprep.subr.msk.bf16.mxu0 %vm17122_vm9, %v17192_v26 }
 0x7d5   : > { %v9302_v39 = vpop.permute.xlu0 %9301 }
 0x7d6   : > { %v9307_v48 = vrot.slane %v9302_v39, %v17200_v57 }
 0x7d7   : > { %11085 = vmatpush1.bf16.msk.msra.mxu0 %vm17122_vm9, %v17194_v62 }
 0x7d8   : > { %11088 = vmatprep.subr.msk.bf16.mxu0 %vm15773_vm11, %v17195_v36 }
 0x7db   : > { %11091 = vmatpush1.bf16.msk.msra.mxu0 %vm15773_vm11, %v17197_v58 }
 0x871   : > { %v9367_v21 = vpop.f32.mrb[128].mxu0 }
 0x872   : > { %v9368_v50 = vadd.f32 %v9367_v21, %v9307_v48  ;;  %v9369_v11 = vpop.f32.mrb[129].mxu0 }
 0x873   : > { %v9370_v30 = vadd.f32 %v9369_v11, %v9307_v48  ;;  %v9371_v24 = vpop.f32.mrb[130].mxu0 }
 0x874   : > { %v9381_v15 = vsel %vm9379_vm4, %v9368_v50, -1e+30  ;;  %v9372_v56 = vpop.f32.mrb[131].mxu0 }
 0x875   : > { %v9382_v42 = vsel %vm9380_vm7, %v9370_v30, -1e+30  ;;  %v9408_v8 = vsel %vm9407_vm10, %v9381_v15, -inf }
 0x876   : > { %v9385_v25 = vcombine.low %v9381_v15, %v9382_v42  ;;  %v9409_v44 = vsel %vm9407_vm10, %v9382_v42, -inf }
 0x877   : > { %v9410_v22 = vmax.f32 %v9408_v8, %v9409_v44 }
 0x878   : > { %v9392_v7 = vrot.slane %v9385_v25, %v17150_v54 }
 0x879   : > { %9411 = vmax.xlane.f32.xlu0 %v9410_v22 }
 0x87a   : > { %v9399_v18 = vrot.slane %v9392_v7, %v17150_v54 }
 0x87c   : > { %9405 = vst.msk [vmem:[%s569_s12] sm:$0x3] %vm9403_vm13, %v9399_v18 }
 0x906   : > { %v9412_v2 = vpop.xlane.xlu0 %9411 }
 0x907   : > { %v9413_v51 = vmax.f32 %v9406_v47, %v9412_v2 }
 0x909   : > { %v9414_v5 = vsub.f32 %v9406_v47, %v9413_v51  ;;  %9570 = vst.msk [vmem:[%s14641_s14] sm:$0x1] %vm9440_vm0, %v9413_v51  ;;  %9419 = vperm.xlu1 %12465, %v9413_v51   ;;  %s17202_s14 = sld [smem:[#allocation111_spill]] }
 0x90b   : > { %v9415_v59 = vmul.f32 1.442695, %v9414_v5 }
 0x90d   : > { %13714 = vpow2.f32 %v9415_v59 }
 0x90f   : > { %s17203_s28 = smov %s17202_s14  ;;  %s16674_s26 = scalar_lea.hbm %s17202_s14, %s11101_s15 }
 0x917   : > { %v13715_v63 = vpop.eup %13714 }
 0x918   : > { %9445 = vperm.xlu0 %12464, %v13715_v63  }
 0x988   : > { %v9420_v29 = vpop.permute.xlu1 %9419 }
 0x989   : > { %v9425_v16 = vrot.slane %v9420_v29, %v17200_v57 }
 0x98b   : > { %v9426_v45 = vsub.f32 %v9381_v15, %v9425_v16  ;;  %v9427_v9 = vsub.f32 %v9382_v42, %v9425_v16 }
 0x98d   : > { %v9428_v10 = vmul.f32 1.442695, %v9426_v45  ;;  %v9430_v43 = vmul.f32 1.442695, %v9427_v9 }
 0x98f   : > { %13716 = vpow2.f32 %v9428_v10 }
 0x990   : > { %13718 = vpow2.f32 %v9430_v43 }
 0x999   : > { %v13717_v55 = vpop.eup %13716 }
 0x99a   : > { %v13719_v33 = vpop.eup %13718  ;;  %v9453_v3 = vpack.c.bf16 %v13717_v55, %v13717_v55  ;;  %v9434_v28 = vsel %vm9407_vm10, %v13717_v55, 0.0 }
 0x99b   : > { %v9454_v52 = vpack.c.bf16 %v13719_v33, %v13719_v33  ;;  %v9435_v19 = vsel %vm9407_vm10, %v13719_v33, 0.0 }
 0x99c   : > { %v9436_v31 = vadd.f32 %v9435_v19, %v9434_v28 }
 0x99d   : > { %9487 = vmatprep.mubr.bf16.mxu1 %v9454_v52  ;;  %9528 = vmatprep.mubr.bf16.mxu0 %v9454_v52 }
 0x99e   : > { %9488 = vmatmul.mubr.bf16.vlgmr.msra.gmra.mrb[128].mxu1 %v9453_v3  ;;  %9529 = vmatmul.mubr.bf16.vlgmr.msra.gmra.mrb[132].mxu0 %v9453_v3 }
 0x99f   : > { %9437 = vadd.xlane.f32.xlu1 %v9436_v31 }
 0x9a0   : > { %13957 = shalt.err (!%p13954_p9)
}
 0x9a1   : > { %s13958_s16 = scalar_lea.hbm %s16674_s26, 32  ;;  %s13962_s19 = scalar_lea.hbm %s17203_s28, 128 }
 0x9a2   : > { %p13959_p8 = scmp.ne.s32.totalorder %s16674_s26, %s13958_s16  ;;  %p13963_p6 = scmp.lt.u32.totalorder %s16674_s26, %s17203_s28 }
 0x9a3   : > { %p13964_p12 = scmp.lt.u32.totalorder %s13962_s19, %s13958_s16  ;;  %p13966_p11 = scmp.lt.u32.totalorder %s13958_s16, %s16674_s26 }
 0x9a4   : > { %p13960_p4 = pnand %p13959_p8, %p17204_p0 }
 0x9a5   : > { %p13965_p10 = por %p13964_p12, %p13963_p6 }
 0x9a6   : > { %p13961_p2 = pneg %p13960_p4 }
 0x9a7   : > { %p13967_p13 = por %p13966_p11, %p13965_p10 }
 0x9a9   : > { %p13968_p1 = pnand %p13967_p13, %p13961_p2 }
 0x9ab   : > { %13971 = shalt.err (!%p13968_p1)
}
 0x9ac   : > { %12287 = dma.vmem_to_hbm [thread:$0]  (%p17204_p0), %s9600_s24, 32, %s16674_s26, %s9572_s17   ;;  %v9432_v41 = vld [vmem:[%s14646_s22] sm:$0x1]  ;;  %v9446_v20 = vpop.permute.xlu0 %9445  ;;  %v9442_v34 = vld [vmem:[%s14649_s2] sm:$0xf]  ;;  %vm9567_vm3 = vcmp.lt.s32.totalorder %v17198_v1, 512 }
 0x9ad   : > { %v9433_v23 = vmul.f32 %v13715_v63, %v9432_v41  ;;  %v9451_v32 = vrot.slane %v9446_v20, %v17200_v57  ;;  %s17205_s13 = sld [smem:[#allocation45_spill]]  ;;  %s11102_s10 = sshll.u32 %s17002_s25, 6 }
 0x9ae   : > { %s17206_s26 = sld [smem:[#allocation114_spill]]  ;;  %s17207_s17 = sand.u32 1, %s14090_s30  }
 0x9af   : > { %v9452_v17 = vmul.f32 %v9451_v32, %v9442_v34  ;;  %s9583_s25 = scalar_lea.sflag [#allocation21], %s17207_s17  ;;  %s14159_s20 = smov [#allocation20]  }
 0x9b0   : > { %s13976_s27 = sshll.u32 %s14159_s20, 4  ;;  %s13977_s27 = int_to_ptr.vmem [resolvable:$false] %s13976_s27 }
 0x9b1   : > { %s13978_s16 = scalar_lea.vmem %s13977_s27, 128 }
 0x9b3   : > { %p17208_p7 = scmp.ne.s32.totalorder %s17205_s13, 0 }
 0x9b4   : > { %s16711_s24 = scalar_lea.hbm %s17206_s26, %s11102_s10 }
 0xa2c   : > { %v9438_v0 = vpop.xlane.xlu1 %9437 }
 0xa2d   : > { %v9439_v38 = vadd.f32 %v9438_v0, %v9433_v23 }
 0xa2f   : > { %9441 = vst.msk [vmem:[%s14646_s22] sm:$0x1] %vm9440_vm0, %v9439_v38  ;;  %s9619_s22 = sshll.u32 %s14649_s2, 4  ;;  %s16713_s22 = int_to_ptr.vmem [resolvable:$true] %s9619_s22 }
 0xa30   : > { %s13972_s11 = scalar_lea.vmem %s16713_s22, 64  ;;  %p13979_p9 = scmp.lt.s32.totalorder %s16713_s22, %s13977_s27 }
 0xa31   : > { %p13973_p0 = scmp.ne.s32.totalorder %s16713_s22, %s13972_s11  ;;  %p13980_p8 = scmp.lt.s32.totalorder %s13978_s16, %s13972_s11 }
 0xa33   : > { %p13974_p3 = pnand %p13973_p0, %p17208_p7  ;;  %p13981_p4 = por %p13980_p8, %p13979_p9 }
 0xa35   : > { %p13975_p5 = pneg %p13974_p3 }
 0xa37   : > { %p13982_p2 = pnand %p13981_p4, %p13975_p5 }
 0xa71   : > { %v9489_v4 = vpop.f32.mrb[128].mxu1  ;;  %v9530_v6 = vpop.f32.mrb[132].mxu0 }
 0xa72   : > { %v9491_v13 = vpop.f32.mrb[129].mxu1  ;;  %v9532_v37 = vpop.f32.mrb[133].mxu0 }
 0xa73   : > { %v9541_v12 = vcombine.low %v9489_v4, %v9491_v13  ;;  %v9542_v46 = vcombine.low %v9530_v6, %v9532_v37  ;;  %v9493_v35 = vpop.f32.mrb[130].mxu1  ;;  %v9534_v61 = vpop.f32.mrb[134].mxu0 }
 0xa74   : > { %v9494_v53 = vpop.f32.mrb[131].mxu1  ;;  %v9535_v26 = vpop.f32.mrb[135].mxu0 }
 0xa75   : > { %v9549_v62 = vrot.slane %v9541_v12, %v17150_v54  ;;  %v9556_v36 = vrot.slane %v9542_v46, %v17150_v54 }
 0xa77   : > { %v9557_v58 = vcombine.low %v9549_v62, %v9556_v36 }
 0xa79   : > { %v9564_v40 = vrot.slane %v9557_v58, %v17150_v54 }
 0xa7b   : > { %v9566_v39 = vadd.f32 %v9564_v40, %v9452_v17 }
 0xa7d   : > { %9569 = vst.msk [vmem:[%s14649_s2] sm:$0xf] %vm9567_vm3, %v9566_v39 }
 0xa7e   : > { %13985 = shalt.err (!%p13982_p2)
}
 0xa7f   : > { %s13986_s2 = scalar_lea.hbm %s16711_s24, 64  ;;  %s13990_s19 = scalar_lea.hbm %s17206_s26, 128 }
 0xa80   : > { %p13987_p6 = scmp.ne.s32.totalorder %s16711_s24, %s13986_s2  ;;  %p13991_p11 = scmp.lt.u32.totalorder %s16711_s24, %s17206_s26 }
 0xa81   : > { %p13992_p13 = scmp.lt.u32.totalorder %s13990_s19, %s13986_s2  ;;  %p13994_p0 = scmp.lt.u32.totalorder %s13986_s2, %s16711_s24 }
 0xa82   : > { %p13988_p12 = pnand %p13987_p6, %p17208_p7 }
 0xa83   : > { %p13993_p1 = por %p13992_p13, %p13991_p11 }
 0xa84   : > { %p13989_p10 = pneg %p13988_p12 }
 0xa85   : > { %p13995_p3 = por %p13994_p0, %p13993_p1 }
 0xa87   : > { %p13996_p5 = pnand %p13995_p3, %p13989_p10 }
 0xa89   : > { %13999 = shalt.err (!%p13996_p5)
}
 0xa8a   : > { %12288 = dma.vmem_to_hbm [thread:$0]  (%p17208_p7), %s16713_s22, 64, %s16711_s24, %s9583_s25  }
 0xa8b PF: > { %s17209_s10 = sld [smem:[#allocation31_spill]]  ;;  %s17210_s21 = sld [smem:[#allocation43_spill]] }
 0xa8c   : > { %p12334_p9 = scmp.ge.s32.totalorder %s14138_s23, 2 }
 0xa91   : > { %s9631_s14 = sand.u32 1, %s17209_s10   ;;  %p17211_p8 = scmp.ne.s32.totalorder %s17210_s21, 0 }
 0xa92   : > { %s9632_s17 = scalar_lea.sflag [#allocation7], %s9631_s14 }
 0xa93   : > { %p12314_p4 = pnand %p12334_p9, %p17211_p8 }
 0xa95   : > { %14077 = dma.done.wait (!%p12314_p4), %s9632_s17, 32  }
 0xa96   : > { %14079 = vsyncadd (!%p12314_p4), %s9632_s17, 4294967264  ;;  %s17212_s11 = sld [smem:[#allocation29_spill]]  ;;  %s17213_s20 = sld [smem:[#allocation46_spill]] }
 0xa9c   : > { %s9652_s27 = sand.u32 1, %s17212_s11   ;;  %p17214_p2 = scmp.ne.s32.totalorder %s17213_s20, 0 }
 0xa9d   : > { %s9653_s13 = scalar_lea.sflag [#allocation21], %s9652_s27 }
 0xa9e   : > { %p12317_p6 = pnand %p12334_p9, %p17214_p2 }
 0xaa0   : > { %14081 = dma.done.wait (!%p12317_p6), %s9653_s13, 64  }
 0xaa1   : > { %14083 = vsyncadd (!%p12317_p6), %s9653_s13, 4294967232  ;;  %s40_s23 = sadd.s32 1, %s14138_s23   ;;  %s17216_s24 = sld [smem:[#allocation30_spill]] }
 0xaa2   : > { %p16747_p7 = scmp.ge.s32.totalorder %s40_s23, 6   ;;  %s17217_s0 = sld [smem:[#allocation44_spill]] }
 0xaa3   : > { %s17218_s25 = sld [smem:[#allocation32_spill]]  ;;  %s17219_s15 = sld [smem:[#allocation41_spill]] }
 0xaa4   : > { %s17220_s16 = sld [smem:[#allocation33_spill]]  ;;  %s17221_s2 = sld [smem:[#allocation42_spill]] }
 0xaa5   : > { %s17222_s19 = sld [smem:[#allocation36_spill]]  ;;  %s17223_s20 = sld [smem:[#allocation37_spill]] }
 0xaa6   : > { %s17224_s21 = sld [smem:[#allocation38_spill]]  ;;  %s17225_s12 = sld [smem:[#allocation39_spill]] }
 0xaa7   : > { %s17227_s29 = smov %s14090_s30  ;;  %s17228_s30 = smov %s17216_s24 }
 0xaa8   : > { %s17229_s14 = smov %s14102_s9  ;;  %s17231_s17 = smov %s14118_s18 }
 0xaa9   : > { %s17230_s9 = smov %s17218_s25  ;;  %39 = sbr.rel (!%p16747_p7) target bundleno = 24 (0x18), region = 174 }
 0xaaa   : > { %s17232_s18 = smov %s17221_s2 }
 0xaac   : > { %s17233_s22 = smov %s17225_s12 }
 0xab0   :  { %9658 = vsyncpa [#allocation6], 1 }
 0xab1   :  { %9660 = vsyncpa [#allocation6 + $0x1], 1 }
 0xab2   :  { %9661 = vsyncpa [#allocation9], 1 }
 0xab3   :  { %9662 = vsyncpa [#allocation12], 1 }
 0xab4   :  { %9663 = vsyncpa [#allocation15], 1 }
 0xab5   :  { %9664 = vsyncpa [#allocation18], 1 }
 0xab6   :  { %9665 = vsyncpa [#allocation7], 1 }
 0xab7   :  { %9667 = vsyncpa [#allocation7 + $0x1], 1 }
 0xab8   :  { %9668 = vsyncpa [#allocation21], 1 }
 0xab9   :  { %9670 = vsyncpa [#allocation21 + $0x1], 1 }

</bundles_post_ra>
